<compile_context>
chip_gen: v6e
topology: v6e:2x2x1
jax: 0.10.0
libtpu: 0.0.40
codegen_flags: <defaults>
</compile_context>

<pallas_src>
import functools
import itertools

import numpy as np
import jax
import jax.numpy as jnp
from jax.experimental import pallas as pl
from jax.experimental.pallas import tpu as pltpu


_ACT_DTYPE = jnp.bfloat16      # inter-block activation storage dtype
_TILE_ROW_ALIGN = 16           # safe sublane alignment for bf16 token tiles
_SQRT_2_OVER_PI = 0.7978845608028654


# ----------------------------------------------------------------------------
# Small math helpers (element-wise, f32)
# ----------------------------------------------------------------------------

def _gelu(x):
    # tanh-approximate GELU: tanh runs on the EUP (its own VLIW slot).
    return 0.5 * x * (1.0 + jnp.tanh(_SQRT_2_OVER_PI * (x + 0.044715 * x * x * x)))


def _softshrink(x, lam):
    # sign(x) * max(|x|-lam, 0)  ==  max(x-lam,0) + min(x+lam,0)
    return jnp.maximum(x - lam, 0.0) + jnp.minimum(x + lam, 0.0)


def _layernorm(x, g, b, eps):
    # one-pass mean / mean-of-squares (halves cross-lane XLU reduction work)
    mu = jnp.mean(x, axis=-1, keepdims=True)
    ms = jnp.mean(x * x, axis=-1, keepdims=True)
    var = jnp.maximum(ms - mu * mu, 0.0)
    return (x - mu) * jax.lax.rsqrt(var + eps) * g + b


# ----------------------------------------------------------------------------
# Pallas kernels
# ----------------------------------------------------------------------------

def matmul_bias_kernel(x_ref, w_ref, b_ref, o_ref):
    """Patch-embed conv as matmul: (tm,K)bf16 @ (K,N)bf16 + (1,N)f32."""
    o_ref[...] = (jnp.dot(x_ref[...], w_ref[...],
                          preferred_element_type=jnp.float32)
                  + b_ref[...]).astype(o_ref.dtype)


def afno_block_kernel(x_ref, mr_ref, mi_ref, art_ref, ait_ref,
                      ln1g_ref, ln1b_ref,
                      w1c_ref, b1c_ref, w2c_ref, b2c_ref,
                      ln2g_ref, ln2b_ref,
                      wf1_ref, bf1_ref, wf2_ref, bf2_ref,
                      o_ref, *, sparsity_threshold, eps):
    """One grid step = k groups of G windows, flattened to (k*G*S, C) tokens.

    x_ref   : (k*GS, C) bf16  window-major, row-major (h, w) tokens
    mr/mi   : (GF, GS)  bf16  block-diag (over G windows of ONE group) rfft2
    art/ait : (GS, GF)  bf16  block-diag inverse (irfft2), transposed
    w1c/w2c : fused real representation of the complex frequency MLP
    """
    gf, gs = mr_ref.shape
    tile_t, c = x_ref.shape
    k = tile_t // gs

    x = x_ref[...].astype(jnp.float32)
    residual = x

    # norm1
    xn = _layernorm(x, ln1g_ref[...], ln1b_ref[...], eps)
    xn_b = xn.astype(jnp.bfloat16)

    # --- AFNO2D spectral filter ---
    # rfft2 (ortho) via per-group block-diagonal DFT matmuls; the per-group
    # contraction GS is one native MXU pass, so no O(k*G) zero-FLOP waste.
    spec_parts = []
    for g in range(k):
        xg = xn_b if k == 1 else xn_b[g * gs:(g + 1) * gs, :]
        xr = jnp.dot(mr_ref[...], xg, preferred_element_type=jnp.float32)
        xi = jnp.dot(mi_ref[...], xg, preferred_element_type=jnp.float32)
        spec_parts.append(jnp.concatenate([xr, xi], axis=-1))     # (GF, 2C)
    z = spec_parts[0] if k == 1 else jnp.concatenate(spec_parts, axis=0)

    # Fused complex 2-layer frequency MLP: two 2C/2H-deep dots instead of 8.
    o1 = jnp.maximum(
        jnp.dot(z.astype(jnp.bfloat16), w1c_ref[...],
                preferred_element_type=jnp.float32) + b1c_ref[...], 0.0)
    o2 = (jnp.dot(o1.astype(jnp.bfloat16), w2c_ref[...],
                  preferred_element_type=jnp.float32) + b2c_ref[...])

    # softshrink (shrink_by_magnitude=False path), applied to real and imag
    o2 = _softshrink(o2, sparsity_threshold)
    o2_b = o2.astype(jnp.bfloat16)

    # irfft2 (ortho): per-group inverse DFT on the lane-aligned halves
    y_parts = []
    for g in range(k):
        og = o2_b if k == 1 else o2_b[g * gf:(g + 1) * gf, :]
        yg = (jnp.dot(art_ref[...], og[:, :c],
                      preferred_element_type=jnp.float32)
              + jnp.dot(ait_ref[...], og[:, c:],
                        preferred_element_type=jnp.float32))
        y_parts.append(yg)
    y = y_parts[0] if k == 1 else jnp.concatenate(y_parts, axis=0)

    # direct_skip=True: the filter returns irfft(...) + its own input
    x = y + xn
    # double_skip=True
    x = x + residual
    residual = x

    # norm2 + spatial MLP + skip
    xn2 = _layernorm(x, ln2g_ref[...], ln2b_ref[...], eps)
    h = _gelu(jnp.dot(xn2.astype(jnp.bfloat16), wf1_ref[...],
                      preferred_element_type=jnp.float32) + bf1_ref[...])
    out = (jnp.dot(h.astype(jnp.bfloat16), wf2_ref[...],
                   preferred_element_type=jnp.float32) + bf2_ref[...])
    o_ref[...] = (out + residual).astype(o_ref.dtype)


# ----------------------------------------------------------------------------
# Generation-aware sizing helpers
# ----------------------------------------------------------------------------

def _round_up(n, m):
    return ((n + m - 1) // m) * m


def _vmem_capacity_bytes():
    try:
        info = pltpu.get_tpu_info()
        cap = getattr(info, "vmem_capacity_bytes", None)
        if cap:
            return int(cap)
    except Exception:
        pass
    return 64 * 2 ** 20      # conservative fallback (v7x per-TC VMEM)


def _gs_target():
    """Block-diag DFT contraction depth per group: one native MXU pass
    (256 on v6e/v7x, 128 on v5e)."""
    try:
        kind = jax.devices()[0].device_kind.lower()
        if "v5 lite" in kind or "v5e" in kind or "v5litepod" in kind:
            return 128
    except Exception:
        pass
    return 256


def _max_tile_tokens():
    """Token rows per grid step: amortize the ~0.35us/step overhead; bigger
    where VMEM allows (v5e/v6e 128 MiB), tighter on v7x (64 MiB)."""
    return 1024 if _vmem_capacity_bytes() >= 100 * 2 ** 20 else 512


def _afno_vmem_limit(weight_args, tile_t, c, two_hf, hm, gf_total, act_bytes):
    """Working-set bound: resident (double-buffered) weights + I/O tiles +
    live f32 intermediates, with headroom, capped at 75% of physical VMEM."""
    weights = sum(int(np.prod(a.shape)) * a.dtype.itemsize for a in weight_args)
    io_tiles = 2 * 2 * tile_t * c * act_bytes
    interm = 4 * (8 * tile_t * max(c, hm) + 6 * gf_total * max(2 * c, two_hf))
    est = 2 * (2 * weights + io_tiles + interm)
    cap = int(0.75 * _vmem_capacity_bytes())
    return int(min(cap, max(32 * 2 ** 20, est)))


# ----------------------------------------------------------------------------
# Pallas wrappers
# ----------------------------------------------------------------------------

def patch_embed_pallas(x_patches, w_mat, bias):
    """x_patches: (M, K), w_mat: (K, N) bf16, bias: (1, N) f32 -> (M, N) bf16."""
    M, K = x_patches.shape
    N = w_mat.shape[1]
    tm = min(1024, _round_up(M, _TILE_ROW_ALIGN))
    Mp = _round_up(M, tm)
    xp = x_patches.astype(jnp.bfloat16)
    if Mp != M:
        xp = jnp.pad(xp, ((0, Mp - M), (0, 0)))
    out = pl.pallas_call(
        matmul_bias_kernel,
        out_shape=jax.ShapeDtypeStruct((Mp, N), _ACT_DTYPE),
        grid=(Mp // tm,),
        in_specs=[pl.BlockSpec((tm, K), lambda i: (i, 0)),
                  pl.BlockSpec((K, N), lambda i: (0, 0)),
                  pl.BlockSpec((1, N), lambda i: (0, 0))],
        out_specs=pl.BlockSpec((tm, N), lambda i: (i, 0)),
        compiler_params=pltpu.CompilerParams(
            dimension_semantics=("parallel",)),
    )(xp, w_mat.astype(jnp.bfloat16), bias)
    return out[:M] if Mp != M else out


def afno_block_pallas(x2d, dft_mats, p, sparsity_threshold, k):
    """x2d: (T, C) bf16, T = n_windows * h * w window-major tokens.

    dft_mats are block-diagonal over G windows (one group); the kernel loops
    over k groups per grid step so the DMA tile is k*G*S rows."""
    T, C = x2d.shape
    mr, mi, art, ait = dft_mats
    GF, GS = mr.shape
    tile_t = k * GS
    assert T % tile_t == 0, (T, tile_t)
    grid = (T // tile_t,)
    two_hf = p['w1c'].shape[1]
    Hm = p['wf1'].shape[1]

    kernel = functools.partial(afno_block_kernel,
                               sparsity_threshold=float(sparsity_threshold),
                               eps=1e-5)

    def tok_map(i):
        return (i, 0)

    def fix_map(i):
        return (0, 0)

    weight_args = (mr, mi, art, ait,
                   p['ln1_g'], p['ln1_b'],
                   p['w1c'], p['b1c'], p['w2c'], p['b2c'],
                   p['ln2_g'], p['ln2_b'],
                   p['wf1'], p['bf1'], p['wf2'], p['bf2'])
    in_specs = ([pl.BlockSpec((tile_t, C), tok_map)]
                + [pl.BlockSpec(a.shape, fix_map) for a in weight_args])

    vmem = _afno_vmem_limit(weight_args, tile_t, C, two_hf, Hm, k * GF,
                            x2d.dtype.itemsize)
    return pl.pallas_call(
        kernel,
        out_shape=jax.ShapeDtypeStruct((T, C), x2d.dtype),
        grid=grid,
        in_specs=in_specs,
        out_specs=pl.BlockSpec((tile_t, C), tok_map),
        compiler_params=pltpu.CompilerParams(
            dimension_semantics=("parallel",),
            vmem_limit_bytes=vmem),
    )(x2d, *weight_args)


# ----------------------------------------------------------------------------
# DFT (rfft2 / irfft2, norm="ortho") as matrices
# ----------------------------------------------------------------------------

_DFT_SMALL_CACHE = {}
_DFT_GROUP_CACHE = {}


def _dft_matrices(h, w):
    """Single-window real/imag DFT matrices (numpy, f32).

    Returns (Mr, Mi) of shape (h*wf, h*w) for the forward rfft2 and
    (ArT, AiT) of shape (h*w, h*wf) for the inverse irfft2 (both ortho)."""
    key = (h, w)
    if key in _DFT_SMALL_CACHE:
        return _DFT_SMALL_CACHE[key]
    wf = w // 2 + 1
    kh = np.arange(h)[:, None, None, None]
    kw = np.arange(wf)[None, :, None, None]
    hh = np.arange(h)[None, None, :, None]
    ww = np.arange(w)[None, None, None, :]
    theta = 2.0 * np.pi * (kh * hh / h + kw * ww / w)          # (h, wf, h, w)
    scale = 1.0 / np.sqrt(h * w)

    # forward rfft2: X[k] = sum_p x[p] * (cos - i sin) / sqrt(HW)
    mr = (np.cos(theta) * scale).reshape(h * wf, h * w)
    mi = (-np.sin(theta) * scale).reshape(h * wf, h * w)

    # inverse irfft2: multiplicity over the rfft (W) axis; the imaginary part
    # of the DC / Nyquist bins along W is ignored, matching pocketfft C2R
    # (torch.fft.irfft2 semantics) for non-Hermitian inputs.
    m = np.ones(wf)
    if w % 2 == 0:
        m[1:wf - 1] = 2.0
    else:
        m[1:] = 2.0
    ar = (np.cos(theta) * scale * m[None, :, None, None]).reshape(h * wf, h * w)
    ai = (-np.sin(theta) * scale * m[None, :, None, None]).reshape(h * wf, h * w)

    out = (mr.astype(np.float32), mi.astype(np.float32),
           np.ascontiguousarray(ar.T).astype(np.float32),
           np.ascontiguousarray(ai.T).astype(np.float32))
    _DFT_SMALL_CACHE[key] = out
    return out


def get_group_dft(g, h, w):
    """Block-diagonal (over G windows of ONE group) DFT matrices, cast to bf16
    MXU operands.  G is bounded so G*S is one MXU contraction -> a few KiB,
    independent of the total window count."""
    key = (g, h, w)
    if key in _DFT_GROUP_CACHE:
        return _DFT_GROUP_CACHE[key]
    mr, mi, art, ait = _dft_matrices(h, w)
    eye = np.eye(g, dtype=np.float32)
    out = tuple(jnp.asarray(np.kron(eye, m), jnp.bfloat16)
                for m in (mr, mi, art, ait))
    _DFT_GROUP_CACHE[key] = out
    return out


def _selfcheck_dft():
    """Validate the DFT matrices against numpy's FFT (ortho), including the
    non-Hermitian irfft2 behaviour and odd widths."""
    rng = np.random.default_rng(0)
    for (h, w) in [(4, 4), (2, 4), (4, 2), (2, 2), (3, 5)]:
        mr, mi, art, ait = _dft_matrices(h, w)
        x = rng.standard_normal((h, w)).astype(np.float32)
        ref = np.fft.rfft2(x, norm="ortho")
        got_r = (mr @ x.reshape(-1)).reshape(h, -1)
        got_i = (mi @ x.reshape(-1)).reshape(h, -1)
        assert np.allclose(got_r, ref.real, atol=1e-4), (h, w)
        assert np.allclose(got_i, ref.imag, atol=1e-4), (h, w)
        z = (rng.standard_normal((h, w // 2 + 1))
             + 1j * rng.standard_normal((h, w // 2 + 1)))
        ref_inv = np.fft.irfft2(z, s=(h, w), norm="ortho")
        got_inv = (art @ z.real.reshape(-1)
                   + ait @ z.imag.reshape(-1)).reshape(h, w)
        assert np.allclose(got_inv, ref_inv, atol=1e-4), (h, w)


# ----------------------------------------------------------------------------
# Swin window partitioning glue (plain JAX, matches the PyTorch helpers)
# ----------------------------------------------------------------------------
# TODO(synk): for the un-shifted path the window partition could be folded
# directly into the BlockSpec index_map (grid over (b, wh, ww) window tiles);
# kept host-side here so the in-kernel layout stays a plain 2-D token slab and
# the shifted (uneven-region) path shares the same code.

def window_partition(x, window_sizes):
    b, c = x.shape[0], x.shape[-1]
    spatial = x.shape[1:-1]
    new_shape = [b]
    for wsz, s in zip(window_sizes, spatial):
        if s >= wsz:
            new_shape.extend([s // wsz, wsz])
        else:
            new_shape.extend([1, s])
    new_shape.append(c)
    x = x.reshape(new_shape)                      # (b, n1, w1, n2, w2, c)
    x = jnp.transpose(x, (0, 1, 3, 2, 4, 5))      # (b, n1, n2, w1, w2, c)
    recover_shape = x.shape
    windows = x.reshape((-1,) + x.shape[3:])      # (b*n1*n2, w1, w2, c)
    return windows, recover_shape


def window_reverse(windows, recover_shape):
    x = windows.reshape(recover_shape)            # (b, n1, n2, w1, w2, c)
    x = jnp.transpose(x, (0, 1, 3, 2, 4, 5))      # (b, n1, w1, n2, w2, c)
    b, n1, w1, n2, w2, c = x.shape
    return x.reshape(b, n1 * w1, n2 * w2, c)


def block_partition(x, window_sizes, shift_sizes):
    def create_slices(shape_, window_, shift_):
        if shape_ <= window_:
            window_ = shape_
            shift_ = 0
        slices_ = []
        if shift_ > 0:
            slices_.append(slice(0, shift_))
        else:
            assert shift_ == 0
        rest = (shape_ - shift_) % window_
        if rest != 0:
            slices_.extend([slice(shift_, -rest), slice(-rest, None)])
        else:
            slices_.append(slice(shift_, None))
        return slices_

    spatial_shape = x.shape[1:-1]
    slices = [create_slices(s, w, sh)
              for s, w, sh in zip(spatial_shape, window_sizes, shift_sizes)]
    blocks = []
    for index in itertools.product([slice(None)], *slices, [slice(None)]):
        y = x[index]
        if y.size > 0:
            blocks.append(window_partition(y, window_sizes) + (index,))
    return blocks


# ----------------------------------------------------------------------------
# Model forward
# ----------------------------------------------------------------------------

def _divisors(n):
    return [d for d in range(1, n + 1) if n % d == 0]


def _choose_group_and_k(n_windows, s, gs_target, max_tile_tokens):
    """G = windows per block-diag DFT group (one MXU-native contraction),
    k = groups per grid step, so the DMA tile (k*G*S rows) is decoupled from
    the block-diagonal structure."""
    aligned = [g for g in _divisors(n_windows)
               if (g * s) % _TILE_ROW_ALIGN == 0]
    small = [g for g in aligned if g * s <= gs_target]
    if small:
        g = max(small)
    elif aligned:
        g = min(aligned)
    else:
        # last resort: one full-extent tile (block == array dims, always legal)
        g = n_windows
    n_groups = n_windows // g
    kc = [k for k in _divisors(n_groups) if k * g * s <= max_tile_tokens]
    k = max(kc) if kc else 1
    return g, k


def afno_block_apply(windows, p, sparsity_threshold, max_tile_tokens,
                     gs_target):
    n, h, w, c = windows.shape
    s = h * w
    g, k = _choose_group_and_k(n, s, gs_target, max_tile_tokens)
    dft_mats = get_group_dft(g, h, w)
    x2d = windows.reshape(n * s, c).astype(_ACT_DTYPE)
    y2d = afno_block_pallas(x2d, dft_mats, p, sparsity_threshold, k)
    return y2d.reshape(n, h, w, c)


def swin_afno_block_forward(x, p, window_size, shift_size, sparsity_threshold,
                            max_tile_tokens, gs_target):
    blocks = block_partition(x, window_size, shift_size)
    if len(blocks) == 1:
        # Un-shifted (single region covering everything): no scatter needed.
        windows, recover_shape, _ = blocks[0]
        y = afno_block_apply(windows, p, sparsity_threshold, max_tile_tokens,
                             gs_target)
        return window_reverse(y, recover_shape)

    # Shifted path: merge regions with identical per-window spatial shapes so
    # the up-to-9 region slabs run in as few pallas_calls as possible.
    groups = {}
    for windows, recover_shape, index in blocks:
        groups.setdefault(tuple(windows.shape[1:]), []).append(
            (windows, recover_shape, index))
    dest = jnp.zeros_like(x)
    for items in groups.values():
        merged = (items[0][0] if len(items) == 1
                  else jnp.concatenate([it[0] for it in items], axis=0))
        ys = afno_block_apply(merged, p, sparsity_threshold, max_tile_tokens,
                              gs_target)
        off = 0
        for windows, recover_shape, index in items:
            n_i = windows.shape[0]
            dest = dest.at[index].set(
                window_reverse(ys[off:off + n_i], recover_shape))
            off += n_i
    # TODO(synk): assemble the shifted output with a single concat-based
    # reconstruction instead of per-region dynamic-update-slices.
    return dest


def swin_afno_forward(x, params, window_size, shift_size, patch_size,
                      sparsity_threshold=0.01):
    # layout: x is NCHW like the PyTorch module; internal layout is NHWC bf16.
    B, Cin, H, W = x.shape
    ph, pw = patch_size
    Hp, Wp = H // ph, W // pw
    gs_target = _gs_target()
    max_tile_tokens = _max_tile_tokens()

    # patch embed = conv(k=s=patch) as im2col + Pallas matmul (bf16 operands)
    xp = x.reshape(B, Cin, Hp, ph, Wp, pw)
    xp = jnp.transpose(xp, (0, 2, 4, 1, 3, 5)).reshape(B * Hp * Wp,
                                                       Cin * ph * pw)
    emb = patch_embed_pallas(xp, params['patch']['w'], params['patch']['b'])
    h = emb.reshape(B, Hp, Wp, -1)

    # TODO(synk): pos_embed / embed dropout are disabled in this config.
    shift = False
    for blk in params['blocks']:
        ss = shift_size if shift else tuple(0 for _ in shift_size)
        h = swin_afno_block_forward(h, blk, window_size, ss,
                                    sparsity_threshold, max_tile_tokens,
                                    gs_target)
        shift = not shift
    # TODO(synk): lift Convolution stages and `head` are None in this config.
    return h.astype(jnp.float32)


# ----------------------------------------------------------------------------
# Deterministic parameter init
# ----------------------------------------------------------------------------

def init_patch_embed(key, in_channels, embed_dim, patch_size):
    ph, pw = patch_size
    k1, k2 = jax.random.split(key)
    w = 0.02 * jax.random.normal(k1, (embed_dim, in_channels, ph, pw),
                                 jnp.float32)
    b = 0.02 * jax.random.normal(k2, (embed_dim,), jnp.float32)
    return dict(w=w.reshape(embed_dim, -1).T.astype(jnp.bfloat16),  # (K, D)
                b=b.reshape(1, -1))


def init_afno_block_params(key, dim, num_blocks, mlp_ratio,
                           hidden_size_factor=1.0):
    assert dim % num_blocks == 0
    bs = dim // num_blocks
    hid = int(bs * hidden_size_factor)
    hm = int(dim * mlp_ratio)
    keys = jax.random.split(key, 6)
    scale = 0.02
    # Canonical AFNO2D parameter shapes: (2, num_blocks, bs, hid) etc.
    w1 = scale * jax.random.normal(keys[0], (2, num_blocks, bs, hid), jnp.float32)
    b1 = scale * jax.random.normal(keys[1], (2, num_blocks, hid), jnp.float32)
    w2 = scale * jax.random.normal(keys[2], (2, num_blocks, hid, bs), jnp.float32)
    b2 = scale * jax.random.normal(keys[3], (2, num_blocks, bs), jnp.float32)

    def block_diag(ws):  # (num_blocks, a, b) -> dense block-diagonal
        return jax.scipy.linalg.block_diag(*[ws[i] for i in range(num_blocks)])

    w1r, w1i = block_diag(w1[0]), block_diag(w1[1])       # (dim, hf)
    w2r, w2i = block_diag(w2[0]), block_diag(w2[1])       # (hf, dim)
    # Fused real form of the complex multiply:
    #   [xr|xi] @ [[w1r, w1i], [-w1i, w1r]] = [xr@w1r - xi@w1i | xr@w1i + xi@w1r]
    w1c = jnp.concatenate(
        [jnp.concatenate([w1r, w1i], axis=1),
         jnp.concatenate([-w1i, w1r], axis=1)], axis=0)    # (2*dim, 2*hf)
    w2c = jnp.concatenate(
        [jnp.concatenate([w2r, w2i], axis=1),
         jnp.concatenate([-w2i, w2r], axis=1)], axis=0)    # (2*hf, 2*dim)
    b1c = jnp.concatenate([b1[0].reshape(1, -1), b1[1].reshape(1, -1)], axis=1)
    b2c = jnp.concatenate([b2[0].reshape(1, -1), b2[1].reshape(1, -1)], axis=1)
    # TODO(synk): for production num_blocks >= 8 at large dim, switch to a
    # per-block batched contraction to avoid the block-diag FLOP/VMEM blowup.
    return dict(
        ln1_g=jnp.ones((1, dim), jnp.float32),
        ln1_b=jnp.zeros((1, dim), jnp.float32),
        w1c=w1c.astype(jnp.bfloat16), b1c=b1c,
        w2c=w2c.astype(jnp.bfloat16), b2c=b2c,
        ln2_g=jnp.ones((1, dim), jnp.float32),
        ln2_b=jnp.zeros((1, dim), jnp.float32),
        wf1=(0.02 * jax.random.normal(keys[4], (dim, hm), jnp.float32)
             ).astype(jnp.bfloat16),
        bf1=jnp.zeros((1, hm), jnp.float32),
        wf2=(0.02 * jax.random.normal(keys[5], (hm, dim), jnp.float32)
             ).astype(jnp.bfloat16),
        bf2=jnp.zeros((1, dim), jnp.float32),
    )


def init_params(key, in_channels, embed_dim, patch_size, depths, num_heads,
                mlp_ratio=4.0, hidden_size_factor=1.0):
    total = sum(depths)
    keys = jax.random.split(key, total + 1)
    params = dict(patch=init_patch_embed(keys[0], in_channels, embed_dim,
                                         patch_size),
                  blocks=[])
    i = 1
    for stage, d in enumerate(depths):
        nh = num_heads if isinstance(num_heads, int) else num_heads[stage]
        for _ in range(d):
            params['blocks'].append(
                init_afno_block_params(keys[i], embed_dim, nh, mlp_ratio,
                                       hidden_size_factor))
            i += 1
    return params


# ----------------------------------------------------------------------------
# Demo
# ----------------------------------------------------------------------------

if __name__ == "__main__":
    _selfcheck_dft()   # validates rfft2/irfft2 matrices vs numpy (host-side)

    B, Cin, H, W = 2, 4, 16, 16
    embed_dim = 128                # multiple of 128 -> lane-dense channels
    patch_size = (2, 2)
    window_size = (4, 4)
    shift_size = (2, 2)            # window // 2
    depths = [2]                   # block 0: no shift, block 1: shifted
    num_heads = 4                  # AFNO num_blocks

    key = jax.random.PRNGKey(0)
    kx, kp = jax.random.split(key)
    x = jax.random.normal(kx, (B, Cin, H, W), jnp.float32)
    params = init_params(kp, Cin, embed_dim, patch_size, depths, num_heads,
                         mlp_ratio=4.0)

    fwd = jax.jit(functools.partial(swin_afno_forward,
                                    window_size=window_size,
                                    shift_size=shift_size,
                                    patch_size=patch_size,
                                    sparsity_threshold=0.01))
    out = jax.block_until_ready(fwd(x, params))
    assert out.shape == (B, H // patch_size[0], W // patch_size[1], embed_dim)
    assert bool(jnp.all(jnp.isfinite(out)))
    print("KERNEL_OK")
</pallas_src>

<mosaic_0001>
module attributes {stable_mosaic.version = 11 : i64} {
  func.func @afno_block_kernel(%arg0: i32, %arg1: memref<128x128xbf16, #tpu.memory_space<vmem>>, %arg2: memref<96x128xbf16, #tpu.memory_space<vmem>>, %arg3: memref<96x128xbf16, #tpu.memory_space<vmem>>, %arg4: memref<128x96xbf16, #tpu.memory_space<vmem>>, %arg5: memref<128x96xbf16, #tpu.memory_space<vmem>>, %arg6: memref<1x128xf32, #tpu.memory_space<vmem>>, %arg7: memref<1x128xf32, #tpu.memory_space<vmem>>, %arg8: memref<256x256xbf16, #tpu.memory_space<vmem>>, %arg9: memref<1x256xf32, #tpu.memory_space<vmem>>, %arg10: memref<256x256xbf16, #tpu.memory_space<vmem>>, %arg11: memref<1x256xf32, #tpu.memory_space<vmem>>, %arg12: memref<1x128xf32, #tpu.memory_space<vmem>>, %arg13: memref<1x128xf32, #tpu.memory_space<vmem>>, %arg14: memref<128x512xbf16, #tpu.memory_space<vmem>>, %arg15: memref<1x512xf32, #tpu.memory_space<vmem>>, %arg16: memref<512x128xbf16, #tpu.memory_space<vmem>>, %arg17: memref<1x128xf32, #tpu.memory_space<vmem>>, %arg18: memref<128x128xbf16, #tpu.memory_space<vmem>>) attributes {dimension_semantics = [#tpu.dimension_semantics<parallel>], iteration_bounds = array<i64: 1>, scalar_prefetch = 0 : i64, scratch_operands = 0 : i64, tpu.core_type = #tpu.core_type<tc>, window_params = [{transform_indices = @transform_0, window_bounds = array<i64: 128, 128>}, {pipeline_mode = #tpu.pipeline_mode<synchronous>, transform_indices = @transform_1, window_bounds = array<i64: 96, 128>}, {pipeline_mode = #tpu.pipeline_mode<synchronous>, transform_indices = @transform_2, window_bounds = array<i64: 96, 128>}, {pipeline_mode = #tpu.pipeline_mode<synchronous>, transform_indices = @transform_3, window_bounds = array<i64: 128, 96>}, {pipeline_mode = #tpu.pipeline_mode<synchronous>, transform_indices = @transform_4, window_bounds = array<i64: 128, 96>}, {pipeline_mode = #tpu.pipeline_mode<synchronous>, transform_indices = @transform_5, window_bounds = array<i64: 1, 128>}, {pipeline_mode = #tpu.pipeline_mode<synchronous>, transform_indices = @transform_6, window_bounds = array<i64: 1, 128>}, {pipeline_mode = #tpu.pipeline_mode<synchronous>, transform_indices = @transform_7, window_bounds = array<i64: 256, 256>}, {pipeline_mode = #tpu.pipeline_mode<synchronous>, transform_indices = @transform_8, window_bounds = array<i64: 1, 256>}, {pipeline_mode = #tpu.pipeline_mode<synchronous>, transform_indices = @transform_9, window_bounds = array<i64: 256, 256>}, {pipeline_mode = #tpu.pipeline_mode<synchronous>, transform_indices = @transform_10, window_bounds = array<i64: 1, 256>}, {pipeline_mode = #tpu.pipeline_mode<synchronous>, transform_indices = @transform_11, window_bounds = array<i64: 1, 128>}, {pipeline_mode = #tpu.pipeline_mode<synchronous>, transform_indices = @transform_12, window_bounds = array<i64: 1, 128>}, {pipeline_mode = #tpu.pipeline_mode<synchronous>, transform_indices = @transform_13, window_bounds = array<i64: 128, 512>}, {pipeline_mode = #tpu.pipeline_mode<synchronous>, transform_indices = @transform_14, window_bounds = array<i64: 1, 512>}, {pipeline_mode = #tpu.pipeline_mode<synchronous>, transform_indices = @transform_15, window_bounds = array<i64: 512, 128>}, {pipeline_mode = #tpu.pipeline_mode<synchronous>, transform_indices = @transform_16, window_bounds = array<i64: 1, 128>}, {transform_indices = @transform_17, window_bounds = array<i64: 128, 128>}]} {
    %c0 = arith.constant 0 : index
    %c0_0 = arith.constant 0 : index
    %0 = vector.load %arg1[%c0, %c0_0] : memref<128x128xbf16, #tpu.memory_space<vmem>>, vector<128x128xbf16>
    %1 = arith.extf %0 : vector<128x128xbf16> to vector<128x128xf32>
    %c0_1 = arith.constant 0 : index
    %c0_2 = arith.constant 0 : index
    %2 = vector.load %arg6[%c0_1, %c0_2] : memref<1x128xf32, #tpu.memory_space<vmem>>, vector<1x128xf32>
    %c0_3 = arith.constant 0 : index
    %c0_4 = arith.constant 0 : index
    %3 = vector.load %arg7[%c0_3, %c0_4] : memref<1x128xf32, #tpu.memory_space<vmem>>, vector<1x128xf32>
    %cst = arith.constant dense<0.000000e+00> : vector<128xf32>
    %4 = vector.multi_reduction <add>, %1, %cst [1] : vector<128x128xf32> to vector<128xf32>
    %5 = vector.shape_cast %4 : vector<128xf32> to vector<128x1xf32>
    %cst_5 = arith.constant 1.280000e+02 : f32
    %6 = vector.broadcast %cst_5 : f32 to vector<128x1xf32>
    %7 = arith.divf %5, %6 : vector<128x1xf32>
    %8 = arith.mulf %1, %1 : vector<128x128xf32>
    %cst_6 = arith.constant dense<0.000000e+00> : vector<128xf32>
    %9 = vector.multi_reduction <add>, %8, %cst_6 [1] : vector<128x128xf32> to vector<128xf32>
    %10 = vector.shape_cast %9 : vector<128xf32> to vector<128x1xf32>
    %cst_7 = arith.constant 1.280000e+02 : f32
    %11 = vector.broadcast %cst_7 : f32 to vector<128x1xf32>
    %12 = arith.divf %10, %11 : vector<128x1xf32>
    %13 = arith.mulf %7, %7 : vector<128x1xf32>
    %14 = arith.subf %12, %13 : vector<128x1xf32>
    %cst_8 = arith.constant 0.000000e+00 : f32
    %15 = vector.broadcast %cst_8 : f32 to vector<128x1xf32>
    %16 = arith.maximumf %14, %15 : vector<128x1xf32>
    %17 = vector.broadcast %7 : vector<128x1xf32> to vector<128x128xf32>
    %18 = arith.subf %1, %17 : vector<128x128xf32>
    %cst_9 = arith.constant 9.99999974E-6 : f32
    %19 = vector.broadcast %cst_9 : f32 to vector<128x1xf32>
    %20 = arith.addf %16, %19 : vector<128x1xf32>
    %21 = math.rsqrt %20 : vector<128x1xf32>
    %22 = vector.broadcast %21 : vector<128x1xf32> to vector<128x128xf32>
    %23 = arith.mulf %18, %22 : vector<128x128xf32>
    %24 = vector.broadcast %2 : vector<1x128xf32> to vector<128x128xf32>
    %25 = arith.mulf %23, %24 : vector<128x128xf32>
    %26 = vector.broadcast %3 : vector<1x128xf32> to vector<128x128xf32>
    %27 = arith.addf %25, %26 : vector<128x128xf32>
    %28 = arith.truncf %27 : vector<128x128xf32> to vector<128x128xbf16>
    %c0_10 = arith.constant 0 : index
    %c0_11 = arith.constant 0 : index
    %29 = vector.load %arg2[%c0_10, %c0_11] : memref<96x128xbf16, #tpu.memory_space<vmem>>, vector<96x128xbf16>
    %cst_12 = arith.constant dense<0.000000e+00> : vector<96x128xf32>
    %30 = tpu.matmul %29, %28, %cst_12 {dimension_numbers = #tpu.dot_dimension_numbers<[1], [0], [0], [1], [0, 0, 1, 1], [], []>} : vector<96x128xbf16>, vector<128x128xbf16>, vector<96x128xf32> -> vector<96x128xf32>
    %c0_13 = arith.constant 0 : index
    %c0_14 = arith.constant 0 : index
    %31 = vector.load %arg3[%c0_13, %c0_14] : memref<96x128xbf16, #tpu.memory_space<vmem>>, vector<96x128xbf16>
    %cst_15 = arith.constant dense<0.000000e+00> : vector<96x128xf32>
    %32 = tpu.matmul %31, %28, %cst_15 {dimension_numbers = #tpu.dot_dimension_numbers<[1], [0], [0], [1], [0, 0, 1, 1], [], []>} : vector<96x128xbf16>, vector<128x128xbf16>, vector<96x128xf32> -> vector<96x128xf32>
    %33 = tpu.concatenate %30, %32 in 1 : vector<96x128xf32>, vector<96x128xf32> -> vector<96x256xf32>
    %34 = arith.truncf %33 : vector<96x256xf32> to vector<96x256xbf16>
    %c0_16 = arith.constant 0 : index
    %c0_17 = arith.constant 0 : index
    %35 = vector.load %arg8[%c0_16, %c0_17] : memref<256x256xbf16, #tpu.memory_space<vmem>>, vector<256x256xbf16>
    %cst_18 = arith.constant dense<0.000000e+00> : vector<96x256xf32>
    %36 = tpu.matmul %34, %35, %cst_18 {dimension_numbers = #tpu.dot_dimension_numbers<[1], [0], [0], [1], [0, 0, 1, 1], [], []>} : vector<96x256xbf16>, vector<256x256xbf16>, vector<96x256xf32> -> vector<96x256xf32>
    %c0_19 = arith.constant 0 : index
    %c0_20 = arith.constant 0 : index
    %37 = vector.load %arg9[%c0_19, %c0_20] : memref<1x256xf32, #tpu.memory_space<vmem>>, vector<1x256xf32>
    %38 = vector.broadcast %37 : vector<1x256xf32> to vector<96x256xf32>
    %39 = arith.addf %36, %38 : vector<96x256xf32>
    %cst_21 = arith.constant 0.000000e+00 : f32
    %40 = vector.broadcast %cst_21 : f32 to vector<96x256xf32>
    %41 = arith.maximumf %39, %40 : vector<96x256xf32>
    %42 = arith.truncf %41 : vector<96x256xf32> to vector<96x256xbf16>
    %c0_22 = arith.constant 0 : index
    %c0_23 = arith.constant 0 : index
    %43 = vector.load %arg10[%c0_22, %c0_23] : memref<256x256xbf16, #tpu.memory_space<vmem>>, vector<256x256xbf16>
    %cst_24 = arith.constant dense<0.000000e+00> : vector<96x256xf32>
    %44 = tpu.matmul %42, %43, %cst_24 {dimension_numbers = #tpu.dot_dimension_numbers<[1], [0], [0], [1], [0, 0, 1, 1], [], []>} : vector<96x256xbf16>, vector<256x256xbf16>, vector<96x256xf32> -> vector<96x256xf32>
    %c0_25 = arith.constant 0 : index
    %c0_26 = arith.constant 0 : index
    %45 = vector.load %arg11[%c0_25, %c0_26] : memref<1x256xf32, #tpu.memory_space<vmem>>, vector<1x256xf32>
    %46 = vector.broadcast %45 : vector<1x256xf32> to vector<96x256xf32>
    %47 = arith.addf %44, %46 : vector<96x256xf32>
    %cst_27 = arith.constant 0.00999999977 : f32
    %48 = vector.broadcast %cst_27 : f32 to vector<96x256xf32>
    %49 = arith.subf %47, %48 : vector<96x256xf32>
    %cst_28 = arith.constant 0.000000e+00 : f32
    %50 = vector.broadcast %cst_28 : f32 to vector<96x256xf32>
    %51 = arith.maximumf %49, %50 : vector<96x256xf32>
    %cst_29 = arith.constant 0.00999999977 : f32
    %52 = vector.broadcast %cst_29 : f32 to vector<96x256xf32>
    %53 = arith.addf %47, %52 : vector<96x256xf32>
    %cst_30 = arith.constant 0.000000e+00 : f32
    %54 = vector.broadcast %cst_30 : f32 to vector<96x256xf32>
    %55 = arith.minimumf %53, %54 : vector<96x256xf32>
    %56 = arith.addf %51, %55 : vector<96x256xf32>
    %57 = arith.truncf %56 : vector<96x256xf32> to vector<96x256xbf16>
    %c0_31 = arith.constant 0 : index
    %c0_32 = arith.constant 0 : index
    %58 = vector.load %arg4[%c0_31, %c0_32] : memref<128x96xbf16, #tpu.memory_space<vmem>>, vector<128x96xbf16>
    %59 = vector.extract_strided_slice %57 {offsets = [0, 0], sizes = [96, 128], strides = [1, 1]} : vector<96x256xbf16> to vector<96x128xbf16>
    %cst_33 = arith.constant dense<0.000000e+00> : vector<128x128xf32>
    %60 = tpu.matmul %58, %59, %cst_33 {dimension_numbers = #tpu.dot_dimension_numbers<[1], [0], [0], [1], [0, 0, 1, 1], [], []>} : vector<128x96xbf16>, vector<96x128xbf16>, vector<128x128xf32> -> vector<128x128xf32>
    %c0_34 = arith.constant 0 : index
    %c0_35 = arith.constant 0 : index
    %61 = vector.load %arg5[%c0_34, %c0_35] : memref<128x96xbf16, #tpu.memory_space<vmem>>, vector<128x96xbf16>
    %62 = vector.extract_strided_slice %57 {offsets = [0, 128], sizes = [96, 128], strides = [1, 1]} : vector<96x256xbf16> to vector<96x128xbf16>
    %cst_36 = arith.constant dense<0.000000e+00> : vector<128x128xf32>
    %63 = tpu.matmul %61, %62, %cst_36 {dimension_numbers = #tpu.dot_dimension_numbers<[1], [0], [0], [1], [0, 0, 1, 1], [], []>} : vector<128x96xbf16>, vector<96x128xbf16>, vector<128x128xf32> -> vector<128x128xf32>
    %64 = arith.addf %60, %63 : vector<128x128xf32>
    %65 = arith.addf %64, %27 : vector<128x128xf32>
    %66 = arith.addf %65, %1 : vector<128x128xf32>
    %c0_37 = arith.constant 0 : index
    %c0_38 = arith.constant 0 : index
    %67 = vector.load %arg12[%c0_37, %c0_38] : memref<1x128xf32, #tpu.memory_space<vmem>>, vector<1x128xf32>
    %c0_39 = arith.constant 0 : index
    %c0_40 = arith.constant 0 : index
    %68 = vector.load %arg13[%c0_39, %c0_40] : memref<1x128xf32, #tpu.memory_space<vmem>>, vector<1x128xf32>
    %cst_41 = arith.constant dense<0.000000e+00> : vector<128xf32>
    %69 = vector.multi_reduction <add>, %66, %cst_41 [1] : vector<128x128xf32> to vector<128xf32>
    %70 = vector.shape_cast %69 : vector<128xf32> to vector<128x1xf32>
    %cst_42 = arith.constant 1.280000e+02 : f32
    %71 = vector.broadcast %cst_42 : f32 to vector<128x1xf32>
    %72 = arith.divf %70, %71 : vector<128x1xf32>
    %73 = arith.mulf %66, %66 : vector<128x128xf32>
    %cst_43 = arith.constant dense<0.000000e+00> : vector<128xf32>
    %74 = vector.multi_reduction <add>, %73, %cst_43 [1] : vector<128x128xf32> to vector<128xf32>
    %75 = vector.shape_cast %74 : vector<128xf32> to vector<128x1xf32>
    %cst_44 = arith.constant 1.280000e+02 : f32
    %76 = vector.broadcast %cst_44 : f32 to vector<128x1xf32>
    %77 = arith.divf %75, %76 : vector<128x1xf32>
    %78 = arith.mulf %72, %72 : vector<128x1xf32>
    %79 = arith.subf %77, %78 : vector<128x1xf32>
    %cst_45 = arith.constant 0.000000e+00 : f32
    %80 = vector.broadcast %cst_45 : f32 to vector<128x1xf32>
    %81 = arith.maximumf %79, %80 : vector<128x1xf32>
    %82 = vector.broadcast %72 : vector<128x1xf32> to vector<128x128xf32>
    %83 = arith.subf %66, %82 : vector<128x128xf32>
    %cst_46 = arith.constant 9.99999974E-6 : f32
    %84 = vector.broadcast %cst_46 : f32 to vector<128x1xf32>
    %85 = arith.addf %81, %84 : vector<128x1xf32>
    %86 = math.rsqrt %85 : vector<128x1xf32>
    %87 = vector.broadcast %86 : vector<128x1xf32> to vector<128x128xf32>
    %88 = arith.mulf %83, %87 : vector<128x128xf32>
    %89 = vector.broadcast %67 : vector<1x128xf32> to vector<128x128xf32>
    %90 = arith.mulf %88, %89 : vector<128x128xf32>
    %91 = vector.broadcast %68 : vector<1x128xf32> to vector<128x128xf32>
    %92 = arith.addf %90, %91 : vector<128x128xf32>
    %93 = arith.truncf %92 : vector<128x128xf32> to vector<128x128xbf16>
    %c0_47 = arith.constant 0 : index
    %c0_48 = arith.constant 0 : index
    %94 = vector.load %arg14[%c0_47, %c0_48] : memref<128x512xbf16, #tpu.memory_space<vmem>>, vector<128x512xbf16>
    %cst_49 = arith.constant dense<0.000000e+00> : vector<128x512xf32>
    %95 = tpu.matmul %93, %94, %cst_49 {dimension_numbers = #tpu.dot_dimension_numbers<[1], [0], [0], [1], [0, 0, 1, 1], [], []>} : vector<128x128xbf16>, vector<128x512xbf16>, vector<128x512xf32> -> vector<128x512xf32>
    %c0_50 = arith.constant 0 : index
    %c0_51 = arith.constant 0 : index
    %96 = vector.load %arg15[%c0_50, %c0_51] : memref<1x512xf32, #tpu.memory_space<vmem>>, vector<1x512xf32>
    %97 = vector.broadcast %96 : vector<1x512xf32> to vector<128x512xf32>
    %98 = arith.addf %95, %97 : vector<128x512xf32>
    %cst_52 = arith.constant 5.000000e-01 : f32
    %99 = vector.broadcast %cst_52 : f32 to vector<128x512xf32>
    %100 = arith.mulf %99, %98 : vector<128x512xf32>
    %cst_53 = arith.constant 4.471500e-02 : f32
    %101 = vector.broadcast %cst_53 : f32 to vector<128x512xf32>
    %102 = arith.mulf %101, %98 : vector<128x512xf32>
    %103 = arith.mulf %102, %98 : vector<128x512xf32>
    %104 = arith.mulf %103, %98 : vector<128x512xf32>
    %105 = arith.addf %98, %104 : vector<128x512xf32>
    %cst_54 = arith.constant 0.797884583 : f32
    %106 = vector.broadcast %cst_54 : f32 to vector<128x512xf32>
    %107 = arith.mulf %106, %105 : vector<128x512xf32>
    %108 = math.tanh %107 : vector<128x512xf32>
    %cst_55 = arith.constant 1.000000e+00 : f32
    %109 = vector.broadcast %cst_55 : f32 to vector<128x512xf32>
    %110 = arith.addf %109, %108 : vector<128x512xf32>
    %111 = arith.mulf %100, %110 : vector<128x512xf32>
    %112 = arith.truncf %111 : vector<128x512xf32> to vector<128x512xbf16>
    %c0_56 = arith.constant 0 : index
    %c0_57 = arith.constant 0 : index
    %113 = vector.load %arg16[%c0_56, %c0_57] : memref<512x128xbf16, #tpu.memory_space<vmem>>, vector<512x128xbf16>
    %cst_58 = arith.constant dense<0.000000e+00> : vector<128x128xf32>
    %114 = tpu.matmul %112, %113, %cst_58 {dimension_numbers = #tpu.dot_dimension_numbers<[1], [0], [0], [1], [0, 0, 1, 1], [], []>} : vector<128x512xbf16>, vector<512x128xbf16>, vector<128x128xf32> -> vector<128x128xf32>
    %c0_59 = arith.constant 0 : index
    %c0_60 = arith.constant 0 : index
    %115 = vector.load %arg17[%c0_59, %c0_60] : memref<1x128xf32, #tpu.memory_space<vmem>>, vector<1x128xf32>
    %116 = vector.broadcast %115 : vector<1x128xf32> to vector<128x128xf32>
    %117 = arith.addf %114, %116 : vector<128x128xf32>
    %118 = arith.addf %117, %66 : vector<128x128xf32>
    %119 = arith.truncf %118 : vector<128x128xf32> to vector<128x128xbf16>
    %c0_61 = arith.constant 0 : index
    %c0_62 = arith.constant 0 : index
    %120 = vector.load %arg18[%c0_61, %c0_62] : memref<128x128xbf16, #tpu.memory_space<vmem>>, vector<128x128xbf16>
    tpu.vector_store %arg18[%c0_61, %c0_62], %119 {strides = array<i32>} : memref<128x128xbf16, #tpu.memory_space<vmem>>, vector<128x128xbf16>,
    return
  }
  func.func @transform_0(%arg0: i32) -> (i32, i32) {
    %c0_i32 = arith.constant 0 : i32
    %c0_i32_0 = arith.constant 0 : i32
    return %arg0, %c0_i32 : i32, i32
  }
  func.func @transform_1(%arg0: i32) -> (i32, i32) {
    %c0_i32 = arith.constant 0 : i32
    %c0_i32_0 = arith.constant 0 : i32
    %c0_i32_1 = arith.constant 0 : i32
    return %c0_i32, %c0_i32_0 : i32, i32
  }
  func.func @transform_2(%arg0: i32) -> (i32, i32) {
    %c0_i32 = arith.constant 0 : i32
    %c0_i32_0 = arith.constant 0 : i32
    %c0_i32_1 = arith.constant 0 : i32
    return %c0_i32, %c0_i32_0 : i32, i32
  }
  func.func @transform_3(%arg0: i32) -> (i32, i32) {
    %c0_i32 = arith.constant 0 : i32
    %c0_i32_0 = arith.constant 0 : i32
    %c0_i32_1 = arith.constant 0 : i32
    return %c0_i32, %c0_i32_0 : i32, i32
  }
  func.func @transform_4(%arg0: i32) -> (i32, i32) {
    %c0_i32 = arith.constant 0 : i32
    %c0_i32_0 = arith.constant 0 : i32
    %c0_i32_1 = arith.constant 0 : i32
    return %c0_i32, %c0_i32_0 : i32, i32
  }
  func.func @transform_5(%arg0: i32) -> (i32, i32) {
    %c0_i32 = arith.constant 0 : i32
    %c0_i32_0 = arith.constant 0 : i32
    %c0_i32_1 = arith.constant 0 : i32
    return %c0_i32, %c0_i32_0 : i32, i32
  }
  func.func @transform_6(%arg0: i32) -> (i32, i32) {
    %c0_i32 = arith.constant 0 : i32
    %c0_i32_0 = arith.constant 0 : i32
    %c0_i32_1 = arith.constant 0 : i32
    return %c0_i32, %c0_i32_0 : i32, i32
  }
  func.func @transform_7(%arg0: i32) -> (i32, i32) {
    %c0_i32 = arith.constant 0 : i32
    %c0_i32_0 = arith.constant 0 : i32
    %c0_i32_1 = arith.constant 0 : i32
    return %c0_i32, %c0_i32_0 : i32, i32
  }
  func.func @transform_8(%arg0: i32) -> (i32, i32) {
    %c0_i32 = arith.constant 0 : i32
    %c0_i32_0 = arith.constant 0 : i32
    %c0_i32_1 = arith.constant 0 : i32
    return %c0_i32, %c0_i32_0 : i32, i32
  }
  func.func @transform_9(%arg0: i32) -> (i32, i32) {
    %c0_i32 = arith.constant 0 : i32
    %c0_i32_0 = arith.constant 0 : i32
    %c0_i32_1 = arith.constant 0 : i32
    return %c0_i32, %c0_i32_0 : i32, i32
  }
  func.func @transform_10(%arg0: i32) -> (i32, i32) {
    %c0_i32 = arith.constant 0 : i32
    %c0_i32_0 = arith.constant 0 : i32
    %c0_i32_1 = arith.constant 0 : i32
    return %c0_i32, %c0_i32_0 : i32, i32
  }
  func.func @transform_11(%arg0: i32) -> (i32, i32) {
    %c0_i32 = arith.constant 0 : i32
    %c0_i32_0 = arith.constant 0 : i32
    %c0_i32_1 = arith.constant 0 : i32
    return %c0_i32, %c0_i32_0 : i32, i32
  }
  func.func @transform_12(%arg0: i32) -> (i32, i32) {
    %c0_i32 = arith.constant 0 : i32
    %c0_i32_0 = arith.constant 0 : i32
    %c0_i32_1 = arith.constant 0 : i32
    return %c0_i32, %c0_i32_0 : i32, i32
  }
  func.func @transform_13(%arg0: i32) -> (i32, i32) {
    %c0_i32 = arith.constant 0 : i32
    %c0_i32_0 = arith.constant 0 : i32
    %c0_i32_1 = arith.constant 0 : i32
    return %c0_i32, %c0_i32_0 : i32, i32
  }
  func.func @transform_14(%arg0: i32) -> (i32, i32) {
    %c0_i32 = arith.constant 0 : i32
    %c0_i32_0 = arith.constant 0 : i32
    %c0_i32_1 = arith.constant 0 : i32
    return %c0_i32, %c0_i32_0 : i32, i32
  }
  func.func @transform_15(%arg0: i32) -> (i32, i32) {
    %c0_i32 = arith.constant 0 : i32
    %c0_i32_0 = arith.constant 0 : i32
    %c0_i32_1 = arith.constant 0 : i32
    return %c0_i32, %c0_i32_0 : i32, i32
  }
  func.func @transform_16(%arg0: i32) -> (i32, i32) {
    %c0_i32 = arith.constant 0 : i32
    %c0_i32_0 = arith.constant 0 : i32
    %c0_i32_1 = arith.constant 0 : i32
    return %c0_i32, %c0_i32_0 : i32, i32
  }
  func.func @transform_17(%arg0: i32) -> (i32, i32) {
    %c0_i32 = arith.constant 0 : i32
    %c0_i32_0 = arith.constant 0 : i32
    return %arg0, %c0_i32 : i32, i32
  }
}

module attributes {stable_mosaic.version = 11 : i64} {
  func.func @matmul_bias_kernel(%arg0: i32, %arg1: memref<128x16xbf16, #tpu.memory_space<vmem>>, %arg2: memref<16x128xbf16, #tpu.memory_space<vmem>>, %arg3: memref<1x128xf32, #tpu.memory_space<vmem>>, %arg4: memref<128x128xbf16, #tpu.memory_space<vmem>>) attributes {dimension_semantics = [#tpu.dimension_semantics<parallel>], iteration_bounds = array<i64: 1>, scalar_prefetch = 0 : i64, scratch_operands = 0 : i64, tpu.core_type = #tpu.core_type<tc>, window_params = [{transform_indices = @transform_0, window_bounds = array<i64: 128, 16>}, {pipeline_mode = #tpu.pipeline_mode<synchronous>, transform_indices = @transform_1, window_bounds = array<i64: 16, 128>}, {pipeline_mode = #tpu.pipeline_mode<synchronous>, transform_indices = @transform_2, window_bounds = array<i64: 1, 128>}, {transform_indices = @transform_3, window_bounds = array<i64: 128, 128>}]} {
    %c0 = arith.constant 0 : index
    %c0_0 = arith.constant 0 : index
    %0 = vector.load %arg1[%c0, %c0_0] : memref<128x16xbf16, #tpu.memory_space<vmem>>, vector<128x16xbf16>
    %c0_1 = arith.constant 0 : index
    %c0_2 = arith.constant 0 : index
    %1 = vector.load %arg2[%c0_1, %c0_2] : memref<16x128xbf16, #tpu.memory_space<vmem>>, vector<16x128xbf16>
    %cst = arith.constant dense<0.000000e+00> : vector<128x128xf32>
    %2 = tpu.matmul %0, %1, %cst {dimension_numbers = #tpu.dot_dimension_numbers<[1], [0], [0], [1], [0, 0, 1, 1], [], []>} : vector<128x16xbf16>, vector<16x128xbf16>, vector<128x128xf32> -> vector<128x128xf32>
    %c0_3 = arith.constant 0 : index
    %c0_4 = arith.constant 0 : index
    %3 = vector.load %arg3[%c0_3, %c0_4] : memref<1x128xf32, #tpu.memory_space<vmem>>, vector<1x128xf32>
    %4 = vector.broadcast %3 : vector<1x128xf32> to vector<128x128xf32>
    %5 = arith.addf %2, %4 : vector<128x128xf32>
    %6 = arith.truncf %5 : vector<128x128xf32> to vector<128x128xbf16>
    %c0_5 = arith.constant 0 : index
    %c0_6 = arith.constant 0 : index
    %7 = vector.load %arg4[%c0_5, %c0_6] : memref<128x128xbf16, #tpu.memory_space<vmem>>, vector<128x128xbf16>
    tpu.vector_store %arg4[%c0_5, %c0_6], %6 {strides = array<i32>} : memref<128x128xbf16, #tpu.memory_space<vmem>>, vector<128x128xbf16>,
    return
  }
  func.func @transform_0(%arg0: i32) -> (i32, i32) {
    %c0_i32 = arith.constant 0 : i32
    %c0_i32_0 = arith.constant 0 : i32
    return %arg0, %c0_i32 : i32, i32
  }
  func.func @transform_1(%arg0: i32) -> (i32, i32) {
    %c0_i32 = arith.constant 0 : i32
    %c0_i32_0 = arith.constant 0 : i32
    %c0_i32_1 = arith.constant 0 : i32
    return %c0_i32, %c0_i32_0 : i32, i32
  }
  func.func @transform_2(%arg0: i32) -> (i32, i32) {
    %c0_i32 = arith.constant 0 : i32
    %c0_i32_0 = arith.constant 0 : i32
    %c0_i32_1 = arith.constant 0 : i32
    return %c0_i32, %c0_i32_0 : i32, i32
  }
  func.func @transform_3(%arg0: i32) -> (i32, i32) {
    %c0_i32 = arith.constant 0 : i32
    %c0_i32_0 = arith.constant 0 : i32
    return %arg0, %c0_i32 : i32, i32
  }
}

module attributes {stable_mosaic.version = 11 : i64} {
  func.func @afno_block_kernel(%arg0: i32, %arg1: memref<32x128xbf16, #tpu.memory_space<vmem>>, %arg2: memref<32x32xbf16, #tpu.memory_space<vmem>>, %arg3: memref<32x32xbf16, #tpu.memory_space<vmem>>, %arg4: memref<32x32xbf16, #tpu.memory_space<vmem>>, %arg5: memref<32x32xbf16, #tpu.memory_space<vmem>>, %arg6: memref<1x128xf32, #tpu.memory_space<vmem>>, %arg7: memref<1x128xf32, #tpu.memory_space<vmem>>, %arg8: memref<256x256xbf16, #tpu.memory_space<vmem>>, %arg9: memref<1x256xf32, #tpu.memory_space<vmem>>, %arg10: memref<256x256xbf16, #tpu.memory_space<vmem>>, %arg11: memref<1x256xf32, #tpu.memory_space<vmem>>, %arg12: memref<1x128xf32, #tpu.memory_space<vmem>>, %arg13: memref<1x128xf32, #tpu.memory_space<vmem>>, %arg14: memref<128x512xbf16, #tpu.memory_space<vmem>>, %arg15: memref<1x512xf32, #tpu.memory_space<vmem>>, %arg16: memref<512x128xbf16, #tpu.memory_space<vmem>>, %arg17: memref<1x128xf32, #tpu.memory_space<vmem>>, %arg18: memref<32x128xbf16, #tpu.memory_space<vmem>>) attributes {dimension_semantics = [#tpu.dimension_semantics<parallel>], iteration_bounds = array<i64: 1>, scalar_prefetch = 0 : i64, scratch_operands = 0 : i64, tpu.core_type = #tpu.core_type<tc>, window_params = [{transform_indices = @transform_0, window_bounds = array<i64: 32, 128>}, {pipeline_mode = #tpu.pipeline_mode<synchronous>, transform_indices = @transform_1, window_bounds = array<i64: 32, 32>}, {pipeline_mode = #tpu.pipeline_mode<synchronous>, transform_indices = @transform_2, window_bounds = array<i64: 32, 32>}, {pipeline_mode = #tpu.pipeline_mode<synchronous>, transform_indices = @transform_3, window_bounds = array<i64: 32, 32>}, {pipeline_mode = #tpu.pipeline_mode<synchronous>, transform_indices = @transform_4, window_bounds = array<i64: 32, 32>}, {pipeline_mode = #tpu.pipeline_mode<synchronous>, transform_indices = @transform_5, window_bounds = array<i64: 1, 128>}, {pipeline_mode = #tpu.pipeline_mode<synchronous>, transform_indices = @transform_6, window_bounds = array<i64: 1, 128>}, {pipeline_mode = #tpu.pipeline_mode<synchronous>, transform_indices = @transform_7, window_bounds = array<i64: 256, 256>}, {pipeline_mode = #tpu.pipeline_mode<synchronous>, transform_indices = @transform_8, window_bounds = array<i64: 1, 256>}, {pipeline_mode = #tpu.pipeline_mode<synchronous>, transform_indices = @transform_9, window_bounds = array<i64: 256, 256>}, {pipeline_mode = #tpu.pipeline_mode<synchronous>, transform_indices = @transform_10, window_bounds = array<i64: 1, 256>}, {pipeline_mode = #tpu.pipeline_mode<synchronous>, transform_indices = @transform_11, window_bounds = array<i64: 1, 128>}, {pipeline_mode = #tpu.pipeline_mode<synchronous>, transform_indices = @transform_12, window_bounds = array<i64: 1, 128>}, {pipeline_mode = #tpu.pipeline_mode<synchronous>, transform_indices = @transform_13, window_bounds = array<i64: 128, 512>}, {pipeline_mode = #tpu.pipeline_mode<synchronous>, transform_indices = @transform_14, window_bounds = array<i64: 1, 512>}, {pipeline_mode = #tpu.pipeline_mode<synchronous>, transform_indices = @transform_15, window_bounds = array<i64: 512, 128>}, {pipeline_mode = #tpu.pipeline_mode<synchronous>, transform_indices = @transform_16, window_bounds = array<i64: 1, 128>}, {transform_indices = @transform_17, window_bounds = array<i64: 32, 128>}]} {
    %c0 = arith.constant 0 : index
    %c0_0 = arith.constant 0 : index
    %0 = vector.load %arg1[%c0, %c0_0] : memref<32x128xbf16, #tpu.memory_space<vmem>>, vector<32x128xbf16>
    %1 = arith.extf %0 : vector<32x128xbf16> to vector<32x128xf32>
    %c0_1 = arith.constant 0 : index
    %c0_2 = arith.constant 0 : index
    %2 = vector.load %arg6[%c0_1, %c0_2] : memref<1x128xf32, #tpu.memory_space<vmem>>, vector<1x128xf32>
    %c0_3 = arith.constant 0 : index
    %c0_4 = arith.constant 0 : index
    %3 = vector.load %arg7[%c0_3, %c0_4] : memref<1x128xf32, #tpu.memory_space<vmem>>, vector<1x128xf32>
    %cst = arith.constant dense<0.000000e+00> : vector<32xf32>
    %4 = vector.multi_reduction <add>, %1, %cst [1] : vector<32x128xf32> to vector<32xf32>
    %5 = vector.shape_cast %4 : vector<32xf32> to vector<32x1xf32>
    %cst_5 = arith.constant 1.280000e+02 : f32
    %6 = vector.broadcast %cst_5 : f32 to vector<32x1xf32>
    %7 = arith.divf %5, %6 : vector<32x1xf32>
    %8 = arith.mulf %1, %1 : vector<32x128xf32>
    %cst_6 = arith.constant dense<0.000000e+00> : vector<32xf32>
    %9 = vector.multi_reduction <add>, %8, %cst_6 [1] : vector<32x128xf32> to vector<32xf32>
    %10 = vector.shape_cast %9 : vector<32xf32> to vector<32x1xf32>
    %cst_7 = arith.constant 1.280000e+02 : f32
    %11 = vector.broadcast %cst_7 : f32 to vector<32x1xf32>
    %12 = arith.divf %10, %11 : vector<32x1xf32>
    %13 = arith.mulf %7, %7 : vector<32x1xf32>
    %14 = arith.subf %12, %13 : vector<32x1xf32>
    %cst_8 = arith.constant 0.000000e+00 : f32
    %15 = vector.broadcast %cst_8 : f32 to vector<32x1xf32>
    %16 = arith.maximumf %14, %15 : vector<32x1xf32>
    %17 = vector.broadcast %7 : vector<32x1xf32> to vector<32x128xf32>
    %18 = arith.subf %1, %17 : vector<32x128xf32>
    %cst_9 = arith.constant 9.99999974E-6 : f32
    %19 = vector.broadcast %cst_9 : f32 to vector<32x1xf32>
    %20 = arith.addf %16, %19 : vector<32x1xf32>
    %21 = math.rsqrt %20 : vector<32x1xf32>
    %22 = vector.broadcast %21 : vector<32x1xf32> to vector<32x128xf32>
    %23 = arith.mulf %18, %22 : vector<32x128xf32>
    %24 = vector.broadcast %2 : vector<1x128xf32> to vector<32x128xf32>
    %25 = arith.mulf %23, %24 : vector<32x128xf32>
    %26 = vector.broadcast %3 : vector<1x128xf32> to vector<32x128xf32>
    %27 = arith.addf %25, %26 : vector<32x128xf32>
    %28 = arith.truncf %27 : vector<32x128xf32> to vector<32x128xbf16>
    %c0_10 = arith.constant 0 : index
    %c0_11 = arith.constant 0 : index
    %29 = vector.load %arg2[%c0_10, %c0_11] : memref<32x32xbf16, #tpu.memory_space<vmem>>, vector<32x32xbf16>
    %cst_12 = arith.constant dense<0.000000e+00> : vector<32x128xf32>
    %30 = tpu.matmul %29, %28, %cst_12 {dimension_numbers = #tpu.dot_dimension_numbers<[1], [0], [0], [1], [0, 0, 1, 1], [], []>} : vector<32x32xbf16>, vector<32x128xbf16>, vector<32x128xf32> -> vector<32x128xf32>
    %c0_13 = arith.constant 0 : index
    %c0_14 = arith.constant 0 : index
    %31 = vector.load %arg3[%c0_13, %c0_14] : memref<32x32xbf16, #tpu.memory_space<vmem>>, vector<32x32xbf16>
    %cst_15 = arith.constant dense<0.000000e+00> : vector<32x128xf32>
    %32 = tpu.matmul %31, %28, %cst_15 {dimension_numbers = #tpu.dot_dimension_numbers<[1], [0], [0], [1], [0, 0, 1, 1], [], []>} : vector<32x32xbf16>, vector<32x128xbf16>, vector<32x128xf32> -> vector<32x128xf32>
    %33 = tpu.concatenate %30, %32 in 1 : vector<32x128xf32>, vector<32x128xf32> -> vector<32x256xf32>
    %34 = arith.truncf %33 : vector<32x256xf32> to vector<32x256xbf16>
    %c0_16 = arith.constant 0 : index
    %c0_17 = arith.constant 0 : index
    %35 = vector.load %arg8[%c0_16, %c0_17] : memref<256x256xbf16, #tpu.memory_space<vmem>>, vector<256x256xbf16>
    %cst_18 = arith.constant dense<0.000000e+00> : vector<32x256xf32>
    %36 = tpu.matmul %34, %35, %cst_18 {dimension_numbers = #tpu.dot_dimension_numbers<[1], [0], [0], [1], [0, 0, 1, 1], [], []>} : vector<32x256xbf16>, vector<256x256xbf16>, vector<32x256xf32> -> vector<32x256xf32>
    %c0_19 = arith.constant 0 : index
    %c0_20 = arith.constant 0 : index
    %37 = vector.load %arg9[%c0_19, %c0_20] : memref<1x256xf32, #tpu.memory_space<vmem>>, vector<1x256xf32>
    %38 = vector.broadcast %37 : vector<1x256xf32> to vector<32x256xf32>
    %39 = arith.addf %36, %38 : vector<32x256xf32>
    %cst_21 = arith.constant 0.000000e+00 : f32
    %40 = vector.broadcast %cst_21 : f32 to vector<32x256xf32>
    %41 = arith.maximumf %39, %40 : vector<32x256xf32>
    %42 = arith.truncf %41 : vector<32x256xf32> to vector<32x256xbf16>
    %c0_22 = arith.constant 0 : index
    %c0_23 = arith.constant 0 : index
    %43 = vector.load %arg10[%c0_22, %c0_23] : memref<256x256xbf16, #tpu.memory_space<vmem>>, vector<256x256xbf16>
    %cst_24 = arith.constant dense<0.000000e+00> : vector<32x256xf32>
    %44 = tpu.matmul %42, %43, %cst_24 {dimension_numbers = #tpu.dot_dimension_numbers<[1], [0], [0], [1], [0, 0, 1, 1], [], []>} : vector<32x256xbf16>, vector<256x256xbf16>, vector<32x256xf32> -> vector<32x256xf32>
    %c0_25 = arith.constant 0 : index
    %c0_26 = arith.constant 0 : index
    %45 = vector.load %arg11[%c0_25, %c0_26] : memref<1x256xf32, #tpu.memory_space<vmem>>, vector<1x256xf32>
    %46 = vector.broadcast %45 : vector<1x256xf32> to vector<32x256xf32>
    %47 = arith.addf %44, %46 : vector<32x256xf32>
    %cst_27 = arith.constant 0.00999999977 : f32
    %48 = vector.broadcast %cst_27 : f32 to vector<32x256xf32>
    %49 = arith.subf %47, %48 : vector<32x256xf32>
    %cst_28 = arith.constant 0.000000e+00 : f32
    %50 = vector.broadcast %cst_28 : f32 to vector<32x256xf32>
    %51 = arith.maximumf %49, %50 : vector<32x256xf32>
    %cst_29 = arith.constant 0.00999999977 : f32
    %52 = vector.broadcast %cst_29 : f32 to vector<32x256xf32>
    %53 = arith.addf %47, %52 : vector<32x256xf32>
    %cst_30 = arith.constant 0.000000e+00 : f32
    %54 = vector.broadcast %cst_30 : f32 to vector<32x256xf32>
    %55 = arith.minimumf %53, %54 : vector<32x256xf32>
    %56 = arith.addf %51, %55 : vector<32x256xf32>
    %57 = arith.truncf %56 : vector<32x256xf32> to vector<32x256xbf16>
    %c0_31 = arith.constant 0 : index
    %c0_32 = arith.constant 0 : index
    %58 = vector.load %arg4[%c0_31, %c0_32] : memref<32x32xbf16, #tpu.memory_space<vmem>>, vector<32x32xbf16>
    %59 = vector.extract_strided_slice %57 {offsets = [0, 0], sizes = [32, 128], strides = [1, 1]} : vector<32x256xbf16> to vector<32x128xbf16>
    %cst_33 = arith.constant dense<0.000000e+00> : vector<32x128xf32>
    %60 = tpu.matmul %58, %59, %cst_33 {dimension_numbers = #tpu.dot_dimension_numbers<[1], [0], [0], [1], [0, 0, 1, 1], [], []>} : vector<32x32xbf16>, vector<32x128xbf16>, vector<32x128xf32> -> vector<32x128xf32>
    %c0_34 = arith.constant 0 : index
    %c0_35 = arith.constant 0 : index
    %61 = vector.load %arg5[%c0_34, %c0_35] : memref<32x32xbf16, #tpu.memory_space<vmem>>, vector<32x32xbf16>
    %62 = vector.extract_strided_slice %57 {offsets = [0, 128], sizes = [32, 128], strides = [1, 1]} : vector<32x256xbf16> to vector<32x128xbf16>
    %cst_36 = arith.constant dense<0.000000e+00> : vector<32x128xf32>
    %63 = tpu.matmul %61, %62, %cst_36 {dimension_numbers = #tpu.dot_dimension_numbers<[1], [0], [0], [1], [0, 0, 1, 1], [], []>} : vector<32x32xbf16>, vector<32x128xbf16>, vector<32x128xf32> -> vector<32x128xf32>
    %64 = arith.addf %60, %63 : vector<32x128xf32>
    %65 = arith.addf %64, %27 : vector<32x128xf32>
    %66 = arith.addf %65, %1 : vector<32x128xf32>
    %c0_37 = arith.constant 0 : index
    %c0_38 = arith.constant 0 : index
    %67 = vector.load %arg12[%c0_37, %c0_38] : memref<1x128xf32, #tpu.memory_space<vmem>>, vector<1x128xf32>
    %c0_39 = arith.constant 0 : index
    %c0_40 = arith.constant 0 : index
    %68 = vector.load %arg13[%c0_39, %c0_40] : memref<1x128xf32, #tpu.memory_space<vmem>>, vector<1x128xf32>
    %cst_41 = arith.constant dense<0.000000e+00> : vector<32xf32>
    %69 = vector.multi_reduction <add>, %66, %cst_41 [1] : vector<32x128xf32> to vector<32xf32>
    %70 = vector.shape_cast %69 : vector<32xf32> to vector<32x1xf32>
    %cst_42 = arith.constant 1.280000e+02 : f32
    %71 = vector.broadcast %cst_42 : f32 to vector<32x1xf32>
    %72 = arith.divf %70, %71 : vector<32x1xf32>
    %73 = arith.mulf %66, %66 : vector<32x128xf32>
    %cst_43 = arith.constant dense<0.000000e+00> : vector<32xf32>
    %74 = vector.multi_reduction <add>, %73, %cst_43 [1] : vector<32x128xf32> to vector<32xf32>
    %75 = vector.shape_cast %74 : vector<32xf32> to vector<32x1xf32>
    %cst_44 = arith.constant 1.280000e+02 : f32
    %76 = vector.broadcast %cst_44 : f32 to vector<32x1xf32>
    %77 = arith.divf %75, %76 : vector<32x1xf32>
    %78 = arith.mulf %72, %72 : vector<32x1xf32>
    %79 = arith.subf %77, %78 : vector<32x1xf32>
    %cst_45 = arith.constant 0.000000e+00 : f32
    %80 = vector.broadcast %cst_45 : f32 to vector<32x1xf32>
    %81 = arith.maximumf %79, %80 : vector<32x1xf32>
    %82 = vector.broadcast %72 : vector<32x1xf32> to vector<32x128xf32>
    %83 = arith.subf %66, %82 : vector<32x128xf32>
    %cst_46 = arith.constant 9.99999974E-6 : f32
    %84 = vector.broadcast %cst_46 : f32 to vector<32x1xf32>
    %85 = arith.addf %81, %84 : vector<32x1xf32>
    %86 = math.rsqrt %85 : vector<32x1xf32>
    %87 = vector.broadcast %86 : vector<32x1xf32> to vector<32x128xf32>
    %88 = arith.mulf %83, %87 : vector<32x128xf32>
    %89 = vector.broadcast %67 : vector<1x128xf32> to vector<32x128xf32>
    %90 = arith.mulf %88, %89 : vector<32x128xf32>
    %91 = vector.broadcast %68 : vector<1x128xf32> to vector<32x128xf32>
    %92 = arith.addf %90, %91 : vector<32x128xf32>
    %93 = arith.truncf %92 : vector<32x128xf32> to vector<32x128xbf16>
    %c0_47 = arith.constant 0 : index
    %c0_48 = arith.constant 0 : index
    %94 = vector.load %arg14[%c0_47, %c0_48] : memref<128x512xbf16, #tpu.memory_space<vmem>>, vector<128x512xbf16>
    %cst_49 = arith.constant dense<0.000000e+00> : vector<32x512xf32>
    %95 = tpu.matmul %93, %94, %cst_49 {dimension_numbers = #tpu.dot_dimension_numbers<[1], [0], [0], [1], [0, 0, 1, 1], [], []>} : vector<32x128xbf16>, vector<128x512xbf16>, vector<32x512xf32> -> vector<32x512xf32>
    %c0_50 = arith.constant 0 : index
    %c0_51 = arith.constant 0 : index
    %96 = vector.load %arg15[%c0_50, %c0_51] : memref<1x512xf32, #tpu.memory_space<vmem>>, vector<1x512xf32>
    %97 = vector.broadcast %96 : vector<1x512xf32> to vector<32x512xf32>
    %98 = arith.addf %95, %97 : vector<32x512xf32>
    %cst_52 = arith.constant 5.000000e-01 : f32
    %99 = vector.broadcast %cst_52 : f32 to vector<32x512xf32>
    %100 = arith.mulf %99, %98 : vector<32x512xf32>
    %cst_53 = arith.constant 4.471500e-02 : f32
    %101 = vector.broadcast %cst_53 : f32 to vector<32x512xf32>
    %102 = arith.mulf %101, %98 : vector<32x512xf32>
    %103 = arith.mulf %102, %98 : vector<32x512xf32>
    %104 = arith.mulf %103, %98 : vector<32x512xf32>
    %105 = arith.addf %98, %104 : vector<32x512xf32>
    %cst_54 = arith.constant 0.797884583 : f32
    %106 = vector.broadcast %cst_54 : f32 to vector<32x512xf32>
    %107 = arith.mulf %106, %105 : vector<32x512xf32>
    %108 = math.tanh %107 : vector<32x512xf32>
    %cst_55 = arith.constant 1.000000e+00 : f32
    %109 = vector.broadcast %cst_55 : f32 to vector<32x512xf32>
    %110 = arith.addf %109, %108 : vector<32x512xf32>
    %111 = arith.mulf %100, %110 : vector<32x512xf32>
    %112 = arith.truncf %111 : vector<32x512xf32> to vector<32x512xbf16>
    %c0_56 = arith.constant 0 : index
    %c0_57 = arith.constant 0 : index
    %113 = vector.load %arg16[%c0_56, %c0_57] : memref<512x128xbf16, #tpu.memory_space<vmem>>, vector<512x128xbf16>
    %cst_58 = arith.constant dense<0.000000e+00> : vector<32x128xf32>
    %114 = tpu.matmul %112, %113, %cst_58 {dimension_numbers = #tpu.dot_dimension_numbers<[1], [0], [0], [1], [0, 0, 1, 1], [], []>} : vector<32x512xbf16>, vector<512x128xbf16>, vector<32x128xf32> -> vector<32x128xf32>
    %c0_59 = arith.constant 0 : index
    %c0_60 = arith.constant 0 : index
    %115 = vector.load %arg17[%c0_59, %c0_60] : memref<1x128xf32, #tpu.memory_space<vmem>>, vector<1x128xf32>
    %116 = vector.broadcast %115 : vector<1x128xf32> to vector<32x128xf32>
    %117 = arith.addf %114, %116 : vector<32x128xf32>
    %118 = arith.addf %117, %66 : vector<32x128xf32>
    %119 = arith.truncf %118 : vector<32x128xf32> to vector<32x128xbf16>
    %c0_61 = arith.constant 0 : index
    %c0_62 = arith.constant 0 : index
    %120 = vector.load %arg18[%c0_61, %c0_62] : memref<32x128xbf16, #tpu.memory_space<vmem>>, vector<32x128xbf16>
    tpu.vector_store %arg18[%c0_61, %c0_62], %119 {strides = array<i32>} : memref<32x128xbf16, #tpu.memory_space<vmem>>, vector<32x128xbf16>,
    return
  }
  func.func @transform_0(%arg0: i32) -> (i32, i32) {
    %c0_i32 = arith.constant 0 : i32
    %c0_i32_0 = arith.constant 0 : i32
    return %arg0, %c0_i32 : i32, i32
  }
  func.func @transform_1(%arg0: i32) -> (i32, i32) {
    %c0_i32 = arith.constant 0 : i32
    %c0_i32_0 = arith.constant 0 : i32
    %c0_i32_1 = arith.constant 0 : i32
    return %c0_i32, %c0_i32_0 : i32, i32
  }
  func.func @transform_2(%arg0: i32) -> (i32, i32) {
    %c0_i32 = arith.constant 0 : i32
    %c0_i32_0 = arith.constant 0 : i32
    %c0_i32_1 = arith.constant 0 : i32
    return %c0_i32, %c0_i32_0 : i32, i32
  }
  func.func @transform_3(%arg0: i32) -> (i32, i32) {
    %c0_i32 = arith.constant 0 : i32
    %c0_i32_0 = arith.constant 0 : i32
    %c0_i32_1 = arith.constant 0 : i32
    return %c0_i32, %c0_i32_0 : i32, i32
  }
  func.func @transform_4(%arg0: i32) -> (i32, i32) {
    %c0_i32 = arith.constant 0 : i32
    %c0_i32_0 = arith.constant 0 : i32
    %c0_i32_1 = arith.constant 0 : i32
    return %c0_i32, %c0_i32_0 : i32, i32
  }
  func.func @transform_5(%arg0: i32) -> (i32, i32) {
    %c0_i32 = arith.constant 0 : i32
    %c0_i32_0 = arith.constant 0 : i32
    %c0_i32_1 = arith.constant 0 : i32
    return %c0_i32, %c0_i32_0 : i32, i32
  }
  func.func @transform_6(%arg0: i32) -> (i32, i32) {
    %c0_i32 = arith.constant 0 : i32
    %c0_i32_0 = arith.constant 0 : i32
    %c0_i32_1 = arith.constant 0 : i32
    return %c0_i32, %c0_i32_0 : i32, i32
  }
  func.func @transform_7(%arg0: i32) -> (i32, i32) {
    %c0_i32 = arith.constant 0 : i32
    %c0_i32_0 = arith.constant 0 : i32
    %c0_i32_1 = arith.constant 0 : i32
    return %c0_i32, %c0_i32_0 : i32, i32
  }
  func.func @transform_8(%arg0: i32) -> (i32, i32) {
    %c0_i32 = arith.constant 0 : i32
    %c0_i32_0 = arith.constant 0 : i32
    %c0_i32_1 = arith.constant 0 : i32
    return %c0_i32, %c0_i32_0 : i32, i32
  }
  func.func @transform_9(%arg0: i32) -> (i32, i32) {
    %c0_i32 = arith.constant 0 : i32
    %c0_i32_0 = arith.constant 0 : i32
    %c0_i32_1 = arith.constant 0 : i32
    return %c0_i32, %c0_i32_0 : i32, i32
  }
  func.func @transform_10(%arg0: i32) -> (i32, i32) {
    %c0_i32 = arith.constant 0 : i32
    %c0_i32_0 = arith.constant 0 : i32
    %c0_i32_1 = arith.constant 0 : i32
    return %c0_i32, %c0_i32_0 : i32, i32
  }
  func.func @transform_11(%arg0: i32) -> (i32, i32) {
    %c0_i32 = arith.constant 0 : i32
    %c0_i32_0 = arith.constant 0 : i32
    %c0_i32_1 = arith.constant 0 : i32
    return %c0_i32, %c0_i32_0 : i32, i32
  }
  func.func @transform_12(%arg0: i32) -> (i32, i32) {
    %c0_i32 = arith.constant 0 : i32
    %c0_i32_0 = arith.constant 0 : i32
    %c0_i32_1 = arith.constant 0 : i32
    return %c0_i32, %c0_i32_0 : i32, i32
  }
  func.func @transform_13(%arg0: i32) -> (i32, i32) {
    %c0_i32 = arith.constant 0 : i32
    %c0_i32_0 = arith.constant 0 : i32
    %c0_i32_1 = arith.constant 0 : i32
    return %c0_i32, %c0_i32_0 : i32, i32
  }
  func.func @transform_14(%arg0: i32) -> (i32, i32) {
    %c0_i32 = arith.constant 0 : i32
    %c0_i32_0 = arith.constant 0 : i32
    %c0_i32_1 = arith.constant 0 : i32
    return %c0_i32, %c0_i32_0 : i32, i32
  }
  func.func @transform_15(%arg0: i32) -> (i32, i32) {
    %c0_i32 = arith.constant 0 : i32
    %c0_i32_0 = arith.constant 0 : i32
    %c0_i32_1 = arith.constant 0 : i32
    return %c0_i32, %c0_i32_0 : i32, i32
  }
  func.func @transform_16(%arg0: i32) -> (i32, i32) {
    %c0_i32 = arith.constant 0 : i32
    %c0_i32_0 = arith.constant 0 : i32
    %c0_i32_1 = arith.constant 0 : i32
    return %c0_i32, %c0_i32_0 : i32, i32
  }
  func.func @transform_17(%arg0: i32) -> (i32, i32) {
    %c0_i32 = arith.constant 0 : i32
    %c0_i32_0 = arith.constant 0 : i32
    return %arg0, %c0_i32 : i32, i32
  }
}

module attributes {stable_mosaic.version = 11 : i64} {
  func.func @afno_block_kernel(%arg0: i32, %arg1: memref<32x128xbf16, #tpu.memory_space<vmem>>, %arg2: memref<24x32xbf16, #tpu.memory_space<vmem>>, %arg3: memref<24x32xbf16, #tpu.memory_space<vmem>>, %arg4: memref<32x24xbf16, #tpu.memory_space<vmem>>, %arg5: memref<32x24xbf16, #tpu.memory_space<vmem>>, %arg6: memref<1x128xf32, #tpu.memory_space<vmem>>, %arg7: memref<1x128xf32, #tpu.memory_space<vmem>>, %arg8: memref<256x256xbf16, #tpu.memory_space<vmem>>, %arg9: memref<1x256xf32, #tpu.memory_space<vmem>>, %arg10: memref<256x256xbf16, #tpu.memory_space<vmem>>, %arg11: memref<1x256xf32, #tpu.memory_space<vmem>>, %arg12: memref<1x128xf32, #tpu.memory_space<vmem>>, %arg13: memref<1x128xf32, #tpu.memory_space<vmem>>, %arg14: memref<128x512xbf16, #tpu.memory_space<vmem>>, %arg15: memref<1x512xf32, #tpu.memory_space<vmem>>, %arg16: memref<512x128xbf16, #tpu.memory_space<vmem>>, %arg17: memref<1x128xf32, #tpu.memory_space<vmem>>, %arg18: memref<32x128xbf16, #tpu.memory_space<vmem>>) attributes {dimension_semantics = [#tpu.dimension_semantics<parallel>], iteration_bounds = array<i64: 1>, scalar_prefetch = 0 : i64, scratch_operands = 0 : i64, tpu.core_type = #tpu.core_type<tc>, window_params = [{transform_indices = @transform_0, window_bounds = array<i64: 32, 128>}, {pipeline_mode = #tpu.pipeline_mode<synchronous>, transform_indices = @transform_1, window_bounds = array<i64: 24, 32>}, {pipeline_mode = #tpu.pipeline_mode<synchronous>, transform_indices = @transform_2, window_bounds = array<i64: 24, 32>}, {pipeline_mode = #tpu.pipeline_mode<synchronous>, transform_indices = @transform_3, window_bounds = array<i64: 32, 24>}, {pipeline_mode = #tpu.pipeline_mode<synchronous>, transform_indices = @transform_4, window_bounds = array<i64: 32, 24>}, {pipeline_mode = #tpu.pipeline_mode<synchronous>, transform_indices = @transform_5, window_bounds = array<i64: 1, 128>}, {pipeline_mode = #tpu.pipeline_mode<synchronous>, transform_indices = @transform_6, window_bounds = array<i64: 1, 128>}, {pipeline_mode = #tpu.pipeline_mode<synchronous>, transform_indices = @transform_7, window_bounds = array<i64: 256, 256>}, {pipeline_mode = #tpu.pipeline_mode<synchronous>, transform_indices = @transform_8, window_bounds = array<i64: 1, 256>}, {pipeline_mode = #tpu.pipeline_mode<synchronous>, transform_indices = @transform_9, window_bounds = array<i64: 256, 256>}, {pipeline_mode = #tpu.pipeline_mode<synchronous>, transform_indices = @transform_10, window_bounds = array<i64: 1, 256>}, {pipeline_mode = #tpu.pipeline_mode<synchronous>, transform_indices = @transform_11, window_bounds = array<i64: 1, 128>}, {pipeline_mode = #tpu.pipeline_mode<synchronous>, transform_indices = @transform_12, window_bounds = array<i64: 1, 128>}, {pipeline_mode = #tpu.pipeline_mode<synchronous>, transform_indices = @transform_13, window_bounds = array<i64: 128, 512>}, {pipeline_mode = #tpu.pipeline_mode<synchronous>, transform_indices = @transform_14, window_bounds = array<i64: 1, 512>}, {pipeline_mode = #tpu.pipeline_mode<synchronous>, transform_indices = @transform_15, window_bounds = array<i64: 512, 128>}, {pipeline_mode = #tpu.pipeline_mode<synchronous>, transform_indices = @transform_16, window_bounds = array<i64: 1, 128>}, {transform_indices = @transform_17, window_bounds = array<i64: 32, 128>}]} {
    %c0 = arith.constant 0 : index
    %c0_0 = arith.constant 0 : index
    %0 = vector.load %arg1[%c0, %c0_0] : memref<32x128xbf16, #tpu.memory_space<vmem>>, vector<32x128xbf16>
    %1 = arith.extf %0 : vector<32x128xbf16> to vector<32x128xf32>
    %c0_1 = arith.constant 0 : index
    %c0_2 = arith.constant 0 : index
    %2 = vector.load %arg6[%c0_1, %c0_2] : memref<1x128xf32, #tpu.memory_space<vmem>>, vector<1x128xf32>
    %c0_3 = arith.constant 0 : index
    %c0_4 = arith.constant 0 : index
    %3 = vector.load %arg7[%c0_3, %c0_4] : memref<1x128xf32, #tpu.memory_space<vmem>>, vector<1x128xf32>
    %cst = arith.constant dense<0.000000e+00> : vector<32xf32>
    %4 = vector.multi_reduction <add>, %1, %cst [1] : vector<32x128xf32> to vector<32xf32>
    %5 = vector.shape_cast %4 : vector<32xf32> to vector<32x1xf32>
    %cst_5 = arith.constant 1.280000e+02 : f32
    %6 = vector.broadcast %cst_5 : f32 to vector<32x1xf32>
    %7 = arith.divf %5, %6 : vector<32x1xf32>
    %8 = arith.mulf %1, %1 : vector<32x128xf32>
    %cst_6 = arith.constant dense<0.000000e+00> : vector<32xf32>
    %9 = vector.multi_reduction <add>, %8, %cst_6 [1] : vector<32x128xf32> to vector<32xf32>
    %10 = vector.shape_cast %9 : vector<32xf32> to vector<32x1xf32>
    %cst_7 = arith.constant 1.280000e+02 : f32
    %11 = vector.broadcast %cst_7 : f32 to vector<32x1xf32>
    %12 = arith.divf %10, %11 : vector<32x1xf32>
    %13 = arith.mulf %7, %7 : vector<32x1xf32>
    %14 = arith.subf %12, %13 : vector<32x1xf32>
    %cst_8 = arith.constant 0.000000e+00 : f32
    %15 = vector.broadcast %cst_8 : f32 to vector<32x1xf32>
    %16 = arith.maximumf %14, %15 : vector<32x1xf32>
    %17 = vector.broadcast %7 : vector<32x1xf32> to vector<32x128xf32>
    %18 = arith.subf %1, %17 : vector<32x128xf32>
    %cst_9 = arith.constant 9.99999974E-6 : f32
    %19 = vector.broadcast %cst_9 : f32 to vector<32x1xf32>
    %20 = arith.addf %16, %19 : vector<32x1xf32>
    %21 = math.rsqrt %20 : vector<32x1xf32>
    %22 = vector.broadcast %21 : vector<32x1xf32> to vector<32x128xf32>
    %23 = arith.mulf %18, %22 : vector<32x128xf32>
    %24 = vector.broadcast %2 : vector<1x128xf32> to vector<32x128xf32>
    %25 = arith.mulf %23, %24 : vector<32x128xf32>
    %26 = vector.broadcast %3 : vector<1x128xf32> to vector<32x128xf32>
    %27 = arith.addf %25, %26 : vector<32x128xf32>
    %28 = arith.truncf %27 : vector<32x128xf32> to vector<32x128xbf16>
    %c0_10 = arith.constant 0 : index
    %c0_11 = arith.constant 0 : index
    %29 = vector.load %arg2[%c0_10, %c0_11] : memref<24x32xbf16, #tpu.memory_space<vmem>>, vector<24x32xbf16>
    %cst_12 = arith.constant dense<0.000000e+00> : vector<24x128xf32>
    %30 = tpu.matmul %29, %28, %cst_12 {dimension_numbers = #tpu.dot_dimension_numbers<[1], [0], [0], [1], [0, 0, 1, 1], [], []>} : vector<24x32xbf16>, vector<32x128xbf16>, vector<24x128xf32> -> vector<24x128xf32>
    %c0_13 = arith.constant 0 : index
    %c0_14 = arith.constant 0 : index
    %31 = vector.load %arg3[%c0_13, %c0_14] : memref<24x32xbf16, #tpu.memory_space<vmem>>, vector<24x32xbf16>
    %cst_15 = arith.constant dense<0.000000e+00> : vector<24x128xf32>
    %32 = tpu.matmul %31, %28, %cst_15 {dimension_numbers = #tpu.dot_dimension_numbers<[1], [0], [0], [1], [0, 0, 1, 1], [], []>} : vector<24x32xbf16>, vector<32x128xbf16>, vector<24x128xf32> -> vector<24x128xf32>
    %33 = tpu.concatenate %30, %32 in 1 : vector<24x128xf32>, vector<24x128xf32> -> vector<24x256xf32>
    %34 = arith.truncf %33 : vector<24x256xf32> to vector<24x256xbf16>
    %c0_16 = arith.constant 0 : index
    %c0_17 = arith.constant 0 : index
    %35 = vector.load %arg8[%c0_16, %c0_17] : memref<256x256xbf16, #tpu.memory_space<vmem>>, vector<256x256xbf16>
    %cst_18 = arith.constant dense<0.000000e+00> : vector<24x256xf32>
    %36 = tpu.matmul %34, %35, %cst_18 {dimension_numbers = #tpu.dot_dimension_numbers<[1], [0], [0], [1], [0, 0, 1, 1], [], []>} : vector<24x256xbf16>, vector<256x256xbf16>, vector<24x256xf32> -> vector<24x256xf32>
    %c0_19 = arith.constant 0 : index
    %c0_20 = arith.constant 0 : index
    %37 = vector.load %arg9[%c0_19, %c0_20] : memref<1x256xf32, #tpu.memory_space<vmem>>, vector<1x256xf32>
    %38 = vector.broadcast %37 : vector<1x256xf32> to vector<24x256xf32>
    %39 = arith.addf %36, %38 : vector<24x256xf32>
    %cst_21 = arith.constant 0.000000e+00 : f32
    %40 = vector.broadcast %cst_21 : f32 to vector<24x256xf32>
    %41 = arith.maximumf %39, %40 : vector<24x256xf32>
    %42 = arith.truncf %41 : vector<24x256xf32> to vector<24x256xbf16>
    %c0_22 = arith.constant 0 : index
    %c0_23 = arith.constant 0 : index
    %43 = vector.load %arg10[%c0_22, %c0_23] : memref<256x256xbf16, #tpu.memory_space<vmem>>, vector<256x256xbf16>
    %cst_24 = arith.constant dense<0.000000e+00> : vector<24x256xf32>
    %44 = tpu.matmul %42, %43, %cst_24 {dimension_numbers = #tpu.dot_dimension_numbers<[1], [0], [0], [1], [0, 0, 1, 1], [], []>} : vector<24x256xbf16>, vector<256x256xbf16>, vector<24x256xf32> -> vector<24x256xf32>
    %c0_25 = arith.constant 0 : index
    %c0_26 = arith.constant 0 : index
    %45 = vector.load %arg11[%c0_25, %c0_26] : memref<1x256xf32, #tpu.memory_space<vmem>>, vector<1x256xf32>
    %46 = vector.broadcast %45 : vector<1x256xf32> to vector<24x256xf32>
    %47 = arith.addf %44, %46 : vector<24x256xf32>
    %cst_27 = arith.constant 0.00999999977 : f32
    %48 = vector.broadcast %cst_27 : f32 to vector<24x256xf32>
    %49 = arith.subf %47, %48 : vector<24x256xf32>
    %cst_28 = arith.constant 0.000000e+00 : f32
    %50 = vector.broadcast %cst_28 : f32 to vector<24x256xf32>
    %51 = arith.maximumf %49, %50 : vector<24x256xf32>
    %cst_29 = arith.constant 0.00999999977 : f32
    %52 = vector.broadcast %cst_29 : f32 to vector<24x256xf32>
    %53 = arith.addf %47, %52 : vector<24x256xf32>
    %cst_30 = arith.constant 0.000000e+00 : f32
    %54 = vector.broadcast %cst_30 : f32 to vector<24x256xf32>
    %55 = arith.minimumf %53, %54 : vector<24x256xf32>
    %56 = arith.addf %51, %55 : vector<24x256xf32>
    %57 = arith.truncf %56 : vector<24x256xf32> to vector<24x256xbf16>
    %c0_31 = arith.constant 0 : index
    %c0_32 = arith.constant 0 : index
    %58 = vector.load %arg4[%c0_31, %c0_32] : memref<32x24xbf16, #tpu.memory_space<vmem>>, vector<32x24xbf16>
    %59 = vector.extract_strided_slice %57 {offsets = [0, 0], sizes = [24, 128], strides = [1, 1]} : vector<24x256xbf16> to vector<24x128xbf16>
    %cst_33 = arith.constant dense<0.000000e+00> : vector<32x128xf32>
    %60 = tpu.matmul %58, %59, %cst_33 {dimension_numbers = #tpu.dot_dimension_numbers<[1], [0], [0], [1], [0, 0, 1, 1], [], []>} : vector<32x24xbf16>, vector<24x128xbf16>, vector<32x128xf32> -> vector<32x128xf32>
    %c0_34 = arith.constant 0 : index
    %c0_35 = arith.constant 0 : index
    %61 = vector.load %arg5[%c0_34, %c0_35] : memref<32x24xbf16, #tpu.memory_space<vmem>>, vector<32x24xbf16>
    %62 = vector.extract_strided_slice %57 {offsets = [0, 128], sizes = [24, 128], strides = [1, 1]} : vector<24x256xbf16> to vector<24x128xbf16>
    %cst_36 = arith.constant dense<0.000000e+00> : vector<32x128xf32>
    %63 = tpu.matmul %61, %62, %cst_36 {dimension_numbers = #tpu.dot_dimension_numbers<[1], [0], [0], [1], [0, 0, 1, 1], [], []>} : vector<32x24xbf16>, vector<24x128xbf16>, vector<32x128xf32> -> vector<32x128xf32>
    %64 = arith.addf %60, %63 : vector<32x128xf32>
    %65 = arith.addf %64, %27 : vector<32x128xf32>
    %66 = arith.addf %65, %1 : vector<32x128xf32>
    %c0_37 = arith.constant 0 : index
    %c0_38 = arith.constant 0 : index
    %67 = vector.load %arg12[%c0_37, %c0_38] : memref<1x128xf32, #tpu.memory_space<vmem>>, vector<1x128xf32>
    %c0_39 = arith.constant 0 : index
    %c0_40 = arith.constant 0 : index
    %68 = vector.load %arg13[%c0_39, %c0_40] : memref<1x128xf32, #tpu.memory_space<vmem>>, vector<1x128xf32>
    %cst_41 = arith.constant dense<0.000000e+00> : vector<32xf32>
    %69 = vector.multi_reduction <add>, %66, %cst_41 [1] : vector<32x128xf32> to vector<32xf32>
    %70 = vector.shape_cast %69 : vector<32xf32> to vector<32x1xf32>
    %cst_42 = arith.constant 1.280000e+02 : f32
    %71 = vector.broadcast %cst_42 : f32 to vector<32x1xf32>
    %72 = arith.divf %70, %71 : vector<32x1xf32>
    %73 = arith.mulf %66, %66 : vector<32x128xf32>
    %cst_43 = arith.constant dense<0.000000e+00> : vector<32xf32>
    %74 = vector.multi_reduction <add>, %73, %cst_43 [1] : vector<32x128xf32> to vector<32xf32>
    %75 = vector.shape_cast %74 : vector<32xf32> to vector<32x1xf32>
    %cst_44 = arith.constant 1.280000e+02 : f32
    %76 = vector.broadcast %cst_44 : f32 to vector<32x1xf32>
    %77 = arith.divf %75, %76 : vector<32x1xf32>
    %78 = arith.mulf %72, %72 : vector<32x1xf32>
    %79 = arith.subf %77, %78 : vector<32x1xf32>
    %cst_45 = arith.constant 0.000000e+00 : f32
    %80 = vector.broadcast %cst_45 : f32 to vector<32x1xf32>
    %81 = arith.maximumf %79, %80 : vector<32x1xf32>
    %82 = vector.broadcast %72 : vector<32x1xf32> to vector<32x128xf32>
    %83 = arith.subf %66, %82 : vector<32x128xf32>
    %cst_46 = arith.constant 9.99999974E-6 : f32
    %84 = vector.broadcast %cst_46 : f32 to vector<32x1xf32>
    %85 = arith.addf %81, %84 : vector<32x1xf32>
    %86 = math.rsqrt %85 : vector<32x1xf32>
    %87 = vector.broadcast %86 : vector<32x1xf32> to vector<32x128xf32>
    %88 = arith.mulf %83, %87 : vector<32x128xf32>
    %89 = vector.broadcast %67 : vector<1x128xf32> to vector<32x128xf32>
    %90 = arith.mulf %88, %89 : vector<32x128xf32>
    %91 = vector.broadcast %68 : vector<1x128xf32> to vector<32x128xf32>
    %92 = arith.addf %90, %91 : vector<32x128xf32>
    %93 = arith.truncf %92 : vector<32x128xf32> to vector<32x128xbf16>
    %c0_47 = arith.constant 0 : index
    %c0_48 = arith.constant 0 : index
    %94 = vector.load %arg14[%c0_47, %c0_48] : memref<128x512xbf16, #tpu.memory_space<vmem>>, vector<128x512xbf16>
    %cst_49 = arith.constant dense<0.000000e+00> : vector<32x512xf32>
    %95 = tpu.matmul %93, %94, %cst_49 {dimension_numbers = #tpu.dot_dimension_numbers<[1], [0], [0], [1], [0, 0, 1, 1], [], []>} : vector<32x128xbf16>, vector<128x512xbf16>, vector<32x512xf32> -> vector<32x512xf32>
    %c0_50 = arith.constant 0 : index
    %c0_51 = arith.constant 0 : index
    %96 = vector.load %arg15[%c0_50, %c0_51] : memref<1x512xf32, #tpu.memory_space<vmem>>, vector<1x512xf32>
    %97 = vector.broadcast %96 : vector<1x512xf32> to vector<32x512xf32>
    %98 = arith.addf %95, %97 : vector<32x512xf32>
    %cst_52 = arith.constant 5.000000e-01 : f32
    %99 = vector.broadcast %cst_52 : f32 to vector<32x512xf32>
    %100 = arith.mulf %99, %98 : vector<32x512xf32>
    %cst_53 = arith.constant 4.471500e-02 : f32
    %101 = vector.broadcast %cst_53 : f32 to vector<32x512xf32>
    %102 = arith.mulf %101, %98 : vector<32x512xf32>
    %103 = arith.mulf %102, %98 : vector<32x512xf32>
    %104 = arith.mulf %103, %98 : vector<32x512xf32>
    %105 = arith.addf %98, %104 : vector<32x512xf32>
    %cst_54 = arith.constant 0.797884583 : f32
    %106 = vector.broadcast %cst_54 : f32 to vector<32x512xf32>
    %107 = arith.mulf %106, %105 : vector<32x512xf32>
    %108 = math.tanh %107 : vector<32x512xf32>
    %cst_55 = arith.constant 1.000000e+00 : f32
    %109 = vector.broadcast %cst_55 : f32 to vector<32x512xf32>
    %110 = arith.addf %109, %108 : vector<32x512xf32>
    %111 = arith.mulf %100, %110 : vector<32x512xf32>
    %112 = arith.truncf %111 : vector<32x512xf32> to vector<32x512xbf16>
    %c0_56 = arith.constant 0 : index
    %c0_57 = arith.constant 0 : index
    %113 = vector.load %arg16[%c0_56, %c0_57] : memref<512x128xbf16, #tpu.memory_space<vmem>>, vector<512x128xbf16>
    %cst_58 = arith.constant dense<0.000000e+00> : vector<32x128xf32>
    %114 = tpu.matmul %112, %113, %cst_58 {dimension_numbers = #tpu.dot_dimension_numbers<[1], [0], [0], [1], [0, 0, 1, 1], [], []>} : vector<32x512xbf16>, vector<512x128xbf16>, vector<32x128xf32> -> vector<32x128xf32>
    %c0_59 = arith.constant 0 : index
    %c0_60 = arith.constant 0 : index
    %115 = vector.load %arg17[%c0_59, %c0_60] : memref<1x128xf32, #tpu.memory_space<vmem>>, vector<1x128xf32>
    %116 = vector.broadcast %115 : vector<1x128xf32> to vector<32x128xf32>
    %117 = arith.addf %114, %116 : vector<32x128xf32>
    %118 = arith.addf %117, %66 : vector<32x128xf32>
    %119 = arith.truncf %118 : vector<32x128xf32> to vector<32x128xbf16>
    %c0_61 = arith.constant 0 : index
    %c0_62 = arith.constant 0 : index
    %120 = vector.load %arg18[%c0_61, %c0_62] : memref<32x128xbf16, #tpu.memory_space<vmem>>, vector<32x128xbf16>
    tpu.vector_store %arg18[%c0_61, %c0_62], %119 {strides = array<i32>} : memref<32x128xbf16, #tpu.memory_space<vmem>>, vector<32x128xbf16>,
    return
  }
  func.func @transform_0(%arg0: i32) -> (i32, i32) {
    %c0_i32 = arith.constant 0 : i32
    %c0_i32_0 = arith.constant 0 : i32
    return %arg0, %c0_i32 : i32, i32
  }
  func.func @transform_1(%arg0: i32) -> (i32, i32) {
    %c0_i32 = arith.constant 0 : i32
    %c0_i32_0 = arith.constant 0 : i32
    %c0_i32_1 = arith.constant 0 : i32
    return %c0_i32, %c0_i32_0 : i32, i32
  }
  func.func @transform_2(%arg0: i32) -> (i32, i32) {
    %c0_i32 = arith.constant 0 : i32
    %c0_i32_0 = arith.constant 0 : i32
    %c0_i32_1 = arith.constant 0 : i32
    return %c0_i32, %c0_i32_0 : i32, i32
  }
  func.func @transform_3(%arg0: i32) -> (i32, i32) {
    %c0_i32 = arith.constant 0 : i32
    %c0_i32_0 = arith.constant 0 : i32
    %c0_i32_1 = arith.constant 0 : i32
    return %c0_i32, %c0_i32_0 : i32, i32
  }
  func.func @transform_4(%arg0: i32) -> (i32, i32) {
    %c0_i32 = arith.constant 0 : i32
    %c0_i32_0 = arith.constant 0 : i32
    %c0_i32_1 = arith.constant 0 : i32
    return %c0_i32, %c0_i32_0 : i32, i32
  }
  func.func @transform_5(%arg0: i32) -> (i32, i32) {
    %c0_i32 = arith.constant 0 : i32
    %c0_i32_0 = arith.constant 0 : i32
    %c0_i32_1 = arith.constant 0 : i32
    return %c0_i32, %c0_i32_0 : i32, i32
  }
  func.func @transform_6(%arg0: i32) -> (i32, i32) {
    %c0_i32 = arith.constant 0 : i32
    %c0_i32_0 = arith.constant 0 : i32
    %c0_i32_1 = arith.constant 0 : i32
    return %c0_i32, %c0_i32_0 : i32, i32
  }
  func.func @transform_7(%arg0: i32) -> (i32, i32) {
    %c0_i32 = arith.constant 0 : i32
    %c0_i32_0 = arith.constant 0 : i32
    %c0_i32_1 = arith.constant 0 : i32
    return %c0_i32, %c0_i32_0 : i32, i32
  }
  func.func @transform_8(%arg0: i32) -> (i32, i32) {
    %c0_i32 = arith.constant 0 : i32
    %c0_i32_0 = arith.constant 0 : i32
    %c0_i32_1 = arith.constant 0 : i32
    return %c0_i32, %c0_i32_0 : i32, i32
  }
  func.func @transform_9(%arg0: i32) -> (i32, i32) {
    %c0_i32 = arith.constant 0 : i32
    %c0_i32_0 = arith.constant 0 : i32
    %c0_i32_1 = arith.constant 0 : i32
    return %c0_i32, %c0_i32_0 : i32, i32
  }
  func.func @transform_10(%arg0: i32) -> (i32, i32) {
    %c0_i32 = arith.constant 0 : i32
    %c0_i32_0 = arith.constant 0 : i32
    %c0_i32_1 = arith.constant 0 : i32
    return %c0_i32, %c0_i32_0 : i32, i32
  }
  func.func @transform_11(%arg0: i32) -> (i32, i32) {
    %c0_i32 = arith.constant 0 : i32
    %c0_i32_0 = arith.constant 0 : i32
    %c0_i32_1 = arith.constant 0 : i32
    return %c0_i32, %c0_i32_0 : i32, i32
  }
  func.func @transform_12(%arg0: i32) -> (i32, i32) {
    %c0_i32 = arith.constant 0 : i32
    %c0_i32_0 = arith.constant 0 : i32
    %c0_i32_1 = arith.constant 0 : i32
    return %c0_i32, %c0_i32_0 : i32, i32
  }
  func.func @transform_13(%arg0: i32) -> (i32, i32) {
    %c0_i32 = arith.constant 0 : i32
    %c0_i32_0 = arith.constant 0 : i32
    %c0_i32_1 = arith.constant 0 : i32
    return %c0_i32, %c0_i32_0 : i32, i32
  }
  func.func @transform_14(%arg0: i32) -> (i32, i32) {
    %c0_i32 = arith.constant 0 : i32
    %c0_i32_0 = arith.constant 0 : i32
    %c0_i32_1 = arith.constant 0 : i32
    return %c0_i32, %c0_i32_0 : i32, i32
  }
  func.func @transform_15(%arg0: i32) -> (i32, i32) {
    %c0_i32 = arith.constant 0 : i32
    %c0_i32_0 = arith.constant 0 : i32
    %c0_i32_1 = arith.constant 0 : i32
    return %c0_i32, %c0_i32_0 : i32, i32
  }
  func.func @transform_16(%arg0: i32) -> (i32, i32) {
    %c0_i32 = arith.constant 0 : i32
    %c0_i32_0 = arith.constant 0 : i32
    %c0_i32_1 = arith.constant 0 : i32
    return %c0_i32, %c0_i32_0 : i32, i32
  }
  func.func @transform_17(%arg0: i32) -> (i32, i32) {
    %c0_i32 = arith.constant 0 : i32
    %c0_i32_0 = arith.constant 0 : i32
    return %arg0, %c0_i32 : i32, i32
  }
}

</mosaic_0001>

<bundles_post_ra>
// kernel: swin_afno_forward.6
= control target key start
LH: loop header
LB: loop body
LE: loop exit
PB: predicated region body
PF: predicated region fallthrough
CT: control target
= control target key end

     0   :  { %vm86_vm0 = vcmask 130048   ;;  %s509_s1 = inlined_call_operand.vmem [shape: bf16[16,128], index: 1, kind: input, shape index: {}]   ;;  %s510_s0 = inlined_call_operand.vmem [shape: bf16[128,16], index: 0, kind: input, shape index: {}]   ;;  %s511_s2 = inlined_call_operand.vmem [shape: f32[1,128], index: 2, kind: input, shape index: {}]   ;;  %s512_s3 = inlined_call_operand.vmem [shape: bf16[128,128], index: 3, kind: output, shape index: {}]  }
   0x1   :  { %v418_v0 = vld [vmem:[%s509_s1] sm:$0xff]   ;;  %v421_v3 = vld [vmem:[%s510_s0 + $0x8] sm:$0xff]   ;;  %v423_v5 = vld [vmem:[%s510_s0 + $0x10] sm:$0xff]  }
   0x2   :  { %v419_v1 = vld [vmem:[%s510_s0] sm:$0xff]   ;;  %398 = vmatprep.subr.bf16.mxu0 %v418_v0  ;;  %416 = vmatprep.subr.bf16.mxu1 %v418_v0  ;;  %v422_v4 = vld [vmem:[%s510_s0 + $0x28] sm:$0xff]   ;;  %v424_v6 = vld [vmem:[%s510_s0 + $0x30] sm:$0xff]  }
   0x3   :  { %v420_v2 = vld [vmem:[%s510_s0 + $0x20] sm:$0xff]   ;;  %399 = vmatpush3.bf16.msra.mxu0 %v418_v0  ;;  %417 = vmatpush3.bf16.msra.mxu1 %v418_v0  ;;  %v425_v7 = vld [vmem:[%s510_s0 + $0x18] sm:$0xff]  }
   0x4   :  { %400 = vmatprep.mubr.msk.bf16.mxu0 %vm86_vm0, %v419_v1  ;;  %408 = vmatprep.mubr.msk.bf16.mxu1 %vm86_vm0, %v420_v2  ;;  %v426_v8 = vld [vmem:[%s510_s0 + $0x38] sm:$0xff]   ;;  %v292_v11 = vld [vmem:[%s511_s2] ss:$0 sm:$0xff] }
   0x6   :  { %401 = vmatmul.mubr.msk.bf16.vlgmr.msra.gmra.mxu0 %vm86_vm0, %v421_v3  ;;  %409 = vmatmul.mubr.msk.bf16.vlgmr.msra.gmra.mxu1 %vm86_vm0, %v422_v4 }
   0x7   :  { %404 = vmatprep.mubr.msk.bf16.mxu0 %vm86_vm0, %v423_v5  ;;  %412 = vmatprep.mubr.msk.bf16.mxu1 %vm86_vm0, %v424_v6 }
   0xe   :  { %405 = vmatmul.mubr.msk.bf16.gmra.mxu0 %vm86_vm0, %v425_v7  ;;  %413 = vmatmul.mubr.msk.bf16.gmra.mxu1 %vm86_vm0, %v426_v8 }
  0xc6   :  { %v402_v9 = vpop.f32.mrf.mxu0  ;;  %v410_v10 = vpop.f32.mrf.mxu1 }
  0xc7   :  { %v154_v16 = vadd.f32 %v402_v9, %v292_v11  ;;  %v186_v17 = vadd.f32 %v410_v10, %v292_v11 }
  0xc8   :  { %v145_v12 = vpop.f32.mrf.mxu0  ;;  %v177_v13 = vpop.f32.mrf.mxu1 }
  0xc9   :  { %v146_v20 = vadd.f32 %v292_v11, %v145_v12  ;;  %v178_v21 = vadd.f32 %v292_v11, %v177_v13 }
  0xca   :  { %v403_v14 = vpop.f32.mrf.mxu0  ;;  %v411_v15 = vpop.f32.mrf.mxu1 }
  0xcb   :  { %v157_v18 = vadd.f32 %v403_v14, %v292_v11  ;;  %v189_v19 = vadd.f32 %v411_v15, %v292_v11 }
  0xcc   :  { %v148_v22 = vpop.f32.mrf.mxu0  ;;  %v180_v23 = vpop.f32.mrf.mxu1 }
  0xcd   :  { %v350_v24 = vpack.c.bf16 %v157_v18, %v154_v16  ;;  %v370_v25 = vpack.c.bf16 %v189_v19, %v186_v17  ;;  %v149_v26 = vadd.f32 %v292_v11, %v148_v22  ;;  %v181_v27 = vadd.f32 %v292_v11, %v180_v23 }
  0xce   :  { %v406_v28 = vpop.f32.mrf.mxu0  ;;  %v414_v29 = vpop.f32.mrf.mxu1 }
  0xcf   :  { %382 = vst [vmem:[%s512_s3 + $0x8] sm:$0xff] %v350_v24   ;;  %386 = vst [vmem:[%s512_s3 + $0x28] sm:$0xff] %v370_v25   ;;  %v345_v30 = vpack.c.bf16 %v149_v26, %v146_v20  ;;  %v365_v31 = vpack.c.bf16 %v181_v27, %v178_v21  ;;  %v170_v36 = vadd.f32 %v406_v28, %v292_v11 }
  0xd0   :  { %v161_v32 = vpop.f32.mrf.mxu0  ;;  %v193_v33 = vpop.f32.mrf.mxu1  ;;  %v202_v37 = vadd.f32 %v414_v29, %v292_v11 }
  0xd1   :  { %346 = vst [vmem:[%s512_s3] sm:$0xff] %v345_v30   ;;  %385 = vst [vmem:[%s512_s3 + $0x20] sm:$0xff] %v365_v31   ;;  %v162_v40 = vadd.f32 %v292_v11, %v161_v32  ;;  %v194_v41 = vadd.f32 %v292_v11, %v193_v33 }
  0xd2   :  { %v407_v34 = vpop.f32.mrf.mxu0  ;;  %v415_v35 = vpop.f32.mrf.mxu1 }
  0xd3   :  { %v173_v38 = vadd.f32 %v407_v34, %v292_v11  ;;  %v205_v39 = vadd.f32 %v415_v35, %v292_v11 }
  0xd4   :  { %v164_v42 = vpop.f32.mrf.mxu0  ;;  %v196_v43 = vpop.f32.mrf.mxu1 }
  0xd5   :  { %v360_v44 = vpack.c.bf16 %v173_v38, %v170_v36  ;;  %v380_v45 = vpack.c.bf16 %v205_v39, %v202_v37  ;;  %v165_v46 = vadd.f32 %v292_v11, %v164_v42  ;;  %v197_v47 = vadd.f32 %v292_v11, %v196_v43 }
  0xd7   :  { %384 = vst [vmem:[%s512_s3 + $0x18] sm:$0xff] %v360_v44   ;;  %388 = vst [vmem:[%s512_s3 + $0x38] sm:$0xff] %v380_v45   ;;  %v355_v48 = vpack.c.bf16 %v165_v46, %v162_v40  ;;  %v375_v49 = vpack.c.bf16 %v197_v47, %v194_v41 }
  0xd9   :  { %383 = vst [vmem:[%s512_s3 + $0x10] sm:$0xff] %v355_v48   ;;  %387 = vst [vmem:[%s512_s3 + $0x30] sm:$0xff] %v375_v49  }

// kernel: swin_afno_forward.8
= control target key start
LH: loop header
LB: loop body
LE: loop exit
PB: predicated region body
PF: predicated region fallthrough
CT: control target
= control target key end

     0   :  { %vm160_vm0 = vcmask 261120   ;;  %s3239_s0 = inlined_call_operand.vmem [shape: bf16[32,128], index: 0, kind: input, shape index: {}]   ;;  %s3240_s1 = inlined_call_operand.vmem [shape: bf16[32,32], index: 1, kind: input, shape index: {}, may-alias: {1,3}]   ;;  %s3241_s2 = inlined_call_operand.vmem [shape: bf16[32,32], index: 2, kind: input, shape index: {}, may-alias: {2,4}]   ;;  %s3242_s7 = inlined_call_operand.vmem [shape: bf16[256,256], index: 7, kind: input, shape index: {}]   ;;  %s3243_s5 = inlined_call_operand.vmem [shape: f32[1,128], index: 5, kind: input, shape index: {}]   ;;  %s3244_s6 = inlined_call_operand.vmem [shape: f32[1,128], index: 6, kind: input, shape index: {}]   ;;  %s3245_s9 = inlined_call_operand.vmem [shape: bf16[256,256], index: 9, kind: input, shape index: {}]   ;;  %s3246_s8 = inlined_call_operand.vmem [shape: f32[1,256], index: 8, kind: input, shape index: {}]   ;;  %s3247_s3 = inlined_call_operand.vmem [shape: bf16[32,32], index: 3, kind: input, shape index: {}, may-alias: {1,3}]   ;;  %s3248_s4 = inlined_call_operand.vmem [shape: bf16[32,32], index: 4, kind: input, shape index: {}, may-alias: {2,4}]   ;;  %s3249_s10 = inlined_call_operand.vmem [shape: f32[1,256], index: 10, kind: input, shape index: {}]   ;;  %s3250_s13 = inlined_call_operand.vmem [shape: bf16[128,512], index: 13, kind: input, shape index: {}]   ;;  %s3251_s11 = inlined_call_operand.vmem [shape: f32[1,128], index: 11, kind: input, shape index: {}]   ;;  %s3252_s12 = inlined_call_operand.vmem [shape: f32[1,128], index: 12, kind: input, shape index: {}]   ;;  %s3253_s15 = inlined_call_operand.vmem [shape: bf16[512,128], index: 15, kind: input, shape index: {}]   ;;  %s3254_s14 = inlined_call_operand.vmem [shape: f32[1,512], index: 14, kind: input, shape index: {}]   ;;  %s3255_s16 = inlined_call_operand.vmem [shape: f32[1,128], index: 16, kind: input, shape index: {}]   ;;  %s3256_s17 = inlined_call_operand.vmem [shape: bf16[32,128], index: 17, kind: output, shape index: {}]  }
   0x1   :  { %3259 = sst [smem:[#allocation2_spill]] %s3239_s0  ;;  %v2237_v11 = vld [vmem:[%s3241_s2] sm:$0xff]  }
   0x2   :  { %3260 = sst [smem:[#allocation3_spill]] %s3240_s1  ;;  %2215 = vmatprep.mubr.msk.bf16.mxu1 %vm160_vm0, %v2237_v11  ;;  %v1946_v47 = vld [vmem:[%s3243_s5] ss:$0 sm:$0xff]  ;;  %v2240_v11 = vld [vmem:[%s3242_s7 + $0x70] ss:$8 sps:$4 sm:$0xff]  }
   0x3   :  { %s3261_s26 = sld [smem:[#allocation2_spill]]  ;;  %v1947_v52 = vld [vmem:[%s3244_s6] ss:$0 sm:$0xff] }
   0x4   :  { %s3262_s30 = sld [smem:[#allocation3_spill]] }
   0x9   :  { %v2129_v0 = vld [vmem:[%s3261_s26 + $0x8] sm:$0xff]   ;;  %v2112_v4 = vld [vmem:[%s3261_s26] sm:$0xff]  }
   0xa   :  { %v2562_v1 = vunpack.c.l.bf16 %v2129_v0  ;;  %v2564_v2 = vunpack.c.h.bf16 %v2129_v0  ;;  %v2575_v6 = vunpack.c.l.bf16 %v2112_v4  ;;  %v2577_v7 = vunpack.c.h.bf16 %v2112_v4  ;;  %v2236_v10 = vld [vmem:[%s3262_s30] sm:$0xff]  }
   0xb   :  { %2207 = vmatprep.mubr.msk.bf16.mxu0 %vm160_vm0, %v2236_v10  ;;  %v2239_v10 = vld [vmem:[%s3241_s2 + $0x8] sm:$0xff]  }
   0xc   :  { %71 = vadd.xlane.f32.xlu0 %v2562_v1  ;;  %v82_v3 = vmul.f32 %v2562_v1, %v2562_v1  ;;  %v83_v5 = vmul.f32 %v2564_v2, %v2564_v2  ;;  %v80_v8 = vmul.f32 %v2575_v6, %v2575_v6  ;;  %v81_v9 = vmul.f32 %v2577_v7, %v2577_v7 }
   0xe   :  { %88 = vadd.xlane.f32.xlu1 %v82_v3 }
  0x10   :  { %73 = vadd.xlane.f32.xlu0 %v2564_v2 }
  0x12   :  { %90 = vadd.xlane.f32.xlu1 %v83_v5 }
  0x14   :  { %67 = vadd.xlane.f32.xlu0 %v2575_v6 }
  0x16   :  { %69 = vadd.xlane.f32.xlu1 %v2577_v7 }
  0x18   :  { %84 = vadd.xlane.f32.xlu0 %v80_v8  ;;  %v2242_v8 = vld [vmem:[%s3242_s7 + $0x74] ss:$8 sps:$4 sm:$0xff]  }
  0x1a   :  { %86 = vadd.xlane.f32.xlu1 %v81_v9  ;;  %v2238_v9 = vld [vmem:[%s3262_s30 + $0x8] sm:$0xff]  }
  0x95   :  { %v72_v12 = vpop.xlane.xlu0 %71 }
  0x96   :  { %v78_v13 = vmul.f32 0.0078125, %v72_v12  ;;  %v2245_v12 = vld [vmem:[%s3242_s7 + $0x64] ss:$8 sps:$4 sm:$0xff]  }
  0x97   :  { %v89_v14 = vpop.xlane.xlu1 %88 }
  0x98   :  { %v98_v15 = vmul.f32 %v78_v13, %v78_v13  ;;  %v94_v16 = vmul.f32 0.0078125, %v89_v14  ;;  %v110_v44 = vsub.f32 %v2562_v1, %v78_v13  ;;  %v2243_v13 = vld [vmem:[%s3242_s7 + $0x60] ss:$8 sps:$4 sm:$0xff]   ;;  %v2248_v14 = vld [vmem:[%s3242_s7 + $0x54] ss:$8 sps:$4 sm:$0xff]  }
  0x99   :  { %v74_v17 = vpop.xlane.xlu0 %73 }
  0x9a   :  { %v102_v18 = vsub.f32 %v94_v16, %v98_v15  ;;  %v79_v19 = vmul.f32 0.0078125, %v74_v17  ;;  %v2246_v15 = vld [vmem:[%s3242_s7 + $0x50] ss:$8 sps:$4 sm:$0xff]   ;;  %v2251_v16 = vld [vmem:[%s3242_s7 + $0x44] ss:$8 sps:$4 sm:$0xff]  }
  0x9b   :  { %v91_v20 = vpop.xlane.xlu1 %90  ;;  %v2249_v17 = vld [vmem:[%s3242_s7 + $0x40] ss:$8 sps:$4 sm:$0xff]  }
  0x9c   :  { %v106_v21 = vmax.f32 %v102_v18, 0.0  ;;  %v99_v22 = vmul.f32 %v79_v19, %v79_v19  ;;  %v95_v23 = vmul.f32 0.0078125, %v91_v20  ;;  %v111_v48 = vsub.f32 %v2564_v2, %v79_v19  ;;  %v2254_v18 = vld [vmem:[%s3242_s7 + $0x34] ss:$8 sps:$4 sm:$0xff]   ;;  %v2252_v19 = vld [vmem:[%s3242_s7 + $0x30] ss:$8 sps:$4 sm:$0xff]  }
  0x9d   :  { %v68_v24 = vpop.xlane.xlu0 %67  ;;  %v2257_v20 = vld [vmem:[%s3242_s7 + $0x24] ss:$8 sps:$4 sm:$0xff]  }
  0x9e   :  { %v114_v25 = vadd.f32 1e-05, %v106_v21  ;;  %v103_v26 = vsub.f32 %v95_v23, %v99_v22  ;;  %v76_v27 = vmul.f32 0.0078125, %v68_v24  ;;  %v2255_v21 = vld [vmem:[%s3242_s7 + $0x20] ss:$8 sps:$4 sm:$0xff]  }
  0x9f   :  { %v70_v28 = vpop.xlane.xlu1 %69  ;;  %v2260_v22 = vld [vmem:[%s3242_s7 + $0x14] ss:$8 sps:$4 sm:$0xff]   ;;  %v2258_v23 = vld [vmem:[%s3242_s7 + $0x10] ss:$8 sps:$4 sm:$0xff]   ;;  %v2263_v24 = vld [vmem:[%s3242_s7 + $0x4] ss:$8 sps:$4 sm:$0xff]  }
  0xa0   :  { %2420 = vrsqrt.f32 %v114_v25  ;;  %v107_v29 = vmax.f32 %v103_v26, 0.0  ;;  %v96_v30 = vmul.f32 %v76_v27, %v76_v27  ;;  %v77_v31 = vmul.f32 0.0078125, %v70_v28  ;;  %v2261_v25 = vld [vmem:[%s3242_s7] ss:$8 sps:$4 sm:$0xff]   ;;  %v2266_v26 = vld [vmem:[%s3242_s7 + $0xf4] ss:$8 sps:$4 sm:$0xff]  }
  0xa1   :  { %v85_v32 = vpop.xlane.xlu0 %84  ;;  %v108_v54 = vsub.f32 %v2575_v6, %v76_v27  ;;  %v2264_v27 = vld [vmem:[%s3242_s7 + $0xf0] ss:$8 sps:$4 sm:$0xff]   ;;  %v2269_v28 = vld [vmem:[%s3242_s7 + $0xe4] ss:$8 sps:$4 sm:$0xff]  }
  0xa2   :  { %v115_v33 = vadd.f32 1e-05, %v107_v29  ;;  %v92_v34 = vmul.f32 0.0078125, %v85_v32  ;;  %v97_v36 = vmul.f32 %v77_v31, %v77_v31  ;;  %v109_v58 = vsub.f32 %v2577_v7, %v77_v31  ;;  %v2267_v29 = vld [vmem:[%s3242_s7 + $0xe0] ss:$8 sps:$4 sm:$0xff]  }
  0xa3   :  { %v87_v35 = vpop.xlane.xlu1 %86  ;;  %v2270_v31 = vld [vmem:[%s3242_s7 + $0xd0] ss:$8 sps:$4 sm:$0xff]   ;;  %v2275_v32 = vld [vmem:[%s3242_s7 + $0xc4] ss:$8 sps:$4 sm:$0xff]  }
  0xa4   :  { %2422 = vrsqrt.f32 %v115_v33  ;;  %v100_v37 = vsub.f32 %v92_v34, %v96_v30  ;;  %v93_v38 = vmul.f32 0.0078125, %v87_v35  ;;  %v2272_v30 = vld [vmem:[%s3242_s7 + $0xd4] ss:$8 sps:$4 sm:$0xff]   ;;  %v2273_v33 = vld [vmem:[%s3242_s7 + $0xc0] ss:$8 sps:$4 sm:$0xff]  }
  0xa5   :  { %v2278_v34 = vld [vmem:[%s3242_s7 + $0xb4] ss:$8 sps:$4 sm:$0xff]   ;;  %v2276_v35 = vld [vmem:[%s3242_s7 + $0xb0] ss:$8 sps:$4 sm:$0xff]  }
  0xa6   :  { %v104_v39 = vmax.f32 %v100_v37, 0.0  ;;  %v101_v40 = vsub.f32 %v93_v38, %v97_v36  ;;  %v2281_v36 = vld [vmem:[%s3242_s7 + $0xa4] ss:$8 sps:$4 sm:$0xff]   ;;  %v2279_v37 = vld [vmem:[%s3242_s7 + $0xa0] ss:$8 sps:$4 sm:$0xff]  }
  0xa7   :  { %v2284_v38 = vld [vmem:[%s3242_s7 + $0x94] ss:$8 sps:$4 sm:$0xff]  }
  0xa8   :  { %v112_v41 = vadd.f32 1e-05, %v104_v39  ;;  %v105_v42 = vmax.f32 %v101_v40, 0.0  ;;  %v2282_v39 = vld [vmem:[%s3242_s7 + $0x90] ss:$8 sps:$4 sm:$0xff]  }
  0xa9   :  { %v2287_v40 = vld [vmem:[%s3242_s7 + $0x84] ss:$8 sps:$4 sm:$0xff]  }
  0xaa   :  { %2424 = vrsqrt.f32 %v112_v41  ;;  %v113_v43 = vadd.f32 1e-05, %v105_v42  ;;  %v2285_v41 = vld [vmem:[%s3242_s7 + $0x80] ss:$8 sps:$4 sm:$0xff]   ;;  %v2288_v42 = vld [vmem:[%s3245_s9 + $0x70] ss:$8 sps:$4 sm:$0xff]  }
  0xac   :  { %2426 = vrsqrt.f32 %v113_v43  ;;  %v2290_v43 = vld [vmem:[%s3245_s9 + $0x74] ss:$8 sps:$4 sm:$0xff]  }
  0xad   :  { %v2421_v45 = vpop.eup %2420 }
  0xae   :  { %v122_v46 = vmul.f32 %v2421_v45, %v110_v44  ;;  %v2293_v44 = vld [vmem:[%s3245_s9 + $0x64] ss:$8 sps:$4 sm:$0xff]   ;;  %v2291_v45 = vld [vmem:[%s3245_s9 + $0x60] ss:$8 sps:$4 sm:$0xff]  }
  0xb0   :  { %v132_v51 = vmul.f32 %v1946_v47, %v122_v46  ;;  %v2296_v46 = vld [vmem:[%s3245_s9 + $0x54] ss:$8 sps:$4 sm:$0xff]  }
  0xb1   :  { %v2423_v49 = vpop.eup %2422 }
  0xb2   :  { %v123_v50 = vmul.f32 %v2423_v49, %v111_v48  ;;  %v2602_v55 = vadd.f32 %v1947_v52, %v132_v51  ;;  %v2299_v48 = vld [vmem:[%s3245_s9 + $0x44] ss:$8 sps:$4 sm:$0xff]   ;;  %v2297_v49 = vld [vmem:[%s3245_s9 + $0x40] ss:$8 sps:$4 sm:$0xff]   ;;  %v2300_v51 = vld [vmem:[%s3245_s9 + $0x30] ss:$8 sps:$4 sm:$0xff]  }
  0xb4   :  { %v133_v53 = vmul.f32 %v1946_v47, %v123_v50  ;;  %v2302_v50 = vld [vmem:[%s3245_s9 + $0x34] ss:$8 sps:$4 sm:$0xff]  }
  0xb6   :  { %v2604_v56 = vadd.f32 %v1947_v52, %v133_v53  ;;  %v2303_v53 = vld [vmem:[%s3245_s9 + $0x20] ss:$8 sps:$4 sm:$0xff]  }
  0xb7   :  { %v2425_v57 = vpop.eup %2424 }
  0xb8   :  { %v145_v59 = vpack.c.bf16 %v2604_v56, %v2602_v55  ;;  %v120_v60 = vmul.f32 %v2425_v57, %v108_v54  ;;  %v2308_v54 = vld [vmem:[%s3245_s9 + $0x14] ss:$8 sps:$4 sm:$0xff]   ;;  %v2306_v57 = vld [vmem:[%s3245_s9 + $0x10] ss:$8 sps:$4 sm:$0xff]  }
  0xb9   :  { %v2427_v61 = vpop.eup %2426 }
  0xba   :  { %2203 = vmatprep.subr.bf16.mxu0 %v145_v59  ;;  %2211 = vmatprep.subr.bf16.mxu1 %v145_v59  ;;  %v121_v62 = vmul.f32 %v2427_v61, %v109_v58  ;;  %v130_v63 = vmul.f32 %v1946_v47, %v120_v60  ;;  %v2311_v58 = vld [vmem:[%s3245_s9 + $0x4] ss:$8 sps:$4 sm:$0xff]   ;;  %v2314_v60 = vld [vmem:[%s3245_s9 + $0xf4] ss:$8 sps:$4 sm:$0xff]   ;;  %v2312_v61 = vld [vmem:[%s3245_s9 + $0xf0] ss:$8 sps:$4 sm:$0xff]  }
  0xbb   :  { %2204 = vmatpush3.bf16.msra.mxu0 %v145_v59  ;;  %2212 = vmatpush3.bf16.msra.mxu1 %v145_v59  ;;  %v2309_v59 = vld [vmem:[%s3245_s9] ss:$8 sps:$4 sm:$0xff]  }
  0xbc   :  { %v131_v0 = vmul.f32 %v1946_v47, %v121_v62  ;;  %v2609_v3 = vadd.f32 %v1947_v52, %v130_v63  ;;  %v2294_v47 = vld [vmem:[%s3245_s9 + $0x50] ss:$8 sps:$4 sm:$0xff]   ;;  %v2317_v62 = vld [vmem:[%s3245_s9 + $0xe4] ss:$8 sps:$4 sm:$0xff]   ;;  %v2315_v63 = vld [vmem:[%s3245_s9 + $0xe0] ss:$8 sps:$4 sm:$0xff]  }
  0xbe   :  { %v2611_v4 = vadd.f32 %v1947_v52, %v131_v0  ;;  %v2305_v52 = vld [vmem:[%s3245_s9 + $0x24] ss:$8 sps:$4 sm:$0xff]   ;;  %v2320_v0 = vld [vmem:[%s3245_s9 + $0xd4] ss:$8 sps:$4 sm:$0xff]  }
  0xc0   :  { %v144_v5 = vpack.c.bf16 %v2611_v4, %v2609_v3 }
  0xc2   :  { %2205 = vmatprep.subr.bf16.mxu0 %v144_v5  ;;  %2213 = vmatprep.subr.bf16.mxu1 %v144_v5 }
  0xc3   :  { %2206 = vmatpush3.bf16.msra.mxu0 %v144_v5  ;;  %2214 = vmatpush3.bf16.msra.mxu1 %v144_v5  ;;  %v2318_v5 = vld [vmem:[%s3245_s9 + $0xd0] ss:$8 sps:$4 sm:$0xff]  }
  0xc4   :  { %493 = vmatprep.subr.bf16.mxu0 %v2242_v8  ;;  %762 = vmatprep.subr.bf16.mxu1 %v2290_v43  ;;  %v2323_v8 = vld [vmem:[%s3245_s9 + $0xc4] ss:$8 sps:$4 sm:$0xff]  }
  0xc6   :  { %2208 = vmatmul.mubr.msk.bf16.vlgmr.msra.gmra.mxu0 %vm160_vm0, %v2238_v9  ;;  %2216 = vmatmul.mubr.msk.bf16.vlgmr.msra.gmra.mxu1 %vm160_vm0, %v2239_v10  ;;  %v2321_v9 = vld [vmem:[%s3245_s9 + $0xc0] ss:$8 sps:$4 sm:$0xff]   ;;  %v2326_v10 = vld [vmem:[%s3245_s9 + $0xb4] ss:$8 sps:$4 sm:$0xff]  }
  0xc7   :  { %494 = vmatpush1.bf16.msra.mxu0 %v2240_v11  ;;  %763 = vmatpush1.bf16.msra.mxu1 %v2288_v42  ;;  %v2324_v11 = vld [vmem:[%s3245_s9 + $0xb0] ss:$8 sps:$4 sm:$0xff]  }
  0xc8   :  { %495 = vmatprep.subr.bf16.mxu0 %v2245_v12  ;;  %764 = vmatprep.subr.bf16.mxu1 %v2293_v44 }
  0xcb   :  { %496 = vmatpush1.bf16.msra.mxu0 %v2243_v13  ;;  %765 = vmatpush1.bf16.msra.mxu1 %v2291_v45 }
  0xcc   :  { %497 = vmatprep.subr.bf16.mxu0 %v2248_v14  ;;  %766 = vmatprep.subr.bf16.mxu1 %v2296_v46 }
  0xcf   :  { %498 = vmatpush1.bf16.msra.mxu0 %v2246_v15  ;;  %767 = vmatpush1.bf16.msra.mxu1 %v2294_v47 }
  0xd0   :  { %499 = vmatprep.subr.bf16.mxu0 %v2251_v16  ;;  %768 = vmatprep.subr.bf16.mxu1 %v2299_v48 }
  0xd3   :  { %500 = vmatpush1.bf16.msra.mxu0 %v2249_v17  ;;  %769 = vmatpush1.bf16.msra.mxu1 %v2297_v49 }
  0xd4   :  { %501 = vmatprep.subr.bf16.mxu0 %v2254_v18  ;;  %770 = vmatprep.subr.bf16.mxu1 %v2302_v50 }
  0xd7   :  { %502 = vmatpush1.bf16.msra.mxu0 %v2252_v19  ;;  %771 = vmatpush1.bf16.msra.mxu1 %v2300_v51 }
  0xd8   :  { %503 = vmatprep.subr.bf16.mxu0 %v2257_v20  ;;  %772 = vmatprep.subr.bf16.mxu1 %v2305_v52 }
  0xdb   :  { %504 = vmatpush1.bf16.msra.mxu0 %v2255_v21  ;;  %773 = vmatpush1.bf16.msra.mxu1 %v2303_v53 }
  0xdc   :  { %505 = vmatprep.subr.bf16.mxu0 %v2260_v22  ;;  %774 = vmatprep.subr.bf16.mxu1 %v2308_v54 }
  0xdf   :  { %506 = vmatpush1.bf16.msra.mxu0 %v2258_v23  ;;  %775 = vmatpush1.bf16.msra.mxu1 %v2306_v57 }
  0xe0   :  { %507 = vmatprep.subr.bf16.mxu0 %v2263_v24  ;;  %776 = vmatprep.subr.bf16.mxu1 %v2311_v58  ;;  %v2329_v24 = vld [vmem:[%s3245_s9 + $0xa4] ss:$8 sps:$4 sm:$0xff]  }
  0xe3   :  { %508 = vmatpush1.bf16.msra.mxu0 %v2261_v25  ;;  %777 = vmatpush1.bf16.msra.mxu1 %v2309_v59  ;;  %v2327_v25 = vld [vmem:[%s3245_s9 + $0xa0] ss:$8 sps:$4 sm:$0xff]  }
  0xe4   :  { %509 = vmatprep.subr.bf16.mxu0 %v2266_v26  ;;  %778 = vmatprep.subr.bf16.mxu1 %v2314_v60  ;;  %v2332_v26 = vld [vmem:[%s3245_s9 + $0x94] ss:$8 sps:$4 sm:$0xff]  }
  0xe7   :  { %510 = vmatpush2.bf16.msra.mxu0 %v2264_v27  ;;  %779 = vmatpush2.bf16.msra.mxu1 %v2312_v61  ;;  %v2330_v27 = vld [vmem:[%s3245_s9 + $0x90] ss:$8 sps:$4 sm:$0xff]  }
  0xe8   :  { %511 = vmatprep.subr.bf16.mxu0 %v2269_v28  ;;  %780 = vmatprep.subr.bf16.mxu1 %v2317_v62  ;;  %v2335_v28 = vld [vmem:[%s3245_s9 + $0x84] ss:$8 sps:$4 sm:$0xff]  }
  0xeb   :  { %512 = vmatpush2.bf16.msra.mxu0 %v2267_v29  ;;  %781 = vmatpush2.bf16.msra.mxu1 %v2315_v63  ;;  %v2333_v29 = vld [vmem:[%s3245_s9 + $0x80] ss:$8 sps:$4 sm:$0xff]  }
  0xec   :  { %513 = vmatprep.subr.bf16.mxu0 %v2272_v30  ;;  %782 = vmatprep.subr.bf16.mxu1 %v2320_v0  ;;  %v323_v30 = vlaneseq }
  0xef   :  { %514 = vmatpush2.bf16.msra.mxu0 %v2270_v31  ;;  %783 = vmatpush2.bf16.msra.mxu1 %v2318_v5  ;;  %v2815_v31 = vshrl.u32 %v323_v30, 7 }
  0xf0   :  { %515 = vmatprep.subr.bf16.mxu0 %v2275_v32  ;;  %784 = vmatprep.subr.bf16.mxu1 %v2323_v8 }
  0xf1   :  { %v2818_v32 = vsub.s32 1, %v2815_v31 }
  0xf3   :  { %516 = vmatpush2.bf16.msra.mxu0 %v2273_v33  ;;  %785 = vmatpush2.bf16.msra.mxu1 %v2321_v9  ;;  %v2821_v33 = vsub.s32 0, %v2815_v31  ;;  %v2337_v9 = vld [vmem:[%s3247_s3] sm:$0xff]  }
  0xf4   :  { %517 = vmatprep.subr.bf16.mxu0 %v2278_v34  ;;  %786 = vmatprep.subr.bf16.mxu1 %v2326_v10  ;;  %v321_v34 = vld [vmem:[%s3246_s8] sm:$0x3] }
  0xf5   :  { %v2336_v10 = vld [vmem:[%s3248_s4] sm:$0xff]  }
  0xf7   :  { %518 = vmatpush2.bf16.msra.mxu0 %v2276_v35  ;;  %787 = vmatpush2.bf16.msra.mxu1 %v2324_v11  ;;  %v590_v11 = vld [vmem:[%s3249_s10] sm:$0x3] }
  0xf8   :  { %519 = vmatprep.subr.bf16.mxu0 %v2281_v36  ;;  %788 = vmatprep.subr.bf16.mxu1 %v2329_v24  ;;  %v330_v36 = vrot.slane %v321_v34, %v2818_v32 }
  0xfb   :  { %520 = vmatpush2.bf16.msra.mxu0 %v2279_v37  ;;  %789 = vmatpush2.bf16.msra.mxu1 %v2327_v25  ;;  %v326_v37 = vrot.slane %v321_v34, %v2821_v33 }
  0xfc   :  { %521 = vmatprep.subr.bf16.mxu0 %v2284_v38  ;;  %790 = vmatprep.subr.bf16.mxu1 %v2332_v26 }
  0xff   :  { %522 = vmatpush2.bf16.msra.mxu0 %v2282_v39  ;;  %791 = vmatpush2.bf16.msra.mxu1 %v2330_v27 }
 0x100   :  { %523 = vmatprep.subr.bf16.mxu0 %v2287_v40  ;;  %792 = vmatprep.subr.bf16.mxu1 %v2335_v28 }
 0x103   :  { %524 = vmatpush2.bf16.msra.mxu0 %v2285_v41  ;;  %793 = vmatpush2.bf16.msra.mxu1 %v2333_v29 }
 0x186   :  { %v2209_v12 = vpop.f32.mrf.mxu0  ;;  %v2217_v13 = vpop.f32.mrf.mxu1 }
 0x188   :  { %v201_v14 = vpop.f32.mrf.mxu0  ;;  %v270_v15 = vpop.f32.mrf.mxu1 }
 0x18a   :  { %v2210_v16 = vpop.f32.mrf.mxu0  ;;  %v2218_v17 = vpop.f32.mrf.mxu1 }
 0x18b   :  { %v288_v22 = vpack.c.bf16 %v2218_v17, %v2217_v13  ;;  %v287_v23 = vpack.c.bf16 %v2210_v16, %v2209_v12  ;;  %v595_v12 = vrot.slane %v590_v11, %v2821_v33  ;;  %v599_v17 = vrot.slane %v590_v11, %v2818_v32 }
 0x18c   :  { %v204_v18 = vpop.f32.mrf.mxu0  ;;  %v273_v19 = vpop.f32.mrf.mxu1 }
 0x18d   :  { %v285_v20 = vpack.c.bf16 %v204_v18, %v201_v14  ;;  %v286_v21 = vpack.c.bf16 %v273_v19, %v270_v15 }
 0x18f   :  { %525 = vmatprep.mubr.bf16.mxu0 %v286_v21 }
 0x190   :  { %526 = vmatmul.mubr.bf16.vlgmr.msra.gmra.mxu0 %v285_v20 }
 0x191   :  { %535 = vmatprep.mubr.bf16.mxu0 %v288_v22 }
 0x198   :  { %536 = vmatmul.mubr.bf16.gmra.mxu0 %v287_v23 }
 0x199   :  { %2223 = vmatprep.mubr.msk.bf16.mxu0 %vm160_vm0, %v2336_v10 }
 0x250   :  { %v527_v35 = vpop.f32.mrf.mxu0 }
 0x251   :  { %v528_v42 = vadd.f32 %v527_v35, %v326_v37 }
 0x252   :  { %v529_v38 = vpop.f32.mrf.mxu0 }
 0x253   :  { %v530_v40 = vadd.f32 %v529_v38, %v330_v36  ;;  %v546_v49 = vmax.f32 %v528_v42, 0.0 }
 0x254   :  { %v531_v39 = vpop.f32.mrf.mxu0 }
 0x255   :  { %v532_v41 = vadd.f32 %v531_v39, %v326_v37  ;;  %v547_v47 = vmax.f32 %v530_v40, 0.0 }
 0x256   :  { %v533_v43 = vpop.f32.mrf.mxu0 }
 0x257   :  { %v534_v44 = vadd.f32 %v533_v43, %v330_v36  ;;  %v548_v45 = vmax.f32 %v532_v41, 0.0 }
 0x258   :  { %v537_v46 = vpop.f32.mrf.mxu0 }
 0x259   :  { %v549_v48 = vmax.f32 %v534_v44, 0.0  ;;  %v554_v52 = vpack.c.bf16 %v548_v45, %v546_v49  ;;  %v538_v58 = vadd.f32 %v537_v46, %v326_v37 }
 0x25a   :  { %v539_v50 = vpop.f32.mrf.mxu0 }
 0x25b   :  { %v555_v51 = vpack.c.bf16 %v549_v48, %v547_v47  ;;  %v540_v54 = vadd.f32 %v539_v50, %v330_v36  ;;  %v550_v0 = vmax.f32 %v538_v58, 0.0 }
 0x25c   :  { %v541_v53 = vpop.f32.mrf.mxu0 }
 0x25d   :  { %v542_v57 = vadd.f32 %v541_v53, %v326_v37  ;;  %794 = vmatprep.mubr.bf16.mxu1 %v555_v51  ;;  %v551_v62 = vmax.f32 %v540_v54, 0.0 }
 0x25e   :  { %v543_v59 = vpop.f32.mrf.mxu0  ;;  %795 = vmatmul.mubr.bf16.vlgmr.msra.gmra.mxu1 %v554_v52 }
 0x25f   :  { %v544_v60 = vadd.f32 %v543_v59, %v330_v36  ;;  %v552_v61 = vmax.f32 %v542_v57, 0.0 }
 0x261   :  { %v553_v63 = vmax.f32 %v544_v60, 0.0  ;;  %v556_v8 = vpack.c.bf16 %v552_v61, %v550_v0 }
 0x263   :  { %v557_v5 = vpack.c.bf16 %v553_v63, %v551_v62 }
 0x265   :  { %804 = vmatprep.mubr.bf16.mxu1 %v557_v5 }
 0x266   :  { %805 = vmatmul.mubr.bf16.gmra.mxu1 %v556_v8 }
 0x267   :  { %2231 = vmatprep.mubr.msk.bf16.mxu1 %vm160_vm0, %v2337_v9 }
 0x31e   :  { %v796_v13 = vpop.f32.mrf.mxu1 }
 0x31f   :  { %v797_v15 = vadd.f32 %v796_v13, %v595_v12 }
 0x320   :  { %v798_v14 = vpop.f32.mrf.mxu1 }
 0x321   :  { %v2020_v20 = vadd.f32 -0.01, %v797_v15  ;;  %v831_v21 = vadd.f32 0.01, %v797_v15  ;;  %v799_v24 = vadd.f32 %v798_v14, %v599_v17 }
 0x322   :  { %v800_v16 = vpop.f32.mrf.mxu1 }
 0x323   :  { %v801_v18 = vadd.f32 %v800_v16, %v595_v12  ;;  %v823_v29 = vmax.f32 %v2020_v20, 0.0  ;;  %v839_v35 = vmin.f32 %v831_v21, 0.0  ;;  %v2021_v40 = vadd.f32 -0.01, %v799_v24  ;;  %v2339_v21 = vld [vmem:[%s3247_s3 + $0x8] sm:$0xff]  }
 0x324   :  { %v802_v19 = vpop.f32.mrf.mxu1  ;;  %v832_v41 = vadd.f32 0.01, %v799_v24 }
 0x325   :  { %v803_v22 = vadd.f32 %v802_v19, %v599_v17  ;;  %v2022_v25 = vadd.f32 -0.01, %v801_v18  ;;  %v833_v27 = vadd.f32 0.01, %v801_v18  ;;  %v824_v63 = vmax.f32 %v2021_v40, 0.0 }
 0x326   :  { %v806_v23 = vpop.f32.mrf.mxu1  ;;  %v840_v0 = vmin.f32 %v832_v41, 0.0 }
 0x327   :  { %v807_v26 = vadd.f32 %v806_v23, %v595_v12  ;;  %v2023_v36 = vadd.f32 -0.01, %v803_v22  ;;  %v834_v37 = vadd.f32 0.01, %v803_v22  ;;  %v825_v42 = vmax.f32 %v2022_v25, 0.0  ;;  %v2338_v22 = vld [vmem:[%s3248_s4 + $0x8] sm:$0xff]  }
 0x328   :  { %v808_v28 = vpop.f32.mrf.mxu1  ;;  %v841_v44 = vmin.f32 %v833_v27, 0.0 }
 0x329   :  { %v2024_v30 = vadd.f32 -0.01, %v807_v26  ;;  %v835_v34 = vadd.f32 0.01, %v807_v26  ;;  %v809_v38 = vadd.f32 %v808_v28, %v599_v17  ;;  %v826_v53 = vmax.f32 %v2023_v36, 0.0 }
 0x32a   :  { %v810_v39 = vpop.f32.mrf.mxu1  ;;  %v842_v54 = vmin.f32 %v834_v37, 0.0  ;;  %v849_v5 = vadd.f32 %v841_v44, %v825_v42  ;;  %v2340_v44 = vld [vmem:[%s3250_s13 + $0xe0] ss:$16 sps:$4 sm:$0xff]  }
 0x32b   :  { %v811_v43 = vadd.f32 %v810_v39, %v595_v12  ;;  %v827_v45 = vmax.f32 %v2024_v30, 0.0  ;;  %v2025_v46 = vadd.f32 -0.01, %v809_v38  ;;  %v836_v47 = vadd.f32 0.01, %v809_v38 }
 0x32c   :  { %v812_v48 = vpop.f32.mrf.mxu1  ;;  %v843_v49 = vmin.f32 %v835_v34, 0.0  ;;  %v847_v12 = vadd.f32 %v839_v35, %v823_v29  ;;  %v850_v13 = vadd.f32 %v842_v54, %v826_v53  ;;  %v2355_v53 = vld [vmem:[%s3250_s13 + $0xa8] ss:$16 sps:$4 sm:$0xff]   ;;  %v2360_v54 = vld [vmem:[%s3250_s13 + $0x84] ss:$16 sps:$4 sm:$0xff]  }
 0x32d   :  { %v2026_v50 = vadd.f32 -0.01, %v811_v43  ;;  %v837_v51 = vadd.f32 0.01, %v811_v43  ;;  %v813_v52 = vadd.f32 %v812_v48, %v599_v17  ;;  %v828_v57 = vmax.f32 %v2025_v46, 0.0 }
 0x32e   :  { %v844_v58 = vmin.f32 %v836_v47, 0.0  ;;  %v851_v8 = vadd.f32 %v843_v49, %v827_v45  ;;  %v848_v17 = vadd.f32 %v840_v0, %v824_v63  ;;  %v855_v19 = vpack.c.bf16 %v849_v5, %v847_v12  ;;  %v2345_v45 = vld [vmem:[%s3250_s13 + $0xec] ss:$16 sps:$4 sm:$0xff]   ;;  %v2348_v46 = vld [vmem:[%s3250_s13 + $0xc4] ss:$16 sps:$4 sm:$0xff]  }
 0x32f   :  { %v829_v59 = vmax.f32 %v2026_v50, 0.0  ;;  %v845_v60 = vmin.f32 %v837_v51, 0.0  ;;  %v2027_v61 = vadd.f32 -0.01, %v813_v52  ;;  %v838_v62 = vadd.f32 0.01, %v813_v52 }
 0x330   :  { %v852_v14 = vadd.f32 %v844_v58, %v828_v57  ;;  %v856_v20 = vpack.c.bf16 %v850_v13, %v848_v17  ;;  %v2351_v47 = vld [vmem:[%s3250_s13 + $0xcc] ss:$16 sps:$4 sm:$0xff]   ;;  %v2346_v48 = vld [vmem:[%s3250_s13 + $0xc0] ss:$16 sps:$4 sm:$0xff]   ;;  %v2349_v49 = vld [vmem:[%s3250_s13 + $0xc8] ss:$16 sps:$4 sm:$0xff]  }
 0x331   :  { %v853_v9 = vadd.f32 %v845_v60, %v829_v59  ;;  %v830_v10 = vmax.f32 %v2027_v61, 0.0  ;;  %v846_v11 = vmin.f32 %v838_v62, 0.0  ;;  %v2354_v50 = vld [vmem:[%s3250_s13 + $0xa4] ss:$16 sps:$4 sm:$0xff]   ;;  %v2357_v51 = vld [vmem:[%s3250_s13 + $0xac] ss:$16 sps:$4 sm:$0xff]  }
 0x332   :  { %v2352_v52 = vld [vmem:[%s3250_s13 + $0xa0] ss:$16 sps:$4 sm:$0xff]   ;;  %v2363_v57 = vld [vmem:[%s3250_s13 + $0x8c] ss:$16 sps:$4 sm:$0xff]   ;;  %v2361_v59 = vld [vmem:[%s3250_s13 + $0x88] ss:$16 sps:$4 sm:$0xff]  }
 0x333   :  { %v854_v15 = vadd.f32 %v846_v11, %v830_v10  ;;  %v857_v16 = vpack.c.bf16 %v853_v9, %v851_v8  ;;  %v2358_v58 = vld [vmem:[%s3250_s13 + $0x80] ss:$16 sps:$4 sm:$0xff]   ;;  %v2366_v60 = vld [vmem:[%s3250_s13 + $0x64] ss:$16 sps:$4 sm:$0xff]   ;;  %v2369_v61 = vld [vmem:[%s3250_s13 + $0x6c] ss:$16 sps:$4 sm:$0xff]  }
 0x334   :  { %v2364_v62 = vld [vmem:[%s3250_s13 + $0x60] ss:$16 sps:$4 sm:$0xff]   ;;  %v2367_v63 = vld [vmem:[%s3250_s13 + $0x68] ss:$16 sps:$4 sm:$0xff]   ;;  %v2372_v5 = vld [vmem:[%s3250_s13 + $0x44] ss:$16 sps:$4 sm:$0xff]  }
 0x335   :  { %2227 = vmatprep.subr.bf16.mxu1 %v857_v16  ;;  %v858_v18 = vpack.c.bf16 %v854_v15, %v852_v14  ;;  %v2370_v0 = vld [vmem:[%s3250_s13 + $0x40] ss:$16 sps:$4 sm:$0xff]   ;;  %v2375_v8 = vld [vmem:[%s3250_s13 + $0x4c] ss:$16 sps:$4 sm:$0xff]   ;;  %v2378_v9 = vld [vmem:[%s3250_s13 + $0x24] ss:$16 sps:$4 sm:$0xff]  }
 0x336   :  { %2228 = vmatpush3.bf16.msra.mxu1 %v857_v16  ;;  %v2373_v10 = vld [vmem:[%s3250_s13 + $0x48] ss:$16 sps:$4 sm:$0xff]   ;;  %v2381_v11 = vld [vmem:[%s3250_s13 + $0x2c] ss:$16 sps:$4 sm:$0xff]   ;;  %v2376_v12 = vld [vmem:[%s3250_s13 + $0x20] ss:$16 sps:$4 sm:$0xff]  }
 0x337   :  { %2219 = vmatprep.subr.bf16.mxu0 %v858_v18  ;;  %2229 = vmatprep.subr.bf16.mxu1 %v855_v19  ;;  %v2384_v13 = vld [vmem:[%s3250_s13 + $0x4] ss:$16 sps:$4 sm:$0xff]   ;;  %v2468_v14 = vmov 0   ;;  %v2379_v15 = vld [vmem:[%s3250_s13 + $0x28] ss:$16 sps:$4 sm:$0xff]  }
 0x338   :  { %2220 = vmatpush3.bf16.msra.mxu0 %v858_v18  ;;  %v2387_v16 = vld [vmem:[%s3250_s13 + $0xc] ss:$16 sps:$4 sm:$0xff]   ;;  %v2382_v17 = vld [vmem:[%s3250_s13] ss:$16 sps:$4 sm:$0xff]   ;;  %v2385_v18 = vld [vmem:[%s3250_s13 + $0x8] ss:$16 sps:$4 sm:$0xff]  }
 0x339   :  { %2221 = vmatprep.subr.bf16.mxu0 %v856_v20 }
 0x33a   :  { %2230 = vmatpush3.bf16.msra.mxu1 %v855_v19 }
 0x33b   :  { %1352 = vmatprep.subr.bf16.mxu1 %v2345_v45 }
 0x33c   :  { %2222 = vmatpush3.bf16.msra.mxu0 %v856_v20 }
 0x33d   :  { %2232 = vmatmul.mubr.msk.bf16.vlgmr.msra.gmra.mxu1 %vm160_vm0, %v2339_v21 }
 0x33e   :  { %1384 = vmatprep.mubr.bf16.mxu1 %v2468_v14 }
 0x33f   :  { %2224 = vmatmul.mubr.msk.bf16.vlgmr.msra.gmra.mxu0 %vm160_vm0, %v2338_v22 }
 0x340   :  { %1331 = vmatprep.mubr.bf16.mxu0 %v2468_v14 }
 0x3fd   :  { %v2233_v23 = vpop.f32.mrf.mxu1 }
 0x3ff   :  { %v2225_v24 = vpop.f32.mrf.mxu0  ;;  %v982_v25 = vpop.f32.mrf.mxu1 }
 0x400   :  { %v991_v36 = vadd.f32 %v2233_v23, %v2225_v24 }
 0x401   :  { %v917_v26 = vpop.f32.mrf.mxu0  ;;  %v2234_v27 = vpop.f32.mrf.mxu1 }
 0x402   :  { %v983_v28 = vadd.f32 %v982_v25, %v917_v26  ;;  %v999_v40 = vadd.f32 %v991_v36, %v2602_v55 }
 0x403   :  { %v2226_v29 = vpop.f32.mrf.mxu0  ;;  %v985_v35 = vpop.f32.mrf.mxu1 }
 0x404   :  { %v997_v30 = vadd.f32 %v983_v28, %v2609_v3  ;;  %v994_v41 = vadd.f32 %v2234_v27, %v2226_v29 }
 0x405   :  { %v920_v34 = vpop.f32.mrf.mxu0 }
 0x406   :  { %v2851_v37 = vadd.f32 %v2575_v6, %v997_v30  ;;  %v986_v38 = vadd.f32 %v985_v35, %v920_v34  ;;  %v2863_v6 = vadd.f32 %v2562_v1, %v999_v40  ;;  %v1000_v43 = vadd.f32 %v994_v41, %v2604_v56  ;;  %v2342_v56 = vld [vmem:[%s3250_s13 + $0xe4] ss:$16 sps:$4 sm:$0xff]  }
 0x407   :  { %1299 = vmatprep.subr.bf16.mxu0 %v2342_v56 }
 0x408   :  { %v998_v39 = vadd.f32 %v986_v38, %v2611_v4  ;;  %1007 = vadd.xlane.f32.xlu0 %v2851_v37  ;;  %v1019_v3 = vmul.f32 %v2851_v37, %v2851_v37  ;;  %v1021_v55 = vmul.f32 %v2863_v6, %v2863_v6  ;;  %1300 = vmatpush1.bf16.msra.mxu0 %v2340_v44 }
 0x409   :  { %1301 = vmatprep.subr.bf16.mxu0 %v2348_v46 }
 0x40a   :  { %v2857_v42 = vadd.f32 %v2577_v7, %v998_v39  ;;  %v2870_v7 = vadd.f32 %v2564_v2, %v1000_v43  ;;  %v2343_v2 = vld [vmem:[%s3250_s13 + $0xe8] ss:$16 sps:$4 sm:$0xff]  }
 0x40b   :  { %1353 = vmatpush1.bf16.msra.mxu1 %v2343_v2 }
 0x40c   :  { %1009 = vadd.xlane.f32.xlu1 %v2857_v42  ;;  %1023 = vadd.xlane.f32.xlu0 %v1019_v3  ;;  %v1020_v4 = vmul.f32 %v2857_v42, %v2857_v42  ;;  %v1022_v1 = vmul.f32 %v2870_v7, %v2870_v7 }
 0x40d   :  { %1354 = vmatprep.subr.bf16.mxu1 %v2351_v47  ;;  %1302 = vmatpush1.bf16.msra.mxu0 %v2346_v48 }
 0x40e   :  { %1303 = vmatprep.subr.bf16.mxu0 %v2354_v50 }
 0x40f   :  { %1355 = vmatpush1.bf16.msra.mxu1 %v2349_v49 }
 0x410   :  { %1025 = vadd.xlane.f32.xlu1 %v1020_v4  ;;  %1011 = vadd.xlane.f32.xlu0 %v2863_v6 }
 0x411   :  { %1356 = vmatprep.subr.bf16.mxu1 %v2357_v51  ;;  %1304 = vmatpush1.bf16.msra.mxu0 %v2352_v52 }
 0x412   :  { %1305 = vmatprep.subr.bf16.mxu0 %v2360_v54 }
 0x413   :  { %1357 = vmatpush1.bf16.msra.mxu1 %v2355_v53  ;;  %v2036_v53 = vld [vmem:[%s3251_s11] ss:$0 sm:$0xff] }
 0x414   :  { %1013 = vadd.xlane.f32.xlu1 %v2870_v7  ;;  %1027 = vadd.xlane.f32.xlu0 %v1021_v55 }
 0x415   :  { %1358 = vmatprep.subr.bf16.mxu1 %v2363_v57  ;;  %1306 = vmatpush1.bf16.msra.mxu0 %v2358_v58 }
 0x416   :  { %1307 = vmatprep.subr.bf16.mxu0 %v2366_v60  ;;  %v2037_v60 = vld [vmem:[%s3252_s12] ss:$0 sm:$0xff] }
 0x417   :  { %1359 = vmatpush1.bf16.msra.mxu1 %v2361_v59 }
 0x418   :  { %1029 = vadd.xlane.f32.xlu1 %v1022_v1  ;;  %1360 = vmatprep.subr.bf16.mxu1 %v2369_v61 }
 0x419   :  { %1308 = vmatpush1.bf16.msra.mxu0 %v2364_v62 }
 0x41a   :  { %1309 = vmatprep.subr.bf16.mxu0 %v2372_v5 }
 0x41b   :  { %1361 = vmatpush1.bf16.msra.mxu1 %v2367_v63 }
 0x41c   :  { %1362 = vmatprep.subr.bf16.mxu1 %v2375_v8 }
 0x41d   :  { %1310 = vmatpush1.bf16.msra.mxu0 %v2370_v0 }
 0x41e   :  { %1311 = vmatprep.subr.bf16.mxu0 %v2378_v9 }
 0x41f   :  { %1363 = vmatpush1.bf16.msra.mxu1 %v2373_v10 }
 0x420   :  { %1364 = vmatprep.subr.bf16.mxu1 %v2381_v11 }
 0x421   :  { %1312 = vmatpush1.bf16.msra.mxu0 %v2376_v12 }
 0x422   :  { %1313 = vmatprep.subr.bf16.mxu0 %v2384_v13 }
 0x423   :  { %1365 = vmatpush1.bf16.msra.mxu1 %v2379_v15 }
 0x424   :  { %1366 = vmatprep.subr.bf16.mxu1 %v2387_v16 }
 0x425   :  { %1314 = vmatpush1.bf16.msra.mxu0 %v2382_v17 }
 0x427   :  { %1367 = vmatpush1.bf16.msra.mxu1 %v2385_v18 }
 0x491   :  { %v1008_v19 = vpop.xlane.xlu0 %1007 }
 0x492   :  { %v1015_v20 = vmul.f32 0.0078125, %v1008_v19  ;;  %v2388_v19 = vld [vmem:[%s3253_s15 + $0x78] sm:$0xff]  }
 0x493   :  { %2147 = vmatprep.subr.bf16.mxu0 %v2388_v19 }
 0x494   :  { %v1035_v23 = vmul.f32 %v1015_v20, %v1015_v20  ;;  %v1047_v50 = vsub.f32 %v2851_v37, %v1015_v20  ;;  %v2389_v20 = vld [vmem:[%s3253_s15 + $0xf8] sm:$0xff]  }
 0x495   :  { %v1010_v21 = vpop.xlane.xlu1 %1009  ;;  %v1024_v22 = vpop.xlane.xlu0 %1023  ;;  %2175 = vmatprep.subr.bf16.mxu1 %v2389_v20 }
 0x496   :  { %v1016_v24 = vmul.f32 0.0078125, %v1010_v21  ;;  %v1031_v25 = vmul.f32 0.0078125, %v1024_v22  ;;  %v2390_v21 = vld [vmem:[%s3253_s15 + $0x38] sm:$0xff]   ;;  %v2392_v22 = vld [vmem:[%s3253_s15 + $0x70] sm:$0xff]  }
 0x498   :  { %v1039_v26 = vsub.f32 %v1031_v25, %v1035_v23  ;;  %v1036_v29 = vmul.f32 %v1016_v24, %v1016_v24  ;;  %v1048_v54 = vsub.f32 %v2857_v42, %v1016_v24  ;;  %v2393_v23 = vld [vmem:[%s3253_s15 + $0xf0] sm:$0xff]  }
 0x499   :  { %v1026_v27 = vpop.xlane.xlu1 %1025  ;;  %v1012_v28 = vpop.xlane.xlu0 %1011  ;;  %v2394_v24 = vld [vmem:[%s3253_s15 + $0x30] sm:$0xff]  }
 0x49a   :  { %v1043_v30 = vmax.f32 %v1039_v26, 0.0  ;;  %v1032_v34 = vmul.f32 0.0078125, %v1026_v27  ;;  %v1017_v35 = vmul.f32 0.0078125, %v1012_v28  ;;  %v2395_v25 = vld [vmem:[%s3253_s15 + $0xb0] sm:$0xff]   ;;  %v2396_v26 = vld [vmem:[%s3253_s15 + $0x68] sm:$0xff]  }
 0x49b   :  { %v2397_v27 = vld [vmem:[%s3253_s15 + $0xe8] sm:$0xff]  }
 0x49c   :  { %v1051_v36 = vadd.f32 1e-05, %v1043_v30  ;;  %v1040_v38 = vsub.f32 %v1032_v34, %v1036_v29  ;;  %v1037_v39 = vmul.f32 %v1017_v35, %v1017_v35  ;;  %v1049_v61 = vsub.f32 %v2863_v6, %v1017_v35  ;;  %v2398_v28 = vld [vmem:[%s3253_s15 + $0x28] sm:$0xff]   ;;  %v2400_v30 = vld [vmem:[%s3253_s15 + $0x60] sm:$0xff]  }
 0x49d   :  { %v1014_v40 = vpop.xlane.xlu1 %1013  ;;  %v1028_v41 = vpop.xlane.xlu0 %1027  ;;  %v2399_v29 = vld [vmem:[%s3253_s15 + $0xa8] sm:$0xff]   ;;  %v2401_v34 = vld [vmem:[%s3253_s15 + $0xe0] sm:$0xff]  }
 0x49e   :  { %2428 = vrsqrt.f32 %v1051_v36  ;;  %v1044_v3 = vmax.f32 %v1040_v38, 0.0  ;;  %v1018_v43 = vmul.f32 0.0078125, %v1014_v40  ;;  %v1033_v4 = vmul.f32 0.0078125, %v1028_v41  ;;  %v2402_v35 = vld [vmem:[%s3253_s15 + $0x20] sm:$0xff]   ;;  %v2404_v38 = vld [vmem:[%s3253_s15 + $0x58] sm:$0xff]  }
 0x49f   :  { %v2403_v36 = vld [vmem:[%s3253_s15 + $0xa0] sm:$0xff]   ;;  %v2406_v40 = vld [vmem:[%s3253_s15 + $0x18] sm:$0xff]  }
 0x4a0   :  { %v1052_v55 = vadd.f32 1e-05, %v1044_v3  ;;  %v1041_v1 = vsub.f32 %v1033_v4, %v1037_v39  ;;  %v1038_v44 = vmul.f32 %v1018_v43, %v1018_v43  ;;  %v1050_v9 = vsub.f32 %v2870_v7, %v1018_v43  ;;  %v2405_v39 = vld [vmem:[%s3253_s15 + $0xd8] sm:$0xff]   ;;  %v2408_v3 = vld [vmem:[%s3253_s15 + $0x50] sm:$0xff]  }
 0x4a1   :  { %v1030_v56 = vpop.xlane.xlu1 %1029  ;;  %v2407_v41 = vld [vmem:[%s3253_s15 + $0x98] sm:$0xff]   ;;  %v2409_v43 = vld [vmem:[%s3253_s15 + $0xd0] sm:$0xff]  }
 0x4a2   :  { %2430 = vrsqrt.f32 %v1052_v55  ;;  %v1045_v2 = vmax.f32 %v1041_v1, 0.0  ;;  %v1034_v45 = vmul.f32 0.0078125, %v1030_v56  ;;  %v2410_v4 = vld [vmem:[%s3253_s15 + $0x10] sm:$0xff]   ;;  %v2412_v1 = vld [vmem:[%s3253_s15 + $0x48] sm:$0xff]  }
 0x4a3   :  { %v2411_v55 = vld [vmem:[%s3253_s15 + $0x90] sm:$0xff]   ;;  %v2413_v56 = vld [vmem:[%s3253_s15 + $0xc8] sm:$0xff]  }
 0x4a4   :  { %v1053_v46 = vadd.f32 1e-05, %v1045_v2  ;;  %v1042_v47 = vsub.f32 %v1034_v45, %v1038_v44  ;;  %v2414_v44 = vld [vmem:[%s3253_s15 + $0x8] sm:$0xff]   ;;  %v2416_v45 = vld [vmem:[%s3253_s15 + $0x40] sm:$0xff]  }
 0x4a5   :  { %v2415_v2 = vld [vmem:[%s3253_s15 + $0x88] sm:$0xff]  }
 0x4a6   :  { %2432 = vrsqrt.f32 %v1053_v46  ;;  %v1046_v48 = vmax.f32 %v1042_v47, 0.0  ;;  %v2417_v46 = vld [vmem:[%s3253_s15 + $0xc0] sm:$0xff]  }
 0x4a7   :  { %v2418_v47 = vld [vmem:[%s3253_s15] sm:$0xff]  }
 0x4a8   :  { %v1054_v49 = vadd.f32 1e-05, %v1046_v48  ;;  %v2419_v48 = vld [vmem:[%s3253_s15 + $0x80] sm:$0xff]  }
 0x4aa   :  { %2434 = vrsqrt.f32 %v1054_v49  ;;  %v1129_v49 = vsub.s32 2, %v2815_v31 }
 0x4ab   :  { %v2429_v51 = vpop.eup %2428 }
 0x4ac   :  { %v1059_v52 = vmul.f32 %v2429_v51, %v1047_v50  ;;  %v1117_v50 = vld [vmem:[%s3254_s14] sm:$0xf]  ;;  %v1133_v51 = vsub.s32 3, %v2815_v31 }
 0x4ae   :  { %v1069_v59 = vmul.f32 %v2036_v53, %v1059_v52  ;;  %v3089_v52 = vrot.slane %v1117_v50, %v2821_v33 }
 0x4af   :  { %v2431_v57 = vpop.eup %2430 }
 0x4b0   :  { %v1060_v58 = vmul.f32 %v2431_v57, %v1048_v54  ;;  %v1079_v0 = vadd.f32 %v2037_v60, %v1069_v59  ;;  %v3096_v59 = vrot.slane %v1117_v50, %v1133_v51 }
 0x4b2   :  { %v1070_v62 = vmul.f32 %v2036_v53, %v1060_v58  ;;  %v3094_v58 = vrot.slane %v1117_v50, %v2818_v32 }
 0x4b3   :  { %v2433_v63 = vpop.eup %2432 }
 0x4b4   :  { %v1080_v5 = vadd.f32 %v2037_v60, %v1070_v62  ;;  %v1061_v8 = vmul.f32 %v2433_v63, %v1049_v61 }
 0x4b6   :  { %v1083_v10 = vpack.c.bf16 %v1080_v5, %v1079_v0  ;;  %v1071_v13 = vmul.f32 %v2036_v53, %v1061_v8 }
 0x4b7   :  { %v2435_v11 = vpop.eup %2434 }
 0x4b8   :  { %1332 = vmatmul.mubr.bf16.vlgmr.msra.gmra.mxu0 %v1083_v10  ;;  %1385 = vmatmul.mubr.bf16.vlgmr.msra.gmra.mxu1 %v1083_v10  ;;  %v1062_v12 = vmul.f32 %v2435_v11, %v1050_v9  ;;  %v1081_v16 = vadd.f32 %v2037_v60, %v1071_v13 }
 0x4b9   :  { %1341 = vmatprep.mubr.bf16.mxu0 %v2468_v14  ;;  %1394 = vmatprep.mubr.bf16.mxu1 %v2468_v14  ;;  %v2391_v14 = vld [vmem:[%s3253_s15 + $0xb8] sm:$0xff]  }
 0x4ba   :  { %v1072_v15 = vmul.f32 %v2036_v53, %v1062_v12  ;;  %2148 = vmatpush3.bf16.msra.mxu0 %v2390_v21  ;;  %2176 = vmatpush3.bf16.msra.mxu1 %v2391_v14  ;;  %v3091_v53 = vrot.slane %v1117_v50, %v1129_v49 }
 0x4bb   :  { %2149 = vmatprep.subr.bf16.mxu0 %v2392_v22  ;;  %2177 = vmatprep.subr.bf16.mxu1 %v2393_v23 }
 0x4bc   :  { %v1082_v17 = vadd.f32 %v2037_v60, %v1072_v15 }
 0x4be   :  { %v1084_v18 = vpack.c.bf16 %v1082_v17, %v1081_v16  ;;  %2150 = vmatpush3.bf16.msra.mxu0 %v2394_v24  ;;  %2178 = vmatpush3.bf16.msra.mxu1 %v2395_v25 }
 0x4bf   :  { %2151 = vmatprep.subr.bf16.mxu0 %v2396_v26  ;;  %2179 = vmatprep.subr.bf16.mxu1 %v2397_v27 }
 0x4c0   :  { %1342 = vmatmul.mubr.bf16.gmra.mxu0 %v1084_v18  ;;  %1395 = vmatmul.mubr.bf16.gmra.mxu1 %v1084_v18 }
 0x4c2   :  { %2152 = vmatpush3.bf16.msra.mxu0 %v2398_v28  ;;  %2180 = vmatpush3.bf16.msra.mxu1 %v2399_v29 }
 0x4c3   :  { %2153 = vmatprep.subr.bf16.mxu0 %v2400_v30  ;;  %2181 = vmatprep.subr.bf16.mxu1 %v2401_v34 }
 0x4c6   :  { %2154 = vmatpush3.bf16.msra.mxu0 %v2402_v35  ;;  %2182 = vmatpush3.bf16.msra.mxu1 %v2403_v36 }
 0x4c7   :  { %2155 = vmatprep.subr.bf16.mxu0 %v2404_v38  ;;  %2183 = vmatprep.subr.bf16.mxu1 %v2405_v39 }
 0x4ca   :  { %2156 = vmatpush3.bf16.msra.mxu0 %v2406_v40  ;;  %2184 = vmatpush3.bf16.msra.mxu1 %v2407_v41 }
 0x4cb   :  { %2157 = vmatprep.subr.bf16.mxu0 %v2408_v3  ;;  %2185 = vmatprep.subr.bf16.mxu1 %v2409_v43 }
 0x4ce   :  { %2158 = vmatpush3.bf16.msra.mxu0 %v2410_v4  ;;  %2186 = vmatpush3.bf16.msra.mxu1 %v2411_v55 }
 0x4cf   :  { %2159 = vmatprep.subr.bf16.mxu0 %v2412_v1  ;;  %2187 = vmatprep.subr.bf16.mxu1 %v2413_v56 }
 0x4d2   :  { %2160 = vmatpush3.bf16.msra.mxu0 %v2414_v44  ;;  %2188 = vmatpush3.bf16.msra.mxu1 %v2415_v2 }
 0x4d3   :  { %2161 = vmatprep.subr.bf16.mxu0 %v2416_v45  ;;  %2189 = vmatprep.subr.bf16.mxu1 %v2417_v46 }
 0x4d6   :  { %2162 = vmatpush3.bf16.msra.mxu0 %v2418_v47  ;;  %2190 = vmatpush3.bf16.msra.mxu1 %v2419_v48 }
 0x578   :  { %v1333_v54 = vpop.f32.mrf.mxu0  ;;  %v1386_v57 = vpop.f32.mrf.mxu1 }
 0x579   :  { %v3099_v60 = vadd.f32 %v1333_v54, %v3089_v52  ;;  %v3102_v61 = vadd.f32 %v1386_v57, %v3091_v53 }
 0x57a   :  { %v1335_v62 = vpop.f32.mrf.mxu0  ;;  %v1388_v31 = vpop.f32.mrf.mxu1 }
 0x57b   :  { %v1421_v33 = vmul.f32 0.044715, %v3099_v60  ;;  %v1423_v63 = vmul.f32 0.044715, %v3102_v61  ;;  %v3107_v0 = vadd.f32 %v1335_v62, %v3094_v58  ;;  %v3110_v32 = vadd.f32 %v1388_v31, %v3096_v59 }
 0x57c   :  { %v1337_v5 = vpop.f32.mrf.mxu0  ;;  %v1390_v8 = vpop.f32.mrf.mxu1 }
 0x57d   :  { %v1437_v9 = vmul.f32 %v1421_v33, %v3099_v60  ;;  %v1439_v10 = vmul.f32 %v1423_v63, %v3102_v61  ;;  %v3115_v11 = vadd.f32 %v1337_v5, %v3089_v52  ;;  %v3118_v12 = vadd.f32 %v1390_v8, %v3091_v53 }
 0x57e   :  { %v1339_v13 = vpop.f32.mrf.mxu0  ;;  %v1392_v15 = vpop.f32.mrf.mxu1  ;;  %v1422_v18 = vmul.f32 0.044715, %v3107_v0  ;;  %v1424_v20 = vmul.f32 0.044715, %v3110_v32 }
 0x57f   :  { %v1453_v16 = vmul.f32 %v1437_v9, %v3099_v60  ;;  %v1455_v17 = vmul.f32 %v1439_v10, %v3102_v61  ;;  %v1425_v19 = vmul.f32 0.044715, %v3115_v11  ;;  %v1427_v21 = vmul.f32 0.044715, %v3118_v12 }
 0x580   :  { %v1343_v14 = vpop.f32.mrf.mxu0  ;;  %v1396_v22 = vpop.f32.mrf.mxu1  ;;  %v3129_v25 = vadd.f32 %v1339_v13, %v3094_v58  ;;  %v3133_v27 = vadd.f32 %v1392_v15, %v3096_v59  ;;  %v1438_v34 = vmul.f32 %v1422_v18, %v3107_v0  ;;  %v1440_v38 = vmul.f32 %v1424_v20, %v3110_v32 }
 0x581   :  { %v1469_v23 = vadd.f32 %v1453_v16, %v3099_v60  ;;  %v1441_v24 = vmul.f32 %v1425_v19, %v3115_v11  ;;  %v1443_v26 = vmul.f32 %v1427_v21, %v3118_v12  ;;  %v1471_v30 = vadd.f32 %v1455_v17, %v3102_v61 }
 0x582   :  { %v1345_v28 = vpop.f32.mrf.mxu0  ;;  %v1398_v29 = vpop.f32.mrf.mxu1  ;;  %v1426_v36 = vmul.f32 0.044715, %v3129_v25  ;;  %v1428_v40 = vmul.f32 0.044715, %v3133_v27  ;;  %v3143_v41 = vadd.f32 %v1343_v14, %v3089_v52  ;;  %v1454_v45 = vmul.f32 %v1438_v34, %v3107_v0 }
 0x583   :  { %v1457_v35 = vmul.f32 %v1441_v24, %v3115_v11  ;;  %v1459_v39 = vmul.f32 %v1443_v26, %v3118_v12  ;;  %v1485_v43 = vmul.f32 0.7978846, %v1469_v23  ;;  %v3148_v1 = vadd.f32 %v1345_v28, %v3094_v58 }
 0x584   :  { %v1347_v3 = vpop.f32.mrf.mxu0  ;;  %v1442_v55 = vmul.f32 %v1426_v36, %v3129_v25  ;;  %v1400_v56 = vpop.f32.mrf.mxu1  ;;  %v1487_v2 = vmul.f32 0.7978846, %v1471_v30  ;;  %v3153_v46 = vadd.f32 %v1396_v22, %v3091_v53  ;;  %v1456_v48 = vmul.f32 %v1440_v38, %v3110_v32 }
 0x585   :  { %v1473_v4 = vadd.f32 %v1457_v35, %v3115_v11  ;;  %v1475_v44 = vadd.f32 %v1459_v39, %v3118_v12  ;;  %v1430_v47 = vmul.f32 0.044715, %v3148_v1  ;;  %v1444_v49 = vmul.f32 %v1428_v40, %v3133_v27 }
 0x586   :  { %v1429_v50 = vmul.f32 0.044715, %v3143_v41  ;;  %v3160_v51 = vadd.f32 %v1398_v29, %v3096_v59  ;;  %v1349_v54 = vpop.f32.mrf.mxu0  ;;  %2436 = vtanh.f32 %v1485_v43  ;;  %v1458_v62 = vmul.f32 %v1442_v55, %v3129_v25  ;;  %v1402_v33 = vpop.f32.mrf.mxu1 }
 0x587   :  { %v1489_v57 = vmul.f32 0.7978846, %v1473_v4  ;;  %v3164_v31 = vadd.f32 %v1347_v3, %v3089_v52  ;;  %v1491_v63 = vmul.f32 0.7978846, %v1475_v44  ;;  %v1446_v5 = vmul.f32 %v1430_v47, %v3148_v1 }
 0x588   :  { %v1432_v8 = vmul.f32 0.044715, %v3160_v51  ;;  %v3169_v9 = vadd.f32 %v1400_v56, %v3091_v53  ;;  %2438 = vtanh.f32 %v1487_v2  ;;  %v1431_v10 = vmul.f32 0.044715, %v3153_v46 }
 0x589   :  { %v1433_v13 = vmul.f32 0.044715, %v3164_v31  ;;  %v3174_v15 = vadd.f32 %v1349_v54, %v3094_v58  ;;  %v1460_v52 = vmul.f32 %v1444_v49, %v3133_v27  ;;  %v1445_v16 = vmul.f32 %v1429_v50, %v3143_v41 }
 0x58a   :  { %v1448_v17 = vmul.f32 %v1432_v8, %v3160_v51  ;;  %v3180_v18 = vadd.f32 %v1402_v33, %v3096_v59  ;;  %2440 = vtanh.f32 %v1489_v57  ;;  %v1470_v19 = vadd.f32 %v1454_v45, %v3107_v0 }
 0x58b   :  { %v1434_v53 = vmul.f32 0.044715, %v3174_v15  ;;  %v1474_v20 = vadd.f32 %v1458_v62, %v3129_v25  ;;  %2442 = vtanh.f32 %v1491_v63  ;;  %v1462_v58 = vmul.f32 %v1446_v5, %v3148_v1 }
 0x58c   :  { %v1435_v21 = vmul.f32 0.044715, %v3169_v9  ;;  %v1436_v14 = vmul.f32 0.044715, %v3180_v18  ;;  %v1449_v22 = vmul.f32 %v1433_v13, %v3164_v31  ;;  %v1486_v59 = vmul.f32 0.7978846, %v1470_v19 }
 0x58d   :  { %v1450_v23 = vmul.f32 %v1434_v53, %v3174_v15  ;;  %v1490_v24 = vmul.f32 0.7978846, %v1474_v20  ;;  %v1464_v26 = vmul.f32 %v1448_v17, %v3160_v51  ;;  %v1472_v29 = vadd.f32 %v1456_v48, %v3110_v32 }
 0x58e   :  { %v1452_v28 = vmul.f32 %v1436_v14, %v3180_v18  ;;  %v1476_v30 = vadd.f32 %v1460_v52, %v3133_v27  ;;  %v1447_v34 = vmul.f32 %v1431_v10, %v3153_v46  ;;  %2444 = vtanh.f32 %v1486_v59 }
 0x58f   :  { %v1466_v35 = vmul.f32 %v1450_v23, %v3174_v15  ;;  %2446 = vtanh.f32 %v1490_v24  ;;  %v1488_v38 = vmul.f32 0.7978846, %v1472_v29  ;;  %v1461_v40 = vmul.f32 %v1445_v16, %v3143_v41 }
 0x590   :  { %v1468_v36 = vmul.f32 %v1452_v28, %v3180_v18  ;;  %v1492_v39 = vmul.f32 0.7978846, %v1476_v30  ;;  %v1451_v3 = vmul.f32 %v1435_v21, %v3169_v9  ;;  %v1478_v43 = vadd.f32 %v1462_v58, %v3148_v1 }
 0x591   :  { %v1482_v4 = vadd.f32 %v1466_v35, %v3174_v15  ;;  %v1465_v55 = vmul.f32 %v1449_v22, %v3164_v31  ;;  %2448 = vtanh.f32 %v1488_v38  ;;  %v1480_v56 = vadd.f32 %v1464_v26, %v3160_v51 }
 0x592   :  { %2450 = vtanh.f32 %v1492_v39  ;;  %v1494_v44 = vmul.f32 0.7978846, %v1478_v43  ;;  %v1484_v47 = vadd.f32 %v1468_v36, %v3180_v18  ;;  %v1463_v49 = vmul.f32 %v1447_v34, %v3153_v46 }
 0x593   :  { %v1498_v2 = vmul.f32 0.7978846, %v1482_v4  ;;  %v2437_v45 = vpop.eup %2436  ;;  %v1496_v48 = vmul.f32 0.7978846, %v1480_v56  ;;  %v1467_v50 = vmul.f32 %v1451_v3, %v3169_v9  ;;  %v1477_v54 = vadd.f32 %v1461_v40, %v3143_v41 }
 0x594   :  { %2452 = vtanh.f32 %v1494_v44  ;;  %v1500_v62 = vmul.f32 0.7978846, %v1484_v47  ;;  %v1481_v33 = vadd.f32 %v1465_v55, %v3164_v31  ;;  %v1479_v13 = vadd.f32 %v1463_v49, %v3153_v46 }
 0x595   :  { %v2439_v57 = vpop.eup %2438  ;;  %2454 = vtanh.f32 %v1498_v2  ;;  %v1493_v63 = vmul.f32 0.7978846, %v1477_v54  ;;  %v1483_v52 = vadd.f32 %v1467_v50, %v3169_v9  ;;  %v1406_v20 = vmul.f32 0.5, %v3107_v0 }
 0x596   :  { %2456 = vtanh.f32 %v1496_v48  ;;  %v1497_v8 = vmul.f32 0.7978846, %v1481_v33  ;;  %v1495_v17 = vmul.f32 0.7978846, %v1479_v13  ;;  %v1409_v21 = vmul.f32 0.5, %v3115_v11 }
 0x597   :  { %v2441_v5 = vpop.eup %2440  ;;  %2458 = vtanh.f32 %v1500_v62  ;;  %v1499_v53 = vmul.f32 0.7978846, %v1483_v52  ;;  %v1517_v22 = vadd.f32 1.0, %v2437_v45  ;;  %v1410_v23 = vmul.f32 0.5, %v3129_v25 }
 0x598   :  { %v2443_v10 = vpop.eup %2442  ;;  %2460 = vtanh.f32 %v1493_v63  ;;  %v1521_v16 = vadd.f32 1.0, %v2441_v5  ;;  %v1405_v28 = vmul.f32 0.5, %v3099_v60  ;;  %v1411_v29 = vmul.f32 0.5, %v3118_v12 }
 0x599   :  { %2462 = vtanh.f32 %v1497_v8  ;;  %v1523_v24 = vadd.f32 1.0, %v2443_v10  ;;  %v1519_v38 = vadd.f32 1.0, %v2439_v57  ;;  %v1408_v11 = vmul.f32 0.5, %v3110_v32 }
 0x59a   :  { %2464 = vtanh.f32 %v1495_v17  ;;  %v1537_v30 = vmul.f32 %v1521_v16, %v1409_v21  ;;  %v1412_v39 = vmul.f32 0.5, %v3133_v27  ;;  %v1533_v25 = vmul.f32 %v1517_v22, %v1405_v28 }
 0x59b   :  { %v2445_v19 = vpop.eup %2444  ;;  %2466 = vtanh.f32 %v1499_v53  ;;  %v1407_v43 = vmul.f32 0.5, %v3102_v61  ;;  %v1539_v55 = vmul.f32 %v1523_v24, %v1411_v29  ;;  %v1414_v48 = vmul.f32 0.5, %v3148_v1 }
 0x59c   :  { %v2447_v58 = vpop.eup %2446  ;;  %v1518_v14 = vadd.f32 1.0, %v2445_v19  ;;  %v1549_v44 = vpack.c.bf16 %v1537_v30, %v1533_v25  ;;  %v1418_v32 = vmul.f32 0.5, %v3174_v15  ;;  %v1416_v61 = vmul.f32 0.5, %v3160_v51  ;;  %v2070_v30 = vld [vmem:[%s3255_s16] ss:$0 sm:$0xff] }
 0x59d   :  { %v1522_v59 = vadd.f32 1.0, %v2447_v58  ;;  %v1535_v47 = vmul.f32 %v1519_v38, %v1407_v43  ;;  %v1420_v54 = vmul.f32 0.5, %v3180_v18  ;;  %v1413_v1 = vmul.f32 0.5, %v3143_v41 }
 0x59e   :  { %v2449_v26 = vpop.eup %2448  ;;  %v1534_v35 = vmul.f32 %v1518_v14, %v1406_v20  ;;  %v1417_v15 = vmul.f32 0.5, %v3164_v31  ;;  %v1415_v22 = vmul.f32 0.5, %v3153_v46  ;;  %v1419_v41 = vmul.f32 0.5, %v3169_v9 }
 0x59f   :  { %v2451_v34 = vpop.eup %2450  ;;  %v1538_v0 = vmul.f32 %v1522_v59, %v1410_v23  ;;  %v1520_v36 = vadd.f32 1.0, %v2449_v26  ;;  %v1551_v33 = vpack.c.bf16 %v1539_v55, %v1535_v47 }
 0x5a0   :  { %v1524_v40 = vadd.f32 1.0, %v2451_v34 }
 0x5a1   :  { %v2453_v3 = vpop.eup %2452  ;;  %v1550_v4 = vpack.c.bf16 %v1538_v0, %v1534_v35  ;;  %v1536_v56 = vmul.f32 %v1520_v36, %v1408_v11 }
 0x5a2   :  { %v2455_v60 = vpop.eup %2454  ;;  %v1540_v12 = vmul.f32 %v1524_v40, %v1412_v39  ;;  %v1526_v2 = vadd.f32 1.0, %v2453_v3 }
 0x5a3   :  { %v2457_v45 = vpop.eup %2456  ;;  %1852 = vmatprep.mubr.bf16.mxu0 %v1550_v4  ;;  %v1530_v27 = vadd.f32 1.0, %v2455_v60 }
 0x5a4   :  { %v2459_v49 = vpop.eup %2458  ;;  %v1552_v50 = vpack.c.bf16 %v1540_v12, %v1536_v56  ;;  %1853 = vmatmul.mubr.bf16.vlgmr.msra.gmra.mxu0 %v1549_v44  ;;  %v1528_v57 = vadd.f32 1.0, %v2457_v45  ;;  %v1542_v63 = vmul.f32 %v1526_v2, %v1414_v48 }
 0x5a5   :  { %v2461_v62 = vpop.eup %2460  ;;  %v1546_v5 = vmul.f32 %v1530_v27, %v1418_v32  ;;  %v1532_v8 = vadd.f32 1.0, %v2459_v49 }
 0x5a6   :  { %v2463_v10 = vpop.eup %2462  ;;  %1901 = vmatprep.mubr.bf16.mxu1 %v1552_v50  ;;  %v1525_v13 = vadd.f32 1.0, %v2461_v62  ;;  %v1544_v16 = vmul.f32 %v1528_v57, %v1416_v61 }
 0x5a7   :  { %1902 = vmatmul.mubr.bf16.vlgmr.msra.gmra.mxu1 %v1551_v33  ;;  %v1554_v52 = vpack.c.bf16 %v1546_v5, %v1542_v63  ;;  %v1548_v17 = vmul.f32 %v1532_v8, %v1420_v54  ;;  %v1529_v51 = vadd.f32 1.0, %v2463_v10  ;;  %v2465_v53 = vpop.eup %2464 }
 0x5a8   :  { %v1541_v19 = vmul.f32 %v1525_v13, %v1413_v1  ;;  %v2467_v58 = vpop.eup %2466  ;;  %v1527_v21 = vadd.f32 1.0, %v2465_v53 }
 0x5a9   :  { %1860 = vmatprep.mubr.bf16.mxu0 %v1554_v52  ;;  %v1556_v18 = vpack.c.bf16 %v1548_v17, %v1544_v16  ;;  %v1545_v20 = vmul.f32 %v1529_v51, %v1417_v15  ;;  %v1531_v31 = vadd.f32 1.0, %v2467_v58 }
 0x5aa   :  { %v1543_v23 = vmul.f32 %v1527_v21, %v1415_v22 }
 0x5ab   :  { %1909 = vmatprep.mubr.bf16.mxu1 %v1556_v18  ;;  %v1553_v14 = vpack.c.bf16 %v1545_v20, %v1541_v19  ;;  %v1547_v59 = vmul.f32 %v1531_v31, %v1419_v41 }
 0x5ad   :  { %1861 = vmatmul.mubr.bf16.gmra.mxu0 %v1553_v14  ;;  %v1555_v24 = vpack.c.bf16 %v1547_v59, %v1543_v23 }
 0x5af   :  { %1910 = vmatmul.mubr.bf16.gmra.mxu1 %v1555_v24 }
 0x664   :  { %v2163_v26 = vpop.f32.mrf.mxu0 }
 0x666   :  { %v2164_v28 = vpop.f32.mrf.mxu0 }
 0x667   :  { %v2191_v29 = vpop.f32.mrf.mxu1  ;;  %v2165_v34 = vadd.f32 %v2164_v28, %v2163_v26 }
 0x668   :  { %v2166_v35 = vpop.f32.mrf.mxu0 }
 0x669   :  { %v2192_v0 = vpop.f32.mrf.mxu1  ;;  %v1855_v36 = vadd.f32 %v2165_v34, %v2070_v30 }
 0x66a   :  { %v2167_v46 = vpop.f32.mrf.mxu0  ;;  %v2193_v11 = vadd.f32 %v2192_v0, %v2191_v29 }
 0x66b   :  { %v2194_v38 = vpop.f32.mrf.mxu1  ;;  %v2168_v9 = vadd.f32 %v2167_v46, %v2166_v35 }
 0x66c   :  { %v1904_v3 = vadd.f32 %v2193_v11, %v1855_v36 }
 0x66d   :  { %v1858_v39 = vadd.f32 %v2168_v9, %v2070_v30  ;;  %v2195_v40 = vpop.f32.mrf.mxu1  ;;  %v2169_v25 = vpop.f32.mrf.mxu0 }
 0x66e   :  { %v2196_v43 = vadd.f32 %v2195_v40, %v2194_v38  ;;  %v1918_v44 = vadd.f32 %v1904_v3, %v2851_v37 }
 0x66f   :  { %v2170_v4 = vpop.f32.mrf.mxu0  ;;  %v2197_v56 = vpop.f32.mrf.mxu1 }
 0x670   :  { %v1907_v55 = vadd.f32 %v2196_v43, %v1858_v39  ;;  %v2171_v60 = vadd.f32 %v2170_v4, %v2169_v25 }
 0x671   :  { %v2172_v12 = vpop.f32.mrf.mxu0  ;;  %v2198_v45 = vpop.f32.mrf.mxu1 }
 0x672   :  { %v1919_v2 = vadd.f32 %v1907_v55, %v2857_v42  ;;  %v1863_v32 = vadd.f32 %v2171_v60, %v2070_v30  ;;  %v2199_v50 = vadd.f32 %v2198_v45, %v2197_v56 }
 0x673   :  { %v2173_v47 = vpop.f32.mrf.mxu0  ;;  %v2200_v49 = vpop.f32.mrf.mxu1 }
 0x674   :  { %v2122_v48 = vpack.c.bf16 %v1919_v2, %v1918_v44  ;;  %v2174_v27 = vadd.f32 %v2173_v47, %v2172_v12  ;;  %v1912_v57 = vadd.f32 %v2199_v50, %v1863_v32 }
 0x675   :  { %v2201_v54 = vpop.f32.mrf.mxu1 }
 0x676   :  { %2123 = vst [vmem:[%s3256_s17] sm:$0xff] %v2122_v48   ;;  %v1866_v61 = vadd.f32 %v2174_v27, %v2070_v30  ;;  %v2202_v62 = vadd.f32 %v2201_v54, %v2200_v49  ;;  %v1920_v37 = vadd.f32 %v1912_v57, %v2863_v6 }
 0x678   :  { %v1915_v33 = vadd.f32 %v2202_v62, %v1866_v61 }
 0x67a   :  { %v1921_v42 = vadd.f32 %v1915_v33, %v2870_v7 }
 0x67c   :  { %v2127_v63 = vpack.c.bf16 %v1921_v42, %v1920_v37 }
 0x67e   :  { %2130 = vst [vmem:[%s3256_s17 + $0x8] sm:$0xff] %v2127_v63  }

// kernel: swin_afno_forward.7
= control target key start
LH: loop header
LB: loop body
LE: loop exit
PB: predicated region body
PF: predicated region fallthrough
CT: control target
= control target key end

     0   :  { %vm1472_vm0 = vcmask 785408   ;;  %s6819_s0 = inlined_call_operand.vmem [shape: bf16[128,128], index: 0, kind: input, shape index: {}]   ;;  %s6820_s1 = inlined_call_operand.vmem [shape: bf16[96,128], index: 1, kind: input, shape index: {}]   ;;  %s6821_s2 = inlined_call_operand.vmem [shape: bf16[96,128], index: 2, kind: input, shape index: {}]   ;;  %s6822_s7 = inlined_call_operand.vmem [shape: bf16[256,256], index: 7, kind: input, shape index: {}]   ;;  %s6823_s5 = inlined_call_operand.vmem [shape: f32[1,128], index: 5, kind: input, shape index: {}]   ;;  %s6824_s6 = inlined_call_operand.vmem [shape: f32[1,128], index: 6, kind: input, shape index: {}]   ;;  %s6825_s9 = inlined_call_operand.vmem [shape: bf16[256,256], index: 9, kind: input, shape index: {}]   ;;  %s6826_s8 = inlined_call_operand.vmem [shape: f32[1,256], index: 8, kind: input, shape index: {}]   ;;  %s6827_s3 = inlined_call_operand.vmem [shape: bf16[128,96], index: 3, kind: input, shape index: {}]   ;;  %s6828_s4 = inlined_call_operand.vmem [shape: bf16[128,96], index: 4, kind: input, shape index: {}]   ;;  %s6829_s10 = inlined_call_operand.vmem [shape: f32[1,256], index: 10, kind: input, shape index: {}]   ;;  %s6830_s13 = inlined_call_operand.vmem [shape: bf16[128,512], index: 13, kind: input, shape index: {}]   ;;  %s6831_s11 = inlined_call_operand.vmem [shape: f32[1,128], index: 11, kind: input, shape index: {}]   ;;  %s6832_s12 = inlined_call_operand.vmem [shape: f32[1,128], index: 12, kind: input, shape index: {}]   ;;  %s6833_s15 = inlined_call_operand.vmem [shape: bf16[512,128], index: 15, kind: input, shape index: {}]   ;;  %s6834_s14 = inlined_call_operand.vmem [shape: f32[1,512], index: 14, kind: input, shape index: {}]   ;;  %s6835_s16 = inlined_call_operand.vmem [shape: f32[1,128], index: 16, kind: input, shape index: {}]   ;;  %s6836_s17 = inlined_call_operand.vmem [shape: bf16[128,128], index: 17, kind: output, shape index: {}]  }
   0x1   :  { %6949 = sst [smem:[#allocation69_spill]] %s6819_s0  ;;  %v4287_v41 = vld [vmem:[%s6821_s2] sm:$0xff]  }
   0x2   :  { %6950 = sst [smem:[#allocation70_spill]] %s6820_s1  ;;  %4217 = vmatprep.mubr.bf16.mxu1 %v4287_v41 }
   0x3   :  { %s6951_s26 = sld [smem:[#allocation69_spill]] }
   0x4   :  { %s6968_s28 = sld [smem:[#allocation70_spill]] }
   0x9   :  { %v3981_v0 = vld [vmem:[%s6951_s26 + $0x38] sm:$0xff]   ;;  %v3980_v4 = vld [vmem:[%s6951_s26 + $0x30] sm:$0xff]   ;;  %v3979_v9 = vld [vmem:[%s6951_s26 + $0x28] sm:$0xff]  }
   0xa   :  { %v4776_v1 = vunpack.c.l.bf16 %v3981_v0  ;;  %v4778_v2 = vunpack.c.h.bf16 %v3981_v0  ;;  %v4789_v6 = vunpack.c.l.bf16 %v3980_v4  ;;  %v4791_v7 = vunpack.c.h.bf16 %v3980_v4  ;;  %v3978_v14 = vld [vmem:[%s6951_s26 + $0x20] sm:$0xff]   ;;  %v3977_v19 = vld [vmem:[%s6951_s26 + $0x18] sm:$0xff]   ;;  %v3976_v24 = vld [vmem:[%s6951_s26 + $0x10] sm:$0xff]  }
   0xb   :  { %v4802_v11 = vunpack.c.l.bf16 %v3979_v9  ;;  %v4804_v12 = vunpack.c.h.bf16 %v3979_v9  ;;  %v4815_v16 = vunpack.c.l.bf16 %v3978_v14  ;;  %v4817_v17 = vunpack.c.h.bf16 %v3978_v14  ;;  %v3975_v29 = vld [vmem:[%s6951_s26 + $0x8] sm:$0xff]   ;;  %v3904_v34 = vld [vmem:[%s6951_s26] sm:$0xff]  }
   0xc   :  { %6952 = vst [vmem:[#allocation2_spill] sm:$0xff] %v4776_v1  ;;  %6953 = vst [vmem:[#allocation3_spill] sm:$0xff] %v4778_v2  ;;  %119 = vadd.xlane.f32.xlu0 %v4776_v1  ;;  %v154_v3 = vmul.f32 %v4776_v1, %v4776_v1  ;;  %v155_v5 = vmul.f32 %v4778_v2, %v4778_v2  ;;  %v152_v8 = vmul.f32 %v4789_v6, %v4789_v6  ;;  %v4286_v40 = vld [vmem:[%s6968_s28] sm:$0xff]  }
   0xd   :  { %6954 = vst [vmem:[#allocation4_spill] sm:$0xff] %v4789_v6  ;;  %6955 = vst [vmem:[#allocation5_spill] sm:$0xff] %v4791_v7  ;;  %v153_v10 = vmul.f32 %v4791_v7, %v4791_v7  ;;  %v150_v13 = vmul.f32 %v4802_v11, %v4802_v11  ;;  %v151_v15 = vmul.f32 %v4804_v12, %v4804_v12  ;;  %v4828_v21 = vunpack.c.l.bf16 %v3977_v19 }
   0xe   :  { %184 = vadd.xlane.f32.xlu1 %v154_v3  ;;  %6956 = vst [vmem:[#allocation6_spill] sm:$0xff] %v4802_v11  ;;  %6957 = vst [vmem:[#allocation7_spill] sm:$0xff] %v4804_v12  ;;  %v148_v18 = vmul.f32 %v4815_v16, %v4815_v16  ;;  %v149_v20 = vmul.f32 %v4817_v17, %v4817_v17  ;;  %v4830_v22 = vunpack.c.h.bf16 %v3977_v19  ;;  %v4841_v26 = vunpack.c.l.bf16 %v3976_v24 }
   0xf   :  { %6958 = vst [vmem:[#allocation8_spill] sm:$0xff] %v4815_v16  ;;  %6959 = vst [vmem:[#allocation9_spill] sm:$0xff] %v4817_v17  ;;  %v146_v23 = vmul.f32 %v4828_v21, %v4828_v21  ;;  %v4843_v27 = vunpack.c.h.bf16 %v3976_v24  ;;  %v4854_v31 = vunpack.c.l.bf16 %v3975_v29  ;;  %v4856_v32 = vunpack.c.h.bf16 %v3975_v29  ;;  %4189 = vmatprep.mubr.bf16.mxu0 %v4286_v40 }
  0x10   :  { %121 = vadd.xlane.f32.xlu0 %v4778_v2  ;;  %6960 = vst [vmem:[#allocation10_spill] sm:$0xff] %v4828_v21  ;;  %6961 = vst [vmem:[#allocation11_spill] sm:$0xff] %v4830_v22  ;;  %v147_v25 = vmul.f32 %v4830_v22, %v4830_v22  ;;  %v144_v28 = vmul.f32 %v4841_v26, %v4841_v26  ;;  %v4867_v36 = vunpack.c.l.bf16 %v3904_v34  ;;  %v4869_v37 = vunpack.c.h.bf16 %v3904_v34 }
  0x11   :  { %6962 = vst [vmem:[#allocation12_spill] sm:$0xff] %v4841_v26  ;;  %6963 = vst [vmem:[#allocation13_spill] sm:$0xff] %v4843_v27  ;;  %v145_v30 = vmul.f32 %v4843_v27, %v4843_v27  ;;  %v142_v33 = vmul.f32 %v4854_v31, %v4854_v31  ;;  %v143_v35 = vmul.f32 %v4856_v32, %v4856_v32 }
  0x12   :  { %186 = vadd.xlane.f32.xlu1 %v155_v5  ;;  %6964 = vst [vmem:[#allocation14_spill] sm:$0xff] %v4854_v31  ;;  %6965 = vst [vmem:[#allocation15_spill] sm:$0xff] %v4856_v32  ;;  %v140_v38 = vmul.f32 %v4867_v36, %v4867_v36  ;;  %v141_v39 = vmul.f32 %v4869_v37, %v4869_v37 }
  0x13   :  { %6966 = vst [vmem:[#allocation16_spill] sm:$0xff] %v4867_v36  ;;  %6967 = vst [vmem:[#allocation17_spill] sm:$0xff] %v4869_v37 }
  0x14   :  { %115 = vadd.xlane.f32.xlu0 %v4789_v6 }
  0x16   :  { %117 = vadd.xlane.f32.xlu1 %v4791_v7 }
  0x18   :  { %180 = vadd.xlane.f32.xlu0 %v152_v8 }
  0x1a   :  { %182 = vadd.xlane.f32.xlu1 %v153_v10 }
  0x1c   :  { %111 = vadd.xlane.f32.xlu0 %v4802_v11 }
  0x1e   :  { %113 = vadd.xlane.f32.xlu1 %v4804_v12 }
  0x20   :  { %176 = vadd.xlane.f32.xlu0 %v150_v13 }
  0x22   :  { %178 = vadd.xlane.f32.xlu1 %v151_v15 }
  0x24   :  { %107 = vadd.xlane.f32.xlu0 %v4815_v16 }
  0x26   :  { %109 = vadd.xlane.f32.xlu1 %v4817_v17 }
  0x28   :  { %172 = vadd.xlane.f32.xlu0 %v148_v18 }
  0x2a   :  { %174 = vadd.xlane.f32.xlu1 %v149_v20 }
  0x2c   :  { %103 = vadd.xlane.f32.xlu0 %v4828_v21 }
  0x2e   :  { %105 = vadd.xlane.f32.xlu1 %v4830_v22 }
  0x30   :  { %168 = vadd.xlane.f32.xlu0 %v146_v23 }
  0x32   :  { %170 = vadd.xlane.f32.xlu1 %v147_v25 }
  0x34   :  { %99 = vadd.xlane.f32.xlu0 %v4841_v26 }
  0x36   :  { %101 = vadd.xlane.f32.xlu1 %v4843_v27 }
  0x38   :  { %164 = vadd.xlane.f32.xlu0 %v144_v28 }
  0x3a   :  { %166 = vadd.xlane.f32.xlu1 %v145_v30 }
  0x3c   :  { %95 = vadd.xlane.f32.xlu0 %v4854_v31 }
  0x3e   :  { %97 = vadd.xlane.f32.xlu1 %v4856_v32 }
  0x40   :  { %160 = vadd.xlane.f32.xlu0 %v142_v33 }
  0x42   :  { %162 = vadd.xlane.f32.xlu1 %v143_v35 }
  0x44   :  { %91 = vadd.xlane.f32.xlu0 %v4867_v36 }
  0x46   :  { %93 = vadd.xlane.f32.xlu1 %v4869_v37 }
  0x48   :  { %156 = vadd.xlane.f32.xlu0 %v140_v38 }
  0x4a   :  { %158 = vadd.xlane.f32.xlu1 %v141_v39 }
  0x95   :  { %v120_v42 = vpop.xlane.xlu0 %119 }
  0x96   :  { %v138_v43 = vmul.f32 0.0078125, %v120_v42 }
  0x97   :  { %v185_v44 = vpop.xlane.xlu1 %184 }
  0x98   :  { %v218_v45 = vmul.f32 %v138_v43, %v138_v43  ;;  %v202_v46 = vmul.f32 0.0078125, %v185_v44  ;;  %v266_v38 = vsub.f32 %v4776_v1, %v138_v43 }
  0x99   :  { %v122_v47 = vpop.xlane.xlu0 %121 }
  0x9a   :  { %v234_v48 = vsub.f32 %v202_v46, %v218_v45  ;;  %v139_v49 = vmul.f32 0.0078125, %v122_v47 }
  0x9b   :  { %v187_v50 = vpop.xlane.xlu1 %186 }
  0x9c   :  { %v250_v51 = vmax.f32 %v234_v48, 0.0  ;;  %v219_v52 = vmul.f32 %v139_v49, %v139_v49  ;;  %v203_v53 = vmul.f32 0.0078125, %v187_v50  ;;  %v267_v46 = vsub.f32 %v4778_v2, %v139_v49 }
  0x9d   :  { %v116_v54 = vpop.xlane.xlu0 %115 }
  0x9e   :  { %v282_v55 = vadd.f32 1e-05, %v250_v51  ;;  %v235_v56 = vsub.f32 %v203_v53, %v219_v52  ;;  %v4883_v57 = vmul.f32 0.0078125, %v116_v54  ;;  %v4908_v51 = vld [vmem:[%s6823_s5] ss:$0 sm:$0xff] }
  0x9f   :  { %v118_v58 = vpop.xlane.xlu1 %117 }
  0xa0   :  { %4490 = vrsqrt.f32 %v282_v55  ;;  %v251_v59 = vmax.f32 %v235_v56, 0.0  ;;  %v216_v60 = vmul.f32 %v4883_v57, %v4883_v57  ;;  %v4887_v61 = vmul.f32 0.0078125, %v118_v58 }
  0xa1   :  { %v181_v62 = vpop.xlane.xlu0 %180 }
  0xa2   :  { %v283_v63 = vadd.f32 1e-05, %v251_v59  ;;  %v200_v0 = vmul.f32 0.0078125, %v181_v62  ;;  %v217_v4 = vmul.f32 %v4887_v61, %v4887_v61 }
  0xa3   :  { %v183_v3 = vpop.xlane.xlu1 %182 }
  0xa4   :  { %4492 = vrsqrt.f32 %v283_v63  ;;  %v232_v5 = vsub.f32 %v200_v0, %v216_v60  ;;  %v201_v8 = vmul.f32 0.0078125, %v183_v3  ;;  %v4918_v63 = vld [vmem:[%s6824_s6] ss:$0 sm:$0xff] }
  0xa5   :  { %v112_v9 = vpop.xlane.xlu0 %111 }
  0xa6   :  { %v248_v10 = vmax.f32 %v232_v5, 0.0  ;;  %v233_v13 = vsub.f32 %v201_v8, %v217_v4  ;;  %v4891_v14 = vmul.f32 0.0078125, %v112_v9 }
  0xa7   :  { %v114_v15 = vpop.xlane.xlu1 %113 }
  0xa8   :  { %v280_v18 = vadd.f32 1e-05, %v248_v10  ;;  %v249_v19 = vmax.f32 %v233_v13, 0.0  ;;  %v214_v20 = vmul.f32 %v4891_v14, %v4891_v14  ;;  %v4895_v23 = vmul.f32 0.0078125, %v114_v15 }
  0xa9   :  { %v177_v24 = vpop.xlane.xlu0 %176  ;;  %v264_v13 = vsub.f32 %v4789_v6, %v4883_v57 }
  0xaa   :  { %4494 = vrsqrt.f32 %v280_v18  ;;  %v281_v25 = vadd.f32 1e-05, %v249_v19  ;;  %v198_v28 = vmul.f32 0.0078125, %v177_v24  ;;  %v215_v30 = vmul.f32 %v4895_v23, %v4895_v23 }
  0xab   :  { %v179_v29 = vpop.xlane.xlu1 %178  ;;  %v265_v19 = vsub.f32 %v4791_v7, %v4887_v61 }
  0xac   :  { %4496 = vrsqrt.f32 %v281_v25  ;;  %v230_v33 = vsub.f32 %v198_v28, %v214_v20  ;;  %v199_v34 = vmul.f32 0.0078125, %v179_v29 }
  0xad   :  { %v4491_v35 = vpop.eup %4490  ;;  %v108_v39 = vpop.xlane.xlu0 %107 }
  0xae   :  { %v246_v40 = vmax.f32 %v230_v33, 0.0  ;;  %v231_v41 = vsub.f32 %v199_v34, %v215_v30  ;;  %v4900_v42 = vmul.f32 0.0078125, %v108_v39  ;;  %v314_v45 = vmul.f32 %v4491_v35, %v266_v38 }
  0xaf   :  { %v110_v44 = vpop.xlane.xlu1 %109 }
  0xb0   :  { %v278_v47 = vadd.f32 1e-05, %v246_v40  ;;  %v247_v48 = vmax.f32 %v231_v41, 0.0  ;;  %v212_v50 = vmul.f32 %v4900_v42, %v4900_v42  ;;  %v4910_v52 = vmul.f32 0.0078125, %v110_v44 }
  0xb1   :  { %v4493_v43 = vpop.eup %4492  ;;  %v173_v53 = vpop.xlane.xlu0 %172  ;;  %v336_v59 = vmul.f32 %v4908_v51, %v314_v45 }
  0xb2   :  { %4498 = vrsqrt.f32 %v278_v47  ;;  %v279_v54 = vadd.f32 1e-05, %v247_v48  ;;  %v196_v55 = vmul.f32 0.0078125, %v173_v53  ;;  %v315_v56 = vmul.f32 %v4493_v43, %v267_v46 }
  0xb3   :  { %v213_v49 = vmul.f32 %v4910_v52, %v4910_v52  ;;  %v175_v58 = vpop.xlane.xlu1 %174  ;;  %v4929_v18 = vadd.f32 %v4918_v63, %v336_v59 }
  0xb4   :  { %4500 = vrsqrt.f32 %v279_v54  ;;  %v228_v60 = vsub.f32 %v196_v55, %v212_v50  ;;  %v197_v62 = vmul.f32 0.0078125, %v175_v58  ;;  %v337_v0 = vmul.f32 %v4908_v51, %v315_v56 }
  0xb5   :  { %v104_v3 = vpop.xlane.xlu0 %103  ;;  %6970 = vst [vmem:[#allocation19_spill] sm:$0xff] %v4929_v18  ;;  %v262_v54 = vsub.f32 %v4802_v11, %v4891_v14 }
  0xb6   :  { %v244_v4 = vmax.f32 %v228_v60, 0.0  ;;  %v229_v5 = vsub.f32 %v197_v62, %v213_v49  ;;  %v4921_v8 = vmul.f32 0.0078125, %v104_v3  ;;  %v4924_v9 = vadd.f32 %v4918_v63, %v337_v0 }
  0xb7   :  { %v4495_v10 = vpop.eup %4494  ;;  %v106_v15 = vpop.xlane.xlu1 %105  ;;  %v263_v49 = vsub.f32 %v4804_v12, %v4895_v23 }
  0xb8   :  { %6969 = vst [vmem:[#allocation18_spill] sm:$0xff] %v4924_v9  ;;  %v276_v20 = vadd.f32 1e-05, %v244_v4  ;;  %v245_v24 = vmax.f32 %v229_v5, 0.0  ;;  %v210_v25 = vmul.f32 %v4921_v8, %v4921_v8  ;;  %v4935_v29 = vmul.f32 0.0078125, %v106_v15 }
  0xb9   :  { %v4497_v28 = vpop.eup %4496  ;;  %v169_v30 = vpop.xlane.xlu0 %168  ;;  %v367_v33 = vpack.c.bf16 %v4924_v9, %v4929_v18  ;;  %v312_v57 = vmul.f32 %v4495_v10, %v264_v13 }
  0xba   :  { %4502 = vrsqrt.f32 %v276_v20  ;;  %v277_v34 = vadd.f32 1e-05, %v245_v24  ;;  %v194_v35 = vmul.f32 0.0078125, %v169_v30  ;;  %v313_v38 = vmul.f32 %v4497_v28, %v265_v19 }
  0xbb   :  { %v211_v61 = vmul.f32 %v4935_v29, %v4935_v29  ;;  %4173 = vmatprep.subr.bf16.mxu0 %v367_v33  ;;  %4201 = vmatprep.subr.bf16.mxu1 %v367_v33  ;;  %v171_v39 = vpop.xlane.xlu1 %170  ;;  %v334_v40 = vmul.f32 %v4908_v51, %v312_v57 }
  0xbc   :  { %4504 = vrsqrt.f32 %v277_v34  ;;  %v226_v41 = vsub.f32 %v194_v35, %v210_v25  ;;  %4174 = vmatpush3.bf16.msra.mxu0 %v367_v33  ;;  %4202 = vmatpush3.bf16.msra.mxu1 %v367_v33  ;;  %v195_v44 = vmul.f32 0.0078125, %v171_v39  ;;  %v335_v45 = vmul.f32 %v4908_v51, %v313_v38 }
  0xbd   :  { %v100_v46 = vpop.xlane.xlu0 %99  ;;  %v4951_v56 = vadd.f32 %v4918_v63, %v334_v40  ;;  %v260_v38 = vsub.f32 %v4815_v16, %v4900_v42  ;;  %v261_v40 = vsub.f32 %v4817_v17, %v4910_v52 }
  0xbe   :  { %v242_v47 = vmax.f32 %v226_v41, 0.0  ;;  %v227_v48 = vsub.f32 %v195_v44, %v211_v61  ;;  %v4943_v50 = vmul.f32 0.0078125, %v100_v46  ;;  %v4946_v43 = vadd.f32 %v4918_v63, %v335_v45 }
  0xbf   :  { %v4499_v53 = vpop.eup %4498  ;;  %v102_v55 = vpop.xlane.xlu1 %101  ;;  %6972 = vst [vmem:[#allocation21_spill] sm:$0xff] %v4951_v56 }
  0xc0   :  { %6971 = vst [vmem:[#allocation20_spill] sm:$0xff] %v4946_v43  ;;  %v274_v58 = vadd.f32 1e-05, %v242_v47  ;;  %v243_v59 = vmax.f32 %v227_v48, 0.0  ;;  %v208_v60 = vmul.f32 %v4943_v50, %v4943_v50  ;;  %v4957_v0 = vmul.f32 0.0078125, %v102_v55 }
  0xc1   :  { %v4501_v62 = vpop.eup %4500  ;;  %v165_v3 = vpop.xlane.xlu0 %164  ;;  %v366_v4 = vpack.c.bf16 %v4946_v43, %v4951_v56  ;;  %v310_v14 = vmul.f32 %v4499_v53, %v262_v54 }
  0xc2   :  { %4506 = vrsqrt.f32 %v274_v58  ;;  %v275_v5 = vadd.f32 1e-05, %v243_v59  ;;  %v192_v10 = vmul.f32 0.0078125, %v165_v3  ;;  %v311_v13 = vmul.f32 %v4501_v62, %v263_v49 }
  0xc3   :  { %v209_v23 = vmul.f32 %v4957_v0, %v4957_v0  ;;  %4175 = vmatprep.subr.bf16.mxu0 %v366_v4  ;;  %4203 = vmatprep.subr.bf16.mxu1 %v366_v4  ;;  %v167_v15 = vpop.xlane.xlu1 %166  ;;  %v332_v19 = vmul.f32 %v4908_v51, %v310_v14 }
  0xc4   :  { %4508 = vrsqrt.f32 %v275_v5  ;;  %v224_v20 = vsub.f32 %v192_v10, %v208_v60  ;;  %4176 = vmatpush3.bf16.msra.mxu0 %v366_v4  ;;  %4204 = vmatpush3.bf16.msra.mxu1 %v366_v4  ;;  %v193_v24 = vmul.f32 0.0078125, %v167_v15  ;;  %v333_v25 = vmul.f32 %v4908_v51, %v311_v13 }
  0xc5   :  { %v96_v28 = vpop.xlane.xlu0 %95  ;;  %v4973_v39 = vadd.f32 %v4918_v63, %v332_v19  ;;  %v258_v15 = vsub.f32 %v4828_v21, %v4921_v8 }
  0xc6   :  { %v240_v30 = vmax.f32 %v224_v20, 0.0  ;;  %v225_v33 = vsub.f32 %v193_v24, %v209_v23  ;;  %v4965_v57 = vmul.f32 0.0078125, %v96_v28  ;;  %v4968_v34 = vadd.f32 %v4918_v63, %v333_v25 }
  0xc7   :  { %v4503_v35 = vpop.eup %4502  ;;  %v98_v61 = vpop.xlane.xlu1 %97  ;;  %6974 = vst [vmem:[#allocation23_spill] sm:$0xff] %v4973_v39  ;;  %v259_v24 = vsub.f32 %v4830_v22, %v4935_v29 }
  0xc8   :  { %6973 = vst [vmem:[#allocation22_spill] sm:$0xff] %v4968_v34  ;;  %v272_v41 = vadd.f32 1e-05, %v240_v30  ;;  %v241_v44 = vmax.f32 %v225_v33, 0.0  ;;  %v206_v45 = vmul.f32 %v4965_v57, %v4965_v57  ;;  %v4979_v47 = vmul.f32 0.0078125, %v98_v61 }
  0xc9   :  { %v4505_v46 = vpop.eup %4504  ;;  %v161_v48 = vpop.xlane.xlu0 %160  ;;  %v365_v53 = vpack.c.bf16 %v4968_v34, %v4973_v39  ;;  %v308_v42 = vmul.f32 %v4503_v35, %v260_v38 }
  0xca   :  { %4510 = vrsqrt.f32 %v272_v41  ;;  %v273_v54 = vadd.f32 1e-05, %v241_v44  ;;  %v190_v55 = vmul.f32 0.0078125, %v161_v48  ;;  %v309_v49 = vmul.f32 %v4505_v46, %v261_v40 }
  0xcb   :  { %v207_v52 = vmul.f32 %v4979_v47, %v4979_v47  ;;  %4177 = vmatprep.subr.bf16.mxu0 %v365_v53  ;;  %4205 = vmatprep.subr.bf16.mxu1 %v365_v53  ;;  %v163_v58 = vpop.xlane.xlu1 %162  ;;  %v330_v59 = vmul.f32 %v4908_v51, %v308_v42 }
  0xcc   :  { %4512 = vrsqrt.f32 %v273_v54  ;;  %v222_v60 = vsub.f32 %v190_v55, %v206_v45  ;;  %4178 = vmatpush3.bf16.msra.mxu0 %v365_v53  ;;  %4206 = vmatpush3.bf16.msra.mxu1 %v365_v53  ;;  %v191_v62 = vmul.f32 0.0078125, %v163_v58  ;;  %v331_v3 = vmul.f32 %v4908_v51, %v309_v49 }
  0xcd   :  { %v92_v4 = vpop.xlane.xlu0 %91  ;;  %v4995_v20 = vadd.f32 %v4918_v63, %v330_v59  ;;  %v256_v54 = vsub.f32 %v4841_v26, %v4943_v50 }
  0xce   :  { %v238_v14 = vmax.f32 %v222_v60, 0.0  ;;  %v223_v5 = vsub.f32 %v191_v62, %v207_v52  ;;  %v4987_v10 = vmul.f32 0.0078125, %v92_v4  ;;  %v4990_v13 = vadd.f32 %v4918_v63, %v331_v3 }
  0xcf   :  { %v4507_v23 = vpop.eup %4506  ;;  %v94_v19 = vpop.xlane.xlu1 %93  ;;  %6976 = vst [vmem:[#allocation25_spill] sm:$0xff] %v4995_v20  ;;  %v257_v60 = vsub.f32 %v4843_v27, %v4957_v0  ;;  %v254_v0 = vsub.f32 %v4854_v31, %v4965_v57 }
  0xd0   :  { %6975 = vst [vmem:[#allocation24_spill] sm:$0xff] %v4990_v13  ;;  %v270_v25 = vadd.f32 1e-05, %v238_v14  ;;  %v239_v28 = vmax.f32 %v223_v5, 0.0  ;;  %v204_v30 = vmul.f32 %v4987_v10, %v4987_v10  ;;  %v5001_v35 = vmul.f32 0.0078125, %v94_v19 }
  0xd1   :  { %v4509_v33 = vpop.eup %4508  ;;  %v157_v38 = vpop.xlane.xlu0 %156  ;;  %v364_v61 = vpack.c.bf16 %v4990_v13, %v4995_v20  ;;  %v306_v8 = vmul.f32 %v4507_v23, %v258_v15 }
  0xd2   :  { %4514 = vrsqrt.f32 %v270_v25  ;;  %v271_v40 = vadd.f32 1e-05, %v239_v28  ;;  %v188_v41 = vmul.f32 0.0078125, %v157_v38  ;;  %v307_v44 = vmul.f32 %v4509_v33, %v259_v24 }
  0xd3   :  { %v205_v29 = vmul.f32 %v5001_v35, %v5001_v35  ;;  %4179 = vmatprep.subr.bf16.mxu0 %v364_v61  ;;  %4207 = vmatprep.subr.bf16.mxu1 %v364_v61  ;;  %v159_v45 = vpop.xlane.xlu1 %158  ;;  %v328_v46 = vmul.f32 %v4908_v51, %v306_v8 }
  0xd4   :  { %4516 = vrsqrt.f32 %v271_v40  ;;  %v220_v48 = vsub.f32 %v188_v41, %v204_v30  ;;  %4180 = vmatpush3.bf16.msra.mxu0 %v364_v61  ;;  %4208 = vmatpush3.bf16.msra.mxu1 %v364_v61  ;;  %v189_v53 = vmul.f32 0.0078125, %v159_v45  ;;  %v329_v42 = vmul.f32 %v4908_v51, %v307_v44 }
  0xd5   :  { %v5012_v52 = vadd.f32 %v4918_v63, %v328_v46  ;;  %v255_v30 = vsub.f32 %v4856_v32, %v4979_v47  ;;  %v252_v41 = vsub.f32 %v4867_v36, %v4987_v10  ;;  %v253_v45 = vsub.f32 %v4869_v37, %v5001_v35 }
  0xd6   :  { %v236_v55 = vmax.f32 %v220_v48, 0.0  ;;  %v221_v49 = vsub.f32 %v189_v53, %v205_v29  ;;  %v5015_v58 = vadd.f32 %v4918_v63, %v329_v42 }
  0xd7   :  { %6977 = vst [vmem:[#allocation26_spill] sm:$0xff] %v5012_v52  ;;  %v4511_v59 = vpop.eup %4510 }
  0xd8   :  { %6978 = vst [vmem:[#allocation27_spill] sm:$0xff] %v5015_v58  ;;  %v268_v62 = vadd.f32 1e-05, %v236_v55  ;;  %v237_v3 = vmax.f32 %v221_v49, 0.0  ;;  %v363_v4 = vpack.c.bf16 %v5015_v58, %v5012_v52  ;;  %v304_v14 = vmul.f32 %v4511_v59, %v256_v54  ;;  %v4300_v59 = vld [vmem:[%s6822_s7 + $0x74] ss:$8 sps:$4 sm:$0xff]  }
  0xd9   :  { %v4513_v5 = vpop.eup %4512 }
  0xda   :  { %4518 = vrsqrt.f32 %v268_v62  ;;  %v269_v50 = vadd.f32 1e-05, %v237_v3  ;;  %4181 = vmatprep.subr.bf16.mxu0 %v363_v4  ;;  %4209 = vmatprep.subr.bf16.mxu1 %v363_v4  ;;  %v305_v23 = vmul.f32 %v4513_v5, %v257_v60  ;;  %v326_v15 = vmul.f32 %v4908_v51, %v304_v14  ;;  %v4288_v60 = vld [vmem:[%s6968_s28 + $0x8] sm:$0xff]   ;;  %v4291_v62 = vld [vmem:[%s6968_s28 + $0x10] sm:$0xff]  }
  0xdb   :  { %4182 = vmatpush3.bf16.msra.mxu0 %v363_v4  ;;  %4210 = vmatpush3.bf16.msra.mxu1 %v363_v4  ;;  %v4298_v3 = vld [vmem:[%s6822_s7 + $0x70] ss:$8 sps:$4 sm:$0xff]   ;;  %v4303_v4 = vld [vmem:[%s6822_s7 + $0x64] ss:$8 sps:$4 sm:$0xff]   ;;  %v4301_v14 = vld [vmem:[%s6822_s7 + $0x60] ss:$8 sps:$4 sm:$0xff]  }
  0xdc   :  { %4520 = vrsqrt.f32 %v269_v50  ;;  %v327_v19 = vmul.f32 %v4908_v51, %v305_v23  ;;  %v5026_v24 = vadd.f32 %v4918_v63, %v326_v15  ;;  %v4306_v5 = vld [vmem:[%s6822_s7 + $0x54] ss:$8 sps:$4 sm:$0xff]   ;;  %v4294_v15 = vld [vmem:[%s6821_s2 + $0x20] sm:$0xff]  }
  0xdd   :  { %v4292_v50 = vld [vmem:[%s6821_s2 + $0x18] sm:$0xff]  }
  0xde   :  { %6979 = vst [vmem:[#allocation28_spill] sm:$0xff] %v5026_v24  ;;  %v5029_v25 = vadd.f32 %v4918_v63, %v327_v19  ;;  %v4293_v23 = vld [vmem:[%s6968_s28 + $0x18] sm:$0xff]   ;;  %v4295_v19 = vld [vmem:[%s6968_s28 + $0x20] sm:$0xff]  }
  0xdf   :  { %v4515_v28 = vpop.eup %4514 }
  0xe0   :  { %6980 = vst [vmem:[#allocation29_spill] sm:$0xff] %v5029_v25  ;;  %v362_v33 = vpack.c.bf16 %v5029_v25, %v5026_v24  ;;  %v302_v38 = vmul.f32 %v4515_v28, %v254_v0  ;;  %v4304_v0 = vld [vmem:[%s6822_s7 + $0x50] ss:$8 sps:$4 sm:$0xff]   ;;  %v4309_v28 = vld [vmem:[%s6822_s7 + $0x44] ss:$8 sps:$4 sm:$0xff]  }
  0xe1   :  { %v4517_v61 = vpop.eup %4516 }
  0xe2   :  { %4183 = vmatprep.subr.bf16.mxu0 %v362_v33  ;;  %4211 = vmatprep.subr.bf16.mxu1 %v362_v33  ;;  %v303_v8 = vmul.f32 %v4517_v61, %v255_v30  ;;  %v324_v57 = vmul.f32 %v4908_v51, %v302_v38  ;;  %v4307_v30 = vld [vmem:[%s6822_s7 + $0x40] ss:$8 sps:$4 sm:$0xff]  }
  0xe3   :  { %4184 = vmatpush3.bf16.msra.mxu0 %v362_v33  ;;  %4212 = vmatpush3.bf16.msra.mxu1 %v362_v33  ;;  %v4312_v33 = vld [vmem:[%s6822_s7 + $0x34] ss:$8 sps:$4 sm:$0xff]   ;;  %v4296_v38 = vld [vmem:[%s6821_s2 + $0x28] sm:$0xff]  }
  0xe4   :  { %v325_v40 = vmul.f32 %v4908_v51, %v303_v8  ;;  %v5040_v44 = vadd.f32 %v4918_v63, %v324_v57  ;;  %v4297_v61 = vld [vmem:[%s6968_s28 + $0x28] sm:$0xff]   ;;  %v4310_v8 = vld [vmem:[%s6822_s7 + $0x30] ss:$8 sps:$4 sm:$0xff]  }
  0xe5   :  { %v4315_v57 = vld [vmem:[%s6822_s7 + $0x24] ss:$8 sps:$4 sm:$0xff]  }
  0xe6   :  { %6981 = vst [vmem:[#allocation30_spill] sm:$0xff] %v5040_v44  ;;  %v5043_v47 = vadd.f32 %v4918_v63, %v325_v40  ;;  %v4313_v40 = vld [vmem:[%s6822_s7 + $0x20] ss:$8 sps:$4 sm:$0xff]  }
  0xe7   :  { %v4519_v29 = vpop.eup %4518 }
  0xe8   :  { %6982 = vst [vmem:[#allocation31_spill] sm:$0xff] %v5043_v47  ;;  %v361_v46 = vpack.c.bf16 %v5043_v47, %v5040_v44  ;;  %v300_v48 = vmul.f32 %v4519_v29, %v252_v41  ;;  %v4318_v41 = vld [vmem:[%s6822_s7 + $0x14] ss:$8 sps:$4 sm:$0xff]   ;;  %v4316_v29 = vld [vmem:[%s6822_s7 + $0x10] ss:$8 sps:$4 sm:$0xff]  }
  0xe9   :  { %v4521_v53 = vpop.eup %4520 }
  0xea   :  { %4185 = vmatprep.subr.bf16.mxu0 %v361_v46  ;;  %4213 = vmatprep.subr.bf16.mxu1 %v361_v46  ;;  %v301_v42 = vmul.f32 %v4521_v53, %v253_v45  ;;  %v322_v10 = vmul.f32 %v4908_v51, %v300_v48  ;;  %v4321_v45 = vld [vmem:[%s6822_s7 + $0x4] ss:$8 sps:$4 sm:$0xff]   ;;  %v4324_v48 = vld [vmem:[%s6822_s7 + $0xf4] ss:$8 sps:$4 sm:$0xff]   ;;  %v4322_v53 = vld [vmem:[%s6822_s7 + $0xf0] ss:$8 sps:$4 sm:$0xff]  }
  0xeb   :  { %4186 = vmatpush3.bf16.msra.mxu0 %v361_v46  ;;  %4214 = vmatpush3.bf16.msra.mxu1 %v361_v46  ;;  %v4319_v46 = vld [vmem:[%s6822_s7] ss:$8 sps:$4 sm:$0xff]  }
  0xec   :  { %v323_v54 = vmul.f32 %v4908_v51, %v301_v42  ;;  %v5052_v55 = vadd.f32 %v4918_v63, %v322_v10  ;;  %v4289_v51 = vld [vmem:[%s6821_s2 + $0x8] sm:$0xff]  }
  0xed   :  { %v4327_v42 = vld [vmem:[%s6822_s7 + $0xe4] ss:$8 sps:$4 sm:$0xff]   ;;  %v4325_v10 = vld [vmem:[%s6822_s7 + $0xe0] ss:$8 sps:$4 sm:$0xff]  }
  0xee   :  { %6983 = vst [vmem:[#allocation32_spill] sm:$0xff] %v5052_v55  ;;  %v5055_v49 = vadd.f32 %v4918_v63, %v323_v54  ;;  %v4290_v63 = vld [vmem:[%s6821_s2 + $0x10] sm:$0xff]  }
  0xef   :  { %v4330_v54 = vld [vmem:[%s6822_s7 + $0xd4] ss:$8 sps:$4 sm:$0xff]  }
  0xf0   :  { %6984 = vst [vmem:[#allocation33_spill] sm:$0xff] %v5055_v49  ;;  %v360_v35 = vpack.c.bf16 %v5055_v49, %v5052_v55 }
  0xf2   :  { %4187 = vmatprep.subr.bf16.mxu0 %v360_v35  ;;  %4215 = vmatprep.subr.bf16.mxu1 %v360_v35 }
  0xf3   :  { %4188 = vmatpush3.bf16.msra.mxu0 %v360_v35  ;;  %4216 = vmatpush3.bf16.msra.mxu1 %v360_v35  ;;  %v4328_v35 = vld [vmem:[%s6822_s7 + $0xd0] ss:$8 sps:$4 sm:$0xff]  }
  0xf4   :  { %842 = vmatprep.subr.bf16.mxu0 %v4300_v59  ;;  %v4333_v59 = vld [vmem:[%s6822_s7 + $0xc4] ss:$8 sps:$4 sm:$0xff]  }
  0xf6   :  { %4190 = vmatmul.mubr.bf16.vlgmr.msra.gmra.mxu0 %v4288_v60  ;;  %4218 = vmatmul.mubr.bf16.vlgmr.msra.gmra.mxu1 %v4289_v51  ;;  %v4331_v60 = vld [vmem:[%s6822_s7 + $0xc0] ss:$8 sps:$4 sm:$0xff]   ;;  %v4336_v51 = vld [vmem:[%s6822_s7 + $0xb4] ss:$8 sps:$4 sm:$0xff]  }
  0xf7   :  { %4221 = vmatprep.mubr.bf16.mxu1 %v4290_v63  ;;  %4193 = vmatprep.mubr.bf16.mxu0 %v4291_v62  ;;  %v4334_v63 = vld [vmem:[%s6822_s7 + $0xb0] ss:$8 sps:$4 sm:$0xff]   ;;  %v4339_v62 = vld [vmem:[%s6822_s7 + $0xa4] ss:$8 sps:$4 sm:$0xff]  }
  0xf8   :  { %843 = vmatpush1.bf16.msra.mxu0 %v4298_v3  ;;  %v4337_v3 = vld [vmem:[%s6822_s7 + $0xa0] ss:$8 sps:$4 sm:$0xff]  }
  0xf9   :  { %844 = vmatprep.subr.bf16.mxu0 %v4303_v4  ;;  %v4342_v4 = vld [vmem:[%s6822_s7 + $0x94] ss:$8 sps:$4 sm:$0xff]  }
  0xfc   :  { %845 = vmatpush1.bf16.msra.mxu0 %v4301_v14  ;;  %v4340_v14 = vld [vmem:[%s6822_s7 + $0x90] ss:$8 sps:$4 sm:$0xff]  }
  0xfd   :  { %846 = vmatprep.subr.bf16.mxu0 %v4306_v5  ;;  %v4345_v5 = vld [vmem:[%s6822_s7 + $0x84] ss:$8 sps:$4 sm:$0xff]  }
  0xfe   :  { %4222 = vmatmul.mubr.bf16.gmra.mxu1 %v4292_v50  ;;  %4194 = vmatmul.mubr.bf16.gmra.mxu0 %v4293_v23  ;;  %v4343_v50 = vld [vmem:[%s6822_s7 + $0x80] ss:$8 sps:$4 sm:$0xff]   ;;  %v4346_v23 = vld [vmem:[%s6825_s9 + $0x70] ss:$8 sps:$4 sm:$0xff]  }
  0xff   :  { %4225 = vmatprep.mubr.bf16.mxu1 %v4294_v15  ;;  %4197 = vmatprep.mubr.bf16.mxu0 %v4295_v19  ;;  %v4348_v15 = vld [vmem:[%s6825_s9 + $0x74] ss:$8 sps:$4 sm:$0xff]   ;;  %v4351_v19 = vld [vmem:[%s6825_s9 + $0x64] ss:$8 sps:$4 sm:$0xff]  }
 0x100   :  { %847 = vmatpush1.bf16.msra.mxu0 %v4304_v0  ;;  %1175 = vmatprep.subr.bf16.mxu1 %v4348_v15  ;;  %v4349_v0 = vld [vmem:[%s6825_s9 + $0x60] ss:$8 sps:$4 sm:$0xff]  }
 0x101   :  { %848 = vmatprep.subr.bf16.mxu0 %v4309_v28  ;;  %1176 = vmatpush1.bf16.msra.mxu1 %v4346_v23  ;;  %v4354_v28 = vld [vmem:[%s6825_s9 + $0x54] ss:$8 sps:$4 sm:$0xff]  }
 0x102   :  { %1177 = vmatprep.subr.bf16.mxu1 %v4351_v19 }
 0x104   :  { %849 = vmatpush1.bf16.msra.mxu0 %v4307_v30  ;;  %v4352_v30 = vld [vmem:[%s6825_s9 + $0x50] ss:$8 sps:$4 sm:$0xff]  }
 0x105   :  { %850 = vmatprep.subr.bf16.mxu0 %v4312_v33  ;;  %1178 = vmatpush1.bf16.msra.mxu1 %v4349_v0  ;;  %v4357_v33 = vld [vmem:[%s6825_s9 + $0x44] ss:$8 sps:$4 sm:$0xff]  }
 0x106   :  { %4226 = vmatmul.mubr.bf16.gmra.mxu1 %v4296_v38  ;;  %4198 = vmatmul.mubr.bf16.gmra.mxu0 %v4297_v61  ;;  %v4355_v38 = vld [vmem:[%s6825_s9 + $0x40] ss:$8 sps:$4 sm:$0xff]   ;;  %v4360_v61 = vld [vmem:[%s6825_s9 + $0x34] ss:$8 sps:$4 sm:$0xff]  }
 0x107   :  { %1179 = vmatprep.subr.bf16.mxu1 %v4354_v28 }
 0x108   :  { %851 = vmatpush1.bf16.msra.mxu0 %v4310_v8  ;;  %v4358_v8 = vld [vmem:[%s6825_s9 + $0x30] ss:$8 sps:$4 sm:$0xff]  }
 0x109   :  { %852 = vmatprep.subr.bf16.mxu0 %v4315_v57  ;;  %1180 = vmatpush1.bf16.msra.mxu1 %v4352_v30  ;;  %v4363_v57 = vld [vmem:[%s6825_s9 + $0x24] ss:$8 sps:$4 sm:$0xff]  }
 0x10a   :  { %1181 = vmatprep.subr.bf16.mxu1 %v4357_v33 }
 0x10c   :  { %853 = vmatpush1.bf16.msra.mxu0 %v4313_v40  ;;  %v4361_v40 = vld [vmem:[%s6825_s9 + $0x20] ss:$8 sps:$4 sm:$0xff]  }
 0x10d   :  { %854 = vmatprep.subr.bf16.mxu0 %v4318_v41  ;;  %1182 = vmatpush1.bf16.msra.mxu1 %v4355_v38  ;;  %v4366_v41 = vld [vmem:[%s6825_s9 + $0x14] ss:$8 sps:$4 sm:$0xff]  }
 0x10e   :  { %1183 = vmatprep.subr.bf16.mxu1 %v4360_v61 }
 0x110   :  { %855 = vmatpush1.bf16.msra.mxu0 %v4316_v29  ;;  %v4364_v29 = vld [vmem:[%s6825_s9 + $0x10] ss:$8 sps:$4 sm:$0xff]  }
 0x111   :  { %856 = vmatprep.subr.bf16.mxu0 %v4321_v45  ;;  %1184 = vmatpush1.bf16.msra.mxu1 %v4358_v8  ;;  %v4369_v45 = vld [vmem:[%s6825_s9 + $0x4] ss:$8 sps:$4 sm:$0xff]  }
 0x112   :  { %1185 = vmatprep.subr.bf16.mxu1 %v4363_v57 }
 0x114   :  { %857 = vmatpush1.bf16.msra.mxu0 %v4319_v46  ;;  %v4367_v46 = vld [vmem:[%s6825_s9] ss:$8 sps:$4 sm:$0xff]  }
 0x115   :  { %858 = vmatprep.subr.bf16.mxu0 %v4324_v48  ;;  %1186 = vmatpush1.bf16.msra.mxu1 %v4361_v40  ;;  %v4372_v48 = vld [vmem:[%s6825_s9 + $0xf4] ss:$8 sps:$4 sm:$0xff]  }
 0x116   :  { %1187 = vmatprep.subr.bf16.mxu1 %v4366_v41 }
 0x118   :  { %859 = vmatpush2.bf16.msra.mxu0 %v4322_v53  ;;  %v4370_v53 = vld [vmem:[%s6825_s9 + $0xf0] ss:$8 sps:$4 sm:$0xff]  }
 0x119   :  { %860 = vmatprep.subr.bf16.mxu0 %v4327_v42  ;;  %1188 = vmatpush1.bf16.msra.mxu1 %v4364_v29  ;;  %v4375_v42 = vld [vmem:[%s6825_s9 + $0xe4] ss:$8 sps:$4 sm:$0xff]  }
 0x11a   :  { %1189 = vmatprep.subr.bf16.mxu1 %v4369_v45 }
 0x11c   :  { %861 = vmatpush2.bf16.msra.mxu0 %v4325_v10  ;;  %v4373_v10 = vld [vmem:[%s6825_s9 + $0xe0] ss:$8 sps:$4 sm:$0xff]  }
 0x11d   :  { %862 = vmatprep.subr.bf16.mxu0 %v4330_v54  ;;  %1190 = vmatpush1.bf16.msra.mxu1 %v4367_v46  ;;  %v4378_v54 = vld [vmem:[%s6825_s9 + $0xd4] ss:$8 sps:$4 sm:$0xff]  }
 0x11e   :  { %1191 = vmatprep.subr.bf16.mxu1 %v4372_v48 }
 0x120   :  { %863 = vmatpush2.bf16.msra.mxu0 %v4328_v35  ;;  %v4376_v35 = vld [vmem:[%s6825_s9 + $0xd0] ss:$8 sps:$4 sm:$0xff]  }
 0x121   :  { %864 = vmatprep.subr.bf16.mxu0 %v4333_v59  ;;  %1192 = vmatpush2.bf16.msra.mxu1 %v4370_v53  ;;  %v4381_v59 = vld [vmem:[%s6825_s9 + $0xc4] ss:$8 sps:$4 sm:$0xff]  }
 0x122   :  { %1193 = vmatprep.subr.bf16.mxu1 %v4375_v42 }
 0x124   :  { %865 = vmatpush2.bf16.msra.mxu0 %v4331_v60  ;;  %v4379_v60 = vld [vmem:[%s6825_s9 + $0xc0] ss:$8 sps:$4 sm:$0xff]  }
 0x125   :  { %866 = vmatprep.subr.bf16.mxu0 %v4336_v51  ;;  %1194 = vmatpush2.bf16.msra.mxu1 %v4373_v10  ;;  %v4384_v51 = vld [vmem:[%s6825_s9 + $0xb4] ss:$8 sps:$4 sm:$0xff]  }
 0x126   :  { %1195 = vmatprep.subr.bf16.mxu1 %v4378_v54 }
 0x128   :  { %867 = vmatpush2.bf16.msra.mxu0 %v4334_v63  ;;  %v4382_v63 = vld [vmem:[%s6825_s9 + $0xb0] ss:$8 sps:$4 sm:$0xff]  }
 0x129   :  { %868 = vmatprep.subr.bf16.mxu0 %v4339_v62  ;;  %1196 = vmatpush2.bf16.msra.mxu1 %v4376_v35 }
 0x12a   :  { %1197 = vmatprep.subr.bf16.mxu1 %v4381_v59 }
 0x12c   :  { %869 = vmatpush2.bf16.msra.mxu0 %v4337_v3 }
 0x12d   :  { %870 = vmatprep.subr.bf16.mxu0 %v4342_v4  ;;  %1198 = vmatpush2.bf16.msra.mxu1 %v4379_v60 }
 0x12e   :  { %1199 = vmatprep.subr.bf16.mxu1 %v4384_v51 }
 0x130   :  { %871 = vmatpush2.bf16.msra.mxu0 %v4340_v14 }
 0x131   :  { %872 = vmatprep.subr.bf16.mxu0 %v4345_v5  ;;  %1200 = vmatpush2.bf16.msra.mxu1 %v4382_v63 }
 0x134   :  { %873 = vmatpush2.bf16.msra.mxu0 %v4343_v50 }
 0x1b6   :  { %v4191_v62 = vpop.f32.mrf.mxu0  ;;  %v4219_v3 = vpop.f32.mrf.mxu1 }
 0x1b8   :  { %v450_v4 = vpop.f32.mrf.mxu0  ;;  %v579_v14 = vpop.f32.mrf.mxu1 }
 0x1ba   :  { %v4192_v5 = vpop.f32.mrf.mxu0  ;;  %v4220_v50 = vpop.f32.mrf.mxu1 }
 0x1bb   :  { %v629_v30 = vpack.c.bf16 %v4220_v50, %v4219_v3  ;;  %v628_v41 = vpack.c.bf16 %v4192_v5, %v4191_v62  ;;  %v4387_v5 = vld [vmem:[%s6825_s9 + $0xa4] ss:$8 sps:$4 sm:$0xff]   ;;  %v4385_v50 = vld [vmem:[%s6825_s9 + $0xa0] ss:$8 sps:$4 sm:$0xff]  }
 0x1bc   :  { %v453_v23 = vpop.f32.mrf.mxu0  ;;  %v582_v15 = vpop.f32.mrf.mxu1  ;;  %1201 = vmatprep.subr.bf16.mxu1 %v4387_v5 }
 0x1bd   :  { %v626_v19 = vpack.c.bf16 %v453_v23, %v450_v4  ;;  %v627_v0 = vpack.c.bf16 %v582_v15, %v579_v14  ;;  %1202 = vmatpush2.bf16.msra.mxu1 %v4385_v50  ;;  %v4390_v23 = vld [vmem:[%s6825_s9 + $0x94] ss:$8 sps:$4 sm:$0xff]   ;;  %v4388_v15 = vld [vmem:[%s6825_s9 + $0x90] ss:$8 sps:$4 sm:$0xff]  }
 0x1be   :  { %v4223_v28 = vpop.f32.mrf.mxu1  ;;  %v4195_v33 = vpop.f32.mrf.mxu0  ;;  %1203 = vmatprep.subr.bf16.mxu1 %v4390_v23 }
 0x1bf   :  { %874 = vmatprep.mubr.bf16.mxu0 %v627_v0  ;;  %v4391_v0 = vld [vmem:[%s6825_s9 + $0x80] ss:$8 sps:$4 sm:$0xff]  }
 0x1c0   :  { %875 = vmatmul.mubr.bf16.vlgmr.msra.gmra.mxu0 %v626_v19  ;;  %v595_v38 = vpop.f32.mrf.mxu1  ;;  %v466_v8 = vpop.f32.mrf.mxu0  ;;  %v4393_v19 = vld [vmem:[%s6825_s9 + $0x84] ss:$8 sps:$4 sm:$0xff]  }
 0x1c1   :  { %884 = vmatprep.mubr.bf16.mxu0 %v629_v30  ;;  %1204 = vmatpush2.bf16.msra.mxu1 %v4388_v15 }
 0x1c2   :  { %v4224_v61 = vpop.f32.mrf.mxu1  ;;  %v4196_v45 = vpop.f32.mrf.mxu0  ;;  %1205 = vmatprep.subr.bf16.mxu1 %v4393_v19 }
 0x1c3   :  { %v633_v10 = vpack.c.bf16 %v4224_v61, %v4223_v28  ;;  %v632_v51 = vpack.c.bf16 %v4196_v45, %v4195_v33  ;;  %v672_v28 = vlaneseq  ;;  %v670_v61 = vld [vmem:[%s6826_s8] sm:$0x3] }
 0x1c4   :  { %v598_v57 = vpop.f32.mrf.mxu1  ;;  %v469_v48 = vpop.f32.mrf.mxu0 }
 0x1c5   :  { %v631_v40 = vpack.c.bf16 %v598_v57, %v595_v38  ;;  %v630_v53 = vpack.c.bf16 %v469_v48, %v466_v8  ;;  %1206 = vmatpush2.bf16.msra.mxu1 %v4391_v0  ;;  %v5281_v30 = vshrl.u32 %v672_v28, 7 }
 0x1c6   :  { %v4227_v29 = vpop.f32.mrf.mxu1  ;;  %v4199_v54 = vpop.f32.mrf.mxu0 }
 0x1c7   :  { %6985 = vst [vmem:[#allocation34_spill] sm:$0xff] %v5281_v30  ;;  %v5284_v33 = vsub.s32 1, %v5281_v30  ;;  %v5287_v38 = vsub.s32 0, %v5281_v30 }
 0x1c8   :  { %885 = vmatmul.mubr.bf16.gmra.mxu0 %v628_v41  ;;  %v611_v46 = vpop.f32.mrf.mxu1  ;;  %v482_v59 = vpop.f32.mrf.mxu0 }
 0x1c9   :  { %894 = vmatprep.mubr.bf16.mxu0 %v631_v40  ;;  %6986 = vst [vmem:[#allocation35_spill] sm:$0xff] %v5284_v33  ;;  %6987 = vst [vmem:[#allocation36_spill] sm:$0xff] %v5287_v38  ;;  %v5293_v57 = vrot.slane %v670_v61, %v5284_v33  ;;  %v5296_v40 = vrot.slane %v670_v61, %v5287_v38 }
 0x1ca   :  { %v4228_v42 = vpop.f32.mrf.mxu1  ;;  %v4200_v63 = vpop.f32.mrf.mxu0 }
 0x1cb   :  { %v637_v4 = vpack.c.bf16 %v4228_v42, %v4227_v29  ;;  %v636_v14 = vpack.c.bf16 %v4200_v63, %v4199_v54 }
 0x1cc   :  { %v614_v35 = vpop.f32.mrf.mxu1  ;;  %v485_v62 = vpop.f32.mrf.mxu0 }
 0x1cd   :  { %v635_v60 = vpack.c.bf16 %v614_v35, %v611_v46  ;;  %v634_v3 = vpack.c.bf16 %v485_v62, %v482_v59 }
 0x1d0   :  { %895 = vmatmul.mubr.bf16.gmra.mxu0 %v630_v53 }
 0x1d1   :  { %904 = vmatprep.mubr.bf16.mxu0 %v633_v10 }
 0x1d8   :  { %905 = vmatmul.mubr.bf16.gmra.mxu0 %v632_v51 }
 0x1d9   :  { %914 = vmatprep.mubr.bf16.mxu0 %v635_v60 }
 0x1e0   :  { %915 = vmatmul.mubr.bf16.gmra.mxu0 %v634_v3 }
 0x1e1   :  { %924 = vmatprep.mubr.bf16.mxu0 %v637_v4 }
 0x1e8   :  { %925 = vmatmul.mubr.bf16.gmra.mxu0 %v636_v14 }
 0x280   :  { %v876_v8 = vpop.f32.mrf.mxu0 }
 0x281   :  { %v877_v48 = vadd.f32 %v876_v8, %v5296_v40 }
 0x282   :  { %v878_v41 = vpop.f32.mrf.mxu0 }
 0x283   :  { %v879_v45 = vadd.f32 %v878_v41, %v5293_v57  ;;  %v935_v60 = vmax.f32 %v877_v48, 0.0 }
 0x284   :  { %v880_v29 = vpop.f32.mrf.mxu0 }
 0x285   :  { %v881_v46 = vadd.f32 %v880_v29, %v5296_v40  ;;  %v936_v35 = vmax.f32 %v879_v45, 0.0 }
 0x286   :  { %v882_v53 = vpop.f32.mrf.mxu0 }
 0x287   :  { %v883_v42 = vadd.f32 %v882_v53, %v5293_v57  ;;  %v937_v10 = vmax.f32 %v881_v46, 0.0 }
 0x288   :  { %v886_v54 = vpop.f32.mrf.mxu0 }
 0x289   :  { %v938_v59 = vmax.f32 %v883_v42, 0.0  ;;  %v959_v62 = vpack.c.bf16 %v937_v10, %v935_v60  ;;  %v887_v5 = vadd.f32 %v886_v54, %v5296_v40 }
 0x28a   :  { %v888_v51 = vpop.f32.mrf.mxu0 }
 0x28b   :  { %v960_v63 = vpack.c.bf16 %v938_v59, %v936_v35  ;;  %v889_v4 = vadd.f32 %v888_v51, %v5293_v57  ;;  %v939_v61 = vmax.f32 %v887_v5, 0.0 }
 0x28c   :  { %v890_v3 = vpop.f32.mrf.mxu0 }
 0x28d   :  { %v891_v14 = vadd.f32 %v890_v3, %v5296_v40  ;;  %1207 = vmatprep.mubr.bf16.mxu1 %v960_v63  ;;  %v940_v0 = vmax.f32 %v889_v4, 0.0 }
 0x28e   :  { %v892_v50 = vpop.f32.mrf.mxu0  ;;  %1208 = vmatmul.mubr.bf16.vlgmr.msra.gmra.mxu1 %v959_v62 }
 0x28f   :  { %v893_v23 = vadd.f32 %v892_v50, %v5293_v57  ;;  %v941_v15 = vmax.f32 %v891_v14, 0.0 }
 0x290   :  { %v896_v19 = vpop.f32.mrf.mxu0 }
 0x291   :  { %v942_v28 = vmax.f32 %v893_v23, 0.0  ;;  %v961_v29 = vpack.c.bf16 %v941_v15, %v939_v61  ;;  %v897_v53 = vadd.f32 %v896_v19, %v5296_v40 }
 0x292   :  { %v898_v8 = vpop.f32.mrf.mxu0 }
 0x293   :  { %v962_v41 = vpack.c.bf16 %v942_v28, %v940_v0  ;;  %v899_v46 = vadd.f32 %v898_v8, %v5293_v57  ;;  %v943_v51 = vmax.f32 %v897_v53, 0.0 }
 0x294   :  { %v900_v45 = vpop.f32.mrf.mxu0 }
 0x295   :  { %v901_v48 = vadd.f32 %v900_v45, %v5296_v40  ;;  %1217 = vmatprep.mubr.bf16.mxu1 %v962_v41  ;;  %v944_v59 = vmax.f32 %v899_v46, 0.0 }
 0x296   :  { %v902_v42 = vpop.f32.mrf.mxu0  ;;  %1218 = vmatmul.mubr.bf16.gmra.mxu1 %v961_v29 }
 0x297   :  { %v903_v10 = vadd.f32 %v902_v42, %v5293_v57  ;;  %v945_v54 = vmax.f32 %v901_v48, 0.0 }
 0x298   :  { %v906_v35 = vpop.f32.mrf.mxu0 }
 0x299   :  { %v946_v60 = vmax.f32 %v903_v10, 0.0  ;;  %v963_v3 = vpack.c.bf16 %v945_v54, %v943_v51  ;;  %v907_v50 = vadd.f32 %v906_v35, %v5296_v40 }
 0x29a   :  { %v908_v63 = vpop.f32.mrf.mxu0 }
 0x29b   :  { %v964_v62 = vpack.c.bf16 %v946_v60, %v944_v59  ;;  %v909_v14 = vadd.f32 %v908_v63, %v5293_v57  ;;  %v947_v8 = vmax.f32 %v907_v50, 0.0 }
 0x29c   :  { %v910_v4 = vpop.f32.mrf.mxu0 }
 0x29d   :  { %v911_v5 = vadd.f32 %v910_v4, %v5296_v40  ;;  %1227 = vmatprep.mubr.bf16.mxu1 %v964_v62  ;;  %v948_v28 = vmax.f32 %v909_v14, 0.0 }
 0x29e   :  { %v912_v23 = vpop.f32.mrf.mxu0  ;;  %1228 = vmatmul.mubr.bf16.gmra.mxu1 %v963_v3 }
 0x29f   :  { %v913_v15 = vadd.f32 %v912_v23, %v5293_v57  ;;  %v949_v19 = vmax.f32 %v911_v5, 0.0 }
 0x2a0   :  { %v916_v0 = vpop.f32.mrf.mxu0 }
 0x2a1   :  { %v950_v61 = vmax.f32 %v913_v15, 0.0  ;;  %v965_v45 = vpack.c.bf16 %v949_v19, %v947_v8  ;;  %v917_v42 = vadd.f32 %v916_v0, %v5296_v40 }
 0x2a2   :  { %v918_v41 = vpop.f32.mrf.mxu0 }
 0x2a3   :  { %v966_v29 = vpack.c.bf16 %v950_v61, %v948_v28  ;;  %v919_v48 = vadd.f32 %v918_v41, %v5293_v57  ;;  %v951_v63 = vmax.f32 %v917_v42, 0.0 }
 0x2a4   :  { %v920_v46 = vpop.f32.mrf.mxu0 }
 0x2a5   :  { %v921_v53 = vadd.f32 %v920_v46, %v5296_v40  ;;  %1237 = vmatprep.mubr.bf16.mxu1 %v966_v29  ;;  %v952_v60 = vmax.f32 %v919_v48, 0.0 }
 0x2a6   :  { %v922_v10 = vpop.f32.mrf.mxu0  ;;  %1238 = vmatmul.mubr.bf16.gmra.mxu1 %v965_v45  ;;  %v4395_v45 = vld [vmem:[%s6827_s3] sm:$0xff]  }
 0x2a7   :  { %v923_v54 = vadd.f32 %v922_v10, %v5293_v57  ;;  %v953_v35 = vmax.f32 %v921_v53, 0.0 }
 0x2a8   :  { %v926_v59 = vpop.f32.mrf.mxu0 }
 0x2a9   :  { %v954_v51 = vmax.f32 %v923_v54, 0.0  ;;  %v967_v4 = vpack.c.bf16 %v953_v35, %v951_v63  ;;  %v927_v23 = vadd.f32 %v926_v59, %v5296_v40 }
 0x2aa   :  { %v928_v62 = vpop.f32.mrf.mxu0 }
 0x2ab   :  { %v968_v3 = vpack.c.bf16 %v954_v51, %v952_v60  ;;  %v929_v5 = vadd.f32 %v928_v62, %v5293_v57  ;;  %v955_v8 = vmax.f32 %v927_v23, 0.0  ;;  %v1003_v51 = vld [vmem:[%s6829_s10] sm:$0x3] }
 0x2ac   :  { %v930_v14 = vpop.f32.mrf.mxu0 }
 0x2ad   :  { %v931_v50 = vadd.f32 %v930_v14, %v5296_v40  ;;  %1247 = vmatprep.mubr.bf16.mxu1 %v968_v3  ;;  %v956_v28 = vmax.f32 %v929_v5, 0.0  ;;  %v4394_v40 = vld [vmem:[%s6828_s4] sm:$0xff]   ;;  %v5334_v3 = vrot.slane %v1003_v51, %v5287_v38 }
 0x2ae   :  { %v932_v15 = vpop.f32.mrf.mxu0  ;;  %1248 = vmatmul.mubr.bf16.gmra.mxu1 %v967_v4  ;;  %4241 = vmatprep.mubr.msk.bf16.mxu0 %vm1472_vm0, %v4394_v40  ;;  %v5337_v4 = vrot.slane %v1003_v51, %v5284_v33 }
 0x2af   :  { %v933_v19 = vadd.f32 %v932_v15, %v5293_v57  ;;  %v957_v0 = vmax.f32 %v931_v50, 0.0 }
 0x2b1   :  { %v958_v61 = vmax.f32 %v933_v19, 0.0  ;;  %v969_v29 = vpack.c.bf16 %v957_v0, %v955_v8 }
 0x2b3   :  { %v970_v41 = vpack.c.bf16 %v958_v61, %v956_v28 }
 0x2b5   :  { %1257 = vmatprep.mubr.bf16.mxu1 %v970_v41 }
 0x2b6   :  { %1258 = vmatmul.mubr.bf16.gmra.mxu1 %v969_v29 }
 0x2b7   :  { %4269 = vmatprep.mubr.msk.bf16.mxu1 %vm1472_vm0, %v4395_v45 }
 0x34e   :  { %v1209_v57 = vpop.f32.mrf.mxu1 }
 0x34f   :  { %v1210_v50 = vadd.f32 %v1209_v57, %v5334_v3 }
 0x350   :  { %v1211_v46 = vpop.f32.mrf.mxu1 }
 0x351   :  { %v5341_v23 = vadd.f32 %v1211_v46, %v5337_v4  ;;  %v5348_v8 = vadd.f32 -0.01, %v1210_v50  ;;  %v5354_v45 = vadd.f32 0.01, %v1210_v50 }
 0x352   :  { %v1213_v48 = vpop.f32.mrf.mxu1 }
 0x353   :  { %v1214_v19 = vadd.f32 %v1213_v48, %v5334_v3  ;;  %v5357_v40 = vadd.f32 -0.01, %v5341_v23 }
 0x354   :  { %v1215_v53 = vpop.f32.mrf.mxu1 }
 0x355   :  { %v5345_v0 = vadd.f32 %v1215_v53, %v5337_v4  ;;  %6988 = vst [vmem:[#allocation37_spill] sm:$0xff] %v5357_v40  ;;  %v5363_v53 = vadd.f32 -0.01, %v1214_v19 }
 0x356   :  { %v1219_v42 = vpop.f32.mrf.mxu1 }
 0x357   :  { %v1220_v28 = vadd.f32 %v1219_v42, %v5334_v3  ;;  %v5365_v42 = vadd.f32 0.01, %v1214_v19 }
 0x358   :  { %v1221_v10 = vpop.f32.mrf.mxu1 }
 0x359   :  { %v5351_v41 = vadd.f32 %v1221_v10, %v5337_v4  ;;  %v5368_v10 = vadd.f32 -0.01, %v5345_v0  ;;  %v5371_v51 = vadd.f32 -0.01, %v1220_v28  ;;  %v5373_v50 = vadd.f32 0.01, %v1220_v28 }
 0x35a   :  { %v1223_v54 = vpop.f32.mrf.mxu1 }
 0x35b   :  { %v1224_v29 = vadd.f32 %v1223_v54, %v5334_v3  ;;  %6989 = vst [vmem:[#allocation38_spill] sm:$0xff] %v5368_v10 }
 0x35c   :  { %v1225_v35 = vpop.f32.mrf.mxu1 }
 0x35d   :  { %v5360_v57 = vadd.f32 %v1225_v35, %v5337_v4  ;;  %v5380_v30 = vadd.f32 -0.01, %v1224_v29  ;;  %v5384_v9 = vadd.f32 0.01, %v1224_v29 }
 0x35e   :  { %v1229_v59 = vpop.f32.mrf.mxu1 }
 0x35f   :  { %v1230_v54 = vadd.f32 %v1229_v59, %v5334_v3  ;;  %v5387_v59 = vadd.f32 -0.01, %v5360_v57 }
 0x360   :  { %v1231_v60 = vpop.f32.mrf.mxu1 }
 0x361   :  { %v1232_v33 = vadd.f32 %v1231_v60, %v5337_v4  ;;  %v5391_v1 = vadd.f32 -0.01, %v1230_v54 }
 0x362   :  { %v1233_v63 = vpop.f32.mrf.mxu1 }
 0x363   :  { %v1234_v35 = vadd.f32 %v1233_v63, %v5334_v3  ;;  %v5393_v63 = vadd.f32 0.01, %v1230_v54  ;;  %v5397_v43 = vadd.f32 -0.01, %v1232_v33 }
 0x364   :  { %v1235_v62 = vpop.f32.mrf.mxu1 }
 0x365   :  { %v1236_v19 = vadd.f32 %v1235_v62, %v5337_v4  ;;  %v5399_v62 = vadd.f32 0.01, %v1232_v33  ;;  %v5404_v56 = vadd.f32 0.01, %v1234_v35 }
 0x366   :  { %v1239_v14 = vpop.f32.mrf.mxu1 }
 0x367   :  { %v1240_v46 = vadd.f32 %v1239_v14, %v5334_v3  ;;  %v5378_v14 = vadd.f32 -0.01, %v5351_v41  ;;  %v5406_v12 = vadd.f32 -0.01, %v1236_v19 }
 0x368   :  { %v1241_v5 = vpop.f32.mrf.mxu1 }
 0x369   :  { %v5389_v28 = vadd.f32 -0.01, %v1240_v46  ;;  %v1242_v7 = vadd.f32 %v1241_v5, %v5337_v4  ;;  %v5411_v5 = vadd.f32 0.01, %v1236_v19  ;;  %v5414_v11 = vadd.f32 0.01, %v1240_v46 }
 0x36a   :  { %v1243_v15 = vpop.f32.mrf.mxu1 }
 0x36b   :  { %v1244_v2 = vadd.f32 %v1243_v15, %v5334_v3  ;;  %v5401_v15 = vadd.f32 -0.01, %v1234_v35  ;;  %v5416_v17 = vadd.f32 -0.01, %v1242_v7  ;;  %v5418_v39 = vadd.f32 0.01, %v1242_v7 }
 0x36c   :  { %v1245_v61 = vpop.f32.mrf.mxu1 }
 0x36d   :  { %v5408_v34 = vadd.f32 -0.01, %v1244_v2  ;;  %v1246_v54 = vadd.f32 %v1245_v61, %v5337_v4  ;;  %v1330_v13 = vadd.f32 0.01, %v1244_v2 }
 0x36e   :  { %v1249_v48 = vpop.f32.mrf.mxu1 }
 0x36f   :  { %v1250_v18 = vadd.f32 %v1249_v48, %v5334_v3  ;;  %v1306_v19 = vmax.f32 %v5408_v34, 0.0  ;;  %v5423_v58 = vadd.f32 -0.01, %v1246_v54  ;;  %v5425_v46 = vadd.f32 0.01, %v1246_v54 }
 0x370   :  { %v1251_v38 = vpop.f32.mrf.mxu1 }
 0x371   :  { %v1332_v21 = vadd.f32 0.01, %v1250_v18  ;;  %v1252_v7 = vadd.f32 %v1251_v38, %v5337_v4 }
 0x372   :  { %v1253_v60 = vpop.f32.mrf.mxu1 }
 0x373   :  { %v1254_v29 = vadd.f32 %v1253_v60, %v5334_v3  ;;  %v3764_v60 = vadd.f32 -0.01, %v1250_v18  ;;  %v1356_v18 = vmin.f32 %v1332_v21, 0.0  ;;  %v3765_v44 = vadd.f32 -0.01, %v1252_v7 }
 0x374   :  { %v1255_v6 = vpop.f32.mrf.mxu1  ;;  %v1333_v38 = vadd.f32 0.01, %v1252_v7  ;;  %v1352_v7 = vmin.f32 %v5414_v11, 0.0  ;;  %v1353_v11 = vmin.f32 %v5418_v39, 0.0 }
 0x375   :  { %v1256_v35 = vadd.f32 %v1255_v6, %v5337_v4  ;;  %v3766_v16 = vadd.f32 -0.01, %v1254_v29  ;;  %v1334_v20 = vadd.f32 0.01, %v1254_v29  ;;  %v1308_v2 = vmax.f32 %v3764_v60, 0.0 }
 0x376   :  { %v1259_v33 = vpop.f32.mrf.mxu1  ;;  %v1357_v10 = vmin.f32 %v1333_v38, 0.0 }
 0x377   :  { %v1260_v22 = vadd.f32 %v1259_v33, %v5334_v3  ;;  %v3767_v25 = vadd.f32 -0.01, %v1256_v35  ;;  %v1335_v29 = vadd.f32 0.01, %v1256_v35  ;;  %v1310_v26 = vmax.f32 %v3766_v16, 0.0 }
 0x378   :  { %v1261_v61 = vpop.f32.mrf.mxu1  ;;  %v1358_v24 = vmin.f32 %v1334_v20, 0.0 }
 0x379   :  { %v1262_v48 = vadd.f32 %v1261_v61, %v5337_v4  ;;  %v3768_v27 = vadd.f32 -0.01, %v1260_v22  ;;  %v1336_v52 = vadd.f32 0.01, %v1260_v22  ;;  %v1311_v49 = vmax.f32 %v3767_v25, 0.0 }
 0x37a   :  { %v1263_v6 = vpop.f32.mrf.mxu1  ;;  %v1359_v60 = vmin.f32 %v1335_v29, 0.0  ;;  %v1380_v25 = vadd.f32 %v1356_v18, %v1308_v2  ;;  %v1346_v2 = vmin.f32 %v5384_v9, 0.0  ;;  %v1299_v9 = vmax.f32 %v5387_v59, 0.0 }
 0x37b   :  { %v1264_v33 = vadd.f32 %v1263_v6, %v5334_v3  ;;  %v3769_v34 = vadd.f32 -0.01, %v1262_v48  ;;  %v1337_v32 = vadd.f32 0.01, %v1262_v48  ;;  %v1312_v54 = vmax.f32 %v3768_v27, 0.0 }
 0x37c   :  { %v1265_v47 = vpop.f32.mrf.mxu1  ;;  %v1360_v31 = vmin.f32 %v1336_v52, 0.0  ;;  %v1354_v6 = vmin.f32 %v1330_v13, 0.0  ;;  %v1382_v48 = vadd.f32 %v1358_v24, %v1310_v26  ;;  %v1309_v52 = vmax.f32 %v3765_v44, 0.0 }
 0x37d   :  { %v3770_v37 = vadd.f32 -0.01, %v1264_v33  ;;  %v1338_v61 = vadd.f32 0.01, %v1264_v33  ;;  %v1266_v22 = vadd.f32 %v1265_v47, %v5337_v4  ;;  %v1313_v55 = vmax.f32 %v3769_v34, 0.0 }
 0x37e   :  { %v1361_v3 = vmin.f32 %v1337_v32, 0.0  ;;  %v1384_v40 = vadd.f32 %v1360_v31, %v1312_v54  ;;  %v1307_v47 = vmax.f32 %v5423_v58, 0.0  ;;  %v1383_v29 = vadd.f32 %v1359_v60, %v1311_v49 }
 0x37f   :  { %v1314_v36 = vmax.f32 %v3770_v37, 0.0  ;;  %v1362_v35 = vmin.f32 %v1338_v61, 0.0  ;;  %v3771_v16 = vadd.f32 -0.01, %v1266_v22  ;;  %v1339_v20 = vadd.f32 0.01, %v1266_v22 }
 0x380   :  { %v1355_v37 = vmin.f32 %v5425_v46, 0.0  ;;  %v1385_v32 = vadd.f32 %v1361_v3, %v1313_v55  ;;  %v1302_v13 = vmax.f32 %v5401_v15, 0.0  ;;  %v1350_v26 = vmin.f32 %v5404_v56, 0.0 }
 0x381   :  { %v1386_v27 = vadd.f32 %v1362_v35, %v1314_v36  ;;  %v1315_v33 = vmax.f32 %v3771_v16, 0.0  ;;  %v1363_v21 = vmin.f32 %v1339_v20, 0.0  ;;  %v1378_v31 = vadd.f32 %v1354_v6, %v1306_v19 }
 0x382   :  { %v1396_v36 = vpack.c.bf16 %v1382_v48, %v1380_v25  ;;  %v1305_v24 = vmax.f32 %v5416_v17, 0.0  ;;  %v1381_v44 = vadd.f32 %v1357_v10, %v1309_v52  ;;  %v1300_v49 = vmax.f32 %v5391_v1, 0.0 }
 0x383   :  { %v1398_v4 = vpack.c.bf16 %v1386_v27, %v1384_v40  ;;  %v1387_v34 = vadd.f32 %v1363_v21, %v1315_v33  ;;  %v1323_v40 = vadd.f32 0.01, %v5360_v57  ;;  %v1348_v55 = vmin.f32 %v5393_v63, 0.0  ;;  %v6992_v33 = vld [vmem:[#allocation37_spill] sm:$0xff] }
 0x384   :  { %v6990_v15 = vmax.f32 %v5389_v28, 0.0  ;;  %v1303_v56 = vmax.f32 %v5406_v12, 0.0  ;;  %v1351_v19 = vmin.f32 %v5411_v5, 0.0  ;;  %v1379_v17 = vadd.f32 %v1355_v37, %v1307_v47 }
 0x385   :  { %4257 = vmatprep.subr.bf16.mxu1 %v1398_v4  ;;  %v1399_v58 = vpack.c.bf16 %v1387_v34, %v1385_v32  ;;  %v1397_v39 = vpack.c.bf16 %v1383_v29, %v1381_v44  ;;  %v1298_v10 = vmax.f32 %v5380_v30, 0.0  ;;  %v1374_v57 = vadd.f32 %v1350_v26, %v1302_v13  ;;  %v4397_v29 = vld [vmem:[%s6827_s3 + $0x8] sm:$0xff]   ;;  %v4399_v32 = vld [vmem:[%s6827_s3 + $0x10] sm:$0xff]   ;;  %v4401_v26 = vld [vmem:[%s6827_s3 + $0x18] sm:$0xff]  }
 0x386   :  { %4258 = vmatpush3.bf16.msra.mxu1 %v1398_v4  ;;  %v1376_v46 = vadd.f32 %v1352_v7, %v6990_v15  ;;  %v1321_v63 = vadd.f32 0.01, %v5351_v41  ;;  %v1301_v28 = vmax.f32 %v5397_v43, 0.0  ;;  %v1349_v54 = vmin.f32 %v5399_v62, 0.0  ;;  %v4396_v34 = vld [vmem:[%s6828_s4 + $0x8] sm:$0xff]   ;;  %v4398_v13 = vld [vmem:[%s6828_s4 + $0x10] sm:$0xff]  }
 0x387   :  { %4259 = vmatprep.subr.bf16.mxu1 %v1396_v36  ;;  %4229 = vmatprep.subr.bf16.mxu0 %v1399_v58  ;;  %v1377_v61 = vadd.f32 %v1353_v11, %v1305_v24  ;;  %v1319_v12 = vadd.f32 0.01, %v5345_v0  ;;  %v1296_v5 = vmax.f32 %v5371_v51, 0.0  ;;  %v1344_v30 = vmin.f32 %v5373_v50, 0.0  ;;  %v4402_v24 = vld [vmem:[%s6828_s4 + $0x20] sm:$0xff]   ;;  %v4405_v11 = vld [vmem:[%s6827_s3 + $0x28] sm:$0xff]  }
 0x388   :  { %4230 = vmatpush3.bf16.msra.mxu0 %v1399_v58  ;;  %v1394_v1 = vpack.c.bf16 %v1378_v31, %v1376_v46  ;;  %v1372_v18 = vadd.f32 %v1348_v55, %v1300_v49  ;;  %v1347_v38 = vmin.f32 %v1323_v40, 0.0  ;;  %v1375_v22 = vadd.f32 %v1351_v19, %v1303_v56  ;;  %v4403_v31 = vld [vmem:[%s6827_s3 + $0x20] sm:$0xff]   ;;  %v4407_v44 = vld [vmem:[%s6827_s3 + $0x30] sm:$0xff]   ;;  %v4404_v58 = vld [vmem:[%s6828_s4 + $0x28] sm:$0xff]  }
 0x389   :  { %4231 = vmatprep.subr.bf16.mxu0 %v1397_v39  ;;  %v1395_v41 = vpack.c.bf16 %v1379_v17, %v1377_v61  ;;  %v1294_v43 = vmax.f32 %v5363_v53, 0.0  ;;  %v1342_v62 = vmin.f32 %v5365_v42, 0.0  ;;  %v1370_v60 = vadd.f32 %v1346_v2, %v1298_v10  ;;  %v6991_v53 = vld [vmem:[#allocation38_spill] sm:$0xff]  ;;  %v4406_v40 = vld [vmem:[%s6828_s4 + $0x30] sm:$0xff]   ;;  %v4409_v49 = vld [vmem:[%s6827_s3 + $0x38] sm:$0xff]  }
 0x38a   :  { %4260 = vmatpush3.bf16.msra.mxu1 %v1396_v36  ;;  %v1392_v35 = vpack.c.bf16 %v1374_v57, %v1372_v18  ;;  %v1317_v0 = vadd.f32 0.01, %v5341_v23  ;;  %v1297_v51 = vmax.f32 %v5378_v14, 0.0  ;;  %v1345_v3 = vmin.f32 %v1321_v63, 0.0  ;;  %v4400_v36 = vld [vmem:[%s6828_s4 + $0x18] sm:$0xff]   ;;  %v6993_v57 = vld [vmem:[#allocation32_spill] sm:$0xff] }
 0x38b   :  { %4261 = vmatprep.subr.bf16.mxu1 %v1394_v1  ;;  %v1373_v50 = vadd.f32 %v1349_v54, %v1301_v28  ;;  %v1292_v59 = vmax.f32 %v5348_v8, 0.0  ;;  %v1340_v16 = vmin.f32 %v5354_v45, 0.0  ;;  %v1368_v20 = vadd.f32 %v1344_v30, %v1296_v5  ;;  %v4408_v55 = vld [vmem:[%s6828_s4 + $0x38] sm:$0xff]   ;;  %v6994_v61 = vld [vmem:[#allocation16_spill] sm:$0xff] }
 0x38c   :  { %4232 = vmatpush3.bf16.msra.mxu0 %v1397_v39  ;;  %v1295_v6 = vmax.f32 %v6991_v53, 0.0  ;;  %v1343_v42 = vmin.f32 %v1319_v12, 0.0  ;;  %v1371_v48 = vadd.f32 %v1347_v38, %v1299_v9  ;;  %v1366_v52 = vadd.f32 %v1342_v62, %v1294_v43  ;;  %v6996_v9 = vld [vmem:[#allocation33_spill] sm:$0xff] }
 0x38d   :  { %4233 = vmatprep.subr.bf16.mxu0 %v1395_v41  ;;  %v1393_v27 = vpack.c.bf16 %v1375_v22, %v1373_v50  ;;  %v1390_v23 = vpack.c.bf16 %v1370_v60, %v1368_v20  ;;  %v1293_v14 = vmax.f32 %v6992_v33, 0.0  ;;  %v1341_v21 = vmin.f32 %v1317_v0, 0.0  ;;  %v6998_v60 = vld [vmem:[#allocation17_spill] sm:$0xff]  ;;  %v7000_v50 = vld [vmem:[#allocation14_spill] sm:$0xff] }
 0x38e   :  { %4262 = vmatpush3.bf16.msra.mxu1 %v1394_v1  ;;  %v1369_v7 = vadd.f32 %v1345_v3, %v1297_v51  ;;  %v1364_v47 = vadd.f32 %v1340_v16, %v1292_v59  ;;  %v1367_v8 = vadd.f32 %v1343_v42, %v1295_v6  ;;  %v7002_v16 = vld [vmem:[#allocation31_spill] sm:$0xff] }
 0x38f   :  { %4263 = vmatprep.subr.bf16.mxu1 %v1392_v35  ;;  %v1365_v4 = vadd.f32 %v1341_v21, %v1293_v14 }
 0x390   :  { %4234 = vmatpush3.bf16.msra.mxu0 %v1395_v41  ;;  %v1391_v45 = vpack.c.bf16 %v1371_v48, %v1369_v7  ;;  %v1388_v25 = vpack.c.bf16 %v1366_v52, %v1364_v47  ;;  %v6997_v41 = vld [vmem:[#allocation30_spill] sm:$0xff] }
 0x391   :  { %4235 = vmatprep.subr.bf16.mxu0 %v1393_v27  ;;  %v1389_v37 = vpack.c.bf16 %v1367_v8, %v1365_v4  ;;  %v7008_v4 = vld [vmem:[#allocation29_spill] sm:$0xff] }
 0x392   :  { %4264 = vmatpush3.bf16.msra.mxu1 %v1392_v35 }
 0x393   :  { %4265 = vmatprep.subr.bf16.mxu1 %v1390_v23 }
 0x394   :  { %4236 = vmatpush3.bf16.msra.mxu0 %v1393_v27  ;;  %v7003_v27 = vld [vmem:[#allocation15_spill] sm:$0xff] }
 0x395   :  { %4237 = vmatprep.subr.bf16.mxu0 %v1391_v45 }
 0x396   :  { %4266 = vmatpush3.bf16.msra.mxu1 %v1390_v23  ;;  %v7005_v23 = vld [vmem:[#allocation28_spill] sm:$0xff] }
 0x397   :  { %4267 = vmatprep.subr.bf16.mxu1 %v1388_v25 }
 0x398   :  { %4238 = vmatpush3.bf16.msra.mxu0 %v1391_v45  ;;  %v7006_v45 = vld [vmem:[#allocation12_spill] sm:$0xff] }
 0x399   :  { %4239 = vmatprep.subr.bf16.mxu0 %v1389_v37 }
 0x39a   :  { %4268 = vmatpush3.bf16.msra.mxu1 %v1388_v25 }
 0x39c   :  { %4240 = vmatpush3.bf16.msra.mxu0 %v1389_v37 }
 0x39d   :  { %4270 = vmatmul.mubr.msk.bf16.vlgmr.msra.gmra.mxu1 %vm1472_vm0, %v4397_v29 }
 0x39e   :  { %4273 = vmatprep.mubr.msk.bf16.mxu1 %vm1472_vm0, %v4399_v32 }
 0x39f   :  { %4242 = vmatmul.mubr.msk.bf16.vlgmr.msra.gmra.mxu0 %vm1472_vm0, %v4396_v34 }
 0x3a0   :  { %4245 = vmatprep.mubr.msk.bf16.mxu0 %vm1472_vm0, %v4398_v13  ;;  %v4412_v13 = vld [vmem:[%s6830_s13 + $0xe4] ss:$16 sps:$4 sm:$0xff]  }
 0x3a1   :  { %2279 = vmatprep.subr.bf16.mxu0 %v4412_v13 }
 0x3a5   :  { %4274 = vmatmul.mubr.msk.bf16.gmra.mxu1 %vm1472_vm0, %v4401_v26  ;;  %v4410_v26 = vld [vmem:[%s6830_s13 + $0xe0] ss:$16 sps:$4 sm:$0xff]  }
 0x3a6   :  { %4277 = vmatprep.mubr.msk.bf16.mxu1 %vm1472_vm0, %v4403_v31  ;;  %v4413_v31 = vld [vmem:[%s6830_s13 + $0xe8] ss:$16 sps:$4 sm:$0xff]   ;;  %2280 = vmatpush1.bf16.msra.mxu0 %v4410_v26  ;;  %v4442_v26 = vld [vmem:[%s6830_s13 + $0x44] ss:$16 sps:$4 sm:$0xff]  }
 0x3a7   :  { %4246 = vmatmul.mubr.msk.bf16.gmra.mxu0 %vm1472_vm0, %v4400_v36  ;;  %v4415_v36 = vld [vmem:[%s6830_s13 + $0xec] ss:$16 sps:$4 sm:$0xff]  }
 0x3a8   :  { %4249 = vmatprep.mubr.msk.bf16.mxu0 %vm1472_vm0, %v4402_v24  ;;  %v7009_v24 = vld [vmem:[#allocation26_spill] sm:$0xff]  ;;  %2392 = vmatprep.subr.bf16.mxu1 %v4415_v36 }
 0x3a9   :  { %2393 = vmatpush1.bf16.msra.mxu1 %v4413_v31  ;;  %v4445_v31 = vld [vmem:[%s6830_s13 + $0x4c] ss:$16 sps:$4 sm:$0xff]   ;;  %v4440_v36 = vld [vmem:[%s6830_s13 + $0x40] ss:$16 sps:$4 sm:$0xff]  }
 0x3ad   :  { %4278 = vmatmul.mubr.msk.bf16.gmra.mxu1 %vm1472_vm0, %v4405_v11 }
 0x3ae   :  { %4281 = vmatprep.mubr.msk.bf16.mxu1 %vm1472_vm0, %v4407_v44 }
 0x3af   :  { %4250 = vmatmul.mubr.msk.bf16.gmra.mxu0 %vm1472_vm0, %v4404_v58  ;;  %v7010_v58 = vld [vmem:[#allocation13_spill] sm:$0xff] }
 0x3b0   :  { %4253 = vmatprep.mubr.msk.bf16.mxu0 %vm1472_vm0, %v4406_v40 }
 0x3b5   :  { %4282 = vmatmul.mubr.msk.bf16.gmra.mxu1 %vm1472_vm0, %v4409_v49 }
 0x3b7   :  { %4254 = vmatmul.mubr.msk.bf16.gmra.mxu0 %vm1472_vm0, %v4408_v55 }
 0x45d   :  { %v4271_v15 = vpop.f32.mrf.mxu1 }
 0x45f   :  { %v1692_v46 = vpop.f32.mrf.mxu1  ;;  %v4243_v56 = vpop.f32.mrf.mxu0 }
 0x460   :  { %v1701_v54 = vadd.f32 %v4271_v15, %v4243_v56  ;;  %v4421_v56 = vld [vmem:[%s6830_s13 + $0xcc] ss:$16 sps:$4 sm:$0xff]  }
 0x461   :  { %v4272_v19 = vpop.f32.mrf.mxu1  ;;  %v1531_v17 = vpop.f32.mrf.mxu0  ;;  %2394 = vmatprep.subr.bf16.mxu1 %v4421_v56 }
 0x462   :  { %v1693_v39 = vadd.f32 %v1692_v46, %v1531_v17  ;;  %v1757_v43 = vadd.f32 %v1701_v54, %v6997_v41  ;;  %v4418_v46 = vld [vmem:[%s6830_s13 + $0xc4] ss:$16 sps:$4 sm:$0xff]   ;;  %v4419_v17 = vld [vmem:[%s6830_s13 + $0xc8] ss:$16 sps:$4 sm:$0xff]  }
 0x463   :  { %v1695_v10 = vpop.f32.mrf.mxu1  ;;  %v4244_v2 = vpop.f32.mrf.mxu0  ;;  %2281 = vmatprep.subr.bf16.mxu0 %v4418_v46  ;;  %2395 = vmatpush1.bf16.msra.mxu1 %v4419_v17  ;;  %v4451_v17 = vld [vmem:[%s6830_s13 + $0x2c] ss:$16 sps:$4 sm:$0xff]  }
 0x464   :  { %v1755_v1 = vadd.f32 %v1693_v39, %v6993_v57  ;;  %v1704_v62 = vadd.f32 %v4272_v19, %v4244_v2  ;;  %v5532_v59 = vadd.f32 %v7000_v50, %v1757_v43  ;;  %v4416_v19 = vld [vmem:[%s6830_s13 + $0xc0] ss:$16 sps:$4 sm:$0xff]   ;;  %v7014_v2 = vld [vmem:[#allocation27_spill] sm:$0xff] }
 0x465   :  { %v4275_v63 = vpop.f32.mrf.mxu1  ;;  %v1534_v28 = vpop.f32.mrf.mxu0  ;;  %v7012_v39 = vld [vmem:[#allocation10_spill] sm:$0xff]  ;;  %2282 = vmatpush1.bf16.msra.mxu0 %v4416_v19 }
 0x466   :  { %v5520_v12 = vadd.f32 %v6994_v61, %v1755_v1  ;;  %v1696_v5 = vadd.f32 %v1695_v10, %v1534_v28  ;;  %7001 = vst [vmem:[#allocation32_spill] sm:$0xff] %v5532_v59  ;;  %v1758_v20 = vadd.f32 %v1704_v62, %v7002_v16  ;;  %v1839_v21 = vmul.f32 %v5532_v59, %v5532_v59  ;;  %v4424_v61 = vld [vmem:[%s6830_s13 + $0xa4] ss:$16 sps:$4 sm:$0xff]   ;;  %v4428_v50 = vld [vmem:[%s6830_s13 + $0x80] ss:$16 sps:$4 sm:$0xff]  }
 0x467   :  { %v4247_v30 = vpop.f32.mrf.mxu0  ;;  %v1708_v18 = vpop.f32.mrf.mxu1  ;;  %2283 = vmatprep.subr.bf16.mxu0 %v4424_v61  ;;  %v4431_v16 = vld [vmem:[%s6830_s13 + $0x88] ss:$16 sps:$4 sm:$0xff]   ;;  %v4448_v19 = vld [vmem:[%s6830_s13 + $0x24] ss:$16 sps:$4 sm:$0xff]  }
 0x468   :  { %6995 = vst [vmem:[#allocation38_spill] sm:$0xff] %v5520_v12  ;;  %v1756_v38 = vadd.f32 %v1696_v5, %v6996_v9  ;;  %1789 = vadd.xlane.f32.xlu0 %v5520_v12  ;;  %v1837_v0 = vmul.f32 %v5520_v12, %v5520_v12  ;;  %v5539_v52 = vadd.f32 %v7003_v27, %v1758_v20  ;;  %v4427_v5 = vld [vmem:[%s6830_s13 + $0xac] ss:$16 sps:$4 sm:$0xff]  }
 0x469   :  { %v1547_v22 = vpop.f32.mrf.mxu0  ;;  %v4276_v3 = vpop.f32.mrf.mxu1  ;;  %v1717_v8 = vadd.f32 %v4275_v63, %v4247_v30  ;;  %v4422_v30 = vld [vmem:[%s6830_s13 + $0xa0] ss:$16 sps:$4 sm:$0xff]   ;;  %v7015_v9 = vld [vmem:[#allocation11_spill] sm:$0xff]  ;;  %2396 = vmatprep.subr.bf16.mxu1 %v4427_v5  ;;  %v4454_v5 = vld [vmem:[%s6830_s13 + $0x4] ss:$16 sps:$4 sm:$0xff]  }
 0x46a   :  { %v5526_v35 = vadd.f32 %v6998_v60, %v1756_v38  ;;  %v1709_v53 = vadd.f32 %v1708_v18, %v1547_v22  ;;  %7004 = vst [vmem:[#allocation16_spill] sm:$0xff] %v5539_v52  ;;  %v1840_v29 = vmul.f32 %v5539_v52, %v5539_v52  ;;  %v4425_v18 = vld [vmem:[%s6830_s13 + $0xa8] ss:$16 sps:$4 sm:$0xff]   ;;  %2284 = vmatpush1.bf16.msra.mxu0 %v4422_v30  ;;  %v4457_v30 = vld [vmem:[%s6830_s13 + $0xc] ss:$16 sps:$4 sm:$0xff]  }
 0x46b   :  { %v4248_v51 = vpop.f32.mrf.mxu0  ;;  %v1711_v48 = vpop.f32.mrf.mxu1  ;;  %v1761_v11 = vadd.f32 %v1717_v8, %v7009_v24  ;;  %v7017_v22 = vld [vmem:[#allocation25_spill] sm:$0xff]  ;;  %2397 = vmatpush1.bf16.msra.mxu1 %v4425_v18  ;;  %v7021_v8 = vld [vmem:[#allocation23_spill] sm:$0xff]  ;;  %v4452_v18 = vld [vmem:[%s6830_s13] ss:$16 sps:$4 sm:$0xff]  }
 0x46c   :  { %6999 = vst [vmem:[#allocation37_spill] sm:$0xff] %v5526_v35  ;;  %1791 = vadd.xlane.f32.xlu1 %v5526_v35  ;;  %1853 = vadd.xlane.f32.xlu0 %v1837_v0  ;;  %v1838_v6 = vmul.f32 %v5526_v35, %v5526_v35  ;;  %v1759_v33 = vadd.f32 %v1709_v53, %v7005_v23  ;;  %v7018_v53 = vld [vmem:[#allocation8_spill] sm:$0xff]  ;;  %v4443_v24 = vld [vmem:[%s6830_s13 + $0x48] ss:$16 sps:$4 sm:$0xff]  }
 0x46d   :  { %v1550_v42 = vpop.f32.mrf.mxu0  ;;  %v5546_v47 = vpop.f32.mrf.mxu1  ;;  %v1720_v44 = vadd.f32 %v4276_v3, %v4248_v51  ;;  %v5588_v10 = vadd.f32 %v7012_v39, %v1761_v11  ;;  %v4430_v51 = vld [vmem:[%s6830_s13 + $0x84] ss:$16 sps:$4 sm:$0xff]   ;;  %v4433_v3 = vld [vmem:[%s6830_s13 + $0x8c] ss:$16 sps:$4 sm:$0xff]   ;;  %v4446_v39 = vld [vmem:[%s6830_s13 + $0x20] ss:$16 sps:$4 sm:$0xff]  }
 0x46e   :  { %v1712_v14 = vadd.f32 %v1711_v48, %v1550_v42  ;;  %v5550_v25 = vadd.f32 %v7006_v45, %v1759_v33  ;;  %2285 = vmatprep.subr.bf16.mxu0 %v4430_v51  ;;  %v7020_v42 = vld [vmem:[#allocation24_spill] sm:$0xff]  ;;  %2398 = vmatprep.subr.bf16.mxu1 %v4433_v3  ;;  %v7024_v11 = vld [vmem:[#allocation6_spill] sm:$0xff] }
 0x46f   :  { %v5544_v7 = vpop.f32.mrf.mxu0  ;;  %v1724_v34 = vpop.f32.mrf.mxu1  ;;  %7013 = vst [vmem:[#allocation17_spill] sm:$0xff] %v5588_v10  ;;  %v1762_v57 = vadd.f32 %v1720_v44, %v7014_v2  ;;  %v1843_v62 = vmul.f32 %v5588_v10, %v5588_v10  ;;  %2286 = vmatpush1.bf16.msra.mxu0 %v4428_v50  ;;  %2399 = vmatpush1.bf16.msra.mxu1 %v4431_v16  ;;  %v4449_v2 = vld [vmem:[%s6830_s13 + $0x28] ss:$16 sps:$4 sm:$0xff]   ;;  %v4682_v50 = vmov 0  }
 0x470   :  { %1855 = vadd.xlane.f32.xlu1 %v1838_v6  ;;  %1793 = vadd.xlane.f32.xlu0 %v5532_v59  ;;  %7007 = vst [vmem:[#allocation33_spill] sm:$0xff] %v5550_v25  ;;  %v1760_v37 = vadd.f32 %v1712_v14, %v7008_v4  ;;  %v1841_v49 = vmul.f32 %v5550_v25, %v5550_v25  ;;  %v4436_v14 = vld [vmem:[%s6830_s13 + $0x64] ss:$16 sps:$4 sm:$0xff]   ;;  %v7033_v16 = vld [vmem:[#allocation19_spill] sm:$0xff] }
 0x471   :  { %v1563_v32 = vpop.f32.mrf.mxu0  ;;  %v4280_v15 = vpop.f32.mrf.mxu1  ;;  %v5607_v38 = vadd.f32 %v7015_v9, %v1762_v57  ;;  %v1733_v20 = vadd.f32 %v5546_v47, %v5544_v7  ;;  %v4434_v7 = vld [vmem:[%s6830_s13 + $0x60] ss:$16 sps:$4 sm:$0xff]   ;;  %2287 = vmatprep.subr.bf16.mxu0 %v4436_v14  ;;  %v4437_v47 = vld [vmem:[%s6830_s13 + $0x68] ss:$16 sps:$4 sm:$0xff]   ;;  %2311 = vmatprep.mubr.bf16.mxu0 %v4682_v50 }
 0x472   :  { %v5570_v40 = vadd.f32 %v7010_v58, %v1760_v37  ;;  %v1725_v1 = vadd.f32 %v1724_v34, %v1563_v32  ;;  %v7022_v37 = vld [vmem:[#allocation9_spill] sm:$0xff]  ;;  %v7026_v58 = vld [vmem:[#allocation22_spill] sm:$0xff]  ;;  %v7027_v57 = vld [vmem:[#allocation7_spill] sm:$0xff]  ;;  %2424 = vmatprep.mubr.bf16.mxu1 %v4682_v50 }
 0x473   :  { %v4252_v55 = vpop.f32.mrf.mxu0  ;;  %v1727_v54 = vpop.f32.mrf.mxu1  ;;  %7016 = vst [vmem:[#allocation14_spill] sm:$0xff] %v5607_v38  ;;  %v1844_v27 = vmul.f32 %v5607_v38, %v5607_v38  ;;  %v1765_v45 = vadd.f32 %v1733_v20, %v7021_v8  ;;  %2288 = vmatpush1.bf16.msra.mxu0 %v4434_v7  ;;  %v4455_v9 = vld [vmem:[%s6830_s13 + $0x8] ss:$16 sps:$4 sm:$0xff]  }
 0x474   :  { %1795 = vadd.xlane.f32.xlu1 %v5539_v52  ;;  %1857 = vadd.xlane.f32.xlu0 %v1839_v21  ;;  %7011 = vst [vmem:[#allocation30_spill] sm:$0xff] %v5570_v40  ;;  %v1842_v63 = vmul.f32 %v5570_v40, %v5570_v40  ;;  %v1763_v41 = vadd.f32 %v1725_v1, %v7017_v22  ;;  %v4439_v21 = vld [vmem:[%s6830_s13 + $0x6c] ss:$16 sps:$4 sm:$0xff]  }
 0x475   :  { %v1566_v28 = vpop.f32.mrf.mxu0  ;;  %v5614_v0 = vpop.f32.mrf.mxu1  ;;  %v1736_v4 = vadd.f32 %v4280_v15, %v4252_v55  ;;  %2400 = vmatprep.subr.bf16.mxu1 %v4439_v21  ;;  %2289 = vmatprep.subr.bf16.mxu0 %v4442_v26  ;;  %v5670_v44 = vadd.f32 %v7024_v11, %v1765_v45  ;;  %v7039_v21 = vld [vmem:[#allocation3_spill] sm:$0xff] }
 0x476   :  { %v1728_v43 = vadd.f32 %v1727_v54, %v1566_v28  ;;  %v5632_v6 = vadd.f32 %v7018_v53, %v1763_v41  ;;  %2401 = vmatpush1.bf16.msra.mxu1 %v4437_v47  ;;  %v7030_v41 = vld [vmem:[#allocation4_spill] sm:$0xff] }
 0x477   :  { %v5612_v60 = vpop.f32.mrf.mxu0  ;;  %v1740_v33 = vpop.f32.mrf.mxu1  ;;  %7025 = vst [vmem:[#allocation28_spill] sm:$0xff] %v5670_v44  ;;  %2402 = vmatprep.subr.bf16.mxu1 %v4445_v31  ;;  %2290 = vmatpush1.bf16.msra.mxu0 %v4440_v36  ;;  %v1847_v61 = vmul.f32 %v5670_v44, %v5670_v44 }
 0x478   :  { %1859 = vadd.xlane.f32.xlu1 %v1840_v29  ;;  %1797 = vadd.xlane.f32.xlu0 %v5550_v25  ;;  %7019 = vst [vmem:[#allocation31_spill] sm:$0xff] %v5632_v6  ;;  %v1764_v48 = vadd.f32 %v1728_v43, %v7020_v42  ;;  %v1845_v32 = vmul.f32 %v5632_v6, %v5632_v6 }
 0x479   :  { %v1579_v23 = vpop.f32.mrf.mxu0  ;;  %v4284_v13 = vpop.f32.mrf.mxu1  ;;  %2291 = vmatprep.subr.bf16.mxu0 %v4448_v19  ;;  %v1749_v22 = vadd.f32 %v5614_v0, %v5612_v60  ;;  %v7034_v0 = vld [vmem:[#allocation5_spill] sm:$0xff] }
 0x47a   :  { %v5652_v29 = vadd.f32 %v7022_v37, %v1764_v48  ;;  %v1741_v55 = vadd.f32 %v1740_v33, %v1579_v23  ;;  %2403 = vmatpush1.bf16.msra.mxu1 %v4443_v24  ;;  %v7036_v48 = vld [vmem:[#allocation2_spill] sm:$0xff] }
 0x47b   :  { %v4256_v34 = vpop.f32.mrf.mxu0  ;;  %v1743_v56 = vpop.f32.mrf.mxu1  ;;  %2404 = vmatprep.subr.bf16.mxu1 %v4451_v17  ;;  %2292 = vmatpush1.bf16.msra.mxu0 %v4446_v39  ;;  %v1769_v20 = vadd.f32 %v1749_v22, %v7033_v16  ;;  %v7038_v23 = vld [vmem:[#allocation18_spill] sm:$0xff] }
 0x47c   :  { %1799 = vadd.xlane.f32.xlu1 %v5570_v40  ;;  %1861 = vadd.xlane.f32.xlu0 %v1841_v49  ;;  %7023 = vst [vmem:[#allocation15_spill] sm:$0xff] %v5652_v29  ;;  %v1766_v49 = vadd.f32 %v1736_v4, %v7026_v58  ;;  %v1846_v15 = vmul.f32 %v5652_v29, %v5652_v29 }
 0x47d   :  { %v1582_v46 = vpop.f32.mrf.mxu0  ;;  %2293 = vmatprep.subr.bf16.mxu0 %v4454_v5  ;;  %v1752_v60 = vadd.f32 %v4284_v13, %v4256_v34 }
 0x47e   :  { %v5689_v1 = vadd.f32 %v7027_v57, %v1766_v49  ;;  %v1744_v54 = vadd.f32 %v1743_v56, %v1582_v46  ;;  %2405 = vmatpush1.bf16.msra.mxu1 %v4449_v2 }
 0x47f   :  { %2406 = vmatprep.subr.bf16.mxu1 %v4457_v30  ;;  %2294 = vmatpush1.bf16.msra.mxu0 %v4452_v18  ;;  %v1770_v33 = vadd.f32 %v1752_v60, %v7038_v23 }
 0x480   :  { %1863 = vadd.xlane.f32.xlu1 %v1842_v63  ;;  %1801 = vadd.xlane.f32.xlu0 %v5588_v10  ;;  %7028 = vst [vmem:[#allocation12_spill] sm:$0xff] %v5689_v1  ;;  %v7029_v63 = vld [vmem:[#allocation21_spill] sm:$0xff]  ;;  %v1848_v3 = vmul.f32 %v5689_v1, %v5689_v1 }
 0x481   :  { %v1767_v28 = vadd.f32 %v1741_v55, %v7029_v63  ;;  %v5733_v7 = vadd.f32 %v7039_v21, %v1770_v33 }
 0x482   :  { %2407 = vmatpush1.bf16.msra.mxu1 %v4455_v9 }
 0x483   :  { %v5710_v43 = vadd.f32 %v7030_v41, %v1767_v28  ;;  %7040 = vst [vmem:[#allocation10_spill] sm:$0xff] %v5733_v7  ;;  %v1852_v8 = vmul.f32 %v5733_v7, %v5733_v7 }
 0x484   :  { %1803 = vadd.xlane.f32.xlu1 %v5607_v38  ;;  %1865 = vadd.xlane.f32.xlu0 %v1843_v62  ;;  %v7032_v62 = vld [vmem:[#allocation20_spill] sm:$0xff] }
 0x485   :  { %7031 = vst [vmem:[#allocation29_spill] sm:$0xff] %v5710_v43  ;;  %v1768_v51 = vadd.f32 %v1744_v54, %v7032_v62  ;;  %v1849_v42 = vmul.f32 %v5710_v43, %v5710_v43 }
 0x487   :  { %v5719_v53 = vadd.f32 %v7034_v0, %v1768_v51 }
 0x488   :  { %1867 = vadd.xlane.f32.xlu1 %v1844_v27  ;;  %1805 = vadd.xlane.f32.xlu0 %v5632_v6  ;;  %v5726_v27 = vadd.f32 %v7036_v48, %v1769_v20 }
 0x489   :  { %7035 = vst [vmem:[#allocation26_spill] sm:$0xff] %v5719_v53  ;;  %v1850_v14 = vmul.f32 %v5719_v53, %v5719_v53 }
 0x48a   :  { %7037 = vst [vmem:[#allocation13_spill] sm:$0xff] %v5726_v27  ;;  %v1851_v47 = vmul.f32 %v5726_v27, %v5726_v27 }
 0x48c   :  { %1807 = vadd.xlane.f32.xlu1 %v5652_v29  ;;  %1869 = vadd.xlane.f32.xlu0 %v1845_v32 }
 0x490   :  { %1871 = vadd.xlane.f32.xlu1 %v1846_v15  ;;  %1809 = vadd.xlane.f32.xlu0 %v5670_v44 }
 0x494   :  { %1811 = vadd.xlane.f32.xlu1 %v5689_v1  ;;  %1873 = vadd.xlane.f32.xlu0 %v1847_v61 }
 0x498   :  { %1875 = vadd.xlane.f32.xlu1 %v1848_v3  ;;  %1813 = vadd.xlane.f32.xlu0 %v5710_v43 }
 0x49c   :  { %1815 = vadd.xlane.f32.xlu1 %v5719_v53  ;;  %1877 = vadd.xlane.f32.xlu0 %v1849_v42 }
 0x4a0   :  { %1879 = vadd.xlane.f32.xlu1 %v1850_v14  ;;  %1817 = vadd.xlane.f32.xlu0 %v5726_v27 }
 0x4a4   :  { %1819 = vadd.xlane.f32.xlu1 %v5733_v7  ;;  %1881 = vadd.xlane.f32.xlu0 %v1851_v47 }
 0x4a8   :  { %1883 = vadd.xlane.f32.xlu1 %v1852_v8 }
 0x4f1   :  { %v1790_v45 = vpop.xlane.xlu0 %1789 }
 0x4f2   :  { %v1821_v4 = vmul.f32 0.0078125, %v1790_v45 }
 0x4f4   :  { %v1901_v34 = vmul.f32 %v1821_v4, %v1821_v4  ;;  %v1949_v45 = vsub.f32 %v5520_v12, %v1821_v4 }
 0x4f5   :  { %v1792_v37 = vpop.xlane.xlu1 %1791  ;;  %v1854_v32 = vpop.xlane.xlu0 %1853 }
 0x4f6   :  { %v5740_v13 = vmul.f32 0.0078125, %v1792_v37  ;;  %v1885_v26 = vmul.f32 0.0078125, %v1854_v32 }
 0x4f8   :  { %v1917_v31 = vsub.f32 %v1885_v26, %v1901_v34  ;;  %v1902_v11 = vmul.f32 %v5740_v13, %v5740_v13  ;;  %v1950_v4 = vsub.f32 %v5526_v35, %v5740_v13 }
 0x4f9   :  { %v1856_v36 = vpop.xlane.xlu1 %1855  ;;  %v1794_v24 = vpop.xlane.xlu0 %1793 }
 0x4fa   :  { %v1933_v58 = vmax.f32 %v1917_v31, 0.0  ;;  %v1886_v49 = vmul.f32 0.0078125, %v1856_v36  ;;  %v5744_v55 = vmul.f32 0.0078125, %v1794_v24 }
 0x4fc   :  { %v1965_v15 = vadd.f32 1e-05, %v1933_v58  ;;  %v1918_v46 = vsub.f32 %v1886_v49, %v1902_v11  ;;  %v1903_v56 = vmul.f32 %v5744_v55, %v5744_v55  ;;  %v5770_v49 = vld [vmem:[%s6831_s11] ss:$0 sm:$0xff] }
 0x4fd   :  { %v1796_v19 = vpop.xlane.xlu1 %1795  ;;  %v1858_v17 = vpop.xlane.xlu0 %1857 }
 0x4fe   :  { %4522 = vrsqrt.f32 %v1965_v15  ;;  %v1934_v39 = vmax.f32 %v1918_v46, 0.0  ;;  %v5748_v2 = vmul.f32 0.0078125, %v1796_v19  ;;  %v1887_v57 = vmul.f32 0.0078125, %v1858_v17 }
 0x500   :  { %v1966_v63 = vadd.f32 1e-05, %v1934_v39  ;;  %v1919_v28 = vsub.f32 %v1887_v57, %v1903_v56  ;;  %v1904_v54 = vmul.f32 %v5748_v2, %v5748_v2 }
 0x501   :  { %v1860_v61 = vpop.xlane.xlu1 %1859  ;;  %v1798_v5 = vpop.xlane.xlu0 %1797 }
 0x502   :  { %4524 = vrsqrt.f32 %v1966_v63  ;;  %v1935_v30 = vmax.f32 %v1919_v28, 0.0  ;;  %v1888_v18 = vmul.f32 0.0078125, %v1860_v61  ;;  %v5752_v9 = vmul.f32 0.0078125, %v1798_v5  ;;  %v5782_v5 = vld [vmem:[%s6832_s12] ss:$0 sm:$0xff] }
 0x504   :  { %v1967_v22 = vadd.f32 1e-05, %v1935_v30  ;;  %v1920_v41 = vsub.f32 %v1888_v18, %v1904_v54  ;;  %v1905_v62 = vmul.f32 %v5752_v9, %v5752_v9  ;;  %v1951_v30 = vsub.f32 %v5532_v59, %v5744_v55 }
 0x505   :  { %v1800_v51 = vpop.xlane.xlu1 %1799  ;;  %v1862_v3 = vpop.xlane.xlu0 %1861 }
 0x506   :  { %4526 = vrsqrt.f32 %v1967_v22  ;;  %v1936_v16 = vmax.f32 %v1920_v41, 0.0  ;;  %v5756_v20 = vmul.f32 0.0078125, %v1800_v51  ;;  %v1889_v60 = vmul.f32 0.0078125, %v1862_v3 }
 0x508   :  { %v1968_v0 = vadd.f32 1e-05, %v1936_v16  ;;  %v1921_v42 = vsub.f32 %v1889_v60, %v1905_v62  ;;  %v1906_v48 = vmul.f32 %v5756_v20, %v5756_v20 }
 0x509   :  { %v1864_v23 = vpop.xlane.xlu1 %1863  ;;  %v1802_v33 = vpop.xlane.xlu0 %1801 }
 0x50a   :  { %4528 = vrsqrt.f32 %v1968_v0  ;;  %v1937_v14 = vmax.f32 %v1921_v42, 0.0  ;;  %v1890_v21 = vmul.f32 0.0078125, %v1864_v23  ;;  %v5760_v47 = vmul.f32 0.0078125, %v1802_v33 }
 0x50b   :  { %v4523_v8 = vpop.eup %4522  ;;  %v1952_v33 = vsub.f32 %v5539_v52, %v5748_v2 }
 0x50c   :  { %v1969_v37 = vadd.f32 1e-05, %v1937_v14  ;;  %v1922_v32 = vsub.f32 %v1890_v21, %v1906_v48  ;;  %v1907_v34 = vmul.f32 %v5760_v47, %v5760_v47  ;;  %v1997_v36 = vmul.f32 %v4523_v8, %v1949_v45 }
 0x50d   :  { %v1804_v26 = vpop.xlane.xlu1 %1803  ;;  %v1866_v31 = vpop.xlane.xlu0 %1865 }
 0x50e   :  { %4530 = vrsqrt.f32 %v1969_v37  ;;  %v1938_v24 = vmax.f32 %v1922_v32, 0.0  ;;  %v5765_v11 = vmul.f32 0.0078125, %v1804_v26  ;;  %v1891_v58 = vmul.f32 0.0078125, %v1866_v31 }
 0x50f   :  { %v4525_v15 = vpop.eup %4524  ;;  %v2019_v63 = vmul.f32 %v5770_v49, %v1997_v36 }
 0x510   :  { %v1970_v46 = vadd.f32 1e-05, %v1938_v24  ;;  %v1923_v56 = vsub.f32 %v1891_v58, %v1907_v34  ;;  %v1908_v19 = vmul.f32 %v5765_v11, %v5765_v11  ;;  %v1998_v57 = vmul.f32 %v4525_v15, %v1950_v4 }
 0x511   :  { %v1868_v17 = vpop.xlane.xlu1 %1867  ;;  %v1806_v39 = vpop.xlane.xlu0 %1805  ;;  %v2041_v16 = vadd.f32 %v5782_v5, %v2019_v63  ;;  %v1953_v58 = vsub.f32 %v5550_v25, %v5752_v9 }
 0x512   :  { %4532 = vrsqrt.f32 %v1970_v46  ;;  %v1939_v28 = vmax.f32 %v1923_v56, 0.0  ;;  %v1892_v54 = vmul.f32 0.0078125, %v1868_v17  ;;  %v5777_v61 = vmul.f32 0.0078125, %v1806_v39 }
 0x513   :  { %v4527_v13 = vpop.eup %4526  ;;  %v2020_v18 = vmul.f32 %v5770_v49, %v1998_v57 }
 0x514   :  { %v1971_v22 = vadd.f32 1e-05, %v1939_v28  ;;  %v1924_v41 = vsub.f32 %v1892_v54, %v1908_v19  ;;  %v1909_v62 = vmul.f32 %v5777_v61, %v5777_v61  ;;  %v1999_v0 = vmul.f32 %v4527_v13, %v1951_v30 }
 0x515   :  { %v1808_v51 = vpop.xlane.xlu1 %1807  ;;  %v1870_v3 = vpop.xlane.xlu0 %1869  ;;  %v2042_v60 = vadd.f32 %v5782_v5, %v2020_v18  ;;  %v1954_v30 = vsub.f32 %v5570_v40, %v5756_v20 }
 0x516   :  { %4534 = vrsqrt.f32 %v1971_v22  ;;  %v1940_v42 = vmax.f32 %v1924_v41, 0.0  ;;  %v5791_v48 = vmul.f32 0.0078125, %v1808_v51  ;;  %v1893_v23 = vmul.f32 0.0078125, %v1870_v3 }
 0x517   :  { %v4529_v55 = vpop.eup %4528  ;;  %v2057_v14 = vpack.c.bf16 %v2042_v60, %v2041_v16  ;;  %v2021_v26 = vmul.f32 %v5770_v49, %v1999_v0 }
 0x518   :  { %v1972_v21 = vadd.f32 1e-05, %v1940_v42  ;;  %v1925_v8 = vsub.f32 %v1893_v23, %v1909_v62  ;;  %v1910_v45 = vmul.f32 %v5791_v48, %v5791_v48  ;;  %v2000_v34 = vmul.f32 %v4529_v55, %v1952_v33 }
 0x519   :  { %2312 = vmatmul.mubr.bf16.vlgmr.msra.gmra.mxu0 %v2057_v14  ;;  %2425 = vmatmul.mubr.bf16.vlgmr.msra.gmra.mxu1 %v2057_v14  ;;  %v1872_v37 = vpop.xlane.xlu1 %1871  ;;  %v1810_v32 = vpop.xlane.xlu0 %1809  ;;  %v2043_v39 = vadd.f32 %v5782_v5, %v2021_v26  ;;  %v1955_v55 = vsub.f32 %v5588_v10, %v5760_v47 }
 0x51a   :  { %4536 = vrsqrt.f32 %v1972_v21  ;;  %v1941_v31 = vmax.f32 %v1925_v8, 0.0  ;;  %v1894_v36 = vmul.f32 0.0078125, %v1872_v37  ;;  %v5798_v24 = vmul.f32 0.0078125, %v1810_v32  ;;  %2321 = vmatprep.mubr.bf16.mxu0 %v4682_v50  ;;  %2434 = vmatprep.mubr.bf16.mxu1 %v4682_v50 }
 0x51b   :  { %v4531_v2 = vpop.eup %4530  ;;  %v2022_v15 = vmul.f32 %v5770_v49, %v2000_v34 }
 0x51c   :  { %v1973_v4 = vadd.f32 1e-05, %v1941_v31  ;;  %v1926_v46 = vsub.f32 %v1894_v36, %v1910_v45  ;;  %v1911_v56 = vmul.f32 %v5798_v24, %v5798_v24  ;;  %v2001_v63 = vmul.f32 %v4531_v2, %v1953_v58 }
 0x51d   :  { %v1812_v19 = vpop.xlane.xlu1 %1811  ;;  %v1874_v17 = vpop.xlane.xlu0 %1873  ;;  %v2044_v57 = vadd.f32 %v5782_v5, %v2022_v15  ;;  %v1956_v58 = vsub.f32 %v5607_v38, %v5765_v11 }
 0x51e   :  { %4538 = vrsqrt.f32 %v1973_v4  ;;  %v1942_v28 = vmax.f32 %v1926_v46, 0.0  ;;  %v5809_v54 = vmul.f32 0.0078125, %v1812_v19  ;;  %v1895_v13 = vmul.f32 0.0078125, %v1874_v17 }
 0x51f   :  { %v4533_v9 = vpop.eup %4532  ;;  %v2058_v18 = vpack.c.bf16 %v2044_v57, %v2043_v39  ;;  %v2023_v60 = vmul.f32 %v5770_v49, %v2001_v63 }
 0x520   :  { %v1974_v22 = vadd.f32 1e-05, %v1942_v28  ;;  %v1927_v41 = vsub.f32 %v1895_v13, %v1911_v56  ;;  %v1912_v62 = vmul.f32 %v5809_v54, %v5809_v54  ;;  %v2002_v16 = vmul.f32 %v4533_v9, %v1954_v30 }
 0x521   :  { %2322 = vmatmul.mubr.bf16.gmra.mxu0 %v2058_v18  ;;  %2435 = vmatmul.mubr.bf16.gmra.mxu1 %v2058_v18  ;;  %v1876_v51 = vpop.xlane.xlu1 %1875  ;;  %v1814_v3 = vpop.xlane.xlu0 %1813  ;;  %v2045_v32 = vadd.f32 %v5782_v5, %v2023_v60  ;;  %v1957_v9 = vsub.f32 %v5632_v6, %v5777_v61 }
 0x522   :  { %4540 = vrsqrt.f32 %v1974_v22  ;;  %v1943_v0 = vmax.f32 %v1927_v41, 0.0  ;;  %v1896_v42 = vmul.f32 0.0078125, %v1876_v51  ;;  %v5816_v23 = vmul.f32 0.0078125, %v1814_v3  ;;  %2331 = vmatprep.mubr.bf16.mxu0 %v4682_v50  ;;  %2444 = vmatprep.mubr.bf16.mxu1 %v4682_v50 }
 0x523   :  { %v4535_v20 = vpop.eup %4534  ;;  %v2024_v33 = vmul.f32 %v5770_v49, %v2002_v16 }
 0x524   :  { %v1975_v14 = vadd.f32 1e-05, %v1943_v0  ;;  %v1928_v21 = vsub.f32 %v1896_v42, %v1912_v62  ;;  %v1913_v8 = vmul.f32 %v5816_v23, %v5816_v23  ;;  %v2003_v26 = vmul.f32 %v4535_v20, %v1955_v55 }
 0x525   :  { %v1816_v45 = vpop.xlane.xlu1 %1815  ;;  %v1878_v37 = vpop.xlane.xlu0 %1877  ;;  %v2046_v34 = vadd.f32 %v5782_v5, %v2024_v33  ;;  %v1958_v55 = vsub.f32 %v5652_v29, %v5791_v48 }
 0x526   :  { %4542 = vrsqrt.f32 %v1975_v14  ;;  %v1944_v31 = vmax.f32 %v1928_v21, 0.0  ;;  %v5827_v36 = vmul.f32 0.0078125, %v1816_v45  ;;  %v1897_v2 = vmul.f32 0.0078125, %v1878_v37 }
 0x527   :  { %v4537_v47 = vpop.eup %4536  ;;  %v2059_v15 = vpack.c.bf16 %v2046_v34, %v2045_v32  ;;  %v2025_v57 = vmul.f32 %v5770_v49, %v2003_v26 }
 0x528   :  { %v1976_v4 = vadd.f32 1e-05, %v1944_v31  ;;  %v1929_v46 = vsub.f32 %v1897_v2, %v1913_v8  ;;  %v1914_v56 = vmul.f32 %v5827_v36, %v5827_v36  ;;  %v2004_v39 = vmul.f32 %v4537_v47, %v1956_v58 }
 0x529   :  { %2332 = vmatmul.mubr.bf16.gmra.mxu0 %v2059_v15  ;;  %2445 = vmatmul.mubr.bf16.gmra.mxu1 %v2059_v15  ;;  %v1880_v19 = vpop.xlane.xlu1 %1879  ;;  %v1818_v17 = vpop.xlane.xlu0 %1817  ;;  %v2047_v3 = vadd.f32 %v5782_v5, %v2025_v57  ;;  %v1959_v8 = vsub.f32 %v5670_v44, %v5798_v24 }
 0x52a   :  { %4544 = vrsqrt.f32 %v1976_v4  ;;  %v1945_v63 = vmax.f32 %v1929_v46, 0.0  ;;  %v1898_v28 = vmul.f32 0.0078125, %v1880_v19  ;;  %v5834_v13 = vmul.f32 0.0078125, %v1818_v17  ;;  %2341 = vmatprep.mubr.bf16.mxu0 %v4682_v50  ;;  %2454 = vmatprep.mubr.bf16.mxu1 %v4682_v50 }
 0x52b   :  { %v4539_v11 = vpop.eup %4538  ;;  %v2026_v30 = vmul.f32 %v5770_v49, %v2004_v39  ;;  %v1960_v46 = vsub.f32 %v5689_v1, %v5809_v54 }
 0x52c   :  { %v1977_v18 = vadd.f32 1e-05, %v1945_v63  ;;  %v1930_v22 = vsub.f32 %v1898_v28, %v1914_v56  ;;  %v1915_v41 = vmul.f32 %v5834_v13, %v5834_v13  ;;  %v2005_v60 = vmul.f32 %v4539_v11, %v1957_v9 }
 0x52d   :  { %v1820_v62 = vpop.xlane.xlu1 %1819  ;;  %v1882_v51 = vpop.xlane.xlu0 %1881  ;;  %v2048_v16 = vadd.f32 %v5782_v5, %v2026_v30  ;;  %v1961_v28 = vsub.f32 %v5710_v43, %v5816_v23 }
 0x52e   :  { %4546 = vrsqrt.f32 %v1977_v18  ;;  %v1946_v0 = vmax.f32 %v1930_v22, 0.0  ;;  %v5845_v42 = vmul.f32 0.0078125, %v1820_v62  ;;  %v1899_v20 = vmul.f32 0.0078125, %v1882_v51 }
 0x52f   :  { %v4541_v61 = vpop.eup %4540  ;;  %v2060_v33 = vpack.c.bf16 %v2048_v16, %v2047_v3  ;;  %v2027_v32 = vmul.f32 %v5770_v49, %v2005_v60  ;;  %v1962_v22 = vsub.f32 %v5719_v53, %v5827_v36  ;;  %v1963_v3 = vsub.f32 %v5726_v27, %v5834_v13 }
 0x530   :  { %v1978_v14 = vadd.f32 1e-05, %v1946_v0  ;;  %v1931_v21 = vsub.f32 %v1899_v20, %v1915_v41  ;;  %v2006_v37 = vmul.f32 %v4541_v61, %v1958_v55  ;;  %v1916_v34 = vmul.f32 %v5845_v42, %v5845_v42 }
 0x531   :  { %2342 = vmatmul.mubr.bf16.gmra.mxu0 %v2060_v33  ;;  %2455 = vmatmul.mubr.bf16.gmra.mxu1 %v2060_v33  ;;  %v1884_v45 = vpop.xlane.xlu1 %1883  ;;  %v2049_v15 = vadd.f32 %v5782_v5, %v2027_v32  ;;  %v1964_v61 = vsub.f32 %v5733_v7, %v5845_v42  ;;  %v4458_v42 = vld [vmem:[%s6833_s15 + $0x78] sm:$0xff]  }
 0x532   :  { %4548 = vrsqrt.f32 %v1978_v14  ;;  %v1947_v26 = vmax.f32 %v1931_v21, 0.0  ;;  %v1900_v31 = vmul.f32 0.0078125, %v1884_v45  ;;  %2351 = vmatprep.mubr.bf16.mxu0 %v4682_v50  ;;  %2464 = vmatprep.mubr.bf16.mxu1 %v4682_v50  ;;  %v2028_v2 = vmul.f32 %v5770_v49, %v2006_v37  ;;  %v4459_v32 = vld [vmem:[%s6833_s15 + $0x38] sm:$0xff]  }
 0x533   :  { %v4543_v48 = vpop.eup %4542  ;;  %4045 = vmatprep.subr.bf16.mxu0 %v4458_v42 }
 0x534   :  { %v1979_v24 = vadd.f32 1e-05, %v1947_v26  ;;  %v1932_v47 = vsub.f32 %v1900_v31, %v1916_v34  ;;  %v2007_v58 = vmul.f32 %v4543_v48, %v1959_v8  ;;  %v2050_v4 = vadd.f32 %v5782_v5, %v2028_v2  ;;  %4046 = vmatpush3.bf16.msra.mxu0 %v4459_v32  ;;  %v4463_v34 = vld [vmem:[%s6833_s15 + $0x30] sm:$0xff]   ;;  %v4466_v48 = vld [vmem:[%s6833_s15 + $0x68] sm:$0xff]  }
 0x535   :  { %v4464_v26 = vld [vmem:[%s6833_s15 + $0xf0] sm:$0xff]   ;;  %v4467_v2 = vld [vmem:[%s6833_s15 + $0xe8] sm:$0xff]  }
 0x536   :  { %4550 = vrsqrt.f32 %v1979_v24  ;;  %v1948_v56 = vmax.f32 %v1932_v47, 0.0  ;;  %v2061_v17 = vpack.c.bf16 %v2050_v4, %v2049_v15  ;;  %v2029_v63 = vmul.f32 %v5770_v49, %v2007_v58  ;;  %v4465_v31 = vld [vmem:[%s6833_s15 + $0xb0] sm:$0xff]   ;;  %v4468_v24 = vld [vmem:[%s6833_s15 + $0x28] sm:$0xff]   ;;  %v4470_v58 = vld [vmem:[%s6833_s15 + $0x60] sm:$0xff]  }
 0x537   :  { %v4545_v19 = vpop.eup %4544  ;;  %v4469_v47 = vld [vmem:[%s6833_s15 + $0xa8] sm:$0xff]   ;;  %v4471_v15 = vld [vmem:[%s6833_s15 + $0xe0] sm:$0xff]  }
 0x538   :  { %v1980_v39 = vadd.f32 1e-05, %v1948_v56  ;;  %v2008_v57 = vmul.f32 %v4545_v19, %v1960_v46  ;;  %v2051_v9 = vadd.f32 %v5782_v5, %v2029_v63  ;;  %v4472_v4 = vld [vmem:[%s6833_s15 + $0x20] sm:$0xff]   ;;  %v4474_v56 = vld [vmem:[%s6833_s15 + $0x58] sm:$0xff]   ;;  %v4479_v63 = vld [vmem:[%s6833_s15 + $0xd0] sm:$0xff]  }
 0x539   :  { %2352 = vmatmul.mubr.bf16.gmra.mxu0 %v2061_v17  ;;  %2465 = vmatmul.mubr.bf16.gmra.mxu1 %v2061_v17  ;;  %v4473_v46 = vld [vmem:[%s6833_s15 + $0xa0] sm:$0xff]   ;;  %v4475_v19 = vld [vmem:[%s6833_s15 + $0xd8] sm:$0xff]  }
 0x53a   :  { %4552 = vrsqrt.f32 %v1980_v39  ;;  %2361 = vmatprep.mubr.bf16.mxu0 %v4682_v50  ;;  %2474 = vmatprep.mubr.bf16.mxu1 %v4682_v50  ;;  %v2030_v54 = vmul.f32 %v5770_v49, %v2008_v57  ;;  %v4476_v17 = vld [vmem:[%s6833_s15 + $0x18] sm:$0xff]   ;;  %v4478_v57 = vld [vmem:[%s6833_s15 + $0x50] sm:$0xff]  }
 0x53b   :  { %v4547_v11 = vpop.eup %4546  ;;  %v4477_v39 = vld [vmem:[%s6833_s15 + $0x98] sm:$0xff]  }
 0x53c   :  { %v2052_v30 = vadd.f32 %v5782_v5, %v2030_v54  ;;  %v2009_v18 = vmul.f32 %v4547_v11, %v1961_v28  ;;  %v4480_v28 = vld [vmem:[%s6833_s15 + $0x10] sm:$0xff]   ;;  %v4482_v11 = vld [vmem:[%s6833_s15 + $0x48] sm:$0xff]  }
 0x53d   :  { %v4481_v54 = vld [vmem:[%s6833_s15 + $0x90] sm:$0xff]  }
 0x53e   :  { %v2062_v41 = vpack.c.bf16 %v2052_v30, %v2051_v9  ;;  %v2031_v23 = vmul.f32 %v5770_v49, %v2009_v18  ;;  %v4483_v9 = vld [vmem:[%s6833_s15 + $0xc8] sm:$0xff]  }
 0x53f   :  { %v4549_v62 = vpop.eup %4548  ;;  %v4484_v30 = vld [vmem:[%s6833_s15 + $0x8] sm:$0xff]  }
 0x540   :  { %v2010_v51 = vmul.f32 %v4549_v62, %v1962_v22  ;;  %v2053_v0 = vadd.f32 %v5782_v5, %v2031_v23  ;;  %v4485_v18 = vld [vmem:[%s6833_s15 + $0x88] sm:$0xff]   ;;  %v4486_v22 = vld [vmem:[%s6833_s15 + $0x40] sm:$0xff]  }
 0x541   :  { %2362 = vmatmul.mubr.bf16.gmra.mxu0 %v2062_v41  ;;  %2475 = vmatmul.mubr.bf16.gmra.mxu1 %v2062_v41  ;;  %v4487_v41 = vld [vmem:[%s6833_s15 + $0xc0] sm:$0xff]  }
 0x542   :  { %2371 = vmatprep.mubr.bf16.mxu0 %v4682_v50  ;;  %2484 = vmatprep.mubr.bf16.mxu1 %v4682_v50  ;;  %v2032_v16 = vmul.f32 %v5770_v49, %v2010_v51  ;;  %v4488_v62 = vld [vmem:[%s6833_s15] sm:$0xff]  }
 0x543   :  { %v4551_v60 = vpop.eup %4550  ;;  %v4489_v51 = vld [vmem:[%s6833_s15 + $0x80] sm:$0xff]  }
 0x544   :  { %v2054_v36 = vadd.f32 %v5782_v5, %v2032_v16  ;;  %v2011_v20 = vmul.f32 %v4551_v60, %v1963_v3  ;;  %v7041_v23 = vld [vmem:[#allocation34_spill] sm:$0xff] }
 0x545   :  { %v2109_v3 = vsub.s32 2, %v7041_v23  ;;  %v2097_v16 = vld [vmem:[%s6834_s14] sm:$0xf]  ;;  %v2113_v60 = vsub.s32 3, %v7041_v23 }
 0x546   :  { %v2063_v55 = vpack.c.bf16 %v2054_v36, %v2053_v0  ;;  %v2033_v13 = vmul.f32 %v5770_v49, %v2011_v20  ;;  %v7042_v0 = vld [vmem:[#allocation36_spill] sm:$0xff] }
 0x547   :  { %v4553_v33 = vpop.eup %4552  ;;  %v5989_v36 = vrot.slane %v2097_v16, %v7042_v0  ;;  %v5991_v20 = vrot.slane %v2097_v16, %v2109_v3 }
 0x548   :  { %v2012_v14 = vmul.f32 %v4553_v33, %v1964_v61  ;;  %v2055_v8 = vadd.f32 %v5782_v5, %v2033_v13  ;;  %v7043_v61 = vld [vmem:[#allocation35_spill] sm:$0xff]  ;;  %v5996_v13 = vrot.slane %v2097_v16, %v2113_v60 }
 0x549   :  { %2372 = vmatmul.mubr.bf16.gmra.mxu0 %v2063_v55  ;;  %2485 = vmatmul.mubr.bf16.gmra.mxu1 %v2063_v55  ;;  %v5994_v55 = vrot.slane %v2097_v16, %v7043_v61 }
 0x54a   :  { %2381 = vmatprep.mubr.bf16.mxu0 %v4682_v50  ;;  %2494 = vmatprep.mubr.bf16.mxu1 %v4682_v50  ;;  %v2034_v21 = vmul.f32 %v5770_v49, %v2012_v14  ;;  %v4460_v50 = vld [vmem:[%s6833_s15 + $0xf8] sm:$0xff]  }
 0x54b   :  { %v4461_v49 = vld [vmem:[%s6833_s15 + $0xb8] sm:$0xff]   ;;  %4109 = vmatprep.subr.bf16.mxu1 %v4460_v50 }
 0x54c   :  { %v2056_v45 = vadd.f32 %v5782_v5, %v2034_v21  ;;  %4110 = vmatpush3.bf16.msra.mxu1 %v4461_v49  ;;  %v4462_v5 = vld [vmem:[%s6833_s15 + $0x70] sm:$0xff]  }
 0x54d   :  { %4047 = vmatprep.subr.bf16.mxu0 %v4462_v5  ;;  %4111 = vmatprep.subr.bf16.mxu1 %v4464_v26 }
 0x54e   :  { %v2064_v37 = vpack.c.bf16 %v2056_v45, %v2055_v8  ;;  %4048 = vmatpush3.bf16.msra.mxu0 %v4463_v34 }
 0x54f   :  { %4049 = vmatprep.subr.bf16.mxu0 %v4466_v48 }
 0x550   :  { %4112 = vmatpush3.bf16.msra.mxu1 %v4465_v31 }
 0x551   :  { %2382 = vmatmul.mubr.bf16.gmra.mxu0 %v2064_v37  ;;  %2495 = vmatmul.mubr.bf16.gmra.mxu1 %v2064_v37 }
 0x552   :  { %4113 = vmatprep.subr.bf16.mxu1 %v4467_v2  ;;  %4050 = vmatpush3.bf16.msra.mxu0 %v4468_v24 }
 0x553   :  { %4051 = vmatprep.subr.bf16.mxu0 %v4470_v58 }
 0x554   :  { %4114 = vmatpush3.bf16.msra.mxu1 %v4469_v47 }
 0x555   :  { %4115 = vmatprep.subr.bf16.mxu1 %v4471_v15 }
 0x556   :  { %4052 = vmatpush3.bf16.msra.mxu0 %v4472_v4 }
 0x557   :  { %4053 = vmatprep.subr.bf16.mxu0 %v4474_v56 }
 0x558   :  { %4116 = vmatpush3.bf16.msra.mxu1 %v4473_v46 }
 0x559   :  { %4117 = vmatprep.subr.bf16.mxu1 %v4475_v19 }
 0x55a   :  { %4054 = vmatpush3.bf16.msra.mxu0 %v4476_v17 }
 0x55b   :  { %4055 = vmatprep.subr.bf16.mxu0 %v4478_v57 }
 0x55c   :  { %4118 = vmatpush3.bf16.msra.mxu1 %v4477_v39 }
 0x55d   :  { %4119 = vmatprep.subr.bf16.mxu1 %v4479_v63 }
 0x55e   :  { %4056 = vmatpush3.bf16.msra.mxu0 %v4480_v28 }
 0x55f   :  { %4057 = vmatprep.subr.bf16.mxu0 %v4482_v11 }
 0x560   :  { %4120 = vmatpush3.bf16.msra.mxu1 %v4481_v54 }
 0x561   :  { %4121 = vmatprep.subr.bf16.mxu1 %v4483_v9 }
 0x562   :  { %4058 = vmatpush3.bf16.msra.mxu0 %v4484_v30 }
 0x563   :  { %4059 = vmatprep.subr.bf16.mxu0 %v4486_v22 }
 0x564   :  { %4122 = vmatpush3.bf16.msra.mxu1 %v4485_v18 }
 0x565   :  { %4123 = vmatprep.subr.bf16.mxu1 %v4487_v41 }
 0x566   :  { %4060 = vmatpush3.bf16.msra.mxu0 %v4488_v62 }
 0x568   :  { %4124 = vmatpush3.bf16.msra.mxu1 %v4489_v51 }
 0x5d9   :  { %v2313_v33 = vpop.f32.mrf.mxu0  ;;  %v2426_v14 = vpop.f32.mrf.mxu1 }
 0x5da   :  { %v2314_v21 = vadd.f32 %v2313_v33, %v5989_v36  ;;  %v2427_v8 = vadd.f32 %v2426_v14, %v5991_v20 }
 0x5db   :  { %v2315_v45 = vpop.f32.mrf.mxu0  ;;  %v2428_v37 = vpop.f32.mrf.mxu1 }
 0x5dc   :  { %v2569_v42 = vmul.f32 0.044715, %v2314_v21  ;;  %v2571_v32 = vmul.f32 0.044715, %v2427_v8  ;;  %v6001_v50 = vadd.f32 %v2315_v45, %v5994_v55  ;;  %v6004_v49 = vadd.f32 %v2428_v37, %v5996_v13 }
 0x5dd   :  { %v2317_v5 = vpop.f32.mrf.mxu0  ;;  %v2430_v34 = vpop.f32.mrf.mxu1  ;;  %v6016_v18 = vmul.f32 0.5, %v2314_v21  ;;  %v6018_v62 = vmul.f32 0.5, %v2427_v8 }
 0x5de   :  { %v2633_v26 = vmul.f32 %v2569_v42, %v2314_v21  ;;  %v2635_v31 = vmul.f32 %v2571_v32, %v2427_v8  ;;  %v2318_v48 = vadd.f32 %v2317_v5, %v5989_v36  ;;  %v2431_v2 = vadd.f32 %v2430_v34, %v5991_v20 }
 0x5df   :  { %v2319_v24 = vpop.f32.mrf.mxu0  ;;  %v2432_v47 = vpop.f32.mrf.mxu1  ;;  %v2570_v46 = vmul.f32 0.044715, %v6001_v50  ;;  %v2572_v57 = vmul.f32 0.044715, %v6004_v49  ;;  %v6027_v14 = vmul.f32 0.5, %v6001_v50  ;;  %v6037_v32 = vmul.f32 0.5, %v6004_v49 }
 0x5e0   :  { %v2697_v58 = vmul.f32 %v2633_v26, %v2314_v21  ;;  %v2699_v15 = vmul.f32 %v2635_v31, %v2427_v8  ;;  %v2573_v4 = vmul.f32 0.044715, %v2318_v48  ;;  %v2575_v56 = vmul.f32 0.044715, %v2431_v2 }
 0x5e1   :  { %v2323_v19 = vpop.f32.mrf.mxu0  ;;  %v2436_v17 = vpop.f32.mrf.mxu1  ;;  %v6011_v28 = vadd.f32 %v2319_v24, %v5994_v55  ;;  %v6014_v11 = vadd.f32 %v2432_v47, %v5996_v13  ;;  %v2634_v51 = vmul.f32 %v2570_v46, %v6001_v50  ;;  %v2636_v61 = vmul.f32 %v2572_v57, %v6004_v49  ;;  %7045 = vst [vmem:[#allocation11_spill] sm:$0xff] %v6027_v14 }
 0x5e2   :  { %v2761_v39 = vadd.f32 %v2697_v58, %v2314_v21  ;;  %v2637_v63 = vmul.f32 %v2573_v4, %v2318_v48  ;;  %v2639_v54 = vmul.f32 %v2575_v56, %v2431_v2  ;;  %v2763_v22 = vadd.f32 %v2699_v15, %v2427_v8  ;;  %7047 = vst [vmem:[#allocation8_spill] sm:$0xff] %v6037_v32 }
 0x5e3   :  { %v2325_v9 = vpop.f32.mrf.mxu0  ;;  %v2438_v30 = vpop.f32.mrf.mxu1  ;;  %v2574_v3 = vmul.f32 0.044715, %v6011_v28  ;;  %v6024_v33 = vadd.f32 %v2323_v19, %v5989_v36  ;;  %v2576_v21 = vmul.f32 0.044715, %v6014_v11  ;;  %v6031_v8 = vadd.f32 %v2436_v17, %v5991_v20 }
 0x5e4   :  { %v2701_v41 = vmul.f32 %v2637_v63, %v2318_v48  ;;  %v2703_v23 = vmul.f32 %v2639_v54, %v2431_v2  ;;  %v2825_v0 = vmul.f32 0.7978846, %v2761_v39  ;;  %v6034_v45 = vadd.f32 %v2325_v9, %v5994_v55 }
 0x5e5   :  { %v2327_v16 = vpop.f32.mrf.mxu0  ;;  %v2440_v60 = vpop.f32.mrf.mxu1  ;;  %7044 = vst [vmem:[#allocation27_spill] sm:$0xff] %v6024_v33  ;;  %7046 = vst [vmem:[#allocation25_spill] sm:$0xff] %v6031_v8  ;;  %v2827_v5 = vmul.f32 0.7978846, %v2763_v22  ;;  %v6039_v34 = vmul.f32 0.5, %v2318_v48  ;;  %v6041_v31 = vmul.f32 0.5, %v2431_v2  ;;  %v6044_v24 = vmul.f32 %v2634_v51, %v6001_v50 }
 0x5e6   :  { %v2765_v26 = vadd.f32 %v2701_v41, %v2318_v48  ;;  %v2767_v47 = vadd.f32 %v2703_v23, %v2431_v2  ;;  %v2638_v58 = vmul.f32 %v2574_v3, %v6011_v28  ;;  %v6048_v15 = vadd.f32 %v2438_v30, %v5996_v13 }
 0x5e7   :  { %v2329_v37 = vpop.f32.mrf.mxu0  ;;  %v2442_v42 = vpop.f32.mrf.mxu1  ;;  %4554 = vtanh.f32 %v2825_v0  ;;  %v6051_v56 = vmul.f32 %v2636_v61, %v6004_v49  ;;  %v2577_v19 = vmul.f32 0.044715, %v6024_v33  ;;  %v6055_v48 = vadd.f32 %v2327_v16, %v5989_v36 }
 0x5e8   :  { %7048 = vst [vmem:[#allocation24_spill] sm:$0xff] %v6048_v15  ;;  %v2640_v17 = vmul.f32 %v2576_v21, %v6014_v11  ;;  %v2579_v2 = vmul.f32 0.044715, %v6031_v8  ;;  %v2578_v39 = vmul.f32 0.044715, %v6034_v45  ;;  %v6061_v57 = vadd.f32 %v2440_v60, %v5991_v20 }
 0x5e9   :  { %v2333_v4 = vpop.f32.mrf.mxu0  ;;  %v2446_v46 = vpop.f32.mrf.mxu1  ;;  %7049 = vst [vmem:[#allocation23_spill] sm:$0xff] %v6055_v48  ;;  %4556 = vtanh.f32 %v2827_v5  ;;  %v2829_v9 = vmul.f32 0.7978846, %v2765_v26  ;;  %v2580_v30 = vmul.f32 0.044715, %v6048_v15  ;;  %v6065_v22 = vadd.f32 %v2329_v37, %v5994_v55 }
 0x5ea   :  { %7050 = vst [vmem:[#allocation9_spill] sm:$0xff] %v6061_v57  ;;  %v2831_v41 = vmul.f32 0.7978846, %v2767_v47  ;;  %v6068_v51 = vmul.f32 %v2638_v58, %v6011_v28  ;;  %v6071_v23 = vadd.f32 %v2442_v42, %v5996_v13  ;;  %v6074_v3 = vadd.f32 %v2333_v4, %v5989_v36 }
 0x5eb   :  { %v2335_v63 = vpop.f32.mrf.mxu0  ;;  %v2448_v54 = vpop.f32.mrf.mxu1  ;;  %v2641_v0 = vmul.f32 %v2577_v19, %v6024_v33  ;;  %v2581_v61 = vmul.f32 0.044715, %v6055_v48  ;;  %v6079_v21 = vadd.f32 %v2446_v46, %v5991_v20  ;;  %v6085_v5 = vmul.f32 %v2640_v17, %v6014_v11 }
 0x5ec   :  { %7051 = vst [vmem:[#allocation6_spill] sm:$0xff] %v6071_v23  ;;  %7052 = vst [vmem:[#allocation22_spill] sm:$0xff] %v6074_v3  ;;  %v6082_v37 = vadd.f32 %v2335_v63, %v5994_v55  ;;  %v2643_v42 = vmul.f32 %v2579_v2, %v6031_v8  ;;  %v2642_v26 = vmul.f32 %v2578_v39, %v6034_v45  ;;  %v2583_v47 = vmul.f32 0.044715, %v6061_v57 }
 0x5ed   :  { %v2337_v16 = vpop.f32.mrf.mxu0  ;;  %v2450_v60 = vpop.f32.mrf.mxu1  ;;  %7053 = vst [vmem:[#allocation7_spill] sm:$0xff] %v6079_v21  ;;  %4558 = vtanh.f32 %v2829_v9  ;;  %v2644_v19 = vmul.f32 %v2580_v30, %v6048_v15  ;;  %v2582_v46 = vmul.f32 0.044715, %v6065_v22  ;;  %v2584_v7 = vmul.f32 0.044715, %v6071_v23 }
 0x5ee   :  { %7054 = vst [vmem:[#allocation21_spill] sm:$0xff] %v6082_v37  ;;  %4560 = vtanh.f32 %v2831_v41  ;;  %v2585_v63 = vmul.f32 0.044715, %v6074_v3  ;;  %v2587_v17 = vmul.f32 0.044715, %v6079_v21  ;;  %v6097_v53 = vmul.f32 %v2641_v0, %v6024_v33 }
 0x5ef   :  { %v2339_v58 = vpop.f32.mrf.mxu0  ;;  %v2452_v4 = vpop.f32.mrf.mxu1  ;;  %v2586_v2 = vmul.f32 0.044715, %v6082_v37  ;;  %v2645_v9 = vmul.f32 %v2581_v61, %v6055_v48  ;;  %v6101_v30 = vadd.f32 %v2448_v54, %v5996_v13  ;;  %v6104_v43 = vadd.f32 %v2337_v16, %v5989_v36 }
 0x5f0   :  { %7055 = vst [vmem:[#allocation4_spill] sm:$0xff] %v6097_v53  ;;  %v6107_v41 = vmul.f32 %v2643_v42, %v6031_v8  ;;  %v6110_v1 = vmul.f32 %v2642_v26, %v6034_v45  ;;  %v2647_v44 = vmul.f32 %v2583_v47, %v6061_v57  ;;  %v6114_v29 = vadd.f32 %v2450_v60, %v5991_v20 }
 0x5f1   :  { %v2343_v27 = vpop.f32.mrf.mxu0  ;;  %v2456_v39 = vpop.f32.mrf.mxu1  ;;  %7056 = vst [vmem:[#allocation20_spill] sm:$0xff] %v6101_v30  ;;  %v6117_v61 = vmul.f32 %v2644_v19, %v6048_v15  ;;  %v2646_v54 = vmul.f32 %v2582_v46, %v6065_v22  ;;  %v2648_v16 = vmul.f32 %v2584_v7, %v6071_v23  ;;  %v6122_v42 = vadd.f32 %v2339_v58, %v5994_v55 }
 0x5f2   :  { %7057 = vst [vmem:[#allocation19_spill] sm:$0xff] %v6107_v41  ;;  %v2649_v26 = vmul.f32 %v2585_v63, %v6074_v3  ;;  %v2651_v38 = vmul.f32 %v2587_v17, %v6079_v21  ;;  %v2650_v47 = vmul.f32 %v2586_v2, %v6082_v37  ;;  %v6128_v60 = vadd.f32 %v2452_v4, %v5996_v13 }
 0x5f3   :  { %v2345_v0 = vpop.f32.mrf.mxu0  ;;  %v2458_v6 = vpop.f32.mrf.mxu1  ;;  %7058 = vst [vmem:[#allocation5_spill] sm:$0xff] %v6117_v61  ;;  %v6131_v19 = vmul.f32 %v2645_v9, %v6055_v48  ;;  %v2588_v46 = vmul.f32 0.044715, %v6101_v30  ;;  %v2589_v7 = vmul.f32 0.044715, %v6104_v43  ;;  %v6136_v58 = vadd.f32 %v2343_v27, %v5989_v36 }
 0x5f4   :  { %v6138_v63 = vpop.eup %4554  ;;  %v6141_v17 = vmul.f32 %v2647_v44, %v6061_v57  ;;  %v2591_v4 = vmul.f32 0.044715, %v6114_v29  ;;  %v2590_v2 = vmul.f32 0.044715, %v6122_v42  ;;  %v6146_v25 = vadd.f32 %v2456_v39, %v5991_v20 }
 0x5f5   :  { %v2347_v10 = vpop.f32.mrf.mxu0  ;;  %v2460_v40 = vpop.f32.mrf.mxu1  ;;  %7059 = vst [vmem:[#allocation2_spill] sm:$0xff] %v6131_v19  ;;  %v6149_v59 = vmul.f32 %v2646_v54, %v6065_v22  ;;  %v6152_v27 = vmul.f32 %v2648_v16, %v6071_v23  ;;  %v2592_v35 = vmul.f32 0.044715, %v6128_v60  ;;  %v6156_v44 = vadd.f32 %v2345_v0, %v5994_v55 }
 0x5f6   :  { %7060 = vst [vmem:[#allocation18_spill] sm:$0xff] %v6141_v17  ;;  %v6158_v12 = vpop.eup %4556  ;;  %v6161_v17 = vmul.f32 %v2649_v26, %v6074_v3  ;;  %v6164_v39 = vmul.f32 %v2651_v38, %v6079_v21  ;;  %v6167_v57 = vmul.f32 %v2650_v47, %v6082_v37  ;;  %v6170_v54 = vadd.f32 %v2458_v6, %v5996_v13 }
 0x5f7   :  { %v2349_v9 = vpop.f32.mrf.mxu0  ;;  %v2462_v52 = vpop.f32.mrf.mxu1  ;;  %7061 = vst [vmem:[#allocation3_spill] sm:$0xff] %v6149_v59  ;;  %7062 = vst [vmem:[#allocation34_spill] sm:$0xff] %v6152_v27  ;;  %v2652_v8 = vmul.f32 %v2588_v46, %v6101_v30  ;;  %v2653_v0 = vmul.f32 %v2589_v7, %v6104_v43  ;;  %v2593_v19 = vmul.f32 0.044715, %v6136_v58  ;;  %v6176_v26 = vadd.f32 %v2347_v10, %v5989_v36 }
 0x5f8   :  { %7063 = vst [vmem:[#allocation36_spill] sm:$0xff] %v6161_v17  ;;  %7064 = vst [vmem:[#allocation35_spill] sm:$0xff] %v6164_v39  ;;  %v2655_v38 = vmul.f32 %v2591_v4, %v6114_v29  ;;  %v2654_v39 = vmul.f32 %v2590_v2, %v6122_v42  ;;  %v2595_v47 = vmul.f32 0.044715, %v6146_v25  ;;  %v6182_v6 = vadd.f32 %v2460_v40, %v5991_v20 }
 0x5f9   :  { %7065 = vst [vmem:[#allocation39_spill] sm:$0xff] %v6167_v57  ;;  %v2353_v16 = vpop.f32.mrf.mxu0  ;;  %v2466_v41 = vpop.f32.mrf.mxu1  ;;  %v2656_v46 = vmul.f32 %v2592_v35, %v6128_v60  ;;  %v2594_v7 = vmul.f32 0.044715, %v6156_v44  ;;  %v2596_v3 = vmul.f32 0.044715, %v6170_v54  ;;  %v6188_v10 = vadd.f32 %v2349_v9, %v5994_v55 }
 0x5fa   :  { %7066 = vst [vmem:[#allocation40_spill] sm:$0xff] %v6182_v6  ;;  %v6190_v57 = vpop.eup %4558  ;;  %v2597_v4 = vmul.f32 0.044715, %v6176_v26  ;;  %v2599_v2 = vmul.f32 0.044715, %v6182_v6  ;;  %v6195_v40 = vadd.f32 %v2462_v52, %v5996_v13  ;;  %v6198_v37 = vadd.f32 %v2353_v16, %v5989_v36 }
 0x5fb   :  { %v2355_v21 = vpop.f32.mrf.mxu0  ;;  %v2468_v17 = vpop.f32.mrf.mxu1  ;;  %v2657_v53 = vmul.f32 %v2593_v19, %v6136_v58  ;;  %v2598_v9 = vmul.f32 0.044715, %v6188_v10  ;;  %v6205_v33 = vadd.f32 %v2466_v41, %v5991_v20  ;;  %v6211_v14 = vmul.f32 %v2652_v8, %v6101_v30 }
 0x5fc   :  { %7067 = vst [vmem:[#allocation41_spill] sm:$0xff] %v6198_v37  ;;  %v6200_v48 = vpop.eup %4560  ;;  %v6208_v32 = vadd.f32 %v2355_v21, %v5994_v55  ;;  %v2659_v52 = vmul.f32 %v2595_v47, %v6146_v25  ;;  %v2600_v16 = vmul.f32 0.044715, %v6195_v40  ;;  %v2601_v27 = vmul.f32 0.044715, %v6198_v37 }
 0x5fd   :  { %v2357_v35 = vpop.f32.mrf.mxu0  ;;  %7068 = vst [vmem:[#allocation42_spill] sm:$0xff] %v6205_v33  ;;  %7070 = vst [vmem:[#allocation44_spill] sm:$0xff] %v6211_v14  ;;  %v2470_v23 = vpop.f32.mrf.mxu1  ;;  %v2658_v19 = vmul.f32 %v2594_v7, %v6156_v44  ;;  %v2660_v61 = vmul.f32 %v2596_v3, %v6170_v54  ;;  %v2603_v41 = vmul.f32 0.044715, %v6205_v33  ;;  %v6221_v21 = vmul.f32 %v2653_v0, %v6104_v43 }
 0x5fe   :  { %7069 = vst [vmem:[#allocation43_spill] sm:$0xff] %v6208_v32  ;;  %v2602_v15 = vmul.f32 0.044715, %v6208_v32  ;;  %v6224_v8 = vmul.f32 %v2655_v38, %v6114_v29  ;;  %v2661_v47 = vmul.f32 %v2597_v4, %v6176_v26  ;;  %v2663_v14 = vmul.f32 %v2599_v2, %v6182_v6 }
 0x5ff   :  { %7071 = vst [vmem:[#allocation45_spill] sm:$0xff] %v6221_v21  ;;  %v2359_v30 = vpop.f32.mrf.mxu0  ;;  %v6229_v59 = vmul.f32 %v2654_v39, %v6122_v42  ;;  %v6232_v3 = vmul.f32 %v2656_v46, %v6128_v60  ;;  %v6235_v7 = vmul.f32 %v2657_v53, %v6136_v58  ;;  %v2662_v0 = vmul.f32 %v2598_v9, %v6188_v10  ;;  %v2472_v39 = vpop.f32.mrf.mxu1 }
 0x600   :  { %7072 = vst [vmem:[#allocation46_spill] sm:$0xff] %v6224_v8  ;;  %v6239_v21 = vmul.f32 %v2659_v52, %v6146_v25  ;;  %v2664_v38 = vmul.f32 %v2600_v16, %v6195_v40  ;;  %v2665_v4 = vmul.f32 %v2601_v27, %v6198_v37  ;;  %v6244_v2 = vadd.f32 %v2468_v17, %v5996_v13 }
 0x601   :  { %v6247_v8 = vmul.f32 %v2658_v19, %v6156_v44  ;;  %v6250_v46 = vmul.f32 %v2660_v61, %v6170_v54  ;;  %v2667_v53 = vmul.f32 %v2603_v41, %v6205_v33  ;;  %v2666_v9 = vmul.f32 %v2602_v15, %v6208_v32  ;;  %v2363_v19 = vpop.f32.mrf.mxu0 }
 0x602   :  { %7073 = vst [vmem:[#allocation47_spill] sm:$0xff] %v6239_v21  ;;  %7074 = vst [vmem:[#allocation48_spill] sm:$0xff] %v6244_v2  ;;  %v6255_v52 = vmul.f32 %v2661_v47, %v6176_v26  ;;  %v6258_v16 = vmul.f32 %v2663_v14, %v6182_v6  ;;  %v6261_v17 = vadd.f32 %v2357_v35, %v5989_v36 }
 0x603   :  { %v6264_v27 = vadd.f32 %v2470_v23, %v5991_v20  ;;  %v6267_v61 = vmul.f32 %v2662_v0, %v6188_v10  ;;  %v6270_v41 = vadd.f32 %v2359_v30, %v5994_v55  ;;  %v2762_v15 = vadd.f32 %v6044_v24, %v6001_v50 }
 0x604   :  { %7075 = vst [vmem:[#allocation49_spill] sm:$0xff] %v6258_v16  ;;  %7076 = vst [vmem:[#allocation50_spill] sm:$0xff] %v6261_v17  ;;  %v2766_v14 = vadd.f32 %v6068_v51, %v6011_v28  ;;  %v6277_v47 = vmul.f32 %v2664_v38, %v6195_v40  ;;  %v6280_v35 = vmul.f32 %v2665_v4, %v6198_v37  ;;  %v2604_v23 = vmul.f32 0.044715, %v6244_v2  ;;  %v2476_v16 = vpop.f32.mrf.mxu1 }
 0x605   :  { %7077 = vst [vmem:[#allocation51_spill] sm:$0xff] %v6264_v27  ;;  %v6284_v0 = vadd.f32 %v2472_v39, %v5996_v13  ;;  %v6287_v30 = vmul.f32 %v2667_v53, %v6205_v33  ;;  %v6290_v50 = vmul.f32 %v2666_v9, %v6208_v32  ;;  %v2826_v24 = vmul.f32 0.7978846, %v2762_v15 }
 0x606   :  { %7078 = vst [vmem:[#allocation52_spill] sm:$0xff] %v6280_v35  ;;  %v2830_v51 = vmul.f32 0.7978846, %v2766_v14  ;;  %v2605_v38 = vmul.f32 0.044715, %v6261_v17  ;;  %v2764_v4 = vadd.f32 %v6051_v56, %v6004_v49  ;;  %v2768_v39 = vadd.f32 %v6085_v5, %v6014_v11  ;;  %v2365_v35 = vpop.f32.mrf.mxu0  ;;  %v2478_v33 = vpop.f32.mrf.mxu1 }
 0x607   :  { %7079 = vst [vmem:[#allocation53_spill] sm:$0xff] %v6284_v0  ;;  %7080 = vst [vmem:[#allocation54_spill] sm:$0xff] %v6287_v30  ;;  %v2607_v6 = vmul.f32 0.044715, %v6264_v27  ;;  %v2606_v37 = vmul.f32 0.044715, %v6270_v41  ;;  %4562 = vtanh.f32 %v2826_v24  ;;  %v6300_v53 = vadd.f32 %v2363_v19, %v5989_v36 }
 0x608   :  { %7081 = vst [vmem:[#allocation55_spill] sm:$0xff] %v6290_v50  ;;  %v6303_v9 = vadd.f32 %v2476_v16, %v5991_v20  ;;  %v2608_v15 = vmul.f32 0.044715, %v6284_v0  ;;  %4564 = vtanh.f32 %v2830_v51  ;;  %v2828_v14 = vmul.f32 0.7978846, %v2764_v4  ;;  %v2367_v51 = vpop.f32.mrf.mxu0 }
 0x609   :  { %7082 = vst [vmem:[#allocation56_spill] sm:$0xff] %v6300_v53  ;;  %v2832_v30 = vmul.f32 0.7978846, %v2768_v39  ;;  %v2668_v49 = vmul.f32 %v2604_v23, %v6244_v2  ;;  %v6308_v56 = vmul.f32 0.5, %v6011_v28  ;;  %v2609_v5 = vmul.f32 0.044715, %v6300_v53 }
 0x60a   :  { %7083 = vst [vmem:[#allocation57_spill] sm:$0xff] %v6303_v9  ;;  %v2611_v24 = vmul.f32 0.044715, %v6303_v9  ;;  %v2669_v19 = vmul.f32 %v2605_v38, %v6261_v17  ;;  %4566 = vtanh.f32 %v2828_v14  ;;  %v2957_v16 = vadd.f32 1.0, %v6190_v57  ;;  %v2480_v57 = vpop.f32.mrf.mxu1 }
 0x60b   :  { %v6315_v50 = vadd.f32 %v2365_v35, %v5994_v55  ;;  %v2671_v4 = vmul.f32 %v2607_v6, %v6264_v27  ;;  %v2670_v23 = vmul.f32 %v2606_v37, %v6270_v41  ;;  %4568 = vtanh.f32 %v2832_v30 }
 0x60c   :  { %v2959_v28 = vadd.f32 1.0, %v6200_v48  ;;  %v2672_v39 = vmul.f32 %v2608_v15, %v6284_v0  ;;  %v2953_v32 = vadd.f32 1.0, %v6138_v63  ;;  %v2955_v38 = vadd.f32 1.0, %v6158_v12 }
 0x60d   :  { %7084 = vst [vmem:[#allocation58_spill] sm:$0xff] %v6315_v50  ;;  %v2610_v14 = vmul.f32 0.044715, %v6315_v50  ;;  %v2673_v35 = vmul.f32 %v2609_v5, %v6300_v53  ;;  %v2675_v21 = vmul.f32 %v2611_v24, %v6303_v9  ;;  %v6327_v6 = vadd.f32 %v2478_v33, %v5996_v13 }
 0x60e   :  { %v6330_v37 = vadd.f32 %v2367_v51, %v5989_v36  ;;  %v6333_v48 = vmul.f32 %v2668_v49, %v6244_v2  ;;  %v6336_v63 = vmul.f32 %v2669_v19, %v6261_v17  ;;  %v2512_v12 = vmul.f32 0.5, %v6014_v11  ;;  %v2369_v49 = vpop.f32.mrf.mxu0  ;;  %v2482_v51 = vpop.f32.mrf.mxu1  ;;  %v7102_v17 = vld [vmem:[#allocation11_spill] sm:$0xff] }
 0x60f   :  { %v6340_v30 = vmul.f32 %v2957_v16, %v6039_v34  ;;  %v6343_v15 = vmul.f32 %v2671_v4, %v6264_v27  ;;  %v6346_v33 = vmul.f32 %v2959_v28, %v6041_v31  ;;  %v2674_v5 = vmul.f32 %v2610_v14, %v6315_v50  ;;  %v7099_v27 = vld [vmem:[#allocation6_spill] sm:$0xff] }
 0x610   :  { %7085 = vst [vmem:[#allocation59_spill] sm:$0xff] %v6330_v37  ;;  %7086 = vst [vmem:[#allocation60_spill] sm:$0xff] %v6333_v48  ;;  %v6350_v24 = vadd.f32 %v2480_v57, %v5991_v20  ;;  %v6353_v19 = vmul.f32 %v2670_v23, %v6270_v41  ;;  %v6356_v11 = vmul.f32 %v2672_v39, %v6284_v0  ;;  %v2612_v28 = vmul.f32 0.044715, %v6327_v6 }
 0x611   :  { %7087 = vst [vmem:[#allocation61_spill] sm:$0xff] %v6336_v63  ;;  %7088 = vst [vmem:[#allocation62_spill] sm:$0xff] %v6343_v15  ;;  %v3017_v34 = vmul.f32 %v2953_v32, %v6016_v18  ;;  %v6360_v16 = vmul.f32 %v2955_v38, %v6018_v62  ;;  %v6363_v31 = vmul.f32 %v2673_v35, %v6300_v53  ;;  %v2613_v23 = vmul.f32 0.044715, %v6330_v37  ;;  %v7094_v62 = vld [vmem:[#allocation3_spill] sm:$0xff]  ;;  %v7097_v53 = vld [vmem:[#allocation24_spill] sm:$0xff] }
 0x612   :  { %7089 = vst [vmem:[#allocation63_spill] sm:$0xff] %v6350_v24  ;;  %7090 = vst [vmem:[#allocation64_spill] sm:$0xff] %v6353_v19  ;;  %v6366_v4 = vmul.f32 %v2675_v21, %v6303_v9  ;;  %v6372_v39 = vadd.f32 %v2369_v49, %v5994_v55  ;;  %v2770_v18 = vadd.f32 %v6110_v1, %v6034_v45  ;;  %v2615_v57 = vmul.f32 0.044715, %v6350_v24 }
 0x613   :  { %7091 = vst [vmem:[#allocation65_spill] sm:$0xff] %v6356_v11  ;;  %7092 = vst [vmem:[#allocation66_spill] sm:$0xff] %v6363_v31  ;;  %v3081_v14 = vpack.c.bf16 %v6340_v30, %v3017_v34  ;;  %v2774_v32 = vadd.f32 %v7094_v62, %v6065_v22  ;;  %v6381_v21 = vmul.f32 %v2674_v5, %v6315_v50  ;;  %v6388_v49 = vmul.f32 0.5, %v6034_v45  ;;  %v2486_v50 = vpop.f32.mrf.mxu1 }
 0x614   :  { %7093 = vst [vmem:[#allocation67_spill] sm:$0xff] %v6366_v4  ;;  %v6385_v35 = vadd.f32 %v2482_v51, %v5996_v13  ;;  %v4563_v30 = vpop.eup %4562  ;;  %v6391_v1 = vmul.f32 0.5, %v6065_v22  ;;  %v2834_v34 = vmul.f32 0.7978846, %v2770_v18  ;;  %v2373_v4 = vpop.f32.mrf.mxu0  ;;  %v2676_v5 = vmul.f32 %v2612_v28, %v6327_v6  ;;  %v7100_v22 = vld [vmem:[#allocation34_spill] sm:$0xff] }
 0x615   :  { %7095 = vst [vmem:[#allocation3_spill] sm:$0xff] %v6381_v21  ;;  %v2838_v62 = vmul.f32 0.7978846, %v2774_v32  ;;  %v4565_v9 = vpop.eup %4564  ;;  %v2954_v38 = vadd.f32 1.0, %v4563_v30  ;;  %v2677_v31 = vmul.f32 %v2613_v23, %v6330_v37  ;;  %v7098_v21 = vld [vmem:[#allocation5_spill] sm:$0xff]  ;;  %v2776_v63 = vadd.f32 %v7100_v22, %v7099_v27 }
 0x616   :  { %7096 = vst [vmem:[#allocation68_spill] sm:$0xff] %v6385_v35  ;;  %v2772_v51 = vadd.f32 %v7098_v21, %v7097_v53  ;;  %v2958_v15 = vadd.f32 1.0, %v4565_v9  ;;  %v2614_v45 = vmul.f32 0.044715, %v6372_v39  ;;  %4570 = vtanh.f32 %v2834_v34  ;;  %v2375_v48 = vpop.f32.mrf.mxu0 }
 0x617   :  { %v4567_v18 = vpop.eup %4566  ;;  %v2616_v32 = vmul.f32 0.044715, %v6385_v35  ;;  %4572 = vtanh.f32 %v2838_v62  ;;  %v6402_v28 = vadd.f32 %v2373_v4, %v5989_v36  ;;  %v3018_v11 = vmul.f32 %v2954_v38, %v7102_v17  ;;  %v2488_v62 = vpop.f32.mrf.mxu1  ;;  %v7105_v17 = vld [vmem:[#allocation8_spill] sm:$0xff]  ;;  %v7106_v38 = vld [vmem:[#allocation27_spill] sm:$0xff] }
 0x618   :  { %v2836_v30 = vmul.f32 0.7978846, %v2772_v51  ;;  %v4569_v23 = vpop.eup %4568  ;;  %v3022_v21 = vmul.f32 %v2958_v15, %v6308_v56  ;;  %v2956_v9 = vadd.f32 1.0, %v4567_v18  ;;  %v2840_v0 = vmul.f32 0.7978846, %v2776_v63 }
 0x619   :  { %7101 = vst [vmem:[#allocation24_spill] sm:$0xff] %v6402_v28  ;;  %v2960_v34 = vadd.f32 1.0, %v4569_v23  ;;  %v2679_v2 = vmul.f32 %v2615_v57, %v6350_v24  ;;  %v6408_v22 = vadd.f32 %v2486_v50, %v5991_v20  ;;  %v6411_v4 = vmul.f32 %v2676_v5, %v6327_v6  ;;  %v7107_v57 = vld [vmem:[#allocation4_spill] sm:$0xff] }
 0x61a   :  { %4574 = vtanh.f32 %v2836_v30  ;;  %v3082_v51 = vpack.c.bf16 %v3022_v21, %v3018_v11  ;;  %v6414_v19 = vmul.f32 0.5, %v7097_v53  ;;  %v3020_v56 = vmul.f32 %v2956_v9, %v7105_v17  ;;  %v7109_v30 = vld [vmem:[#allocation23_spill] sm:$0xff]  ;;  %v7110_v53 = vld [vmem:[#allocation2_spill] sm:$0xff] }
 0x61b   :  { %7103 = vst [vmem:[#allocation5_spill] sm:$0xff] %v6408_v22  ;;  %7104 = vst [vmem:[#allocation6_spill] sm:$0xff] %v6411_v4  ;;  %4576 = vtanh.f32 %v2840_v0  ;;  %v3024_v63 = vmul.f32 %v2960_v34, %v2512_v12  ;;  %v2617_v15 = vmul.f32 0.044715, %v6402_v28  ;;  %v2769_v18 = vadd.f32 %v7107_v57, %v7106_v38  ;;  %v2377_v0 = vpop.f32.mrf.mxu0  ;;  %v7111_v34 = vld [vmem:[#allocation25_spill] sm:$0xff]  ;;  %v7112_v17 = vld [vmem:[#allocation19_spill] sm:$0xff] }
 0x61c   :  { %3408 = vmatprep.mubr.bf16.mxu0 %v3082_v51  ;;  %v6421_v50 = vmul.f32 %v2677_v31, %v6330_v37  ;;  %v2678_v11 = vmul.f32 %v2614_v45, %v6372_v39  ;;  %v2680_v5 = vmul.f32 %v2616_v32, %v6385_v35  ;;  %v2773_v23 = vadd.f32 %v7110_v53, %v7109_v30  ;;  %v2490_v51 = vpop.f32.mrf.mxu1  ;;  %v7113_v31 = vld [vmem:[#allocation9_spill] sm:$0xff] }
 0x61d   :  { %v3084_v21 = vpack.c.bf16 %v3024_v63, %v3020_v56  ;;  %3409 = vmatmul.mubr.bf16.vlgmr.msra.gmra.mxu0 %v3081_v14  ;;  %v2619_v12 = vmul.f32 0.044715, %v6408_v22  ;;  %v2833_v9 = vmul.f32 0.7978846, %v2769_v18  ;;  %v2771_v57 = vadd.f32 %v7112_v17, %v7111_v34 }
 0x61e   :  { %7108 = vst [vmem:[#allocation34_spill] sm:$0xff] %v6421_v50  ;;  %v2837_v4 = vmul.f32 0.7978846, %v2773_v23  ;;  %v7114_v50 = vld [vmem:[#allocation18_spill] sm:$0xff]  ;;  %v6433_v45 = vadd.f32 %v2375_v48, %v5994_v55  ;;  %v6436_v32 = vadd.f32 %v2488_v62, %v5996_v13  ;;  %v2681_v14 = vmul.f32 %v2617_v15, %v6402_v28 }
 0x61f   :  { %v2775_v37 = vadd.f32 %v7114_v50, %v7113_v31  ;;  %3505 = vmatprep.mubr.bf16.mxu1 %v3084_v21  ;;  %4578 = vtanh.f32 %v2833_v9  ;;  %v2835_v56 = vmul.f32 0.7978846, %v2771_v57  ;;  %v6440_v63 = vadd.f32 %v2377_v0, %v5989_v36  ;;  %v2379_v0 = vpop.f32.mrf.mxu0 }
 0x620   :  { %7115 = vst [vmem:[#allocation11_spill] sm:$0xff] %v6433_v45  ;;  %7116 = vst [vmem:[#allocation8_spill] sm:$0xff] %v6436_v32  ;;  %v7117_v18 = vpack.c.bf16 %v6346_v33, %v6360_v16  ;;  %v6446_v50 = vmul.f32 %v2679_v2, %v6350_v24  ;;  %4580 = vtanh.f32 %v2837_v4  ;;  %v6449_v62 = vadd.f32 %v2490_v51, %v5991_v20 }
 0x621   :  { %v2839_v48 = vmul.f32 0.7978846, %v2775_v37  ;;  %v2520_v53 = vmul.f32 0.5, %v7099_v27  ;;  %v2683_v15 = vmul.f32 %v2619_v12, %v6408_v22  ;;  %4582 = vtanh.f32 %v2835_v56 }
 0x622   :  { %3506 = vmatmul.mubr.bf16.vlgmr.msra.gmra.mxu1 %v7117_v18  ;;  %7118 = vst [vmem:[#allocation27_spill] sm:$0xff] %v6446_v50  ;;  %v2618_v23 = vmul.f32 0.044715, %v6433_v45  ;;  %v6455_v21 = vmul.f32 %v2678_v11, %v6372_v39  ;;  %v2620_v2 = vmul.f32 0.044715, %v6436_v32  ;;  %v6460_v16 = vmul.f32 %v2680_v5, %v6385_v35  ;;  %v2492_v11 = vpop.f32.mrf.mxu1 }
 0x623   :  { %4584 = vtanh.f32 %v2839_v48  ;;  %v2621_v33 = vmul.f32 0.044715, %v6440_v63  ;;  %v4571_v37 = vpop.eup %4570  ;;  %v6463_v27 = vmul.f32 %v2681_v14, %v6402_v28  ;;  %v6466_v4 = vmul.f32 0.5, %v7106_v38 }
 0x624   :  { %7119 = vst [vmem:[#allocation4_spill] sm:$0xff] %v6460_v16  ;;  %v6469_v12 = vmul.f32 0.5, %v7109_v30  ;;  %v4573_v9 = vpop.eup %4572  ;;  %v2962_v17 = vadd.f32 1.0, %v4571_v37  ;;  %v6472_v57 = vmul.f32 0.5, %v7111_v34  ;;  %v2623_v51 = vmul.f32 0.044715, %v6449_v62  ;;  %v2496_v24 = vpop.f32.mrf.mxu1 }
 0x625   :  { %7120 = vst [vmem:[#allocation23_spill] sm:$0xff] %v6463_v27  ;;  %v6476_v5 = vadd.f32 %v2379_v0, %v5994_v55  ;;  %v2966_v56 = vadd.f32 1.0, %v4573_v9  ;;  %v6479_v14 = vmul.f32 %v2683_v15, %v6408_v22  ;;  %v6482_v38 = vmul.f32 0.5, %v7113_v31  ;;  %v7122_v27 = vld [vmem:[#allocation21_spill] sm:$0xff]  ;;  %v7123_v0 = vld [vmem:[#allocation39_spill] sm:$0xff] }
 0x626   :  { %v2682_v30 = vmul.f32 %v2618_v23, %v6433_v45  ;;  %v2684_v48 = vmul.f32 %v2620_v2, %v6436_v32  ;;  %v2685_v34 = vmul.f32 %v2621_v33, %v6440_v63  ;;  %v6488_v37 = vadd.f32 %v2492_v11, %v5996_v13  ;;  %v2383_v11 = vpop.f32.mrf.mxu0 }
 0x627   :  { %7121 = vst [vmem:[#allocation2_spill] sm:$0xff] %v6479_v14  ;;  %v4575_v18 = vpop.eup %4574  ;;  %v2778_v28 = vadd.f32 %v7123_v0, %v7122_v27  ;;  %v3026_v15 = vmul.f32 %v2962_v17, %v6388_v49  ;;  %v3030_v14 = vmul.f32 %v2966_v56, %v6391_v1  ;;  %v2782_v23 = vadd.f32 %v6229_v59, %v6122_v42  ;;  %v7124_v17 = vld [vmem:[#allocation20_spill] sm:$0xff] }
 0x628   :  { %v4577_v9 = vpop.eup %4576  ;;  %v2964_v31 = vadd.f32 1.0, %v4575_v18  ;;  %v2687_v2 = vmul.f32 %v2623_v51, %v6449_v62  ;;  %v2622_v33 = vmul.f32 0.044715, %v6476_v5  ;;  %v6500_v35 = vmul.f32 0.5, %v7122_v27  ;;  %v7125_v56 = vld [vmem:[#allocation44_spill] sm:$0xff] }
 0x629   :  { %v2968_v22 = vadd.f32 1.0, %v4577_v9  ;;  %v2842_v50 = vmul.f32 0.7978846, %v2778_v28  ;;  %v3086_v16 = vpack.c.bf16 %v3030_v14, %v3026_v15  ;;  %v2846_v49 = vmul.f32 0.7978846, %v2782_v23 }
 0x62a   :  { %v3028_v0 = vmul.f32 %v2964_v31, %v6414_v19  ;;  %v2780_v59 = vadd.f32 %v7125_v56, %v7124_v17  ;;  %v2784_v51 = vadd.f32 %v6232_v3, %v6128_v60  ;;  %v6507_v28 = vmul.f32 %v2682_v30, %v6433_v45  ;;  %v7128_v30 = vld [vmem:[#allocation22_spill] sm:$0xff]  ;;  %v7129_v31 = vld [vmem:[#allocation36_spill] sm:$0xff]  ;;  %v2385_v56 = vpop.f32.mrf.mxu0 }
 0x62b   :  { %v3032_v1 = vmul.f32 %v2968_v22, %v2520_v53  ;;  %4586 = vtanh.f32 %v2842_v50  ;;  %3416 = vmatprep.mubr.bf16.mxu0 %v3086_v16  ;;  %v6510_v14 = vadd.f32 %v2383_v11, %v5989_v36  ;;  %v6513_v19 = vadd.f32 %v2496_v24, %v5991_v20 }
 0x62c   :  { %7126 = vst [vmem:[#allocation25_spill] sm:$0xff] %v6507_v28  ;;  %4588 = vtanh.f32 %v2846_v49  ;;  %v4579_v27 = vpop.eup %4578  ;;  %v2624_v50 = vmul.f32 0.044715, %v6488_v37  ;;  %v2844_v53 = vmul.f32 0.7978846, %v2780_v59  ;;  %v2777_v23 = vadd.f32 %v7129_v31, %v7128_v30  ;;  %v2498_v31 = vpop.f32.mrf.mxu1 }
 0x62d   :  { %7127 = vst [vmem:[#allocation19_spill] sm:$0xff] %v6513_v19  ;;  %v3088_v22 = vpack.c.bf16 %v3032_v1, %v3028_v0  ;;  %v2848_v18 = vmul.f32 0.7978846, %v2784_v51  ;;  %v4581_v9 = vpop.eup %4580  ;;  %v2961_v15 = vadd.f32 1.0, %v4579_v27  ;;  %v2625_v3 = vmul.f32 0.044715, %v6510_v14 }
 0x62e   :  { %v2627_v16 = vmul.f32 0.044715, %v6513_v19  ;;  %v4583_v11 = vpop.eup %4582  ;;  %v2965_v49 = vadd.f32 1.0, %v4581_v9  ;;  %v6521_v24 = vmul.f32 %v2684_v48, %v6436_v32  ;;  %4590 = vtanh.f32 %v2844_v53  ;;  %v7131_v0 = vld [vmem:[#allocation45_spill] sm:$0xff] }
 0x62f   :  { %3513 = vmatprep.mubr.bf16.mxu1 %v3088_v22  ;;  %v2781_v1 = vadd.f32 %v7131_v0, %v6104_v43  ;;  %v2963_v51 = vadd.f32 1.0, %v4583_v11  ;;  %v6526_v27 = vmul.f32 %v2685_v34, %v6440_v63  ;;  %4592 = vtanh.f32 %v2848_v18 }
 0x630   :  { %7130 = vst [vmem:[#allocation9_spill] sm:$0xff] %v6521_v24  ;;  %v4585_v59 = vpop.eup %4584  ;;  %v2689_v28 = vmul.f32 %v2625_v3, %v6510_v14  ;;  %v3025_v22 = vmul.f32 %v2961_v15, %v6466_v4  ;;  %v3029_v9 = vmul.f32 %v2965_v49, %v6469_v12  ;;  %v2841_v24 = vmul.f32 0.7978846, %v2777_v23  ;;  %v2387_v3 = vpop.f32.mrf.mxu0  ;;  %v7132_v12 = vld [vmem:[#allocation7_spill] sm:$0xff] }
 0x631   :  { %v2967_v48 = vadd.f32 1.0, %v4585_v59  ;;  %v2686_v53 = vmul.f32 %v2622_v33, %v6476_v5  ;;  %v2688_v0 = vmul.f32 %v2624_v50, %v6488_v37  ;;  %v2691_v32 = vmul.f32 %v2627_v16, %v6513_v19  ;;  %v7133_v15 = vld [vmem:[#allocation35_spill] sm:$0xff]  ;;  %v7134_v33 = vld [vmem:[#allocation46_spill] sm:$0xff]  ;;  %v2500_v50 = vpop.f32.mrf.mxu1 }
 0x632   :  { %v2845_v11 = vmul.f32 0.7978846, %v2781_v1  ;;  %v3085_v45 = vpack.c.bf16 %v3029_v9, %v3025_v22  ;;  %v3027_v34 = vmul.f32 %v2963_v51, %v6472_v57  ;;  %4594 = vtanh.f32 %v2841_v24 }
 0x633   :  { %v3031_v18 = vmul.f32 %v2967_v48, %v6482_v38  ;;  %v2753_v4 = vmul.f32 %v2689_v28, %v6510_v14  ;;  %v2779_v23 = vadd.f32 %v7133_v15, %v7132_v12  ;;  %v2783_v49 = vadd.f32 %v7134_v33, %v6114_v29  ;;  %v2389_v15 = vpop.f32.mrf.mxu0 }
 0x634   :  { %4596 = vtanh.f32 %v2845_v11  ;;  %3417 = vmatmul.mubr.bf16.gmra.mxu0 %v3085_v45  ;;  %v6542_v1 = vmul.f32 %v2687_v2, %v6449_v62  ;;  %v6545_v57 = vadd.f32 %v2385_v56, %v5994_v55  ;;  %v6548_v38 = vadd.f32 %v2498_v31, %v5996_v13 }
 0x635   :  { %v3087_v16 = vpack.c.bf16 %v3031_v18, %v3027_v34  ;;  %v6551_v28 = vmul.f32 %v2686_v53, %v6476_v5  ;;  %v2526_v24 = vmul.f32 0.5, %v6122_v42  ;;  %v2843_v59 = vmul.f32 0.7978846, %v2779_v23 }
 0x636   :  { %v6555_v51 = vadd.f32 %v2387_v3, %v5989_v36  ;;  %v6558_v45 = vmul.f32 %v2688_v0, %v6488_v37  ;;  %v2755_v2 = vmul.f32 %v2691_v32, %v6513_v19  ;;  %v2847_v56 = vmul.f32 0.7978846, %v2783_v49 }
 0x637   :  { %3514 = vmatmul.mubr.bf16.gmra.mxu1 %v3087_v16  ;;  %v6562_v22 = vadd.f32 %v2500_v50, %v5991_v20  ;;  %v2524_v9 = vmul.f32 0.5, %v7124_v17  ;;  %v2528_v48 = vmul.f32 0.5, %v6128_v60  ;;  %v2817_v42 = vadd.f32 %v2753_v4, %v6510_v14  ;;  %v2502_v16 = vpop.f32.mrf.mxu1 }
 0x638   :  { %v4587_v31 = vpop.eup %4586  ;;  %v2629_v36 = vmul.f32 0.044715, %v6555_v51  ;;  %v2521_v0 = vmul.f32 0.5, %v7128_v30  ;;  %v2626_v34 = vmul.f32 0.044715, %v6545_v57  ;;  %4598 = vtanh.f32 %v2843_v59 }
 0x639   :  { %7135 = vst [vmem:[#allocation18_spill] sm:$0xff] %v6562_v22  ;;  %v4589_v53 = vpop.eup %4588  ;;  %v2970_v11 = vadd.f32 1.0, %v4587_v31  ;;  %v2628_v32 = vmul.f32 0.044715, %v6548_v38  ;;  %v2631_v17 = vmul.f32 0.044715, %v6562_v22  ;;  %v2819_v60 = vadd.f32 %v2755_v2, %v6513_v19 }
 0x63a   :  { %v2974_v18 = vadd.f32 1.0, %v4589_v53  ;;  %v2693_v20 = vmul.f32 %v2629_v36, %v6555_v51  ;;  %v2525_v3 = vmul.f32 0.5, %v6104_v43  ;;  %v6576_v4 = vmul.f32 0.5, %v7132_v12 }
 0x63b   :  { %4600 = vtanh.f32 %v2847_v56  ;;  %v4591_v30 = vpop.eup %4590  ;;  %v3034_v23 = vmul.f32 %v2970_v11, %v6500_v35  ;;  %v2881_v49 = vmul.f32 0.7978846, %v2817_v42  ;;  %v2527_v36 = vmul.f32 0.5, %v6114_v29 }
 0x63c   :  { %v3038_v33 = vmul.f32 %v2974_v18, %v2526_v24  ;;  %v2757_v50 = vmul.f32 %v2693_v20, %v6555_v51  ;;  %v4593_v59 = vpop.eup %4592  ;;  %v2972_v31 = vadd.f32 1.0, %v4591_v30  ;;  %v2690_v2 = vmul.f32 %v2626_v34, %v6545_v57 }
 0x63d   :  { %v2695_v43 = vmul.f32 %v2631_v17, %v6562_v22  ;;  %v2976_v53 = vadd.f32 1.0, %v4593_v59  ;;  %v2692_v56 = vmul.f32 %v2628_v32, %v6548_v38  ;;  %v6585_v19 = vadd.f32 %v2389_v15, %v5994_v55 }
 0x63e   :  { %v3090_v12 = vpack.c.bf16 %v3038_v33, %v3034_v23  ;;  %v6587_v35 = vmul.f32 0.7978846, %v2819_v60  ;;  %v2821_v24 = vadd.f32 %v2757_v50, %v6555_v51  ;;  %v6591_v42 = vadd.f32 %v2502_v16, %v5996_v13 }
 0x63f   :  { %v2786_v29 = vadd.f32 %v6247_v8, %v6156_v44  ;;  %v4595_v11 = vpop.eup %4594  ;;  %v3036_v34 = vmul.f32 %v2972_v31, %v2524_v9  ;;  %v3040_v18 = vmul.f32 %v2976_v53, %v2528_v48  ;;  %4602 = vtanh.f32 %v2881_v49 }
 0x640   :  { %3424 = vmatprep.mubr.bf16.mxu0 %v3090_v12  ;;  %v2790_v32 = vadd.f32 %v6267_v61, %v6188_v10  ;;  %v2969_v20 = vadd.f32 1.0, %v4595_v11  ;;  %v6598_v17 = vmul.f32 %v2690_v2, %v6545_v57  ;;  %v2759_v60 = vmul.f32 %v2695_v43, %v6562_v22 }
 0x641   :  { %v4597_v55 = vpop.eup %4596  ;;  %v2850_v13 = vmul.f32 0.7978846, %v2786_v29  ;;  %v3092_v15 = vpack.c.bf16 %v3040_v18, %v3036_v34  ;;  %v6602_v8 = vmul.f32 %v2692_v56, %v6548_v38  ;;  %v2630_v9 = vmul.f32 0.044715, %v6585_v19  ;;  %v7138_v18 = vld [vmem:[#allocation49_spill] sm:$0xff] }
 0x642   :  { %v2973_v30 = vadd.f32 1.0, %v4597_v55  ;;  %v2885_v48 = vmul.f32 0.7978846, %v2821_v24  ;;  %v2632_v23 = vmul.f32 0.044715, %v6591_v42  ;;  %v3033_v61 = vmul.f32 %v2969_v20, %v2521_v0 }
 0x643   :  { %v2854_v33 = vmul.f32 0.7978846, %v2790_v32  ;;  %4604 = vtanh.f32 %v2850_v13  ;;  %3521 = vmatprep.mubr.bf16.mxu1 %v3092_v15  ;;  %v6607_v50 = vmul.f32 0.5, %v6156_v44  ;;  %v2788_v16 = vadd.f32 %v6250_v46, %v6170_v54 }
 0x644   :  { %v3037_v49 = vmul.f32 %v2973_v30, %v2525_v3  ;;  %v2823_v59 = vadd.f32 %v2759_v60, %v6562_v22  ;;  %v6613_v31 = vmul.f32 0.5, %v6188_v10  ;;  %v2792_v2 = vadd.f32 %v6277_v47, %v6195_v40  ;;  %v7136_v10 = vld [vmem:[#allocation47_spill] sm:$0xff] }
 0x645   :  { %4606 = vtanh.f32 %v2854_v33  ;;  %v2852_v12 = vmul.f32 0.7978846, %v2788_v16  ;;  %v2785_v0 = vadd.f32 %v6235_v7, %v6136_v58  ;;  %v2789_v44 = vadd.f32 %v6255_v52, %v6176_v26  ;;  %v4599_v3 = vpop.eup %4598  ;;  %v7137_v7 = vld [vmem:[#allocation40_spill] sm:$0xff]  ;;  %v7139_v30 = vld [vmem:[#allocation43_spill] sm:$0xff] }
 0x646   :  { %v3089_v43 = vpack.c.bf16 %v3037_v49, %v3033_v61  ;;  %4608 = vtanh.f32 %v2885_v48  ;;  %v6622_v46 = vmul.f32 %v2630_v9, %v6585_v19  ;;  %v2856_v53 = vmul.f32 0.7978846, %v2792_v2  ;;  %v7140_v9 = vld [vmem:[#allocation55_spill] sm:$0xff]  ;;  %v7141_v49 = vld [vmem:[#allocation64_spill] sm:$0xff] }
 0x647   :  { %v2787_v56 = vadd.f32 %v7136_v10, %v6146_v25  ;;  %v2971_v47 = vadd.f32 1.0, %v4599_v3  ;;  %4610 = vtanh.f32 %v2852_v12  ;;  %v2849_v29 = vmul.f32 0.7978846, %v2785_v0  ;;  %v7142_v2 = vld [vmem:[#allocation48_spill] sm:$0xff]  ;;  %v7146_v10 = vld [vmem:[#allocation41_spill] sm:$0xff] }
 0x648   :  { %v4601_v24 = vpop.eup %4600  ;;  %3425 = vmatmul.mubr.bf16.gmra.mxu0 %v3089_v43  ;;  %v2853_v11 = vmul.f32 0.7978846, %v2789_v44  ;;  %4612 = vtanh.f32 %v2856_v53  ;;  %v2791_v52 = vadd.f32 %v7138_v18, %v7137_v7  ;;  %v6629_v20 = vmul.f32 0.7978846, %v2823_v59  ;;  %v7144_v44 = vld [vmem:[#allocation53_spill] sm:$0xff] }
 0x649   :  { %v2975_v34 = vadd.f32 1.0, %v4601_v24  ;;  %v2851_v32 = vmul.f32 0.7978846, %v2787_v56  ;;  %v3035_v55 = vmul.f32 %v2971_v47, %v6576_v4  ;;  %v6632_v60 = vmul.f32 %v2632_v23, %v6591_v42  ;;  %v7147_v56 = vld [vmem:[#allocation52_spill] sm:$0xff]  ;;  %v7148_v47 = vld [vmem:[#allocation50_spill] sm:$0xff] }
 0x64a   :  { %4614 = vtanh.f32 %v2849_v29  ;;  %v2855_v15 = vmul.f32 0.7978846, %v2791_v52  ;;  %v2794_v48 = vadd.f32 %v7140_v9, %v7139_v30  ;;  %v2532_v33 = vmul.f32 0.5, %v6170_v54  ;;  %v7149_v29 = vld [vmem:[#allocation61_spill] sm:$0xff]  ;;  %v7150_v9 = vld [vmem:[#allocation42_spill] sm:$0xff] }
 0x64b   :  { %v3039_v13 = vmul.f32 %v2975_v34, %v2527_v36  ;;  %4616 = vtanh.f32 %v2853_v11  ;;  %v2536_v61 = vmul.f32 0.5, %v6195_v40  ;;  %v2798_v4 = vadd.f32 %v7141_v49, %v6270_v41  ;;  %v7143_v36 = vld [vmem:[#allocation60_spill] sm:$0xff]  ;;  %v7145_v40 = vld [vmem:[#allocation65_spill] sm:$0xff] }
 0x64c   :  { %4618 = vtanh.f32 %v2851_v32  ;;  %v6640_v16 = vpop.eup %4602  ;;  %v2858_v23 = vmul.f32 0.7978846, %v2794_v48  ;;  %v2796_v43 = vadd.f32 %v7143_v36, %v7142_v2  ;;  %v2529_v12 = vmul.f32 0.5, %v6136_v58  ;;  %v7151_v48 = vld [vmem:[#allocation54_spill] sm:$0xff] }
 0x64d   :  { %v3091_v59 = vpack.c.bf16 %v3039_v13, %v3035_v55  ;;  %4620 = vtanh.f32 %v2855_v15  ;;  %v6646_v0 = vmul.f32 0.5, %v6176_v26  ;;  %v2862_v54 = vmul.f32 0.7978846, %v2798_v4  ;;  %v7152_v4 = vld [vmem:[#allocation51_spill] sm:$0xff] }
 0x64e   :  { %v2800_v3 = vadd.f32 %v7145_v40, %v7144_v44  ;;  %4622 = vtanh.f32 %v2858_v23  ;;  %v2860_v53 = vmul.f32 0.7978846, %v2796_v43  ;;  %v2793_v24 = vadd.f32 %v7147_v56, %v7146_v10  ;;  %v7154_v40 = vld [vmem:[#allocation58_spill] sm:$0xff] }
 0x64f   :  { %3522 = vmatmul.mubr.bf16.gmra.mxu1 %v3091_v59  ;;  %v2797_v11 = vadd.f32 %v7149_v29, %v7148_v47  ;;  %v2531_v18 = vmul.f32 0.5, %v6146_v25  ;;  %v6656_v58 = vmul.f32 0.5, %v7137_v7  ;;  %4624 = vtanh.f32 %v2862_v54  ;;  %v7153_v59 = vld [vmem:[#allocation62_spill] sm:$0xff] }
 0x650   :  { %v4605_v34 = vpop.eup %4604  ;;  %v2864_v26 = vmul.f32 0.7978846, %v2800_v3  ;;  %4626 = vtanh.f32 %v2860_v53  ;;  %v2857_v32 = vmul.f32 0.7978846, %v2793_v24  ;;  %v6659_v15 = vmul.f32 0.5, %v7139_v30  ;;  %v7155_v3 = vld [vmem:[#allocation3_spill] sm:$0xff] }
 0x651   :  { %v2978_v52 = vadd.f32 1.0, %v4605_v34  ;;  %v2861_v55 = vmul.f32 0.7978846, %v2797_v11  ;;  %v2795_v49 = vadd.f32 %v7151_v48, %v7150_v9  ;;  %v2799_v25 = vadd.f32 %v7153_v59, %v7152_v4 }
 0x652   :  { %v4607_v13 = vpop.eup %4606  ;;  %4628 = vtanh.f32 %v2864_v26  ;;  %v6666_v7 = vmul.f32 0.5, %v6270_v41  ;;  %v6669_v36 = vmul.f32 0.5, %v7142_v2  ;;  %v2802_v53 = vadd.f32 %v7155_v3, %v7154_v40 }
 0x653   :  { %v2982_v23 = vadd.f32 1.0, %v4607_v13  ;;  %4630 = vtanh.f32 %v2857_v32  ;;  %v6671_v43 = vpop.eup %4608  ;;  %v2859_v30 = vmul.f32 0.7978846, %v2795_v49  ;;  %v2863_v54 = vmul.f32 0.7978846, %v2799_v25  ;;  %v7156_v32 = vld [vmem:[#allocation6_spill] sm:$0xff] }
 0x654   :  { %4632 = vtanh.f32 %v2861_v55  ;;  %v4611_v56 = vpop.eup %4610  ;;  %v3042_v24 = vmul.f32 %v2978_v52, %v6607_v50  ;;  %v6678_v41 = vmul.f32 0.5, %v7144_v44  ;;  %v2806_v2 = vadd.f32 %v6455_v21, %v6372_v39  ;;  %v7157_v44 = vld [vmem:[#allocation68_spill] sm:$0xff] }
 0x655   :  { %v3046_v29 = vmul.f32 %v2982_v23, %v6613_v31  ;;  %v4613_v11 = vpop.eup %4612  ;;  %v2980_v34 = vadd.f32 1.0, %v4611_v56  ;;  %4634 = vtanh.f32 %v2859_v30  ;;  %v2866_v26 = vmul.f32 0.7978846, %v2802_v53  ;;  %v7158_v25 = vld [vmem:[#allocation4_spill] sm:$0xff] }
 0x656   :  { %v2804_v55 = vadd.f32 %v7156_v32, %v6327_v6  ;;  %v2984_v49 = vadd.f32 1.0, %v4613_v11  ;;  %4636 = vtanh.f32 %v2863_v54  ;;  %v2870_v50 = vmul.f32 0.7978846, %v2806_v2 }
 0x657   :  { %v4615_v13 = vpop.eup %4614  ;;  %v3094_v48 = vpack.c.bf16 %v3046_v29, %v3042_v24  ;;  %v3044_v31 = vmul.f32 %v2980_v34, %v2532_v33  ;;  %4638 = vtanh.f32 %v2866_v26  ;;  %v2808_v23 = vadd.f32 %v7158_v25, %v7157_v44 }
 0x658   :  { %v4617_v52 = vpop.eup %4616  ;;  %v2977_v59 = vadd.f32 1.0, %v4615_v13  ;;  %v3048_v3 = vmul.f32 %v2984_v49, %v2536_v61  ;;  %4640 = vtanh.f32 %v2870_v50  ;;  %v2868_v53 = vmul.f32 0.7978846, %v2804_v55  ;;  %v7159_v61 = vld [vmem:[#allocation56_spill] sm:$0xff]  ;;  %v7160_v13 = vld [vmem:[#allocation66_spill] sm:$0xff]  ;;  %v7161_v50 = vld [vmem:[#allocation59_spill] sm:$0xff] }
 0x659   :  { %v4619_v21 = vpop.eup %4618  ;;  %3432 = vmatprep.mubr.bf16.mxu0 %v3094_v48  ;;  %v2981_v30 = vadd.f32 1.0, %v4617_v52  ;;  %v2537_v24 = vmul.f32 0.5, %v7146_v10  ;;  %v2872_v54 = vmul.f32 0.7978846, %v2808_v23  ;;  %v2541_v26 = vmul.f32 0.5, %v7148_v47  ;;  %v7162_v52 = vld [vmem:[#allocation34_spill] sm:$0xff] }
 0x65a   :  { %v4621_v56 = vpop.eup %4620  ;;  %v3041_v32 = vmul.f32 %v2977_v59, %v2529_v12  ;;  %v2979_v22 = vadd.f32 1.0, %v4619_v21  ;;  %v3096_v29 = vpack.c.bf16 %v3048_v3, %v3044_v31  ;;  %4642 = vtanh.f32 %v2868_v53 }
 0x65b   :  { %v3045_v33 = vmul.f32 %v2981_v30, %v6646_v0  ;;  %v2983_v2 = vadd.f32 1.0, %v4621_v56  ;;  %v4623_v11 = vpop.eup %4622  ;;  %4644 = vtanh.f32 %v2872_v54  ;;  %v2801_v48 = vadd.f32 %v7160_v13, %v7159_v61  ;;  %v7164_v54 = vld [vmem:[#allocation67_spill] sm:$0xff] }
 0x65c   :  { %v3043_v34 = vmul.f32 %v2979_v22, %v2531_v18  ;;  %v4625_v55 = vpop.eup %4624  ;;  %3529 = vmatprep.mubr.bf16.mxu1 %v3096_v29  ;;  %v2986_v10 = vadd.f32 1.0, %v4623_v11  ;;  %v2805_v31 = vadd.f32 %v7162_v52, %v7161_v50  ;;  %v2539_v25 = vmul.f32 0.5, %v7150_v9  ;;  %v7166_v11 = vld [vmem:[#allocation27_spill] sm:$0xff] }
 0x65d   :  { %v3093_v12 = vpack.c.bf16 %v3045_v33, %v3041_v32  ;;  %v3047_v49 = vmul.f32 %v2983_v2, %v6656_v58  ;;  %v4627_v0 = vpop.eup %4626  ;;  %v2990_v59 = vadd.f32 1.0, %v4625_v55  ;;  %v2543_v22 = vmul.f32 0.5, %v7152_v4  ;;  %v7163_v32 = vld [vmem:[#allocation57_spill] sm:$0xff]  ;;  %v7165_v2 = vld [vmem:[#allocation63_spill] sm:$0xff] }
 0x65e   :  { %v2865_v47 = vmul.f32 0.7978846, %v2801_v48  ;;  %v3050_v21 = vmul.f32 %v2986_v10, %v6659_v15  ;;  %v2988_v3 = vadd.f32 1.0, %v4627_v0  ;;  %v2869_v30 = vmul.f32 0.7978846, %v2805_v31 }
 0x65f   :  { %v4629_v18 = vpop.eup %4628  ;;  %3433 = vmatmul.mubr.bf16.gmra.mxu0 %v3093_v12  ;;  %v3095_v23 = vpack.c.bf16 %v3047_v49, %v3043_v34  ;;  %v3054_v58 = vmul.f32 %v2990_v59, %v6666_v7  ;;  %v2803_v29 = vadd.f32 %v7164_v54, %v7163_v32  ;;  %v2807_v34 = vadd.f32 %v7166_v11, %v7165_v2  ;;  %v7170_v11 = vld [vmem:[#allocation9_spill] sm:$0xff] }
 0x660   :  { %v4631_v53 = vpop.eup %4630  ;;  %v2992_v56 = vadd.f32 1.0, %v4629_v18  ;;  %4646 = vtanh.f32 %v2865_v47  ;;  %v3052_v9 = vmul.f32 %v2988_v3, %v6669_v36  ;;  %v2546_v49 = vmul.f32 0.5, %v7154_v40 }
 0x661   :  { %v4633_v33 = vpop.eup %4632  ;;  %3530 = vmatmul.mubr.bf16.gmra.mxu1 %v3095_v23  ;;  %v2985_v4 = vadd.f32 1.0, %v4631_v53  ;;  %4648 = vtanh.f32 %v2869_v30  ;;  %v3098_v15 = vpack.c.bf16 %v3054_v58, %v3050_v21  ;;  %v2867_v55 = vmul.f32 0.7978846, %v2803_v29  ;;  %v7167_v23 = vld [vmem:[#allocation11_spill] sm:$0xff] }
 0x662   :  { %v3056_v13 = vmul.f32 %v2992_v56, %v6678_v41  ;;  %v2989_v48 = vadd.f32 1.0, %v4633_v33  ;;  %v4635_v7 = vpop.eup %4634  ;;  %v2550_v10 = vmul.f32 0.5, %v6372_v39  ;;  %v2871_v52 = vmul.f32 0.7978846, %v2807_v34  ;;  %v7168_v41 = vld [vmem:[#allocation25_spill] sm:$0xff] }
 0x663   :  { %v3049_v12 = vmul.f32 %v2985_v4, %v2537_v24  ;;  %v4637_v31 = vpop.eup %4636  ;;  %3440 = vmatprep.mubr.bf16.mxu0 %v3098_v15  ;;  %v2987_v59 = vadd.f32 1.0, %v4635_v7  ;;  %4650 = vtanh.f32 %v2867_v55  ;;  %v2810_v21 = vadd.f32 %v7168_v41, %v7167_v23  ;;  %v7169_v4 = vld [vmem:[#allocation8_spill] sm:$0xff] }
 0x664   :  { %v3100_v36 = vpack.c.bf16 %v3056_v13, %v3052_v9  ;;  %v3053_v0 = vmul.f32 %v2989_v48, %v2541_v26  ;;  %v4639_v47 = vpop.eup %4638  ;;  %v2991_v18 = vadd.f32 1.0, %v4637_v31  ;;  %4652 = vtanh.f32 %v2871_v52  ;;  %v7172_v52 = vld [vmem:[#allocation23_spill] sm:$0xff] }
 0x665   :  { %v2814_v24 = vadd.f32 %v6551_v28, %v6476_v5  ;;  %v4641_v3 = vpop.eup %4640  ;;  %v3051_v39 = vmul.f32 %v2987_v59, %v2539_v25  ;;  %v2994_v30 = vadd.f32 1.0, %v4639_v47  ;;  %v2548_v53 = vmul.f32 0.5, %v6327_v6  ;;  %v7174_v59 = vld [vmem:[#allocation2_spill] sm:$0xff] }
 0x666   :  { %3537 = vmatprep.mubr.bf16.mxu1 %v3100_v36  ;;  %v3097_v40 = vpack.c.bf16 %v3053_v0, %v3049_v12  ;;  %v3055_v58 = vmul.f32 %v2991_v18, %v2543_v22  ;;  %v2998_v26 = vadd.f32 1.0, %v4641_v3  ;;  %v2874_v56 = vmul.f32 0.7978846, %v2810_v21 }
 0x667   :  { %v2878_v54 = vmul.f32 0.7978846, %v2814_v24  ;;  %v4643_v29 = vpop.eup %4642  ;;  %v3058_v33 = vmul.f32 %v2994_v30, %v2546_v49  ;;  %v2552_v9 = vmul.f32 0.5, %v7157_v44  ;;  %v2812_v34 = vadd.f32 %v7170_v11, %v7169_v4 }
 0x668   :  { %3441 = vmatmul.mubr.bf16.gmra.mxu0 %v3097_v40  ;;  %v2816_v28 = vadd.f32 %v6558_v45, %v6488_v37  ;;  %v4645_v15 = vpop.eup %4644  ;;  %v3099_v25 = vpack.c.bf16 %v3055_v58, %v3051_v39  ;;  %v3062_v13 = vmul.f32 %v2998_v26, %v2550_v10  ;;  %v2996_v48 = vadd.f32 1.0, %v4643_v29  ;;  %v7171_v45 = vld [vmem:[#allocation24_spill] sm:$0xff] }
 0x669   :  { %4654 = vtanh.f32 %v2874_v56  ;;  %v3000_v6 = vadd.f32 1.0, %v4645_v15  ;;  %v2876_v22 = vmul.f32 0.7978846, %v2812_v34  ;;  %v2758_v44 = vmul.f32 %v6622_v46, %v6585_v19  ;;  %v7173_v46 = vld [vmem:[#allocation5_spill] sm:$0xff] }
 0x66a   :  { %4656 = vtanh.f32 %v2878_v54  ;;  %v2880_v55 = vmul.f32 0.7978846, %v2816_v28  ;;  %3538 = vmatmul.mubr.bf16.gmra.mxu1 %v3099_v25  ;;  %v3102_v7 = vpack.c.bf16 %v3062_v13, %v3058_v33  ;;  %v3060_v12 = vmul.f32 %v2996_v48, %v2548_v53 }
 0x66b   :  { %4658 = vtanh.f32 %v6629_v20  ;;  %v3064_v49 = vmul.f32 %v3000_v6, %v2552_v9  ;;  %v2809_v31 = vadd.f32 %v7172_v52, %v7171_v45  ;;  %v2813_v10 = vadd.f32 %v6526_v27, %v6440_v63 }
 0x66c   :  { %4660 = vtanh.f32 %v2876_v22  ;;  %v2760_v0 = vmul.f32 %v6632_v60, %v6591_v42  ;;  %3448 = vmatprep.mubr.bf16.mxu0 %v3102_v7  ;;  %v2545_v20 = vmul.f32 0.5, %v7159_v61  ;;  %v2811_v47 = vadd.f32 %v7174_v59, %v7173_v46 }
 0x66d   :  { %v4647_v36 = vpop.eup %4646  ;;  %4662 = vtanh.f32 %v2880_v55  ;;  %v3104_v41 = vpack.c.bf16 %v3064_v49, %v3060_v12  ;;  %v2873_v24 = vmul.f32 0.7978846, %v2809_v31  ;;  %v2877_v3 = vmul.f32 0.7978846, %v2813_v10 }
 0x66e   :  { %v4649_v18 = vpop.eup %4648  ;;  %v2993_v21 = vadd.f32 1.0, %v4647_v36  ;;  %v2549_v40 = vmul.f32 0.5, %v7161_v50  ;;  %v2815_v27 = vadd.f32 %v6542_v1, %v6449_v62  ;;  %v2875_v30 = vmul.f32 0.7978846, %v2811_v47 }
 0x66f   :  { %v2997_v39 = vadd.f32 1.0, %v4649_v18  ;;  %3545 = vmatprep.mubr.bf16.mxu1 %v3104_v41  ;;  %v2547_v61 = vmul.f32 0.5, %v7163_v32  ;;  %4664 = vtanh.f32 %v2873_v24  ;;  %v2818_v53 = vadd.f32 %v6598_v17, %v6545_v57 }
 0x670   :  { %v3057_v60 = vmul.f32 %v2993_v21, %v2545_v20  ;;  %v4651_v58 = vpop.eup %4650  ;;  %4666 = vtanh.f32 %v2877_v3  ;;  %v2879_v56 = vmul.f32 0.7978846, %v2815_v27  ;;  %v2822_v54 = vadd.f32 %v2758_v44, %v6585_v19 }
 0x671   :  { %v3061_v26 = vmul.f32 %v2997_v39, %v2549_v40  ;;  %v4653_v50 = vpop.eup %4652  ;;  %v2551_v29 = vmul.f32 0.5, %v7165_v2  ;;  %v2995_v33 = vadd.f32 1.0, %v4651_v58  ;;  %4668 = vtanh.f32 %v2875_v30 }
 0x672   :  { %v2882_v1 = vmul.f32 0.7978846, %v2818_v53  ;;  %v2999_v11 = vadd.f32 1.0, %v4653_v50  ;;  %4670 = vtanh.f32 %v2879_v56  ;;  %v2886_v32 = vmul.f32 0.7978846, %v2822_v54 }
 0x673   :  { %v3101_v9 = vpack.c.bf16 %v3061_v26, %v3057_v60  ;;  %v2820_v17 = vadd.f32 %v6602_v8, %v6548_v38  ;;  %v3059_v34 = vmul.f32 %v2995_v33, %v2547_v61  ;;  %v2824_v15 = vadd.f32 %v2760_v0, %v6591_v42 }
 0x674   :  { %4672 = vtanh.f32 %v2882_v1  ;;  %v3063_v28 = vmul.f32 %v2999_v11, %v2551_v29  ;;  %v2554_v44 = vmul.f32 0.5, %v7167_v23  ;;  %v2558_v7 = vmul.f32 0.5, %v6476_v5 }
 0x675   :  { %3449 = vmatmul.mubr.bf16.gmra.mxu0 %v3101_v9  ;;  %4674 = vtanh.f32 %v2886_v32  ;;  %v2884_v13 = vmul.f32 0.7978846, %v2820_v17  ;;  %v2888_v22 = vmul.f32 0.7978846, %v2824_v15  ;;  %v2556_v36 = vmul.f32 0.5, %v7169_v4 }
 0x676   :  { %v4655_v25 = vpop.eup %4654  ;;  %4676 = vtanh.f32 %v6587_v35  ;;  %v3103_v48 = vpack.c.bf16 %v3063_v28, %v3059_v34  ;;  %v2560_v35 = vmul.f32 0.5, %v6488_v37  ;;  %v2553_v24 = vmul.f32 0.5, %v7171_v45 }
 0x677   :  { %v4657_v2 = vpop.eup %4656  ;;  %v3002_v6 = vadd.f32 1.0, %v4655_v25  ;;  %4678 = vtanh.f32 %v2884_v13  ;;  %v2557_v3 = vmul.f32 0.5, %v6440_v63  ;;  %v2555_v4 = vmul.f32 0.5, %v7173_v46 }
 0x678   :  { %v4659_v55 = vpop.eup %4658  ;;  %v3006_v8 = vadd.f32 1.0, %v4657_v2  ;;  %3546 = vmatmul.mubr.bf16.gmra.mxu1 %v3103_v48  ;;  %4680 = vtanh.f32 %v2888_v22  ;;  %v2559_v61 = vmul.f32 0.5, %v6449_v62  ;;  %v2562_v26 = vmul.f32 0.5, %v6545_v57  ;;  %v7175_v2 = vld [vmem:[#allocation18_spill] sm:$0xff] }
 0x679   :  { %v4661_v12 = vpop.eup %4660  ;;  %v3066_v52 = vmul.f32 %v3002_v6, %v2554_v44  ;;  %v2566_v56 = vmul.f32 0.5, %v6585_v19  ;;  %v3013_v63 = vadd.f32 1.0, %v6671_v43  ;;  %v2564_v1 = vmul.f32 0.5, %v6548_v38 }
 0x67a   :  { %v4663_v49 = vpop.eup %4662  ;;  %v3070_v31 = vmul.f32 %v3006_v8, %v2558_v7  ;;  %v3004_v10 = vadd.f32 1.0, %v4661_v12  ;;  %v2565_v9 = vmul.f32 0.5, %v6555_v51  ;;  %v3009_v62 = vadd.f32 1.0, %v6640_v16  ;;  %v7176_v16 = vld [vmem:[#allocation19_spill] sm:$0xff] }
 0x67b   :  { %v3008_v0 = vadd.f32 1.0, %v4663_v49  ;;  %v3015_v19 = vadd.f32 1.0, %v4659_v55  ;;  %v2568_v43 = vmul.f32 0.5, %v6591_v42  ;;  %v2561_v15 = vmul.f32 0.5, %v6510_v14 }
 0x67c   :  { %v3106_v20 = vpack.c.bf16 %v3070_v31, %v3066_v52  ;;  %v4665_v59 = vpop.eup %4664  ;;  %v3068_v47 = vmul.f32 %v3004_v10, %v2556_v36  ;;  %v3077_v25 = vmul.f32 %v3013_v63, %v2565_v9  ;;  %v2567_v51 = vmul.f32 0.5, %v7175_v2  ;;  %v6761_v10 = vld [vmem:[%s6835_s16] ss:$0 sm:$0xff] }
 0x67d   :  { %v3072_v23 = vmul.f32 %v3008_v0, %v2560_v35  ;;  %v4667_v18 = vpop.eup %4666  ;;  %v3001_v5 = vadd.f32 1.0, %v4665_v59  ;;  %v2563_v6 = vmul.f32 0.5, %v7176_v16  ;;  %v3073_v7 = vmul.f32 %v3009_v62, %v2561_v15  ;;  %v7179_v62 = vld [vmem:[#allocation32_spill] sm:$0xff] }
 0x67e   :  { %3456 = vmatprep.mubr.bf16.mxu0 %v3106_v20  ;;  %v4669_v41 = vpop.eup %4668  ;;  %v3005_v40 = vadd.f32 1.0, %v4667_v18  ;;  %v3079_v55 = vmul.f32 %v3015_v19, %v2567_v51 }
 0x67f   :  { %v3108_v21 = vpack.c.bf16 %v3072_v23, %v3068_v47  ;;  %v4671_v39 = vpop.eup %4670  ;;  %v3003_v27 = vadd.f32 1.0, %v4669_v41  ;;  %v3065_v30 = vmul.f32 %v3001_v5, %v2553_v24  ;;  %v3109_v12 = vpack.c.bf16 %v3077_v25, %v3073_v7 }
 0x680   :  { %v3069_v60 = vmul.f32 %v3005_v40, %v2557_v3  ;;  %v3007_v53 = vadd.f32 1.0, %v4671_v39  ;;  %v7177_v40 = vld [vmem:[#allocation38_spill] sm:$0xff] }
 0x681   :  { %v4673_v37 = vpop.eup %4672  ;;  %3553 = vmatprep.mubr.bf16.mxu1 %v3108_v21  ;;  %v3067_v50 = vmul.f32 %v3003_v27, %v2555_v4  ;;  %v7178_v4 = vld [vmem:[#allocation37_spill] sm:$0xff] }
 0x682   :  { %v4675_v58 = vpop.eup %4674  ;;  %v3010_v45 = vadd.f32 1.0, %v4673_v37  ;;  %v3105_v54 = vpack.c.bf16 %v3069_v60, %v3065_v30  ;;  %v3071_v29 = vmul.f32 %v3007_v53, %v2559_v61 }
 0x683   :  { %v3014_v46 = vadd.f32 1.0, %v4675_v58  ;;  %v4677_v33 = vpop.eup %4676 }
 0x684   :  { %v4679_v11 = vpop.eup %4678  ;;  %3457 = vmatmul.mubr.bf16.gmra.mxu0 %v3105_v54  ;;  %v3107_v32 = vpack.c.bf16 %v3071_v29, %v3067_v50  ;;  %v3074_v57 = vmul.f32 %v3010_v45, %v2562_v26  ;;  %v3011_v48 = vadd.f32 1.0, %v4677_v33 }
 0x685   :  { %v3078_v17 = vmul.f32 %v3014_v46, %v2566_v56  ;;  %v4681_v34 = vpop.eup %4680  ;;  %v3012_v28 = vadd.f32 1.0, %v4679_v11 }
 0x686   :  { %3554 = vmatmul.mubr.bf16.gmra.mxu1 %v3107_v32  ;;  %v3016_v38 = vadd.f32 1.0, %v4681_v34  ;;  %v3075_v42 = vmul.f32 %v3011_v48, %v2563_v6  ;;  %v7180_v32 = vld [vmem:[#allocation16_spill] sm:$0xff] }
 0x687   :  { %v3110_v13 = vpack.c.bf16 %v3078_v17, %v3074_v57  ;;  %v3076_v22 = vmul.f32 %v3012_v28, %v2564_v1 }
 0x688   :  { %v3080_v44 = vmul.f32 %v3016_v38, %v2568_v43  ;;  %v3111_v14 = vpack.c.bf16 %v3079_v55, %v3075_v42  ;;  %v7181_v55 = vld [vmem:[#allocation33_spill] sm:$0xff] }
 0x689   :  { %3464 = vmatprep.mubr.bf16.mxu0 %v3110_v13 }
 0x68a   :  { %v3112_v8 = vpack.c.bf16 %v3080_v44, %v3076_v22 }
 0x68c   :  { %3561 = vmatprep.mubr.bf16.mxu1 %v3112_v8  ;;  %3465 = vmatmul.mubr.bf16.gmra.mxu0 %v3109_v12  ;;  %v7182_v12 = vld [vmem:[#allocation30_spill] sm:$0xff] }
 0x68e   :  { %3562 = vmatmul.mubr.bf16.gmra.mxu1 %v3111_v14 }
 0x6dd   :  { %v4061_v49 = vpop.f32.mrf.mxu0 }
 0x6df   :  { %v4062_v52 = vpop.f32.mrf.mxu0 }
 0x6e0   :  { %v4063_v36 = vadd.f32 %v4062_v52, %v4061_v49 }
 0x6e1   :  { %v4064_v35 = vpop.f32.mrf.mxu0 }
 0x6e2   :  { %v4125_v31 = vpop.f32.mrf.mxu1  ;;  %v3411_v20 = vadd.f32 %v4063_v36, %v6761_v10 }
 0x6e3   :  { %v4065_v59 = vpop.f32.mrf.mxu0 }
 0x6e4   :  { %v4126_v0 = vpop.f32.mrf.mxu1  ;;  %v4066_v23 = vadd.f32 %v4065_v59, %v4064_v35 }
 0x6e5   :  { %v4127_v18 = vadd.f32 %v4126_v0, %v4125_v31 }
 0x6e6   :  { %v4128_v47 = vpop.f32.mrf.mxu1  ;;  %v3414_v5 = vadd.f32 %v4066_v23, %v6761_v10 }
 0x6e7   :  { %v3508_v21 = vadd.f32 %v4127_v18, %v3411_v20 }
 0x6e8   :  { %v4129_v41 = vpop.f32.mrf.mxu1 }
 0x6e9   :  { %v4130_v24 = vadd.f32 %v4129_v41, %v4128_v47  ;;  %v3570_v39 = vadd.f32 %v3508_v21, %v7177_v40 }
 0x6eb   :  { %v3511_v3 = vadd.f32 %v4130_v24, %v3414_v5 }
 0x6ed   :  { %v3571_v27 = vadd.f32 %v3511_v3, %v7178_v4 }
 0x6ef   :  { %v3938_v37 = vpack.c.bf16 %v3571_v27, %v3570_v39 }
 0x6f1   :  { %3939 = vst [vmem:[%s6836_s17] sm:$0xff] %v3938_v37   ;;  %v7183_v37 = vld [vmem:[#allocation17_spill] sm:$0xff] }
 0x6f4   :  { %v4067_v30 = vpop.f32.mrf.mxu0 }
 0x6f6   :  { %v4068_v61 = vpop.f32.mrf.mxu0 }
 0x6f7   :  { %v4131_v60 = vpop.f32.mrf.mxu1  ;;  %v4069_v53 = vadd.f32 %v4068_v61, %v4067_v30 }
 0x6f8   :  { %v4070_v26 = vpop.f32.mrf.mxu0 }
 0x6f9   :  { %v4132_v58 = vpop.f32.mrf.mxu1  ;;  %v3419_v56 = vadd.f32 %v4069_v53, %v6761_v10 }
 0x6fa   :  { %v4071_v63 = vpop.f32.mrf.mxu0  ;;  %v4133_v54 = vadd.f32 %v4132_v58, %v4131_v60  ;;  %v7184_v60 = vld [vmem:[#allocation14_spill] sm:$0xff] }
 0x6fb   :  { %v4134_v45 = vpop.f32.mrf.mxu1  ;;  %v4072_v50 = vadd.f32 %v4071_v63, %v4070_v26 }
 0x6fc   :  { %v3516_v46 = vadd.f32 %v4133_v54, %v3419_v56 }
 0x6fd   :  { %v4135_v29 = vpop.f32.mrf.mxu1  ;;  %v3422_v33 = vadd.f32 %v4072_v50, %v6761_v10 }
 0x6fe   :  { %v4136_v1 = vadd.f32 %v4135_v29, %v4134_v45  ;;  %v3572_v11 = vadd.f32 %v3516_v46, %v7179_v62 }
 0x700   :  { %v3519_v9 = vadd.f32 %v4136_v1, %v3422_v33 }
 0x702   :  { %v3573_v57 = vadd.f32 %v3519_v9, %v7180_v32 }
 0x704   :  { %v3943_v17 = vpack.c.bf16 %v3573_v57, %v3572_v11  ;;  %v7185_v11 = vld [vmem:[#allocation31_spill] sm:$0xff] }
 0x705   :  { %v7186_v57 = vld [vmem:[#allocation15_spill] sm:$0xff] }
 0x706   :  { %3982 = vst [vmem:[%s6836_s17 + $0x8] sm:$0xff] %v3943_v17  }
 0x708   :  { %v4073_v19 = vpop.f32.mrf.mxu0 }
 0x70a   :  { %v4074_v34 = vpop.f32.mrf.mxu0 }
 0x70b   :  { %v4075_v28 = vadd.f32 %v4074_v34, %v4073_v19 }
 0x70c   :  { %v4076_v43 = vpop.f32.mrf.mxu0 }
 0x70d   :  { %v3427_v2 = vadd.f32 %v4075_v28, %v6761_v10 }
 0x70e   :  { %v4077_v15 = vpop.f32.mrf.mxu0 }
 0x70f   :  { %v4137_v25 = vpop.f32.mrf.mxu1  ;;  %v4078_v13 = vadd.f32 %v4077_v15, %v4076_v43 }
 0x711   :  { %v4138_v38 = vpop.f32.mrf.mxu1  ;;  %v3430_v16 = vadd.f32 %v4078_v13, %v6761_v10 }
 0x712   :  { %v4139_v48 = vadd.f32 %v4138_v38, %v4137_v25 }
 0x713   :  { %v4140_v51 = vpop.f32.mrf.mxu1 }
 0x714   :  { %v3524_v22 = vadd.f32 %v4139_v48, %v3427_v2 }
 0x715   :  { %v4141_v6 = vpop.f32.mrf.mxu1 }
 0x716   :  { %v4142_v44 = vadd.f32 %v4141_v6, %v4140_v51  ;;  %v3574_v8 = vadd.f32 %v3524_v22, %v7181_v55  ;;  %v7187_v55 = vld [vmem:[#allocation28_spill] sm:$0xff] }
 0x718   :  { %v3527_v7 = vadd.f32 %v4142_v44, %v3430_v16 }
 0x71a   :  { %v3575_v42 = vadd.f32 %v3527_v7, %v7182_v12  ;;  %v7188_v12 = vld [vmem:[#allocation12_spill] sm:$0xff] }
 0x71c   :  { %v3948_v14 = vpack.c.bf16 %v3575_v42, %v3574_v8 }
 0x71e   :  { %3983 = vst [vmem:[%s6836_s17 + $0x10] sm:$0xff] %v3948_v14  }
 0x71f   :  { %v4079_v49 = vpop.f32.mrf.mxu0 }
 0x721   :  { %v4143_v52 = vpop.f32.mrf.mxu1  ;;  %v4080_v31 = vpop.f32.mrf.mxu0 }
 0x722   :  { %v4081_v36 = vadd.f32 %v4080_v31, %v4079_v49 }
 0x723   :  { %v4144_v35 = vpop.f32.mrf.mxu1  ;;  %v4082_v0 = vpop.f32.mrf.mxu0 }
 0x724   :  { %v3435_v20 = vadd.f32 %v4081_v36, %v6761_v10  ;;  %v4145_v23 = vadd.f32 %v4144_v35, %v4143_v52 }
 0x725   :  { %v4146_v59 = vpop.f32.mrf.mxu1  ;;  %v4083_v47 = vpop.f32.mrf.mxu0 }
 0x726   :  { %v4084_v18 = vadd.f32 %v4083_v47, %v4082_v0  ;;  %v3532_v41 = vadd.f32 %v4145_v23, %v3435_v20 }
 0x727   :  { %v4147_v5 = vpop.f32.mrf.mxu1 }
 0x728   :  { %v3438_v21 = vadd.f32 %v4084_v18, %v6761_v10  ;;  %v4148_v24 = vadd.f32 %v4147_v5, %v4146_v59  ;;  %v4085_v3 = vpop.f32.mrf.mxu0  ;;  %v3576_v30 = vadd.f32 %v3532_v41, %v7183_v37 }
 0x72a   :  { %v3535_v40 = vadd.f32 %v4148_v24, %v3438_v21  ;;  %v4086_v39 = vpop.f32.mrf.mxu0  ;;  %v4149_v4 = vpop.f32.mrf.mxu1 }
 0x72b   :  { %v4087_v27 = vadd.f32 %v4086_v39, %v4085_v3 }
 0x72c   :  { %v3577_v61 = vadd.f32 %v3535_v40, %v7184_v60  ;;  %v4088_v53 = vpop.f32.mrf.mxu0  ;;  %v4150_v58 = vpop.f32.mrf.mxu1  ;;  %v7189_v60 = vld [vmem:[#allocation29_spill] sm:$0xff] }
 0x72d   :  { %v3443_v56 = vadd.f32 %v4087_v27, %v6761_v10  ;;  %v4151_v50 = vadd.f32 %v4150_v58, %v4149_v4 }
 0x72e   :  { %v3953_v26 = vpack.c.bf16 %v3577_v61, %v3576_v30  ;;  %v4089_v45 = vpop.f32.mrf.mxu0  ;;  %v4152_v63 = vpop.f32.mrf.mxu1 }
 0x72f   :  { %v4090_v54 = vadd.f32 %v4089_v45, %v4088_v53  ;;  %v3540_v33 = vadd.f32 %v4151_v50, %v3443_v56  ;;  %v7190_v53 = vld [vmem:[#allocation26_spill] sm:$0xff] }
 0x730   :  { %3984 = vst [vmem:[%s6836_s17 + $0x18] sm:$0xff] %v3953_v26   ;;  %v4153_v46 = vpop.f32.mrf.mxu1 }
 0x731   :  { %v3446_v29 = vadd.f32 %v4090_v54, %v6761_v10  ;;  %v4154_v1 = vadd.f32 %v4153_v46, %v4152_v63  ;;  %v3578_v32 = vadd.f32 %v3540_v33, %v7185_v11 }
 0x733   :  { %v3543_v9 = vadd.f32 %v4154_v1, %v3446_v29 }
 0x735   :  { %v4091_v62 = vpop.f32.mrf.mxu0  ;;  %v3579_v17 = vadd.f32 %v3543_v9, %v7186_v57 }
 0x737   :  { %v4092_v19 = vpop.f32.mrf.mxu0  ;;  %v3958_v34 = vpack.c.bf16 %v3579_v17, %v3578_v32  ;;  %v7192_v32 = vld [vmem:[#allocation10_spill] sm:$0xff] }
 0x738   :  { %v4093_v43 = vadd.f32 %v4092_v19, %v4091_v62  ;;  %v4155_v28 = vpop.f32.mrf.mxu1  ;;  %v7191_v62 = vld [vmem:[#allocation13_spill] sm:$0xff] }
 0x739   :  { %v4094_v15 = vpop.f32.mrf.mxu0  ;;  %3985 = vst [vmem:[%s6836_s17 + $0x20] sm:$0xff] %v3958_v34  }
 0x73a   :  { %v4156_v25 = vpop.f32.mrf.mxu1  ;;  %v3451_v38 = vadd.f32 %v4093_v43, %v6761_v10 }
 0x73b   :  { %v4095_v13 = vpop.f32.mrf.mxu0  ;;  %v4157_v48 = vadd.f32 %v4156_v25, %v4155_v28 }
 0x73c   :  { %v4096_v2 = vadd.f32 %v4095_v13, %v4094_v15  ;;  %v4158_v51 = vpop.f32.mrf.mxu1 }
 0x73d   :  { %v3548_v22 = vadd.f32 %v4157_v48, %v3451_v38 }
 0x73e   :  { %v3454_v16 = vadd.f32 %v4096_v2, %v6761_v10  ;;  %v4159_v6 = vpop.f32.mrf.mxu1 }
 0x73f   :  { %v4160_v44 = vadd.f32 %v4159_v6, %v4158_v51  ;;  %v3580_v8 = vadd.f32 %v3548_v22, %v7187_v55 }
 0x741   :  { %v3551_v7 = vadd.f32 %v4160_v44, %v3454_v16 }
 0x743   :  { %v3581_v42 = vadd.f32 %v3551_v7, %v7188_v12 }
 0x744   :  { %v4097_v14 = vpop.f32.mrf.mxu0 }
 0x745   :  { %v3963_v49 = vpack.c.bf16 %v3581_v42, %v3580_v8 }
 0x746   :  { %v4161_v52 = vpop.f32.mrf.mxu1  ;;  %v4098_v31 = vpop.f32.mrf.mxu0 }
 0x747   :  { %3986 = vst [vmem:[%s6836_s17 + $0x28] sm:$0xff] %v3963_v49   ;;  %v4099_v36 = vadd.f32 %v4098_v31, %v4097_v14 }
 0x748   :  { %v4162_v35 = vpop.f32.mrf.mxu1  ;;  %v4100_v0 = vpop.f32.mrf.mxu0 }
 0x749   :  { %v3459_v20 = vadd.f32 %v4099_v36, %v6761_v10  ;;  %v4163_v23 = vadd.f32 %v4162_v35, %v4161_v52 }
 0x74a   :  { %v4164_v59 = vpop.f32.mrf.mxu1  ;;  %v4101_v47 = vpop.f32.mrf.mxu0 }
 0x74b   :  { %v4102_v18 = vadd.f32 %v4101_v47, %v4100_v0  ;;  %v3556_v21 = vadd.f32 %v4163_v23, %v3459_v20 }
 0x74c   :  { %v4165_v5 = vpop.f32.mrf.mxu1  ;;  %v4103_v41 = vpop.f32.mrf.mxu0 }
 0x74d   :  { %v3462_v24 = vadd.f32 %v4102_v18, %v6761_v10  ;;  %v4166_v3 = vadd.f32 %v4165_v5, %v4164_v59  ;;  %v3582_v61 = vadd.f32 %v3556_v21, %v7189_v60 }
 0x74e   :  { %v4167_v40 = vpop.f32.mrf.mxu1  ;;  %v4104_v39 = vpop.f32.mrf.mxu0 }
 0x74f   :  { %v3559_v4 = vadd.f32 %v4166_v3, %v3462_v24  ;;  %v4105_v27 = vadd.f32 %v4104_v39, %v4103_v41 }
 0x750   :  { %v4168_v37 = vpop.f32.mrf.mxu1  ;;  %v4106_v30 = vpop.f32.mrf.mxu0 }
 0x751   :  { %v3583_v58 = vadd.f32 %v3559_v4, %v7190_v53  ;;  %v3467_v26 = vadd.f32 %v4105_v27, %v6761_v10  ;;  %v4169_v54 = vadd.f32 %v4168_v37, %v4167_v40 }
 0x752   :  { %v4170_v56 = vpop.f32.mrf.mxu1  ;;  %v4107_v45 = vpop.f32.mrf.mxu0 }
 0x753   :  { %v3968_v63 = vpack.c.bf16 %v3583_v58, %v3582_v61  ;;  %v4108_v50 = vadd.f32 %v4107_v45, %v4106_v30  ;;  %v3564_v46 = vadd.f32 %v4169_v54, %v3467_v26 }
 0x754   :  { %v4171_v29 = vpop.f32.mrf.mxu1 }
 0x755   :  { %3987 = vst [vmem:[%s6836_s17 + $0x30] sm:$0xff] %v3968_v63   ;;  %v3470_v33 = vadd.f32 %v4108_v50, %v6761_v10  ;;  %v4172_v1 = vadd.f32 %v4171_v29, %v4170_v56  ;;  %v3584_v11 = vadd.f32 %v3564_v46, %v7191_v62 }
 0x757   :  { %v3567_v9 = vadd.f32 %v4172_v1, %v3470_v33 }
 0x759   :  { %v3585_v57 = vadd.f32 %v3567_v9, %v7192_v32 }
 0x75b   :  { %v3973_v17 = vpack.c.bf16 %v3585_v57, %v3584_v11 }
 0x75d   :  { %3988 = vst [vmem:[%s6836_s17 + $0x38] sm:$0xff] %v3973_v17  }

// kernel: swin_afno_forward.9
= control target key start
LH: loop header
LB: loop body
LE: loop exit
PB: predicated region body
PF: predicated region fallthrough
CT: control target
= control target key end

     0   :  { %vm157_vm0 = vcmask 261120   ;;  %vm853_vm1 = vcmask 195584   ;;  %vm860_vm2 = vcmask 1043456   ;;  %s3227_s0 = inlined_call_operand.vmem [shape: bf16[32,128], index: 0, kind: input, shape index: {}]   ;;  %s3228_s1 = inlined_call_operand.vmem [shape: bf16[24,32], index: 1, kind: input, shape index: {}]   ;;  %s3229_s2 = inlined_call_operand.vmem [shape: bf16[24,32], index: 2, kind: input, shape index: {}]   ;;  %s3230_s7 = inlined_call_operand.vmem [shape: bf16[256,256], index: 7, kind: input, shape index: {}]   ;;  %s3231_s5 = inlined_call_operand.vmem [shape: f32[1,128], index: 5, kind: input, shape index: {}]   ;;  %s3232_s6 = inlined_call_operand.vmem [shape: f32[1,128], index: 6, kind: input, shape index: {}]   ;;  %s3233_s9 = inlined_call_operand.vmem [shape: bf16[256,256], index: 9, kind: input, shape index: {}]   ;;  %s3234_s8 = inlined_call_operand.vmem [shape: f32[1,256], index: 8, kind: input, shape index: {}]   ;;  %s3235_s3 = inlined_call_operand.vmem [shape: bf16[32,24], index: 3, kind: input, shape index: {}]   ;;  %s3236_s4 = inlined_call_operand.vmem [shape: bf16[32,24], index: 4, kind: input, shape index: {}]   ;;  %s3237_s10 = inlined_call_operand.vmem [shape: f32[1,256], index: 10, kind: input, shape index: {}]   ;;  %s3238_s13 = inlined_call_operand.vmem [shape: bf16[128,512], index: 13, kind: input, shape index: {}]   ;;  %s3239_s11 = inlined_call_operand.vmem [shape: f32[1,128], index: 11, kind: input, shape index: {}]   ;;  %s3240_s12 = inlined_call_operand.vmem [shape: f32[1,128], index: 12, kind: input, shape index: {}]   ;;  %s3241_s15 = inlined_call_operand.vmem [shape: bf16[512,128], index: 15, kind: input, shape index: {}]   ;;  %s3242_s14 = inlined_call_operand.vmem [shape: f32[1,512], index: 14, kind: input, shape index: {}]   ;;  %s3243_s16 = inlined_call_operand.vmem [shape: f32[1,128], index: 16, kind: input, shape index: {}]   ;;  %s3244_s17 = inlined_call_operand.vmem [shape: bf16[32,128], index: 17, kind: output, shape index: {}]  }
   0x1   :  { %3247 = sst [smem:[#allocation2_spill]] %s3227_s0  ;;  %v2222_v11 = vld [vmem:[%s3229_s2] sm:$0xff]  }
   0x2   :  { %3248 = sst [smem:[#allocation3_spill]] %s3228_s1  ;;  %2197 = vmatprep.mubr.msk.bf16.mxu1 %vm157_vm0, %v2222_v11  ;;  %v1930_v47 = vld [vmem:[%s3231_s5] ss:$0 sm:$0xff]  ;;  %v2224_v11 = vld [vmem:[%s3230_s7 + $0x70] ss:$8 sps:$4 sm:$0xff]  }
   0x3   :  { %s3249_s26 = sld [smem:[#allocation2_spill]]  ;;  %v1931_v52 = vld [vmem:[%s3232_s6] ss:$0 sm:$0xff] }
   0x4   :  { %s3250_s30 = sld [smem:[#allocation3_spill]] }
   0x9   :  { %v2111_v0 = vld [vmem:[%s3249_s26 + $0x8] sm:$0xff]   ;;  %v2094_v4 = vld [vmem:[%s3249_s26] sm:$0xff]  }
   0xa   :  { %v2546_v1 = vunpack.c.l.bf16 %v2111_v0  ;;  %v2548_v2 = vunpack.c.h.bf16 %v2111_v0  ;;  %v2559_v6 = vunpack.c.l.bf16 %v2094_v4  ;;  %v2561_v7 = vunpack.c.h.bf16 %v2094_v4  ;;  %v2220_v10 = vld [vmem:[%s3250_s30] sm:$0xff]  }
   0xb   :  { %2189 = vmatprep.mubr.msk.bf16.mxu0 %vm157_vm0, %v2220_v10  ;;  %v2223_v10 = vld [vmem:[%s3229_s2 + $0x8] ss:$0 sps:$4 sm:$0xff]  }
   0xc   :  { %71 = vadd.xlane.f32.xlu0 %v2546_v1  ;;  %v82_v3 = vmul.f32 %v2546_v1, %v2546_v1  ;;  %v83_v5 = vmul.f32 %v2548_v2, %v2548_v2  ;;  %v80_v8 = vmul.f32 %v2559_v6, %v2559_v6  ;;  %v81_v9 = vmul.f32 %v2561_v7, %v2561_v7 }
   0xe   :  { %88 = vadd.xlane.f32.xlu1 %v82_v3 }
  0x10   :  { %73 = vadd.xlane.f32.xlu0 %v2548_v2 }
  0x12   :  { %90 = vadd.xlane.f32.xlu1 %v83_v5 }
  0x14   :  { %67 = vadd.xlane.f32.xlu0 %v2559_v6 }
  0x16   :  { %69 = vadd.xlane.f32.xlu1 %v2561_v7 }
  0x18   :  { %84 = vadd.xlane.f32.xlu0 %v80_v8  ;;  %v2226_v8 = vld [vmem:[%s3230_s7 + $0x74] ss:$8 sps:$4 sm:$0xff]  }
  0x1a   :  { %86 = vadd.xlane.f32.xlu1 %v81_v9  ;;  %v2221_v9 = vld [vmem:[%s3250_s30 + $0x8] ss:$0 sps:$4 sm:$0xff]  }
  0x95   :  { %v72_v12 = vpop.xlane.xlu0 %71 }
  0x96   :  { %v78_v13 = vmul.f32 0.0078125, %v72_v12  ;;  %v2229_v12 = vld [vmem:[%s3230_s7 + $0x64] ss:$8 sps:$4 sm:$0xff]  }
  0x97   :  { %v89_v14 = vpop.xlane.xlu1 %88 }
  0x98   :  { %v98_v15 = vmul.f32 %v78_v13, %v78_v13  ;;  %v94_v16 = vmul.f32 0.0078125, %v89_v14  ;;  %v110_v44 = vsub.f32 %v2546_v1, %v78_v13  ;;  %v2227_v13 = vld [vmem:[%s3230_s7 + $0x60] ss:$8 sps:$4 sm:$0xff]   ;;  %v2232_v14 = vld [vmem:[%s3230_s7 + $0x54] ss:$8 sps:$4 sm:$0xff]  }
  0x99   :  { %v74_v17 = vpop.xlane.xlu0 %73 }
  0x9a   :  { %v102_v18 = vsub.f32 %v94_v16, %v98_v15  ;;  %v79_v19 = vmul.f32 0.0078125, %v74_v17  ;;  %v2230_v15 = vld [vmem:[%s3230_s7 + $0x50] ss:$8 sps:$4 sm:$0xff]   ;;  %v2235_v16 = vld [vmem:[%s3230_s7 + $0x44] ss:$8 sps:$4 sm:$0xff]  }
  0x9b   :  { %v91_v20 = vpop.xlane.xlu1 %90  ;;  %v2233_v17 = vld [vmem:[%s3230_s7 + $0x40] ss:$8 sps:$4 sm:$0xff]  }
  0x9c   :  { %v106_v21 = vmax.f32 %v102_v18, 0.0  ;;  %v99_v22 = vmul.f32 %v79_v19, %v79_v19  ;;  %v95_v23 = vmul.f32 0.0078125, %v91_v20  ;;  %v111_v48 = vsub.f32 %v2548_v2, %v79_v19  ;;  %v2238_v18 = vld [vmem:[%s3230_s7 + $0x34] ss:$8 sps:$4 sm:$0xff]   ;;  %v2236_v19 = vld [vmem:[%s3230_s7 + $0x30] ss:$8 sps:$4 sm:$0xff]  }
  0x9d   :  { %v68_v24 = vpop.xlane.xlu0 %67  ;;  %v2241_v20 = vld [vmem:[%s3230_s7 + $0x24] ss:$8 sps:$4 sm:$0xff]  }
  0x9e   :  { %v114_v25 = vadd.f32 1e-05, %v106_v21  ;;  %v103_v26 = vsub.f32 %v95_v23, %v99_v22  ;;  %v76_v27 = vmul.f32 0.0078125, %v68_v24  ;;  %v2239_v21 = vld [vmem:[%s3230_s7 + $0x20] ss:$8 sps:$4 sm:$0xff]  }
  0x9f   :  { %v70_v28 = vpop.xlane.xlu1 %69  ;;  %v2244_v22 = vld [vmem:[%s3230_s7 + $0x14] ss:$8 sps:$4 sm:$0xff]   ;;  %v2242_v23 = vld [vmem:[%s3230_s7 + $0x10] ss:$8 sps:$4 sm:$0xff]   ;;  %v2247_v24 = vld [vmem:[%s3230_s7 + $0x4] ss:$8 sps:$4 sm:$0xff]  }
  0xa0   :  { %2404 = vrsqrt.f32 %v114_v25  ;;  %v107_v29 = vmax.f32 %v103_v26, 0.0  ;;  %v96_v30 = vmul.f32 %v76_v27, %v76_v27  ;;  %v77_v31 = vmul.f32 0.0078125, %v70_v28  ;;  %v2245_v25 = vld [vmem:[%s3230_s7] ss:$8 sps:$4 sm:$0xff]   ;;  %v2250_v26 = vld [vmem:[%s3230_s7 + $0xf4] ss:$8 sps:$4 sm:$0xff]  }
  0xa1   :  { %v85_v32 = vpop.xlane.xlu0 %84  ;;  %v108_v54 = vsub.f32 %v2559_v6, %v76_v27  ;;  %v2248_v27 = vld [vmem:[%s3230_s7 + $0xf0] ss:$8 sps:$4 sm:$0xff]   ;;  %v2253_v28 = vld [vmem:[%s3230_s7 + $0xe4] ss:$8 sps:$4 sm:$0xff]  }
  0xa2   :  { %v115_v33 = vadd.f32 1e-05, %v107_v29  ;;  %v92_v34 = vmul.f32 0.0078125, %v85_v32  ;;  %v97_v36 = vmul.f32 %v77_v31, %v77_v31  ;;  %v109_v58 = vsub.f32 %v2561_v7, %v77_v31  ;;  %v2251_v29 = vld [vmem:[%s3230_s7 + $0xe0] ss:$8 sps:$4 sm:$0xff]  }
  0xa3   :  { %v87_v35 = vpop.xlane.xlu1 %86  ;;  %v2254_v31 = vld [vmem:[%s3230_s7 + $0xd0] ss:$8 sps:$4 sm:$0xff]   ;;  %v2259_v32 = vld [vmem:[%s3230_s7 + $0xc4] ss:$8 sps:$4 sm:$0xff]  }
  0xa4   :  { %2406 = vrsqrt.f32 %v115_v33  ;;  %v100_v37 = vsub.f32 %v92_v34, %v96_v30  ;;  %v93_v38 = vmul.f32 0.0078125, %v87_v35  ;;  %v2256_v30 = vld [vmem:[%s3230_s7 + $0xd4] ss:$8 sps:$4 sm:$0xff]   ;;  %v2257_v33 = vld [vmem:[%s3230_s7 + $0xc0] ss:$8 sps:$4 sm:$0xff]  }
  0xa5   :  { %v2262_v34 = vld [vmem:[%s3230_s7 + $0xb4] ss:$8 sps:$4 sm:$0xff]   ;;  %v2260_v35 = vld [vmem:[%s3230_s7 + $0xb0] ss:$8 sps:$4 sm:$0xff]  }
  0xa6   :  { %v104_v39 = vmax.f32 %v100_v37, 0.0  ;;  %v101_v40 = vsub.f32 %v93_v38, %v97_v36  ;;  %v2265_v36 = vld [vmem:[%s3230_s7 + $0xa4] ss:$8 sps:$4 sm:$0xff]   ;;  %v2263_v37 = vld [vmem:[%s3230_s7 + $0xa0] ss:$8 sps:$4 sm:$0xff]  }
  0xa7   :  { %v2268_v38 = vld [vmem:[%s3230_s7 + $0x94] ss:$8 sps:$4 sm:$0xff]  }
  0xa8   :  { %v112_v41 = vadd.f32 1e-05, %v104_v39  ;;  %v105_v42 = vmax.f32 %v101_v40, 0.0  ;;  %v2266_v39 = vld [vmem:[%s3230_s7 + $0x90] ss:$8 sps:$4 sm:$0xff]  }
  0xa9   :  { %v2271_v40 = vld [vmem:[%s3230_s7 + $0x84] ss:$8 sps:$4 sm:$0xff]  }
  0xaa   :  { %2408 = vrsqrt.f32 %v112_v41  ;;  %v113_v43 = vadd.f32 1e-05, %v105_v42  ;;  %v2269_v41 = vld [vmem:[%s3230_s7 + $0x80] ss:$8 sps:$4 sm:$0xff]   ;;  %v2272_v42 = vld [vmem:[%s3233_s9 + $0x70] ss:$8 sps:$4 sm:$0xff]  }
  0xac   :  { %2410 = vrsqrt.f32 %v113_v43  ;;  %v2274_v43 = vld [vmem:[%s3233_s9 + $0x74] ss:$8 sps:$4 sm:$0xff]  }
  0xad   :  { %v2405_v45 = vpop.eup %2404 }
  0xae   :  { %v122_v46 = vmul.f32 %v2405_v45, %v110_v44  ;;  %v2277_v44 = vld [vmem:[%s3233_s9 + $0x64] ss:$8 sps:$4 sm:$0xff]   ;;  %v2275_v45 = vld [vmem:[%s3233_s9 + $0x60] ss:$8 sps:$4 sm:$0xff]  }
  0xb0   :  { %v132_v51 = vmul.f32 %v1930_v47, %v122_v46  ;;  %v2280_v46 = vld [vmem:[%s3233_s9 + $0x54] ss:$8 sps:$4 sm:$0xff]  }
  0xb1   :  { %v2407_v49 = vpop.eup %2406 }
  0xb2   :  { %v123_v50 = vmul.f32 %v2407_v49, %v111_v48  ;;  %v2586_v55 = vadd.f32 %v1931_v52, %v132_v51  ;;  %v2283_v48 = vld [vmem:[%s3233_s9 + $0x44] ss:$8 sps:$4 sm:$0xff]   ;;  %v2281_v49 = vld [vmem:[%s3233_s9 + $0x40] ss:$8 sps:$4 sm:$0xff]   ;;  %v2284_v51 = vld [vmem:[%s3233_s9 + $0x30] ss:$8 sps:$4 sm:$0xff]  }
  0xb4   :  { %v133_v53 = vmul.f32 %v1930_v47, %v123_v50  ;;  %v2286_v50 = vld [vmem:[%s3233_s9 + $0x34] ss:$8 sps:$4 sm:$0xff]  }
  0xb6   :  { %v2588_v56 = vadd.f32 %v1931_v52, %v133_v53  ;;  %v2287_v53 = vld [vmem:[%s3233_s9 + $0x20] ss:$8 sps:$4 sm:$0xff]  }
  0xb7   :  { %v2409_v57 = vpop.eup %2408 }
  0xb8   :  { %v145_v59 = vpack.c.bf16 %v2588_v56, %v2586_v55  ;;  %v120_v60 = vmul.f32 %v2409_v57, %v108_v54  ;;  %v2292_v54 = vld [vmem:[%s3233_s9 + $0x14] ss:$8 sps:$4 sm:$0xff]   ;;  %v2290_v57 = vld [vmem:[%s3233_s9 + $0x10] ss:$8 sps:$4 sm:$0xff]  }
  0xb9   :  { %v2411_v61 = vpop.eup %2410 }
  0xba   :  { %2185 = vmatprep.subr.bf16.mxu0 %v145_v59  ;;  %2193 = vmatprep.subr.bf16.mxu1 %v145_v59  ;;  %v121_v62 = vmul.f32 %v2411_v61, %v109_v58  ;;  %v130_v63 = vmul.f32 %v1930_v47, %v120_v60  ;;  %v2295_v58 = vld [vmem:[%s3233_s9 + $0x4] ss:$8 sps:$4 sm:$0xff]   ;;  %v2298_v60 = vld [vmem:[%s3233_s9 + $0xf4] ss:$8 sps:$4 sm:$0xff]   ;;  %v2296_v61 = vld [vmem:[%s3233_s9 + $0xf0] ss:$8 sps:$4 sm:$0xff]  }
  0xbb   :  { %2186 = vmatpush3.bf16.msra.mxu0 %v145_v59  ;;  %2194 = vmatpush3.bf16.msra.mxu1 %v145_v59  ;;  %v2293_v59 = vld [vmem:[%s3233_s9] ss:$8 sps:$4 sm:$0xff]  }
  0xbc   :  { %v131_v0 = vmul.f32 %v1930_v47, %v121_v62  ;;  %v2593_v3 = vadd.f32 %v1931_v52, %v130_v63  ;;  %v2278_v47 = vld [vmem:[%s3233_s9 + $0x50] ss:$8 sps:$4 sm:$0xff]   ;;  %v2301_v62 = vld [vmem:[%s3233_s9 + $0xe4] ss:$8 sps:$4 sm:$0xff]   ;;  %v2299_v63 = vld [vmem:[%s3233_s9 + $0xe0] ss:$8 sps:$4 sm:$0xff]  }
  0xbe   :  { %v2595_v4 = vadd.f32 %v1931_v52, %v131_v0  ;;  %v2289_v52 = vld [vmem:[%s3233_s9 + $0x24] ss:$8 sps:$4 sm:$0xff]   ;;  %v2304_v0 = vld [vmem:[%s3233_s9 + $0xd4] ss:$8 sps:$4 sm:$0xff]  }
  0xc0   :  { %v144_v5 = vpack.c.bf16 %v2595_v4, %v2593_v3 }
  0xc2   :  { %2187 = vmatprep.subr.bf16.mxu0 %v144_v5  ;;  %2195 = vmatprep.subr.bf16.mxu1 %v144_v5 }
  0xc3   :  { %2188 = vmatpush3.bf16.msra.mxu0 %v144_v5  ;;  %2196 = vmatpush3.bf16.msra.mxu1 %v144_v5  ;;  %v2302_v5 = vld [vmem:[%s3233_s9 + $0xd0] ss:$8 sps:$4 sm:$0xff]  }
  0xc4   :  { %485 = vmatprep.subr.bf16.mxu0 %v2226_v8  ;;  %750 = vmatprep.subr.bf16.mxu1 %v2274_v43  ;;  %v2307_v8 = vld [vmem:[%s3233_s9 + $0xc4] ss:$8 sps:$4 sm:$0xff]  }
  0xc6   :  { %2190 = vmatmul.mubr.msk.bf16.vlgmr.msra.gmra.mxu0 %vm157_vm0, %v2221_v9  ;;  %2198 = vmatmul.mubr.msk.bf16.vlgmr.msra.gmra.mxu1 %vm157_vm0, %v2223_v10  ;;  %v2305_v9 = vld [vmem:[%s3233_s9 + $0xc0] ss:$8 sps:$4 sm:$0xff]   ;;  %v2310_v10 = vld [vmem:[%s3233_s9 + $0xb4] ss:$8 sps:$4 sm:$0xff]  }
  0xc7   :  { %486 = vmatpush1.bf16.msra.mxu0 %v2224_v11  ;;  %751 = vmatpush1.bf16.msra.mxu1 %v2272_v42  ;;  %v2308_v11 = vld [vmem:[%s3233_s9 + $0xb0] ss:$8 sps:$4 sm:$0xff]  }
  0xc8   :  { %487 = vmatprep.subr.bf16.mxu0 %v2229_v12  ;;  %752 = vmatprep.subr.bf16.mxu1 %v2277_v44 }
  0xcb   :  { %488 = vmatpush1.bf16.msra.mxu0 %v2227_v13  ;;  %753 = vmatpush1.bf16.msra.mxu1 %v2275_v45 }
  0xcc   :  { %489 = vmatprep.subr.bf16.mxu0 %v2232_v14  ;;  %754 = vmatprep.subr.bf16.mxu1 %v2280_v46 }
  0xcf   :  { %490 = vmatpush1.bf16.msra.mxu0 %v2230_v15  ;;  %755 = vmatpush1.bf16.msra.mxu1 %v2278_v47 }
  0xd0   :  { %491 = vmatprep.subr.bf16.mxu0 %v2235_v16  ;;  %756 = vmatprep.subr.bf16.mxu1 %v2283_v48 }
  0xd3   :  { %492 = vmatpush1.bf16.msra.mxu0 %v2233_v17  ;;  %757 = vmatpush1.bf16.msra.mxu1 %v2281_v49 }
  0xd4   :  { %493 = vmatprep.subr.bf16.mxu0 %v2238_v18  ;;  %758 = vmatprep.subr.bf16.mxu1 %v2286_v50 }
  0xd7   :  { %494 = vmatpush1.bf16.msra.mxu0 %v2236_v19  ;;  %759 = vmatpush1.bf16.msra.mxu1 %v2284_v51 }
  0xd8   :  { %495 = vmatprep.subr.bf16.mxu0 %v2241_v20  ;;  %760 = vmatprep.subr.bf16.mxu1 %v2289_v52 }
  0xdb   :  { %496 = vmatpush1.bf16.msra.mxu0 %v2239_v21  ;;  %761 = vmatpush1.bf16.msra.mxu1 %v2287_v53 }
  0xdc   :  { %497 = vmatprep.subr.bf16.mxu0 %v2244_v22  ;;  %762 = vmatprep.subr.bf16.mxu1 %v2292_v54 }
  0xdf   :  { %498 = vmatpush1.bf16.msra.mxu0 %v2242_v23  ;;  %763 = vmatpush1.bf16.msra.mxu1 %v2290_v57 }
  0xe0   :  { %499 = vmatprep.subr.bf16.mxu0 %v2247_v24  ;;  %764 = vmatprep.subr.bf16.mxu1 %v2295_v58  ;;  %v2313_v24 = vld [vmem:[%s3233_s9 + $0xa4] ss:$8 sps:$4 sm:$0xff]  }
  0xe3   :  { %500 = vmatpush1.bf16.msra.mxu0 %v2245_v25  ;;  %765 = vmatpush1.bf16.msra.mxu1 %v2293_v59  ;;  %v2311_v25 = vld [vmem:[%s3233_s9 + $0xa0] ss:$8 sps:$4 sm:$0xff]  }
  0xe4   :  { %501 = vmatprep.subr.bf16.mxu0 %v2250_v26  ;;  %766 = vmatprep.subr.bf16.mxu1 %v2298_v60  ;;  %v2316_v26 = vld [vmem:[%s3233_s9 + $0x94] ss:$8 sps:$4 sm:$0xff]  }
  0xe7   :  { %502 = vmatpush2.bf16.msra.mxu0 %v2248_v27  ;;  %767 = vmatpush2.bf16.msra.mxu1 %v2296_v61  ;;  %v2314_v27 = vld [vmem:[%s3233_s9 + $0x90] ss:$8 sps:$4 sm:$0xff]  }
  0xe8   :  { %503 = vmatprep.subr.bf16.mxu0 %v2253_v28  ;;  %768 = vmatprep.subr.bf16.mxu1 %v2301_v62  ;;  %v2319_v28 = vld [vmem:[%s3233_s9 + $0x84] ss:$8 sps:$4 sm:$0xff]  }
  0xeb   :  { %504 = vmatpush2.bf16.msra.mxu0 %v2251_v29  ;;  %769 = vmatpush2.bf16.msra.mxu1 %v2299_v63  ;;  %v2317_v29 = vld [vmem:[%s3233_s9 + $0x80] ss:$8 sps:$4 sm:$0xff]  }
  0xec   :  { %505 = vmatprep.subr.bf16.mxu0 %v2256_v30  ;;  %770 = vmatprep.subr.bf16.mxu1 %v2304_v0  ;;  %v315_v30 = vlaneseq  ;;  %v2321_v63 = vld [vmem:[%s3235_s3] sm:$0xff]  }
  0xed   :  { %v2320_v0 = vld [vmem:[%s3236_s4] sm:$0xff]  }
  0xef   :  { %506 = vmatpush2.bf16.msra.mxu0 %v2254_v31  ;;  %771 = vmatpush2.bf16.msra.mxu1 %v2302_v5  ;;  %v2799_v31 = vshrl.u32 %v315_v30, 7  ;;  %v578_v5 = vld [vmem:[%s3237_s10] sm:$0x3] }
  0xf0   :  { %507 = vmatprep.subr.bf16.mxu0 %v2259_v32  ;;  %772 = vmatprep.subr.bf16.mxu1 %v2307_v8 }
  0xf1   :  { %v2802_v32 = vsub.s32 1, %v2799_v31 }
  0xf3   :  { %508 = vmatpush2.bf16.msra.mxu0 %v2257_v33  ;;  %773 = vmatpush2.bf16.msra.mxu1 %v2305_v9  ;;  %v2805_v33 = vsub.s32 0, %v2799_v31 }
  0xf4   :  { %509 = vmatprep.subr.bf16.mxu0 %v2262_v34  ;;  %774 = vmatprep.subr.bf16.mxu1 %v2310_v10  ;;  %v313_v34 = vld [vmem:[%s3234_s8] sm:$0x3] }
  0xf5   :  { %v583_v9 = vrot.slane %v578_v5, %v2805_v33 }
  0xf7   :  { %510 = vmatpush2.bf16.msra.mxu0 %v2260_v35  ;;  %775 = vmatpush2.bf16.msra.mxu1 %v2308_v11  ;;  %v587_v11 = vrot.slane %v578_v5, %v2802_v32  ;;  %v2323_v5 = vld [vmem:[%s3235_s3 + $0x8] sm:$0xff]  }
  0xf8   :  { %511 = vmatprep.subr.bf16.mxu0 %v2265_v36  ;;  %776 = vmatprep.subr.bf16.mxu1 %v2313_v24  ;;  %v322_v36 = vrot.slane %v313_v34, %v2802_v32 }
  0xfb   :  { %512 = vmatpush2.bf16.msra.mxu0 %v2263_v37  ;;  %777 = vmatpush2.bf16.msra.mxu1 %v2311_v25  ;;  %v318_v37 = vrot.slane %v313_v34, %v2805_v33 }
  0xfc   :  { %513 = vmatprep.subr.bf16.mxu0 %v2268_v38  ;;  %778 = vmatprep.subr.bf16.mxu1 %v2316_v26 }
  0xff   :  { %514 = vmatpush2.bf16.msra.mxu0 %v2266_v39  ;;  %779 = vmatpush2.bf16.msra.mxu1 %v2314_v27 }
 0x100   :  { %515 = vmatprep.subr.bf16.mxu0 %v2271_v40  ;;  %780 = vmatprep.subr.bf16.mxu1 %v2319_v28 }
 0x103   :  { %516 = vmatpush2.bf16.msra.mxu0 %v2269_v41  ;;  %781 = vmatpush2.bf16.msra.mxu1 %v2317_v29 }
 0x186   :  { %v2191_v12 = vpop.f32.mrf.mxu0  ;;  %v2199_v13 = vpop.f32.mrf.mxu1 }
 0x187   :  { %v280_v22 = vpack.c.bf16 %v2199_v13, %v2199_v13  ;;  %v279_v23 = vpack.c.bf16 %v2191_v12, %v2191_v12 }
 0x188   :  { %v198_v14 = vpop.f32.mrf.mxu0  ;;  %v263_v15 = vpop.f32.mrf.mxu1 }
 0x18a   :  { %v2192_v16 = vpop.f32.mrf.mxu0  ;;  %v2200_v17 = vpop.f32.mrf.mxu1 }
 0x18c   :  { %v201_v18 = vpop.f32.mrf.mxu0  ;;  %v266_v19 = vpop.f32.mrf.mxu1 }
 0x18d   :  { %v277_v20 = vpack.c.bf16 %v201_v18, %v198_v14  ;;  %v278_v21 = vpack.c.bf16 %v266_v19, %v263_v15 }
 0x18f   :  { %517 = vmatprep.mubr.bf16.mxu0 %v278_v21 }
 0x190   :  { %518 = vmatmul.mubr.bf16.vlgmr.msra.gmra.mxu0 %v277_v20 }
 0x191   :  { %527 = vmatprep.mubr.bf16.mxu0 %v280_v22 }
 0x198   :  { %528 = vmatmul.mubr.bf16.gmra.mxu0 %v279_v23 }
 0x199   :  { %2205 = vmatprep.mubr.msk.bf16.mxu0 %vm853_vm1, %v2320_v0 }
 0x250   :  { %v519_v35 = vpop.f32.mrf.mxu0 }
 0x251   :  { %v520_v42 = vadd.f32 %v519_v35, %v318_v37 }
 0x252   :  { %v521_v38 = vpop.f32.mrf.mxu0 }
 0x253   :  { %v522_v40 = vadd.f32 %v521_v38, %v322_v36  ;;  %v536_v49 = vmax.f32 %v520_v42, 0.0 }
 0x254   :  { %v523_v39 = vpop.f32.mrf.mxu0 }
 0x255   :  { %v524_v41 = vadd.f32 %v523_v39, %v318_v37  ;;  %v537_v47 = vmax.f32 %v522_v40, 0.0 }
 0x256   :  { %v525_v43 = vpop.f32.mrf.mxu0 }
 0x257   :  { %v526_v44 = vadd.f32 %v525_v43, %v322_v36  ;;  %v538_v45 = vmax.f32 %v524_v41, 0.0 }
 0x258   :  { %v529_v46 = vpop.f32.mrf.mxu0 }
 0x259   :  { %v539_v48 = vmax.f32 %v526_v44, 0.0  ;;  %v542_v53 = vpack.c.bf16 %v538_v45, %v536_v49  ;;  %v530_v54 = vadd.f32 %v529_v46, %v318_v37 }
 0x25a   :  { %v531_v50 = vpop.f32.mrf.mxu0 }
 0x25b   :  { %v543_v51 = vpack.c.bf16 %v539_v48, %v537_v47  ;;  %v532_v52 = vadd.f32 %v531_v50, %v322_v36  ;;  %v540_v61 = vmax.f32 %v530_v54, 0.0 }
 0x25c   :  { %v533_v57 = vpop.f32.mrf.mxu0 }
 0x25d   :  { %v541_v58 = vmax.f32 %v532_v52, 0.0  ;;  %782 = vmatprep.mubr.bf16.mxu1 %v543_v51  ;;  %v544_v62 = vpack.c.bf16 %v540_v61, %v540_v61 }
 0x25e   :  { %v534_v59 = vpop.f32.mrf.mxu0  ;;  %783 = vmatmul.mubr.bf16.vlgmr.msra.gmra.mxu1 %v542_v53 }
 0x25f   :  { %v545_v60 = vpack.c.bf16 %v541_v58, %v541_v58 }
 0x261   :  { %792 = vmatprep.mubr.bf16.mxu1 %v545_v60 }
 0x266   :  { %793 = vmatmul.mubr.bf16.gmra.mxu1 %v544_v62 }
 0x267   :  { %2213 = vmatprep.mubr.msk.bf16.mxu1 %vm853_vm1, %v2321_v63 }
 0x31e   :  { %v784_v8 = vpop.f32.mrf.mxu1 }
 0x31f   :  { %v785_v13 = vadd.f32 %v784_v8, %v583_v9  ;;  %v2322_v8 = vld [vmem:[%s3236_s4 + $0x8] sm:$0xff]  }
 0x320   :  { %v786_v10 = vpop.f32.mrf.mxu1 }
 0x321   :  { %v787_v17 = vadd.f32 %v786_v10, %v587_v11  ;;  %v2004_v21 = vadd.f32 -0.01, %v785_v13  ;;  %v813_v22 = vadd.f32 0.01, %v785_v13 }
 0x322   :  { %v788_v12 = vpop.f32.mrf.mxu1 }
 0x323   :  { %v789_v14 = vadd.f32 %v788_v12, %v583_v9  ;;  %v2005_v34 = vadd.f32 -0.01, %v787_v17  ;;  %v814_v35 = vadd.f32 0.01, %v787_v17  ;;  %v807_v38 = vmax.f32 %v2004_v21, 0.0 }
 0x324   :  { %v790_v15 = vpop.f32.mrf.mxu1  ;;  %v819_v39 = vmin.f32 %v813_v22, 0.0 }
 0x325   :  { %v791_v16 = vadd.f32 %v790_v15, %v587_v11  ;;  %v2006_v18 = vadd.f32 -0.01, %v789_v14  ;;  %v815_v19 = vadd.f32 0.01, %v789_v14  ;;  %v808_v49 = vmax.f32 %v2005_v34, 0.0 }
 0x326   :  { %v794_v20 = vpop.f32.mrf.mxu1  ;;  %v820_v50 = vmin.f32 %v814_v35, 0.0  ;;  %v825_v53 = vadd.f32 %v819_v39, %v807_v38  ;;  %v2330_v34 = vld [vmem:[%s3238_s13 + $0xc0] ss:$16 sps:$4 sm:$0xff]   ;;  %v2333_v35 = vld [vmem:[%s3238_s13 + $0xc8] ss:$16 sps:$4 sm:$0xff]  }
 0x327   :  { %v795_v23 = vadd.f32 %v794_v20, %v583_v9  ;;  %v2007_v24 = vadd.f32 -0.01, %v791_v16  ;;  %v816_v25 = vadd.f32 0.01, %v791_v16  ;;  %v809_v27 = vmax.f32 %v2006_v18, 0.0 }
 0x328   :  { %v796_v26 = vpop.f32.mrf.mxu1  ;;  %v821_v28 = vmin.f32 %v815_v19, 0.0  ;;  %v826_v61 = vadd.f32 %v820_v50, %v808_v49  ;;  %v2336_v38 = vld [vmem:[%s3238_s13 + $0xa0] ss:$16 sps:$4 sm:$0xff]   ;;  %v2339_v39 = vld [vmem:[%s3238_s13 + $0xa8] ss:$16 sps:$4 sm:$0xff]  }
 0x329   :  { %v2008_v29 = vadd.f32 -0.01, %v795_v23  ;;  %v817_v30 = vadd.f32 0.01, %v795_v23  ;;  %v797_v36 = vadd.f32 %v796_v26, %v587_v11  ;;  %v810_v42 = vmax.f32 %v2007_v24, 0.0 }
 0x32a   :  { %v798_v37 = vpop.f32.mrf.mxu1  ;;  %v822_v43 = vmin.f32 %v816_v25, 0.0  ;;  %v827_v47 = vadd.f32 %v821_v28, %v809_v27  ;;  %v2324_v27 = vld [vmem:[%s3238_s13 + $0xe0] ss:$16 sps:$4 sm:$0xff]   ;;  %v2329_v28 = vld [vmem:[%s3238_s13 + $0xec] ss:$16 sps:$4 sm:$0xff]  }
 0x32b   :  { %v811_v40 = vmax.f32 %v2008_v29, 0.0  ;;  %v823_v41 = vmin.f32 %v817_v30, 0.0  ;;  %v2009_v44 = vadd.f32 -0.01, %v797_v36  ;;  %v818_v45 = vadd.f32 0.01, %v797_v36 }
 0x32c   :  { %v799_v46 = vpop.f32.mrf.mxu1  ;;  %v828_v57 = vadd.f32 %v822_v43, %v810_v42  ;;  %v831_v60 = vpack.c.bf16 %v827_v47, %v825_v53  ;;  %v2332_v29 = vld [vmem:[%s3238_s13 + $0xc4] ss:$16 sps:$4 sm:$0xff]   ;;  %v2335_v30 = vld [vmem:[%s3238_s13 + $0xcc] ss:$16 sps:$4 sm:$0xff]   ;;  %v2342_v42 = vld [vmem:[%s3238_s13 + $0x80] ss:$16 sps:$4 sm:$0xff]  }
 0x32d   :  { %v829_v48 = vadd.f32 %v823_v41, %v811_v40  ;;  %v812_v51 = vmax.f32 %v2009_v44, 0.0  ;;  %v824_v52 = vmin.f32 %v818_v45, 0.0  ;;  %v2338_v36 = vld [vmem:[%s3238_s13 + $0xa4] ss:$16 sps:$4 sm:$0xff]   ;;  %v2341_v37 = vld [vmem:[%s3238_s13 + $0xac] ss:$16 sps:$4 sm:$0xff]  }
 0x32e   :  { %v832_v0 = vpack.c.bf16 %v828_v57, %v826_v61  ;;  %v2344_v40 = vld [vmem:[%s3238_s13 + $0x84] ss:$16 sps:$4 sm:$0xff]   ;;  %v2347_v41 = vld [vmem:[%s3238_s13 + $0x8c] ss:$16 sps:$4 sm:$0xff]   ;;  %v2345_v43 = vld [vmem:[%s3238_s13 + $0x88] ss:$16 sps:$4 sm:$0xff]  }
 0x32f   :  { %v833_v54 = vpack.c.bf16 %v829_v48, %v829_v48  ;;  %v830_v58 = vadd.f32 %v824_v52, %v812_v51  ;;  %v2350_v44 = vld [vmem:[%s3238_s13 + $0x64] ss:$16 sps:$4 sm:$0xff]   ;;  %v2353_v45 = vld [vmem:[%s3238_s13 + $0x6c] ss:$16 sps:$4 sm:$0xff]   ;;  %v2348_v46 = vld [vmem:[%s3238_s13 + $0x60] ss:$16 sps:$4 sm:$0xff]  }
 0x330   :  { %v2351_v47 = vld [vmem:[%s3238_s13 + $0x68] ss:$16 sps:$4 sm:$0xff]   ;;  %v2354_v48 = vld [vmem:[%s3238_s13 + $0x40] ss:$16 sps:$4 sm:$0xff]   ;;  %v2356_v49 = vld [vmem:[%s3238_s13 + $0x44] ss:$16 sps:$4 sm:$0xff]  }
 0x331   :  { %2218 = vmatprep.subr.msk.bf16.mxu1 %vm860_vm2, %v833_v54  ;;  %v930_v59 = vsel %vm860_vm2, %v833_v54, 0  ;;  %v834_v62 = vpack.c.bf16 %v830_v58, %v830_v58  ;;  %v2357_v50 = vld [vmem:[%s3238_s13 + $0x48] ss:$16 sps:$4 sm:$0xff]   ;;  %v2359_v51 = vld [vmem:[%s3238_s13 + $0x4c] ss:$16 sps:$4 sm:$0xff]  }
 0x332   :  { %2210 = vmatpush3.bf16.msra.mxu1 %v930_v59  ;;  %v2362_v52 = vld [vmem:[%s3238_s13 + $0x24] ss:$16 sps:$4 sm:$0xff]   ;;  %v2365_v53 = vld [vmem:[%s3238_s13 + $0x2c] ss:$16 sps:$4 sm:$0xff]   ;;  %v2360_v54 = vld [vmem:[%s3238_s13 + $0x20] ss:$16 sps:$4 sm:$0xff]  }
 0x333   :  { %2211 = vmatprep.subr.bf16.mxu1 %v831_v60  ;;  %2217 = vmatprep.subr.msk.bf16.mxu0 %vm860_vm2, %v834_v62  ;;  %v862_v63 = vsel %vm860_vm2, %v834_v62, 0  ;;  %v2368_v57 = vld [vmem:[%s3238_s13 + $0x4] ss:$16 sps:$4 sm:$0xff]   ;;  %v2363_v58 = vld [vmem:[%s3238_s13 + $0x28] ss:$16 sps:$4 sm:$0xff]   ;;  %v2452_v59 = vmov 0  }
 0x334   :  { %2202 = vmatpush3.bf16.msra.mxu0 %v862_v63  ;;  %v2366_v61 = vld [vmem:[%s3238_s13] ss:$16 sps:$4 sm:$0xff]   ;;  %v2369_v62 = vld [vmem:[%s3238_s13 + $0x8] ss:$16 sps:$4 sm:$0xff]  }
 0x335   :  { %2203 = vmatprep.subr.bf16.mxu0 %v832_v0 }
 0x336   :  { %2212 = vmatpush3.bf16.msra.mxu1 %v831_v60  ;;  %v2371_v60 = vld [vmem:[%s3238_s13 + $0xc] ss:$16 sps:$4 sm:$0xff]  }
 0x337   :  { %1336 = vmatprep.subr.bf16.mxu1 %v2329_v28 }
 0x338   :  { %2204 = vmatpush3.bf16.msra.mxu0 %v832_v0 }
 0x339   :  { %2214 = vmatmul.mubr.msk.bf16.vlgmr.msra.gmra.mxu1 %vm853_vm1, %v2323_v5 }
 0x33a   :  { %1368 = vmatprep.mubr.bf16.mxu1 %v2452_v59 }
 0x33b   :  { %2206 = vmatmul.mubr.msk.bf16.vlgmr.msra.gmra.mxu0 %vm853_vm1, %v2322_v8 }
 0x33c   :  { %1315 = vmatprep.mubr.bf16.mxu0 %v2452_v59 }
 0x3f9   :  { %v2215_v9 = vpop.f32.mrf.mxu1 }
 0x3fb   :  { %v966_v10 = vpop.f32.mrf.mxu1  ;;  %v2207_v11 = vpop.f32.mrf.mxu0 }
 0x3fc   :  { %v975_v19 = vadd.f32 %v2215_v9, %v2207_v11 }
 0x3fd   :  { %v898_v12 = vpop.f32.mrf.mxu0  ;;  %v2216_v13 = vpop.f32.mrf.mxu1 }
 0x3fe   :  { %v967_v14 = vadd.f32 %v966_v10, %v898_v12  ;;  %v983_v23 = vadd.f32 %v975_v19, %v2586_v55 }
 0x3ff   :  { %v2208_v15 = vpop.f32.mrf.mxu0  ;;  %v969_v18 = vpop.f32.mrf.mxu1 }
 0x400   :  { %v981_v16 = vadd.f32 %v967_v14, %v2593_v3  ;;  %v978_v24 = vadd.f32 %v2216_v13, %v2208_v15 }
 0x401   :  { %v901_v17 = vpop.f32.mrf.mxu0 }
 0x402   :  { %v2839_v20 = vadd.f32 %v2559_v6, %v981_v16  ;;  %v970_v21 = vadd.f32 %v969_v18, %v901_v17  ;;  %v2851_v6 = vadd.f32 %v2546_v1, %v983_v23  ;;  %v984_v26 = vadd.f32 %v978_v24, %v2588_v56  ;;  %v2326_v56 = vld [vmem:[%s3238_s13 + $0xe4] ss:$16 sps:$4 sm:$0xff]  }
 0x403   :  { %1283 = vmatprep.subr.bf16.mxu0 %v2326_v56 }
 0x404   :  { %v982_v22 = vadd.f32 %v970_v21, %v2595_v4  ;;  %991 = vadd.xlane.f32.xlu0 %v2839_v20  ;;  %v1003_v3 = vmul.f32 %v2839_v20, %v2839_v20  ;;  %v1005_v55 = vmul.f32 %v2851_v6, %v2851_v6  ;;  %1284 = vmatpush1.bf16.msra.mxu0 %v2324_v27 }
 0x405   :  { %1285 = vmatprep.subr.bf16.mxu0 %v2332_v29 }
 0x406   :  { %v2845_v25 = vadd.f32 %v2561_v7, %v982_v22  ;;  %v2858_v7 = vadd.f32 %v2548_v2, %v984_v26  ;;  %v2327_v2 = vld [vmem:[%s3238_s13 + $0xe8] ss:$16 sps:$4 sm:$0xff]  }
 0x407   :  { %1337 = vmatpush1.bf16.msra.mxu1 %v2327_v2 }
 0x408   :  { %993 = vadd.xlane.f32.xlu1 %v2845_v25  ;;  %1007 = vadd.xlane.f32.xlu0 %v1003_v3  ;;  %v1004_v4 = vmul.f32 %v2845_v25, %v2845_v25  ;;  %v1006_v1 = vmul.f32 %v2858_v7, %v2858_v7 }
 0x409   :  { %1338 = vmatprep.subr.bf16.mxu1 %v2335_v30  ;;  %1286 = vmatpush1.bf16.msra.mxu0 %v2330_v34 }
 0x40a   :  { %1287 = vmatprep.subr.bf16.mxu0 %v2338_v36 }
 0x40b   :  { %1339 = vmatpush1.bf16.msra.mxu1 %v2333_v35 }
 0x40c   :  { %1009 = vadd.xlane.f32.xlu1 %v1004_v4  ;;  %995 = vadd.xlane.f32.xlu0 %v2851_v6 }
 0x40d   :  { %1340 = vmatprep.subr.bf16.mxu1 %v2341_v37  ;;  %1288 = vmatpush1.bf16.msra.mxu0 %v2336_v38 }
 0x40e   :  { %1289 = vmatprep.subr.bf16.mxu0 %v2344_v40 }
 0x40f   :  { %1341 = vmatpush1.bf16.msra.mxu1 %v2339_v39  ;;  %v2018_v39 = vld [vmem:[%s3239_s11] ss:$0 sm:$0xff] }
 0x410   :  { %997 = vadd.xlane.f32.xlu1 %v2858_v7  ;;  %1011 = vadd.xlane.f32.xlu0 %v1005_v55 }
 0x411   :  { %1342 = vmatprep.subr.bf16.mxu1 %v2347_v41  ;;  %1290 = vmatpush1.bf16.msra.mxu0 %v2342_v42 }
 0x412   :  { %1291 = vmatprep.subr.bf16.mxu0 %v2350_v44  ;;  %v2019_v44 = vld [vmem:[%s3240_s12] ss:$0 sm:$0xff] }
 0x413   :  { %1343 = vmatpush1.bf16.msra.mxu1 %v2345_v43 }
 0x414   :  { %1013 = vadd.xlane.f32.xlu1 %v1006_v1  ;;  %1344 = vmatprep.subr.bf16.mxu1 %v2353_v45 }
 0x415   :  { %1292 = vmatpush1.bf16.msra.mxu0 %v2348_v46 }
 0x416   :  { %1293 = vmatprep.subr.bf16.mxu0 %v2356_v49 }
 0x417   :  { %1345 = vmatpush1.bf16.msra.mxu1 %v2351_v47 }
 0x418   :  { %1346 = vmatprep.subr.bf16.mxu1 %v2359_v51 }
 0x419   :  { %1294 = vmatpush1.bf16.msra.mxu0 %v2354_v48 }
 0x41a   :  { %1295 = vmatprep.subr.bf16.mxu0 %v2362_v52 }
 0x41b   :  { %1347 = vmatpush1.bf16.msra.mxu1 %v2357_v50 }
 0x41c   :  { %1348 = vmatprep.subr.bf16.mxu1 %v2365_v53 }
 0x41d   :  { %1296 = vmatpush1.bf16.msra.mxu0 %v2360_v54 }
 0x41e   :  { %1297 = vmatprep.subr.bf16.mxu0 %v2368_v57 }
 0x41f   :  { %1349 = vmatpush1.bf16.msra.mxu1 %v2363_v58 }
 0x420   :  { %1350 = vmatprep.subr.bf16.mxu1 %v2371_v60 }
 0x421   :  { %1298 = vmatpush1.bf16.msra.mxu0 %v2366_v61 }
 0x423   :  { %1351 = vmatpush1.bf16.msra.mxu1 %v2369_v62 }
 0x48d   :  { %v992_v63 = vpop.xlane.xlu0 %991 }
 0x48e   :  { %v999_v0 = vmul.f32 0.0078125, %v992_v63  ;;  %v2372_v63 = vld [vmem:[%s3241_s15 + $0x78] sm:$0xff]  }
 0x48f   :  { %2129 = vmatprep.subr.bf16.mxu0 %v2372_v63 }
 0x490   :  { %v1019_v9 = vmul.f32 %v999_v0, %v999_v0  ;;  %v1031_v36 = vsub.f32 %v2839_v20, %v999_v0  ;;  %v2373_v0 = vld [vmem:[%s3241_s15 + $0xf8] sm:$0xff]  }
 0x491   :  { %v994_v5 = vpop.xlane.xlu1 %993  ;;  %v1008_v8 = vpop.xlane.xlu0 %1007  ;;  %2157 = vmatprep.subr.bf16.mxu1 %v2373_v0 }
 0x492   :  { %v1000_v10 = vmul.f32 0.0078125, %v994_v5  ;;  %v1015_v11 = vmul.f32 0.0078125, %v1008_v8  ;;  %v2374_v5 = vld [vmem:[%s3241_s15 + $0x38] sm:$0xff]   ;;  %v2376_v8 = vld [vmem:[%s3241_s15 + $0x70] sm:$0xff]  }
 0x494   :  { %v1023_v12 = vsub.f32 %v1015_v11, %v1019_v9  ;;  %v1020_v15 = vmul.f32 %v1000_v10, %v1000_v10  ;;  %v1032_v40 = vsub.f32 %v2845_v25, %v1000_v10  ;;  %v2377_v9 = vld [vmem:[%s3241_s15 + $0xf0] sm:$0xff]  }
 0x495   :  { %v1010_v13 = vpop.xlane.xlu1 %1009  ;;  %v996_v14 = vpop.xlane.xlu0 %995  ;;  %v2378_v10 = vld [vmem:[%s3241_s15 + $0x30] sm:$0xff]  }
 0x496   :  { %v1027_v16 = vmax.f32 %v1023_v12, 0.0  ;;  %v1016_v17 = vmul.f32 0.0078125, %v1010_v13  ;;  %v1001_v18 = vmul.f32 0.0078125, %v996_v14  ;;  %v2379_v11 = vld [vmem:[%s3241_s15 + $0xb0] sm:$0xff]   ;;  %v2380_v12 = vld [vmem:[%s3241_s15 + $0x68] sm:$0xff]  }
 0x497   :  { %v2381_v13 = vld [vmem:[%s3241_s15 + $0xe8] sm:$0xff]  }
 0x498   :  { %v1035_v19 = vadd.f32 1e-05, %v1027_v16  ;;  %v1024_v21 = vsub.f32 %v1016_v17, %v1020_v15  ;;  %v1021_v22 = vmul.f32 %v1001_v18, %v1001_v18  ;;  %v1033_v45 = vsub.f32 %v2851_v6, %v1001_v18  ;;  %v2382_v14 = vld [vmem:[%s3241_s15 + $0x28] sm:$0xff]   ;;  %v2384_v16 = vld [vmem:[%s3241_s15 + $0x60] sm:$0xff]  }
 0x499   :  { %v998_v23 = vpop.xlane.xlu1 %997  ;;  %v1012_v24 = vpop.xlane.xlu0 %1011  ;;  %v2383_v15 = vld [vmem:[%s3241_s15 + $0xa8] sm:$0xff]   ;;  %v2385_v17 = vld [vmem:[%s3241_s15 + $0xe0] sm:$0xff]  }
 0x49a   :  { %2412 = vrsqrt.f32 %v1035_v19  ;;  %v1028_v3 = vmax.f32 %v1024_v21, 0.0  ;;  %v1002_v26 = vmul.f32 0.0078125, %v998_v23  ;;  %v1017_v4 = vmul.f32 0.0078125, %v1012_v24  ;;  %v2386_v18 = vld [vmem:[%s3241_s15 + $0x20] sm:$0xff]   ;;  %v2388_v21 = vld [vmem:[%s3241_s15 + $0x58] sm:$0xff]  }
 0x49b   :  { %v2387_v19 = vld [vmem:[%s3241_s15 + $0xa0] sm:$0xff]   ;;  %v2390_v23 = vld [vmem:[%s3241_s15 + $0x18] sm:$0xff]  }
 0x49c   :  { %v1036_v55 = vadd.f32 1e-05, %v1028_v3  ;;  %v1025_v1 = vsub.f32 %v1017_v4, %v1021_v22  ;;  %v1022_v27 = vmul.f32 %v1002_v26, %v1002_v26  ;;  %v1034_v51 = vsub.f32 %v2858_v7, %v1002_v26  ;;  %v2389_v22 = vld [vmem:[%s3241_s15 + $0xd8] sm:$0xff]   ;;  %v2392_v3 = vld [vmem:[%s3241_s15 + $0x50] sm:$0xff]  }
 0x49d   :  { %v1014_v56 = vpop.xlane.xlu1 %1013  ;;  %v2391_v24 = vld [vmem:[%s3241_s15 + $0x98] sm:$0xff]   ;;  %v2393_v26 = vld [vmem:[%s3241_s15 + $0xd0] sm:$0xff]  }
 0x49e   :  { %2414 = vrsqrt.f32 %v1036_v55  ;;  %v1029_v2 = vmax.f32 %v1025_v1, 0.0  ;;  %v1018_v28 = vmul.f32 0.0078125, %v1014_v56  ;;  %v2394_v4 = vld [vmem:[%s3241_s15 + $0x10] sm:$0xff]   ;;  %v2396_v1 = vld [vmem:[%s3241_s15 + $0x48] sm:$0xff]  }
 0x49f   :  { %v2395_v55 = vld [vmem:[%s3241_s15 + $0x90] sm:$0xff]   ;;  %v2397_v56 = vld [vmem:[%s3241_s15 + $0xc8] sm:$0xff]  }
 0x4a0   :  { %v1037_v29 = vadd.f32 1e-05, %v1029_v2  ;;  %v1026_v30 = vsub.f32 %v1018_v28, %v1022_v27  ;;  %v2398_v27 = vld [vmem:[%s3241_s15 + $0x8] sm:$0xff]   ;;  %v2400_v28 = vld [vmem:[%s3241_s15 + $0x40] sm:$0xff]  }
 0x4a1   :  { %v2399_v2 = vld [vmem:[%s3241_s15 + $0x88] sm:$0xff]  }
 0x4a2   :  { %2416 = vrsqrt.f32 %v1037_v29  ;;  %v1030_v34 = vmax.f32 %v1026_v30, 0.0  ;;  %v2401_v29 = vld [vmem:[%s3241_s15 + $0xc0] sm:$0xff]  }
 0x4a3   :  { %v2402_v30 = vld [vmem:[%s3241_s15] sm:$0xff]  }
 0x4a4   :  { %v1038_v35 = vadd.f32 1e-05, %v1030_v34  ;;  %v2403_v34 = vld [vmem:[%s3241_s15 + $0x80] sm:$0xff]  }
 0x4a6   :  { %2418 = vrsqrt.f32 %v1038_v35  ;;  %v1113_v35 = vsub.s32 2, %v2799_v31 }
 0x4a7   :  { %v2413_v37 = vpop.eup %2412 }
 0x4a8   :  { %v1043_v38 = vmul.f32 %v2413_v37, %v1031_v36  ;;  %v1101_v36 = vld [vmem:[%s3242_s14] sm:$0xf]  ;;  %v1117_v37 = vsub.s32 3, %v2799_v31 }
 0x4aa   :  { %v1053_v43 = vmul.f32 %v2018_v39, %v1043_v38  ;;  %v3077_v38 = vrot.slane %v1101_v36, %v2805_v33 }
 0x4ab   :  { %v2415_v41 = vpop.eup %2414 }
 0x4ac   :  { %v1044_v42 = vmul.f32 %v2415_v41, %v1032_v40  ;;  %v1063_v48 = vadd.f32 %v2019_v44, %v1053_v43  ;;  %v3084_v43 = vrot.slane %v1101_v36, %v1117_v37 }
 0x4ae   :  { %v1054_v46 = vmul.f32 %v2018_v39, %v1044_v42  ;;  %v3082_v42 = vrot.slane %v1101_v36, %v2802_v32 }
 0x4af   :  { %v2417_v47 = vpop.eup %2416 }
 0x4b0   :  { %v1064_v49 = vadd.f32 %v2019_v44, %v1054_v46  ;;  %v1045_v50 = vmul.f32 %v2417_v47, %v1033_v45 }
 0x4b2   :  { %v1067_v52 = vpack.c.bf16 %v1064_v49, %v1063_v48  ;;  %v1055_v57 = vmul.f32 %v2018_v39, %v1045_v50 }
 0x4b3   :  { %v2419_v53 = vpop.eup %2418 }
 0x4b4   :  { %1316 = vmatmul.mubr.bf16.vlgmr.msra.gmra.mxu0 %v1067_v52  ;;  %1369 = vmatmul.mubr.bf16.vlgmr.msra.gmra.mxu1 %v1067_v52  ;;  %v1046_v54 = vmul.f32 %v2419_v53, %v1034_v51  ;;  %v1065_v60 = vadd.f32 %v2019_v44, %v1055_v57 }
 0x4b5   :  { %1325 = vmatprep.mubr.bf16.mxu0 %v2452_v59  ;;  %1378 = vmatprep.mubr.bf16.mxu1 %v2452_v59  ;;  %v2375_v59 = vld [vmem:[%s3241_s15 + $0xb8] sm:$0xff]  }
 0x4b6   :  { %v1056_v58 = vmul.f32 %v2018_v39, %v1046_v54  ;;  %2130 = vmatpush3.bf16.msra.mxu0 %v2374_v5  ;;  %2158 = vmatpush3.bf16.msra.mxu1 %v2375_v59  ;;  %v3079_v39 = vrot.slane %v1101_v36, %v1113_v35 }
 0x4b7   :  { %2131 = vmatprep.subr.bf16.mxu0 %v2376_v8  ;;  %2159 = vmatprep.subr.bf16.mxu1 %v2377_v9 }
 0x4b8   :  { %v1066_v61 = vadd.f32 %v2019_v44, %v1056_v58 }
 0x4ba   :  { %v1068_v62 = vpack.c.bf16 %v1066_v61, %v1065_v60  ;;  %2132 = vmatpush3.bf16.msra.mxu0 %v2378_v10  ;;  %2160 = vmatpush3.bf16.msra.mxu1 %v2379_v11 }
 0x4bb   :  { %2133 = vmatprep.subr.bf16.mxu0 %v2380_v12  ;;  %2161 = vmatprep.subr.bf16.mxu1 %v2381_v13 }
 0x4bc   :  { %1326 = vmatmul.mubr.bf16.gmra.mxu0 %v1068_v62  ;;  %1379 = vmatmul.mubr.bf16.gmra.mxu1 %v1068_v62 }
 0x4be   :  { %2134 = vmatpush3.bf16.msra.mxu0 %v2382_v14  ;;  %2162 = vmatpush3.bf16.msra.mxu1 %v2383_v15 }
 0x4bf   :  { %2135 = vmatprep.subr.bf16.mxu0 %v2384_v16  ;;  %2163 = vmatprep.subr.bf16.mxu1 %v2385_v17 }
 0x4c2   :  { %2136 = vmatpush3.bf16.msra.mxu0 %v2386_v18  ;;  %2164 = vmatpush3.bf16.msra.mxu1 %v2387_v19 }
 0x4c3   :  { %2137 = vmatprep.subr.bf16.mxu0 %v2388_v21  ;;  %2165 = vmatprep.subr.bf16.mxu1 %v2389_v22 }
 0x4c6   :  { %2138 = vmatpush3.bf16.msra.mxu0 %v2390_v23  ;;  %2166 = vmatpush3.bf16.msra.mxu1 %v2391_v24 }
 0x4c7   :  { %2139 = vmatprep.subr.bf16.mxu0 %v2392_v3  ;;  %2167 = vmatprep.subr.bf16.mxu1 %v2393_v26 }
 0x4ca   :  { %2140 = vmatpush3.bf16.msra.mxu0 %v2394_v4  ;;  %2168 = vmatpush3.bf16.msra.mxu1 %v2395_v55 }
 0x4cb   :  { %2141 = vmatprep.subr.bf16.mxu0 %v2396_v1  ;;  %2169 = vmatprep.subr.bf16.mxu1 %v2397_v56 }
 0x4ce   :  { %2142 = vmatpush3.bf16.msra.mxu0 %v2398_v27  ;;  %2170 = vmatpush3.bf16.msra.mxu1 %v2399_v2 }
 0x4cf   :  { %2143 = vmatprep.subr.bf16.mxu0 %v2400_v28  ;;  %2171 = vmatprep.subr.bf16.mxu1 %v2401_v29 }
 0x4d2   :  { %2144 = vmatpush3.bf16.msra.mxu0 %v2402_v30  ;;  %2172 = vmatpush3.bf16.msra.mxu1 %v2403_v34 }
 0x574   :  { %v1317_v40 = vpop.f32.mrf.mxu0  ;;  %v1370_v41 = vpop.f32.mrf.mxu1 }
 0x575   :  { %v3087_v44 = vadd.f32 %v1317_v40, %v3077_v38  ;;  %v3090_v45 = vadd.f32 %v1370_v41, %v3079_v39 }
 0x576   :  { %v1319_v46 = vpop.f32.mrf.mxu0  ;;  %v1372_v31 = vpop.f32.mrf.mxu1 }
 0x577   :  { %v1405_v33 = vmul.f32 0.044715, %v3087_v44  ;;  %v1407_v47 = vmul.f32 0.044715, %v3090_v45  ;;  %v3095_v48 = vadd.f32 %v1319_v46, %v3082_v42  ;;  %v3098_v32 = vadd.f32 %v1372_v31, %v3084_v43 }
 0x578   :  { %v1321_v49 = vpop.f32.mrf.mxu0  ;;  %v1374_v50 = vpop.f32.mrf.mxu1 }
 0x579   :  { %v1421_v51 = vmul.f32 %v1405_v33, %v3087_v44  ;;  %v1423_v52 = vmul.f32 %v1407_v47, %v3090_v45  ;;  %v3103_v53 = vadd.f32 %v1321_v49, %v3077_v38  ;;  %v3106_v54 = vadd.f32 %v1374_v50, %v3079_v39 }
 0x57a   :  { %v1323_v57 = vpop.f32.mrf.mxu0  ;;  %v1376_v58 = vpop.f32.mrf.mxu1  ;;  %v1406_v62 = vmul.f32 0.044715, %v3095_v48  ;;  %v1408_v0 = vmul.f32 0.044715, %v3098_v32 }
 0x57b   :  { %v1437_v60 = vmul.f32 %v1421_v51, %v3087_v44  ;;  %v1439_v61 = vmul.f32 %v1423_v52, %v3090_v45  ;;  %v1409_v63 = vmul.f32 0.044715, %v3103_v53  ;;  %v1411_v5 = vmul.f32 0.044715, %v3106_v54 }
 0x57c   :  { %v1327_v59 = vpop.f32.mrf.mxu0  ;;  %v1380_v8 = vpop.f32.mrf.mxu1  ;;  %v3117_v11 = vadd.f32 %v1323_v57, %v3082_v42  ;;  %v3121_v13 = vadd.f32 %v1376_v58, %v3084_v43  ;;  %v1422_v17 = vmul.f32 %v1406_v62, %v3095_v48  ;;  %v1424_v21 = vmul.f32 %v1408_v0, %v3098_v32 }
 0x57d   :  { %v1453_v9 = vadd.f32 %v1437_v60, %v3087_v44  ;;  %v1425_v10 = vmul.f32 %v1409_v63, %v3103_v53  ;;  %v1427_v12 = vmul.f32 %v1411_v5, %v3106_v54  ;;  %v1455_v16 = vadd.f32 %v1439_v61, %v3090_v45 }
 0x57e   :  { %v1329_v14 = vpop.f32.mrf.mxu0  ;;  %v1382_v15 = vpop.f32.mrf.mxu1  ;;  %v1410_v19 = vmul.f32 0.044715, %v3117_v11  ;;  %v1412_v23 = vmul.f32 0.044715, %v3121_v13  ;;  %v3131_v24 = vadd.f32 %v1327_v59, %v3077_v38  ;;  %v1438_v28 = vmul.f32 %v1422_v17, %v3095_v48 }
 0x57f   :  { %v1441_v18 = vmul.f32 %v1425_v10, %v3103_v53  ;;  %v1443_v22 = vmul.f32 %v1427_v12, %v3106_v54  ;;  %v1469_v26 = vmul.f32 0.7978846, %v1453_v9  ;;  %v3136_v1 = vadd.f32 %v1329_v14, %v3082_v42 }
 0x580   :  { %v1331_v3 = vpop.f32.mrf.mxu0  ;;  %v1426_v55 = vmul.f32 %v1410_v19, %v3117_v11  ;;  %v1384_v56 = vpop.f32.mrf.mxu1  ;;  %v1471_v2 = vmul.f32 0.7978846, %v1455_v16  ;;  %v3141_v29 = vadd.f32 %v1380_v8, %v3079_v39  ;;  %v1440_v34 = vmul.f32 %v1424_v21, %v3098_v32 }
 0x581   :  { %v1457_v4 = vadd.f32 %v1441_v18, %v3103_v53  ;;  %v1459_v27 = vadd.f32 %v1443_v22, %v3106_v54  ;;  %v1414_v30 = vmul.f32 0.044715, %v3136_v1  ;;  %v1428_v35 = vmul.f32 %v1412_v23, %v3121_v13 }
 0x582   :  { %v1413_v36 = vmul.f32 0.044715, %v3131_v24  ;;  %v3148_v37 = vadd.f32 %v1382_v15, %v3084_v43  ;;  %v1333_v40 = vpop.f32.mrf.mxu0  ;;  %2420 = vtanh.f32 %v1469_v26  ;;  %v1442_v46 = vmul.f32 %v1426_v55, %v3117_v11  ;;  %v1386_v33 = vpop.f32.mrf.mxu1 }
 0x583   :  { %v1473_v41 = vmul.f32 0.7978846, %v1457_v4  ;;  %v3152_v31 = vadd.f32 %v1331_v3, %v3077_v38  ;;  %v1475_v47 = vmul.f32 0.7978846, %v1459_v27  ;;  %v1430_v49 = vmul.f32 %v1414_v30, %v3136_v1 }
 0x584   :  { %v1416_v50 = vmul.f32 0.044715, %v3148_v37  ;;  %v3157_v51 = vadd.f32 %v1384_v56, %v3079_v39  ;;  %2422 = vtanh.f32 %v1471_v2  ;;  %v1415_v52 = vmul.f32 0.044715, %v3141_v29 }
 0x585   :  { %v1417_v57 = vmul.f32 0.044715, %v3152_v31  ;;  %v3162_v58 = vadd.f32 %v1333_v40, %v3082_v42  ;;  %v1444_v38 = vmul.f32 %v1428_v35, %v3121_v13  ;;  %v1429_v60 = vmul.f32 %v1413_v36, %v3131_v24 }
 0x586   :  { %v1432_v61 = vmul.f32 %v1416_v50, %v3148_v37  ;;  %v3168_v62 = vadd.f32 %v1386_v33, %v3084_v43  ;;  %2424 = vtanh.f32 %v1473_v41  ;;  %v1454_v63 = vadd.f32 %v1438_v28, %v3095_v48 }
 0x587   :  { %v1418_v39 = vmul.f32 0.044715, %v3162_v58  ;;  %v1458_v0 = vadd.f32 %v1442_v46, %v3117_v11  ;;  %2426 = vtanh.f32 %v1475_v47  ;;  %v1446_v42 = vmul.f32 %v1430_v49, %v3136_v1 }
 0x588   :  { %v1419_v5 = vmul.f32 0.044715, %v3157_v51  ;;  %v1420_v59 = vmul.f32 0.044715, %v3168_v62  ;;  %v1433_v8 = vmul.f32 %v1417_v57, %v3152_v31  ;;  %v1470_v43 = vmul.f32 0.7978846, %v1454_v63 }
 0x589   :  { %v1434_v9 = vmul.f32 %v1418_v39, %v3162_v58  ;;  %v1474_v10 = vmul.f32 0.7978846, %v1458_v0  ;;  %v1448_v12 = vmul.f32 %v1432_v61, %v3148_v37  ;;  %v1456_v15 = vadd.f32 %v1440_v34, %v3098_v32 }
 0x58a   :  { %v1436_v14 = vmul.f32 %v1420_v59, %v3168_v62  ;;  %v1460_v16 = vadd.f32 %v1444_v38, %v3121_v13  ;;  %v1431_v17 = vmul.f32 %v1415_v52, %v3141_v29  ;;  %2428 = vtanh.f32 %v1470_v43 }
 0x58b   :  { %v1450_v18 = vmul.f32 %v1434_v9, %v3162_v58  ;;  %2430 = vtanh.f32 %v1474_v10  ;;  %v1472_v21 = vmul.f32 0.7978846, %v1456_v15  ;;  %v1445_v23 = vmul.f32 %v1429_v60, %v3131_v24 }
 0x58c   :  { %v1452_v19 = vmul.f32 %v1436_v14, %v3168_v62  ;;  %v1476_v22 = vmul.f32 0.7978846, %v1460_v16  ;;  %v1435_v3 = vmul.f32 %v1419_v5, %v3157_v51  ;;  %v1462_v26 = vadd.f32 %v1446_v42, %v3136_v1 }
 0x58d   :  { %v1466_v4 = vadd.f32 %v1450_v18, %v3162_v58  ;;  %v1449_v55 = vmul.f32 %v1433_v8, %v3152_v31  ;;  %2432 = vtanh.f32 %v1472_v21  ;;  %v1464_v56 = vadd.f32 %v1448_v12, %v3148_v37 }
 0x58e   :  { %2434 = vtanh.f32 %v1476_v22  ;;  %v1478_v27 = vmul.f32 0.7978846, %v1462_v26  ;;  %v1468_v30 = vadd.f32 %v1452_v19, %v3168_v62  ;;  %v1447_v35 = vmul.f32 %v1431_v17, %v3141_v29 }
 0x58f   :  { %v1482_v2 = vmul.f32 0.7978846, %v1466_v4  ;;  %v2421_v28 = vpop.eup %2420  ;;  %v1480_v34 = vmul.f32 0.7978846, %v1464_v56  ;;  %v1451_v36 = vmul.f32 %v1435_v3, %v3157_v51  ;;  %v1461_v40 = vadd.f32 %v1445_v23, %v3131_v24 }
 0x590   :  { %2436 = vtanh.f32 %v1478_v27  ;;  %v1484_v46 = vmul.f32 0.7978846, %v1468_v30  ;;  %v1465_v33 = vadd.f32 %v1449_v55, %v3152_v31  ;;  %v1463_v57 = vadd.f32 %v1447_v35, %v3141_v29 }
 0x591   :  { %v2423_v41 = vpop.eup %2422  ;;  %2438 = vtanh.f32 %v1482_v2  ;;  %v1477_v47 = vmul.f32 0.7978846, %v1461_v40  ;;  %v1467_v38 = vadd.f32 %v1451_v36, %v3157_v51  ;;  %v1390_v0 = vmul.f32 0.5, %v3095_v48 }
 0x592   :  { %2440 = vtanh.f32 %v1480_v34  ;;  %v1481_v50 = vmul.f32 0.7978846, %v1465_v33  ;;  %v1479_v61 = vmul.f32 0.7978846, %v1463_v57  ;;  %v1393_v5 = vmul.f32 0.5, %v3103_v53 }
 0x593   :  { %v2425_v49 = vpop.eup %2424  ;;  %2442 = vtanh.f32 %v1484_v46  ;;  %v1483_v39 = vmul.f32 0.7978846, %v1467_v38  ;;  %v1501_v8 = vadd.f32 1.0, %v2421_v28  ;;  %v1394_v9 = vmul.f32 0.5, %v3117_v11 }
 0x594   :  { %v2427_v52 = vpop.eup %2426  ;;  %2444 = vtanh.f32 %v1477_v47  ;;  %v1505_v60 = vadd.f32 1.0, %v2425_v49  ;;  %v1389_v14 = vmul.f32 0.5, %v3087_v44  ;;  %v1395_v15 = vmul.f32 0.5, %v3106_v54 }
 0x595   :  { %2446 = vtanh.f32 %v1481_v50  ;;  %v1507_v10 = vadd.f32 1.0, %v2427_v52  ;;  %v1503_v21 = vadd.f32 1.0, %v2423_v41  ;;  %v1392_v53 = vmul.f32 0.5, %v3098_v32 }
 0x596   :  { %2448 = vtanh.f32 %v1479_v61  ;;  %v1521_v16 = vmul.f32 %v1505_v60, %v1393_v5  ;;  %v1396_v22 = vmul.f32 0.5, %v3121_v13  ;;  %v1517_v11 = vmul.f32 %v1501_v8, %v1389_v14 }
 0x597   :  { %v2429_v63 = vpop.eup %2428  ;;  %2450 = vtanh.f32 %v1483_v39  ;;  %v1391_v26 = vmul.f32 0.5, %v3090_v45  ;;  %v1523_v55 = vmul.f32 %v1507_v10, %v1395_v15  ;;  %v1398_v34 = vmul.f32 0.5, %v3136_v1 }
 0x598   :  { %v2431_v42 = vpop.eup %2430  ;;  %v1502_v59 = vadd.f32 1.0, %v2429_v63  ;;  %v1533_v27 = vpack.c.bf16 %v1521_v16, %v1517_v11  ;;  %v1402_v32 = vmul.f32 0.5, %v3162_v58  ;;  %v1400_v45 = vmul.f32 0.5, %v3148_v37  ;;  %v2052_v16 = vld [vmem:[%s3243_s16] ss:$0 sm:$0xff] }
 0x599   :  { %v1506_v43 = vadd.f32 1.0, %v2431_v42  ;;  %v1519_v30 = vmul.f32 %v1503_v21, %v1391_v26  ;;  %v1404_v40 = vmul.f32 0.5, %v3168_v62  ;;  %v1397_v1 = vmul.f32 0.5, %v3131_v24 }
 0x59a   :  { %v2433_v12 = vpop.eup %2432  ;;  %v1518_v18 = vmul.f32 %v1502_v59, %v1390_v0  ;;  %v1401_v58 = vmul.f32 0.5, %v3152_v31  ;;  %v1399_v8 = vmul.f32 0.5, %v3141_v29  ;;  %v1403_v24 = vmul.f32 0.5, %v3157_v51 }
 0x59b   :  { %v2435_v17 = vpop.eup %2434  ;;  %v1522_v48 = vmul.f32 %v1506_v43, %v1394_v9  ;;  %v1504_v19 = vadd.f32 1.0, %v2433_v12  ;;  %v1535_v33 = vpack.c.bf16 %v1523_v55, %v1519_v30 }
 0x59c   :  { %v1508_v23 = vadd.f32 1.0, %v2435_v17 }
 0x59d   :  { %v2437_v3 = vpop.eup %2436  ;;  %v1534_v4 = vpack.c.bf16 %v1522_v48, %v1518_v18  ;;  %v1520_v56 = vmul.f32 %v1504_v19, %v1392_v53 }
 0x59e   :  { %v2439_v44 = vpop.eup %2438  ;;  %v1524_v54 = vmul.f32 %v1508_v23, %v1396_v22  ;;  %v1510_v2 = vadd.f32 1.0, %v2437_v3 }
 0x59f   :  { %v2441_v28 = vpop.eup %2440  ;;  %1836 = vmatprep.mubr.bf16.mxu0 %v1534_v4  ;;  %v1514_v13 = vadd.f32 1.0, %v2439_v44 }
 0x5a0   :  { %v2443_v35 = vpop.eup %2442  ;;  %v1536_v36 = vpack.c.bf16 %v1524_v54, %v1520_v56  ;;  %1837 = vmatmul.mubr.bf16.vlgmr.msra.gmra.mxu0 %v1533_v27  ;;  %v1512_v41 = vadd.f32 1.0, %v2441_v28  ;;  %v1526_v47 = vmul.f32 %v1510_v2, %v1398_v34 }
 0x5a1   :  { %v2445_v46 = vpop.eup %2444  ;;  %v1530_v49 = vmul.f32 %v1514_v13, %v1402_v32  ;;  %v1516_v50 = vadd.f32 1.0, %v2443_v35 }
 0x5a2   :  { %v2447_v52 = vpop.eup %2446  ;;  %1885 = vmatprep.mubr.bf16.mxu1 %v1536_v36  ;;  %v1509_v57 = vadd.f32 1.0, %v2445_v46  ;;  %v1528_v60 = vmul.f32 %v1512_v41, %v1400_v45 }
 0x5a3   :  { %1886 = vmatmul.mubr.bf16.vlgmr.msra.gmra.mxu1 %v1535_v33  ;;  %v1538_v38 = vpack.c.bf16 %v1530_v49, %v1526_v47  ;;  %v1532_v61 = vmul.f32 %v1516_v50, %v1404_v40  ;;  %v1513_v37 = vadd.f32 1.0, %v2447_v52  ;;  %v2449_v39 = vpop.eup %2448 }
 0x5a4   :  { %v1525_v63 = vmul.f32 %v1509_v57, %v1397_v1  ;;  %v2451_v42 = vpop.eup %2450  ;;  %v1511_v5 = vadd.f32 1.0, %v2449_v39 }
 0x5a5   :  { %1844 = vmatprep.mubr.bf16.mxu0 %v1538_v38  ;;  %v1540_v62 = vpack.c.bf16 %v1532_v61, %v1528_v60  ;;  %v1529_v0 = vmul.f32 %v1513_v37, %v1401_v58  ;;  %v1515_v31 = vadd.f32 1.0, %v2451_v42 }
 0x5a6   :  { %v1527_v9 = vmul.f32 %v1511_v5, %v1399_v8 }
 0x5a7   :  { %1893 = vmatprep.mubr.bf16.mxu1 %v1540_v62  ;;  %v1537_v59 = vpack.c.bf16 %v1529_v0, %v1525_v63  ;;  %v1531_v43 = vmul.f32 %v1515_v31, %v1403_v24 }
 0x5a9   :  { %1845 = vmatmul.mubr.bf16.gmra.mxu0 %v1537_v59  ;;  %v1539_v10 = vpack.c.bf16 %v1531_v43, %v1527_v9 }
 0x5ab   :  { %1894 = vmatmul.mubr.bf16.gmra.mxu1 %v1539_v10 }
 0x660   :  { %v2145_v12 = vpop.f32.mrf.mxu0 }
 0x662   :  { %v2146_v14 = vpop.f32.mrf.mxu0 }
 0x663   :  { %v2173_v15 = vpop.f32.mrf.mxu1  ;;  %v2147_v17 = vadd.f32 %v2146_v14, %v2145_v12 }
 0x664   :  { %v2148_v18 = vpop.f32.mrf.mxu0 }
 0x665   :  { %v2174_v48 = vpop.f32.mrf.mxu1  ;;  %v1839_v19 = vadd.f32 %v2147_v17, %v2052_v16 }
 0x666   :  { %v2149_v29 = vpop.f32.mrf.mxu0  ;;  %v2175_v53 = vadd.f32 %v2174_v48, %v2173_v15 }
 0x667   :  { %v2176_v21 = vpop.f32.mrf.mxu1  ;;  %v2150_v51 = vadd.f32 %v2149_v29, %v2148_v18 }
 0x668   :  { %v1888_v3 = vadd.f32 %v2175_v53, %v1839_v19 }
 0x669   :  { %v1842_v22 = vadd.f32 %v2150_v51, %v2052_v16  ;;  %v2177_v23 = vpop.f32.mrf.mxu1  ;;  %v2151_v11 = vpop.f32.mrf.mxu0 }
 0x66a   :  { %v2178_v26 = vadd.f32 %v2177_v23, %v2176_v21  ;;  %v1902_v27 = vadd.f32 %v1888_v3, %v2839_v20 }
 0x66b   :  { %v2152_v4 = vpop.f32.mrf.mxu0  ;;  %v2179_v56 = vpop.f32.mrf.mxu1 }
 0x66c   :  { %v1891_v55 = vadd.f32 %v2178_v26, %v1842_v22  ;;  %v2153_v44 = vadd.f32 %v2152_v4, %v2151_v11 }
 0x66d   :  { %v2154_v54 = vpop.f32.mrf.mxu0  ;;  %v2180_v28 = vpop.f32.mrf.mxu1 }
 0x66e   :  { %v1903_v2 = vadd.f32 %v1891_v55, %v2845_v25  ;;  %v1847_v32 = vadd.f32 %v2153_v44, %v2052_v16  ;;  %v2181_v36 = vadd.f32 %v2180_v28, %v2179_v56 }
 0x66f   :  { %v2155_v30 = vpop.f32.mrf.mxu0  ;;  %v2182_v35 = vpop.f32.mrf.mxu1 }
 0x670   :  { %v2104_v34 = vpack.c.bf16 %v1903_v2, %v1902_v27  ;;  %v2156_v13 = vadd.f32 %v2155_v30, %v2154_v54  ;;  %v1896_v41 = vadd.f32 %v2181_v36, %v1847_v32 }
 0x671   :  { %v2183_v40 = vpop.f32.mrf.mxu1 }
 0x672   :  { %2105 = vst [vmem:[%s3244_s17] sm:$0xff] %v2104_v34   ;;  %v1850_v45 = vadd.f32 %v2156_v13, %v2052_v16  ;;  %v2184_v46 = vadd.f32 %v2183_v40, %v2182_v35  ;;  %v1904_v20 = vadd.f32 %v1896_v41, %v2851_v6 }
 0x674   :  { %v1899_v33 = vadd.f32 %v2184_v46, %v1850_v45 }
 0x676   :  { %v1905_v25 = vadd.f32 %v1899_v33, %v2858_v7 }
 0x678   :  { %v2109_v47 = vpack.c.bf16 %v1905_v25, %v1904_v20 }
 0x67a   :  { %2112 = vst [vmem:[%s3244_s17 + $0x8] sm:$0xff] %v2109_v47  }

</bundles_post_ra>
